<compile_context>
chip_gen: v7x
topology: tpu7x:2x2x1
jax: 0.10.0
libtpu: 0.0.40
codegen_flags: <defaults>
</compile_context>

<pallas_src>
import functools

import jax
import jax.numpy as jnp
from jax.experimental import pallas as pl
from jax.experimental.pallas import tpu as pltpu


TILE_N = 1024  # node rows per grid step (multiple of 8)


# ---------------------------------------------------------------------------
# Kernels
# ---------------------------------------------------------------------------
def _gru_kernel_fused(m_ref, h_ref, w_ref, b_ref, out_ref):
    """v6e/v7x path: one (M+H, 4H) block-structured matmul, bf16 EUP gates."""
    m = m_ref[...]                                    # [T, M]  bf16
    h = h_ref[...]                                    # [T, H]  bf16
    hd = h_ref.shape[-1]

    # Single K = M+H MXU pass yields columns [r | z | i_n | h_n].
    mh = jnp.concatenate([m, h], axis=-1)             # [T, M+H]
    g = jnp.dot(mh, w_ref[...],
                preferred_element_type=jnp.float32) + b_ref[...]

    # Transcendentals on the EUP in bf16 (2x rate on v6e/v7x); sigmoid(x) is
    # computed as 0.5*tanh(0.5*x)+0.5 -> one EUP pass instead of exp + recip.
    gb = g.astype(jnp.bfloat16)
    r = 0.5 * jnp.tanh(0.5 * gb[:, :hd]).astype(jnp.float32) + 0.5
    z = 0.5 * jnp.tanh(0.5 * gb[:, hd:2 * hd]).astype(jnp.float32) + 0.5
    n_arg = g[:, 2 * hd:3 * hd] + r * g[:, 3 * hd:]   # f32 glue (VPU has slack)
    n = jnp.tanh(n_arg.astype(jnp.bfloat16)).astype(jnp.float32)

    h32 = h.astype(jnp.float32)
    out_ref[...] = (n + z * (h32 - n)).astype(out_ref.dtype)      # (1-z)*n + z*h


def _gru_kernel_split(m_ref, h_ref, w_irz_ref, w_hrz_ref, w_in_ref, w_hn_ref,
                      b_rz_ref, b_in_ref, b_hn_ref, out_ref):
    """v5e path: four K=128-native dots, no [m|h] concat, f32 gates."""
    m = m_ref[...]                                    # [T, M]  bf16
    h = h_ref[...]                                    # [T, H]  bf16
    hd = h_ref.shape[-1]

    g_rz = (jnp.dot(m, w_irz_ref[...], preferred_element_type=jnp.float32)
            + jnp.dot(h, w_hrz_ref[...], preferred_element_type=jnp.float32)
            + b_rz_ref[...])
    r = jax.nn.sigmoid(g_rz[:, :hd])
    z = jax.nn.sigmoid(g_rz[:, hd:])

    i_n = jnp.dot(m, w_in_ref[...],
                  preferred_element_type=jnp.float32) + b_in_ref[...]
    h_n = jnp.dot(h, w_hn_ref[...],
                  preferred_element_type=jnp.float32) + b_hn_ref[...]
    n = jnp.tanh(i_n + r * h_n)

    h32 = h.astype(jnp.float32)
    out_ref[...] = (n + z * (h32 - n)).astype(out_ref.dtype)


# ---------------------------------------------------------------------------
# Once-per-model weight packing (hoisted out of the per-timestep step)
# ---------------------------------------------------------------------------
def pack_gru_weights(w_ih_t, w_hh_t, b_ih, b_hh, *, fused):
    """Pack PyTorch GRUCell weights (pre-transposed, gate order [r|z|n])."""
    hd = w_hh_t.shape[0]
    md = w_ih_t.shape[0]
    if fused:
        # Block-structured (M+H, 4H):
        #   [[W_ih_rz, W_ih_n, 0     ],
        #    [W_hh_rz, 0,      W_hh_n]]   -> columns [r | z | i_n | h_n]
        w_top = jnp.concatenate(
            [w_ih_t[:, :2 * hd], w_ih_t[:, 2 * hd:],
             jnp.zeros((md, hd), w_ih_t.dtype)], axis=1)
        w_bot = jnp.concatenate(
            [w_hh_t[:, :2 * hd], jnp.zeros((hd, hd), w_hh_t.dtype),
             w_hh_t[:, 2 * hd:]], axis=1)
        w_all = jnp.concatenate([w_top, w_bot], axis=0).astype(jnp.bfloat16)
        b_all = jnp.concatenate(
            [b_ih[:, :2 * hd] + b_hh[:, :2 * hd],
             b_ih[:, 2 * hd:], b_hh[:, 2 * hd:]], axis=1).astype(jnp.float32)
        return (w_all, b_all)
    w_irz = w_ih_t[:, :2 * hd].astype(jnp.bfloat16)
    w_hrz = w_hh_t[:, :2 * hd].astype(jnp.bfloat16)
    w_in = w_ih_t[:, 2 * hd:].astype(jnp.bfloat16)
    w_hn = w_hh_t[:, 2 * hd:].astype(jnp.bfloat16)
    b_rz = (b_ih[:, :2 * hd] + b_hh[:, :2 * hd]).astype(jnp.float32)
    b_in = b_ih[:, 2 * hd:].astype(jnp.float32)
    b_hn = b_hh[:, 2 * hd:].astype(jnp.float32)
    return (w_irz, w_hrz, w_in, w_hn, b_rz, b_in, b_hn)


# ---------------------------------------------------------------------------
# Per-timestep step: hidden is donated and overwritten in place
# ---------------------------------------------------------------------------
@functools.partial(jax.jit, static_argnames=("fused",), donate_argnums=(1,))
def vertex_update(messages, hidden, params, *, fused=True):
    """One GRUCell vertex-update timestep.

    messages: [N, M] bf16; hidden: [N, H] bf16 (persistent MPNN state; DONATED
    and overwritten in place via input_output_aliases).
    params: output of pack_gru_weights(..., fused=fused).
    """
    N, H = hidden.shape
    M = messages.shape[1]
    tile_n = TILE_N if N > TILE_N else N
    num_tiles = pl.cdiv(N, tile_n)

    resident = lambda a: pl.BlockSpec(a.shape, lambda i: (0, 0))
    row_spec = lambda d: pl.BlockSpec((tile_n, d), lambda i: (i, 0))

    kernel = _gru_kernel_fused if fused else _gru_kernel_split
    return pl.pallas_call(
        kernel,
        out_shape=jax.ShapeDtypeStruct((N, H), hidden.dtype),
        grid_spec=pltpu.PrefetchScalarGridSpec(
            num_scalar_prefetch=0,
            grid=(num_tiles,),
            in_specs=[row_spec(M), row_spec(H)] + [resident(p) for p in params],
            out_specs=row_spec(H),
        ),
        compiler_params=pltpu.CompilerParams(
            dimension_semantics=("parallel",),
            vmem_limit_bytes=32 * 1024 * 1024,
        ),
        # h_{t+1} overwrites the donated bf16 h_t buffer (input index 1).
        input_output_aliases={1: 0},
    )(messages, hidden, *params)


def _reference_gru(messages, hidden, w_ih_t, w_hh_t, b_ih, b_hh):
    gi = messages @ w_ih_t + b_ih
    gh = hidden @ w_hh_t + b_hh
    hd = hidden.shape[-1]
    r = jax.nn.sigmoid(gi[:, :hd] + gh[:, :hd])
    z = jax.nn.sigmoid(gi[:, hd:2 * hd] + gh[:, hd:2 * hd])
    n = jnp.tanh(gi[:, 2 * hd:] + r * gh[:, 2 * hd:])
    return (1.0 - z) * n + z * hidden


if __name__ == "__main__":
    # config: hidden_dim=128, message_dim=128, vertex_state_dim=0.
    # 128 keeps every gate slice and the output store lane-dense (x128 lanes).
    # TODO(synk): vertex_state_dim is stored by the base class but never used
    # in its (abstract) forward; it is not consumed here.
    hidden_dim = 128
    message_dim = 128
    num_nodes = 2000   # > TILE_N -> 2 grid steps (keeps both v7x cores busy)
                       # and a non-multiple tail exercises the partial block.

    # v5e (and older) has a 128-K-native MXU and no bf16 EUP/VPU path -> use
    # the split kernel there; v6e/v7x get the fused (M+H, 4H) kernel.
    kind = jax.devices()[0].device_kind.lower()
    fused = not any(t in kind for t in ("v2", "v3", "v4", "v5"))

    key = jax.random.PRNGKey(0)
    k_m, k_h, k_wi, k_wh, k_bi, k_bh = jax.random.split(key, 6)

    messages_f32 = jax.random.normal(k_m, (num_nodes, message_dim), jnp.float32)
    hidden_f32 = jax.random.normal(k_h, (num_nodes, hidden_dim), jnp.float32)

    # PyTorch-style uniform +/- 1/sqrt(H) parameters, stored pre-transposed.
    bound = 1.0 / jnp.sqrt(jnp.float32(hidden_dim))
    w_ih_t = jax.random.uniform(k_wi, (message_dim, 3 * hidden_dim),
                                jnp.float32, -bound, bound)
    w_hh_t = jax.random.uniform(k_wh, (hidden_dim, 3 * hidden_dim),
                                jnp.float32, -bound, bound)
    b_ih = jax.random.uniform(k_bi, (1, 3 * hidden_dim), jnp.float32, -bound, bound)
    b_hh = jax.random.uniform(k_bh, (1, 3 * hidden_dim), jnp.float32, -bound, bound)

    # Packed once per model (NOT per timestep).
    params = pack_gru_weights(w_ih_t, w_hh_t, b_ih, b_hh, fused=fused)

    # Persistent MPNN state lives in bf16 across timesteps (no per-call casts).
    messages = messages_f32.astype(jnp.bfloat16)
    hidden = hidden_f32.astype(jnp.bfloat16)

    # Reference on the same bf16-quantized operands (f32 math) BEFORE the
    # kernel call, since `hidden` is donated.
    q = lambda x: x.astype(jnp.bfloat16).astype(jnp.float32)
    ref = _reference_gru(q(messages_f32), q(hidden_f32), q(w_ih_t), q(w_hh_t),
                         b_ih, b_hh)

    h1 = vertex_update(messages, hidden, params, fused=fused)
    h1 = jax.block_until_ready(h1)
    assert h1.shape == (num_nodes, hidden_dim) and h1.dtype == jnp.bfloat16

    # bf16 state + bf16 EUP gates are a deliberate precision trade vs the f32
    # PyTorch GRUCell; tolerance reflects that (long-rollout drift should be
    # validated separately).
    assert jnp.allclose(h1.astype(jnp.float32), ref, atol=5e-2, rtol=5e-2)

    # Second timestep: h1 is donated in turn, demonstrating the in-place
    # persistent-state pattern the aliasing/donation is meant for.
    h2 = vertex_update(messages, h1, params, fused=fused)
    h2 = jax.block_until_ready(h2)
    assert h2.shape == (num_nodes, hidden_dim)

    print("KERNEL_OK")
</pallas_src>

<mosaic_0001>
module attributes {stable_mosaic.version = 11 : i64} {
  func.func @_gru_kernel_fused(%arg0: i32, %arg1: memref<1024x128xbf16, #tpu.memory_space<vmem>>, %arg2: memref<1024x128xbf16, #tpu.memory_space<vmem>>, %arg3: memref<256x512xbf16, #tpu.memory_space<vmem>>, %arg4: memref<1x512xf32, #tpu.memory_space<vmem>>, %arg5: memref<1024x128xbf16, #tpu.memory_space<vmem>>) attributes {dimension_semantics = [#tpu.dimension_semantics<parallel>], iteration_bounds = array<i64: 2>, scalar_prefetch = 0 : i64, scratch_operands = 0 : i64, tpu.core_type = #tpu.core_type<tc>, window_params = [{transform_indices = @transform_0, window_bounds = array<i64: 1024, 128>}, {transform_indices = @transform_1, window_bounds = array<i64: 1024, 128>}, {pipeline_mode = #tpu.pipeline_mode<synchronous>, transform_indices = @transform_2, window_bounds = array<i64: 256, 512>}, {pipeline_mode = #tpu.pipeline_mode<synchronous>, transform_indices = @transform_3, window_bounds = array<i64: 1, 512>}, {transform_indices = @transform_4, window_bounds = array<i64: 1024, 128>}]} {
    %c0 = arith.constant 0 : index
    %c0_0 = arith.constant 0 : index
    %0 = vector.load %arg1[%c0, %c0_0] : memref<1024x128xbf16, #tpu.memory_space<vmem>>, vector<1024x128xbf16>
    %c0_1 = arith.constant 0 : index
    %c0_2 = arith.constant 0 : index
    %1 = vector.load %arg2[%c0_1, %c0_2] : memref<1024x128xbf16, #tpu.memory_space<vmem>>, vector<1024x128xbf16>
    %2 = tpu.concatenate %0, %1 in 1 : vector<1024x128xbf16>, vector<1024x128xbf16> -> vector<1024x256xbf16>
    %c0_3 = arith.constant 0 : index
    %c0_4 = arith.constant 0 : index
    %3 = vector.load %arg3[%c0_3, %c0_4] : memref<256x512xbf16, #tpu.memory_space<vmem>>, vector<256x512xbf16>
    %cst = arith.constant dense<0.000000e+00> : vector<1024x512xf32>
    %4 = tpu.matmul %2, %3, %cst {dimension_numbers = #tpu.dot_dimension_numbers<[1], [0], [0], [1], [0, 0, 1, 1], [], []>} : vector<1024x256xbf16>, vector<256x512xbf16>, vector<1024x512xf32> -> vector<1024x512xf32>
    %c0_5 = arith.constant 0 : index
    %c0_6 = arith.constant 0 : index
    %5 = vector.load %arg4[%c0_5, %c0_6] : memref<1x512xf32, #tpu.memory_space<vmem>>, vector<1x512xf32>
    %6 = vector.broadcast %5 : vector<1x512xf32> to vector<1024x512xf32>
    %7 = arith.addf %4, %6 : vector<1024x512xf32>
    %8 = arith.truncf %7 : vector<1024x512xf32> to vector<1024x512xbf16>
    %9 = vector.extract_strided_slice %8 {offsets = [0, 0], sizes = [1024, 128], strides = [1, 1]} : vector<1024x512xbf16> to vector<1024x128xbf16>
    %cst_7 = arith.constant 5.000000e-01 : bf16
    %10 = vector.broadcast %cst_7 : bf16 to vector<1024x128xbf16>
    %11 = arith.mulf %10, %9 : vector<1024x128xbf16>
    %12 = math.tanh %11 : vector<1024x128xbf16>
    %13 = arith.extf %12 : vector<1024x128xbf16> to vector<1024x128xf32>
    %cst_8 = arith.constant 5.000000e-01 : f32
    %14 = vector.broadcast %cst_8 : f32 to vector<1024x128xf32>
    %15 = arith.mulf %14, %13 : vector<1024x128xf32>
    %cst_9 = arith.constant 5.000000e-01 : f32
    %16 = vector.broadcast %cst_9 : f32 to vector<1024x128xf32>
    %17 = arith.addf %15, %16 : vector<1024x128xf32>
    %18 = vector.extract_strided_slice %8 {offsets = [0, 128], sizes = [1024, 128], strides = [1, 1]} : vector<1024x512xbf16> to vector<1024x128xbf16>
    %cst_10 = arith.constant 5.000000e-01 : bf16
    %19 = vector.broadcast %cst_10 : bf16 to vector<1024x128xbf16>
    %20 = arith.mulf %19, %18 : vector<1024x128xbf16>
    %21 = math.tanh %20 : vector<1024x128xbf16>
    %22 = arith.extf %21 : vector<1024x128xbf16> to vector<1024x128xf32>
    %cst_11 = arith.constant 5.000000e-01 : f32
    %23 = vector.broadcast %cst_11 : f32 to vector<1024x128xf32>
    %24 = arith.mulf %23, %22 : vector<1024x128xf32>
    %cst_12 = arith.constant 5.000000e-01 : f32
    %25 = vector.broadcast %cst_12 : f32 to vector<1024x128xf32>
    %26 = arith.addf %24, %25 : vector<1024x128xf32>
    %27 = vector.extract_strided_slice %7 {offsets = [0, 256], sizes = [1024, 128], strides = [1, 1]} : vector<1024x512xf32> to vector<1024x128xf32>
    %28 = vector.extract_strided_slice %7 {offsets = [0, 384], sizes = [1024, 128], strides = [1, 1]} : vector<1024x512xf32> to vector<1024x128xf32>
    %29 = arith.mulf %17, %28 : vector<1024x128xf32>
    %30 = arith.addf %27, %29 : vector<1024x128xf32>
    %31 = arith.truncf %30 : vector<1024x128xf32> to vector<1024x128xbf16>
    %32 = math.tanh %31 : vector<1024x128xbf16>
    %33 = arith.extf %32 : vector<1024x128xbf16> to vector<1024x128xf32>
    %34 = arith.extf %1 : vector<1024x128xbf16> to vector<1024x128xf32>
    %35 = arith.subf %34, %33 : vector<1024x128xf32>
    %36 = arith.mulf %26, %35 : vector<1024x128xf32>
    %37 = arith.addf %33, %36 : vector<1024x128xf32>
    %38 = arith.truncf %37 : vector<1024x128xf32> to vector<1024x128xbf16>
    %c0_13 = arith.constant 0 : index
    %c0_14 = arith.constant 0 : index
    %39 = vector.load %arg5[%c0_13, %c0_14] : memref<1024x128xbf16, #tpu.memory_space<vmem>>, vector<1024x128xbf16>
    tpu.vector_store %arg5[%c0_13, %c0_14], %38 {strides = array<i32>} : memref<1024x128xbf16, #tpu.memory_space<vmem>>, vector<1024x128xbf16>,
    return
  }
  func.func @transform_0(%arg0: i32) -> (i32, i32) {
    %c0_i32 = arith.constant 0 : i32
    %c0_i32_0 = arith.constant 0 : i32
    return %arg0, %c0_i32 : i32, i32
  }
  func.func @transform_1(%arg0: i32) -> (i32, i32) {
    %c0_i32 = arith.constant 0 : i32
    %c0_i32_0 = arith.constant 0 : i32
    return %arg0, %c0_i32 : i32, i32
  }
  func.func @transform_2(%arg0: i32) -> (i32, i32) {
    %c0_i32 = arith.constant 0 : i32
    %c0_i32_0 = arith.constant 0 : i32
    %c0_i32_1 = arith.constant 0 : i32
    return %c0_i32, %c0_i32_0 : i32, i32
  }
  func.func @transform_3(%arg0: i32) -> (i32, i32) {
    %c0_i32 = arith.constant 0 : i32
    %c0_i32_0 = arith.constant 0 : i32
    %c0_i32_1 = arith.constant 0 : i32
    return %c0_i32, %c0_i32_0 : i32, i32
  }
  func.func @transform_4(%arg0: i32) -> (i32, i32) {
    %c0_i32 = arith.constant 0 : i32
    %c0_i32_0 = arith.constant 0 : i32
    return %arg0, %c0_i32 : i32, i32
  }
}

</mosaic_0001>

<bundles_post_ra>
// kernel: vertex_update.1
= control target key start
LH: loop header
LB: loop body
LE: loop exit
PB: predicated region body
PF: predicated region fallthrough
CT: control target
= control target key end

     0   :  { %9 = vsyncpa [#allocation3], 0  ;;  %s11495_s0 = inlined_call_operand.hbm [shape: bf16[2000,128], index: 0, kind: input, shape index: {}]   ;;  %s11496_s1 = inlined_call_operand.hbm [shape: bf16[2000,128], index: 1, kind: input, shape index: {}, may-alias: {1,4}]   ;;  %s11497_s2 = inlined_call_operand.hbm [shape: bf16[256,512], index: 2, kind: input, shape index: {}]   ;;  %s11498_s3 = inlined_call_operand.vmem [shape: f32[1,512], index: 3, kind: input, shape index: {}]   ;;  %s11499_s4 = inlined_call_operand.hbm [shape: bf16[2000,128], index: 4, kind: output, shape index: {}, may-alias: {1,4}]  }
   0x1   :  { %11 = vsyncpa [#allocation3 + $0x1], 0 }
   0x2   :  { %12 = vsyncpa [#allocation6], 0 }
   0x3   :  { %14 = vsyncpa [#allocation6 + $0x1], 0 }
   0x4   :  { %15 = vsyncpa [#allocation4], 0 }
   0x5   :  { %17 = vsyncpa [#allocation4 + $0x1], 0  ;;  %s7825_s15 = smov 0   ;;  %s7827_s16 = smov 0  }
   0x6   :  { %s7829_s17 = smov 0   ;;  %s7831_s18 = smov 0  }
   0x7 LB: > { %s7846_s19 = sadd.s32 4294967295, %s7786_s18   ;;  %s6015_s20 = sadd.s32 4294967294, %s7786_s18   ;;  %s7786_s18 = sphi %s7831_s18, %s12259_s18   ;;  %s7782_s17 = sphi %s7829_s17, %s12258_s17   ;;  %s7778_s16 = sphi %s7827_s16, %s12257_s16   ;;  %s7774_s15 = sphi %s7825_s15, %s12256_s15  }
   0x8   : > { %s7850_s21 = sadd.s32 1, %s7786_s18   ;;  %s30_s22 = sadd.s32 1, %s7782_s17 }
   0x9   : > { %s27_s23 = ssub.s32 %s7786_s18, %s7850_s21  ;;  %p37_p0 = scmp.ne.s32.totalorder %s7782_s17, %s7778_s16 }
   0xa   : > { %p28_p1 = scmp.eq.s32.totalorder %s27_s23, 0  ;;  %p38_p2 = scmp.eq.s32.totalorder %s7786_s18, 0 }
   0xb   : > { %p43_p3 = scmp.ne.s32.totalorder %s7778_s16, %s7774_s15  ;;  %p11500_p4 = scmp.eq.s32.totalorder %s7846_s19, 0 }
   0xc   : > { %s7862_s24 = scalar_select %p28_p1, %s7782_s17, %s30_s22  }
   0xd   : > { %p7864_p5 = por %p38_p2, %p37_p0  ;;  %p7870_p6 = por %p11500_p4, %p43_p3 }
   0xe   : > { %p135_p7 = scmp.eq.s32.totalorder %s7846_s19, 1  ;;  %p141_p8 = scmp.eq.s32.totalorder %s6015_s20, 1 }
   0xf   : > { %s11603_s25 = scalar_select %p7864_p5, 1, 0 }
  0x10   : > { %s11604_s26 = scalar_select %p7870_p6, 1, 0 }
  0x11   : > { %p6016_p9 = scmp.ge.s32.totalorder %s7786_s18, 1  ;;  %p148_p10 = scmp.lt.s32.totalorder %s7786_s18, 3 }
  0x12   : > { %p7877_p11 = por %p135_p7, %p37_p0  ;;  %p7881_p12 = por %p141_p8, %p43_p3 }
  0x13   : > { %p7885_p13 = pnand %p6016_p9, %p148_p10  ;;  %s7788_s30 = smov [#allocation7]  }
  0x14   : > { %s11605_s27 = scalar_select %p7877_p11, 1, 0 }
  0x15   : > { %s11606_s28 = scalar_select %p7881_p12, 1, 0 }
  0x16   : > { %s11607_s29 = scalar_select %p7885_p13, 1, 0 }
  0x17   : > { %p6888_p1 = pneg %p7885_p13  ;;  %s160_s5 = sshll.u32 %s7788_s30, 4  ;;  %s161_s5 = int_to_ptr.vmem [resolvable:$true] %s160_s5 }
  0x18   : > { %s7628_s9 = scalar_lea.hbm %s11497_s2, 8192 }
  0x19   : > { %p7893_p2 = pnand %p6888_p1, %p11500_p4  ;;  %p7629_p0 = scmp.ne.s32.totalorder %s11497_s2, %s7628_s9 }
  0x1a   : > { %p7635_p9 = scmp.lt.u32.totalorder %s7628_s9, %s11497_s2 }
  0x1b   : > { %p7630_p3 = pneg %p7893_p2 }
  0x1d   : > { %p7631_p7 = pnand %p7630_p3, %p7629_p0 }
  0x1f   : > { %p7632_p8 = pneg %p7631_p7 }
  0x21   : > { %p7637_p10 = pnand %p7635_p9, %p7632_p8 }
  0x23   : > { %7640 = shalt.err (!%p7637_p10)
}
  0x24   : > { %s7641_s14 = scalar_lea.vmem %s161_s5, 8192  ;;  %p7649_p11 = scmp.lt.s32.totalorder %s161_s5, %s161_s5 }
  0x25   : > { %p7642_p1 = scmp.ne.s32.totalorder %s161_s5, %s7641_s14  ;;  %p7650_p6 = scmp.lt.s32.totalorder %s7641_s14, %s7641_s14 }
  0x27   : > { %p7644_p4 = pnand %p7642_p1, %p7630_p3  ;;  %p7651_p13 = por %p7650_p6, %p7649_p11 }
  0x29   : > { %p7645_p12 = pneg %p7644_p4 }
  0x2b   : > { %p7652_p5 = pnand %p7651_p13, %p7645_p12 }
  0x2d   : > { %7655 = shalt.err (!%p7652_p5)
}
  0x2e   : > { %s7789_s20 = smov 256   ;;  %s7790_s22 = smov 16  }
  0x2f   : > { %6891 = dma.hbm_to_vmem [thread:$0]  (!%p7893_p2), %s11497_s2, 8192, %s161_s5, [#allocation6], %s7789_s20, %s7789_s20, %s7790_s22  }
  0x30   : > { %p6018_p0 = scmp.ge.s32.totalorder %s7786_s18, 2 }
  0x31   : > { %p11609_p4 = scmp.ne.s32.totalorder (!%p6018_p0), %s11603_s25, 0 }
  0x32   : > { %173 = sbr.rel (%p6018_p0) target bundleno = 129 (0x81), region = 24 }
  0x39   : > { %176 = sbr.rel (!%p11609_p4) target bundleno = 92 (0x5c), region = 28  ;;  %s177_s7 = sand.u32 (%p11609_p4), 1, %s7782_s17  }
  0x3a   : > { %s6020_s8 = sshll.u32 (%p11609_p4), %s7786_s18, 7  ;;  %s6019_s9 = sshll.u32 (%p11609_p4), %s177_s7, 9 }
  0x3b   : > { %s183_s10 = ssub.s32 (%p11609_p4), 250, %s6020_s8  ;;  %s7923_s11 = scalar_lea.sflag (%p11609_p4), [#allocation3], %s177_s7 }
  0x3c   : > { %p184_p5 = scmp.lt.s32.totalorder (%p11609_p4), %s183_s10, 128  ;;  %s181_s12 = scalar_lea.vmem (%p11609_p4), [#allocation2], %s6019_s9 }
  0x40   : > { %s12261_s10 = smov (!%p184_p5, %s183_s10), 128 }
  0x41   : > { %s7920_s6 = sshll.u32 %s12261_s10, 6 }
  0x42   : > { %s188_s5 = ssub.s32 8192, %s7920_s6 }
  0x43   : > { %189 = vsyncadd %s7923_s11, %s188_s5  ;;  %p6022_p6 = scmp.ne.s32.totalorder %s7920_s6, 0  ;;  %s6367_s13 = sshll.u32 %s7786_s18, 13 }
  0x44   : > { %s7931_s22 = scalar_lea.hbm %s11495_s0, %s6367_s13  ;;  %s194_s23 = sshll.u32 %s181_s12, 4  ;;  %s7933_s23 = int_to_ptr.vmem [resolvable:$true] %s194_s23 }
  0x45   : > { %s7656_s30 = scalar_lea.hbm %s7931_s22, %s7920_s6  ;;  %s7660_s9 = scalar_lea.hbm %s11495_s0, 16000 }
  0x46   : > { %p7657_p11 = scmp.ne.s32.totalorder %s7931_s22, %s7656_s30  ;;  %p7661_p2 = scmp.lt.u32.totalorder %s7931_s22, %s11495_s0 }
  0x47   : > { %p7662_p3 = scmp.lt.u32.totalorder %s7660_s9, %s7656_s30  ;;  %p7664_p8 = scmp.lt.u32.totalorder %s7656_s30, %s7931_s22 }
  0x48   : > { %p7658_p12 = pnand %p7657_p11, %p6022_p6 }
  0x49   : > { %p7663_p7 = por %p7662_p3, %p7661_p2 }
  0x4a   : > { %p7659_p13 = pneg %p7658_p12 }
  0x4b   : > { %p7665_p9 = por %p7664_p8, %p7663_p7 }
  0x4d   : > { %p7666_p10 = pnand %p7665_p9, %p7659_p13 }
  0x4f   : > { %7669 = shalt.err (!%p7666_p10)
}
  0x50   : > { %s7670_s12 = scalar_lea.vmem %s7933_s23, %s7920_s6  ;;  %s7791_s13 = smov [#allocation2]  }
  0x51   : > { %p7671_p1 = scmp.ne.s32.totalorder %s7933_s23, %s7670_s12  ;;  %s7674_s14 = sshll.u32 %s7791_s13, 4  ;;  %s7675_s14 = int_to_ptr.vmem [resolvable:$false] %s7674_s14 }
  0x52   : > { %s7676_s20 = scalar_lea.vmem %s7675_s14, 16384  ;;  %p7677_p11 = scmp.lt.s32.totalorder %s7933_s23, %s7675_s14 }
  0x53   : > { %p7672_p4 = pnand %p7671_p1, %p6022_p6  ;;  %p7678_p12 = scmp.lt.s32.totalorder %s7676_s20, %s7670_s12 }
  0x55   : > { %p7673_p5 = pneg %p7672_p4  ;;  %p7679_p2 = por %p7678_p12, %p7677_p11 }
  0x57   : > { %p7680_p3 = pnand %p7679_p2, %p7673_p5 }
  0x59   : > { %7683 = shalt.err (!%p7680_p3)
}
  0x5a   : > { %s7792_s30 = smov 64   ;;  %s7793_s7 = smov 4  }
  0x5b   : > { %200 = dma.hbm_to_vmem [thread:$0]  (%p6022_p6), %s7931_s22, %s7920_s6, %s7933_s23, %s7923_s11, %s7792_s30, %s7792_s30, %s7793_s7  }
  0x5c PF: > { %p11610_p13 = scmp.ne.s32.totalorder %s11603_s25, 0 }
  0x5d   : > { %s204_s8 = sand.u32 (%p11610_p13), 1, %s7786_s18   ;;  %s206_s9 = sand.u32 (%p11610_p13), 1, %s7782_s17  }
  0x5e   : > { %203 = sbr.rel (!%p11610_p13) target bundleno = 129 (0x81), region = 32  ;;  %s6026_s10 = sshll.u32 (%p11610_p13), %s206_s9, 9 }
  0x5f   : > { %s6027_s5 = sshll.u32 (%p11610_p13), %s7786_s18, 7  ;;  %s7968_s20 = scalar_lea.sflag (%p11610_p13), [#allocation6], %s204_s8 }
  0x60   : > { %s210_s12 = ssub.s32 (%p11610_p13), 250, %s6027_s5  ;;  %s208_s6 = scalar_lea.vmem (%p11610_p13), [#allocation5], %s6026_s10 }
  0x61   : > { %p211_p7 = scmp.lt.s32.totalorder (%p11610_p13), %s210_s12, 128 }
  0x65   : > { %s12263_s12 = smov (!%p211_p7, %s210_s12), 128 }
  0x66   : > { %s7965_s13 = sshll.u32 %s12263_s12, 6 }
  0x67   : > { %s215_s14 = ssub.s32 8192, %s7965_s13 }
  0x68   : > { %216 = vsyncadd %s7968_s20, %s215_s14  ;;  %p6029_p6 = scmp.ne.s32.totalorder %s7965_s13, 0  ;;  %s6368_s25 = sshll.u32 %s7786_s18, 13 }
  0x69   : > { %s7976_s23 = scalar_lea.hbm %s11496_s1, %s6368_s25  ;;  %s221_s30 = sshll.u32 %s208_s6, 4  ;;  %s7978_s30 = int_to_ptr.vmem [resolvable:$true] %s221_s30 }
  0x6a   : > { %s7684_s7 = scalar_lea.hbm %s7976_s23, %s7965_s13  ;;  %s7688_s10 = scalar_lea.hbm %s11496_s1, 16000 }
  0x6b   : > { %p7685_p8 = scmp.ne.s32.totalorder %s7976_s23, %s7684_s7  ;;  %p7689_p1 = scmp.lt.u32.totalorder %s7976_s23, %s11496_s1 }
  0x6c   : > { %p7690_p4 = scmp.lt.u32.totalorder %s7688_s10, %s7684_s7  ;;  %p7692_p11 = scmp.lt.u32.totalorder %s7684_s7, %s7976_s23 }
  0x6d   : > { %p7686_p9 = pnand %p7685_p8, %p6029_p6 }
  0x6e   : > { %p7691_p5 = por %p7690_p4, %p7689_p1 }
  0x6f   : > { %p7687_p10 = pneg %p7686_p9 }
  0x70   : > { %p7693_p12 = por %p7692_p11, %p7691_p5 }
  0x72   : > { %p7694_p2 = pnand %p7693_p12, %p7687_p10 }
  0x74   : > { %7697 = shalt.err (!%p7694_p2)
}
  0x75   : > { %s7698_s14 = scalar_lea.vmem %s7978_s30, %s7965_s13  ;;  %s7794_s6 = smov [#allocation5]  }
  0x76   : > { %p7699_p3 = scmp.ne.s32.totalorder %s7978_s30, %s7698_s14  ;;  %s7702_s25 = sshll.u32 %s7794_s6, 4  ;;  %s7703_s25 = int_to_ptr.vmem [resolvable:$false] %s7702_s25 }
  0x77   : > { %s7704_s11 = scalar_lea.vmem %s7703_s25, 16384  ;;  %p7705_p8 = scmp.lt.s32.totalorder %s7978_s30, %s7703_s25 }
  0x78   : > { %p7700_p13 = pnand %p7699_p3, %p6029_p6  ;;  %p7706_p9 = scmp.lt.s32.totalorder %s7704_s11, %s7698_s14 }
  0x7a   : > { %p7701_p7 = pneg %p7700_p13  ;;  %p7707_p1 = por %p7706_p9, %p7705_p8 }
  0x7c   : > { %p7708_p4 = pnand %p7707_p1, %p7701_p7 }
  0x7e   : > { %7711 = shalt.err (!%p7708_p4)
}
  0x7f   : > { %s7795_s22 = smov 64   ;;  %s7796_s7 = smov 4  }
  0x80   : > { %227 = dma.hbm_to_vmem [thread:$0]  (%p6029_p6), %s7976_s23, %s7965_s13, %s7978_s30, %s7968_s20, %s7795_s22, %s7795_s22, %s7796_s7  }
  0x81 PF: > { %p11611_p10 = scmp.ne.s32.totalorder %s11607_s29, 0 }
  0x83   : > { %233 = sbr.rel (%p11611_p10) target bundleno = 1172 (0x494), region = 36 }
  0x8a   : > { %s8008_s8 = sand.u32 1, %s7778_s16   ;;  %p11612_p5 = scmp.ne.s32.totalorder %s11604_s26, 0 }
  0x8b   : > { %s8011_s9 = sshll.u32 %s8008_s8, 9  ;;  %s236_s10 = scalar_lea.sflag [#allocation3], %s8008_s8 }
  0x8c   : > { %s8015_s5 = scalar_lea.vmem [#allocation2], %s8011_s9 }
  0x8d   : > { %7757 = dma.done.wait (%p11612_p5), %s236_s10, 8192  }
  0x8e   : > { %7759 = vsyncadd (%p11612_p5), %s236_s10, 4294959104  ;;  %s244_s29 = sand.u32 1, %s7846_s19   ;;  %s8023_s20 = scalar_lea.vmem [#allocation5], %s8011_s9 }
  0x8f   : > { %s245_s13 = scalar_lea.sflag [#allocation6], %s244_s29 }
  0x90   : > { %7761 = dma.done.wait (%p11612_p5), %s245_s13, 8192  }
  0x91   : > { %7763 = vsyncadd (%p11612_p5), %s245_s13, 4294959104  ;;  %p11613_p6 = scmp.eq.s32.totalorder %s7846_s19, 0 }
  0x93   : > { %7765 = dma.done.wait (%p11613_p6), [#allocation6], 8192   ;;  %p11614_p11 = pmov %p11613_p6 }
  0x94   : > { %v6940_v0 = vld [vmem:[#allocation7 + $0x4] ss:$16 sps:$4 sm:$0xff]   ;;  %v6942_v1 = vld [vmem:[#allocation7] ss:$16 sps:$4 sm:$0xff]   ;;  %v6955_v6 = vld [vmem:[#allocation7 + $0xc] ss:$16 sps:$4 sm:$0xff]  }
  0x95   : > { %7767 = vsyncadd (%p11614_p11), [#allocation6], 4294959104  ;;  %1728 = vmatprep.subr.bf16.mxu0 %v6940_v0  ;;  %v6943_v2 = vld [vmem:[#allocation7 + $0x24] ss:$16 sps:$4 sm:$0xff]   ;;  %v6945_v3 = vld [vmem:[#allocation7 + $0x20] ss:$16 sps:$4 sm:$0xff]   ;;  %2401 = vmatprep.subr.bf16.mxu1 %v6955_v6 }
  0x96   : > { %1729 = vmatpush1.bf16.msra.mxu0 %v6942_v1  ;;  %v6946_v4 = vld [vmem:[#allocation7 + $0x44] ss:$16 sps:$4 sm:$0xff]   ;;  %v6948_v5 = vld [vmem:[#allocation7 + $0x40] ss:$16 sps:$4 sm:$0xff]   ;;  %v6957_v7 = vld [vmem:[#allocation7 + $0x8] ss:$16 sps:$4 sm:$0xff]  }
  0x97   : > { %1730 = vmatprep.subr.bf16.mxu0 %v6943_v2  ;;  %v6949_v8 = vld [vmem:[#allocation7 + $0x64] ss:$16 sps:$4 sm:$0xff]   ;;  %2402 = vmatpush1.bf16.msra.mxu1 %v6957_v7  ;;  %v6961_v9 = vld [vmem:[#allocation7 + $0x2c] ss:$16 sps:$4 sm:$0xff]   ;;  %v6963_v10 = vld [vmem:[#allocation7 + $0x28] ss:$16 sps:$4 sm:$0xff]  }
  0x98   : > { %v6951_v11 = vld [vmem:[#allocation7 + $0x60] ss:$16 sps:$4 sm:$0xff]   ;;  %v6952_v12 = vld [vmem:[#allocation7 + $0x84] ss:$16 sps:$4 sm:$0xff]   ;;  %2403 = vmatprep.subr.bf16.mxu1 %v6961_v9  ;;  %v6967_v13 = vld [vmem:[#allocation7 + $0x4c] ss:$16 sps:$4 sm:$0xff]  }
  0x99   : > { %v6969_v14 = vld [vmem:[#allocation7 + $0x48] ss:$16 sps:$4 sm:$0xff]   ;;  %v6954_v15 = vld [vmem:[#allocation7 + $0x80] ss:$16 sps:$4 sm:$0xff]   ;;  %v6973_v16 = vld [vmem:[#allocation7 + $0x6c] ss:$16 sps:$4 sm:$0xff]  }
  0x9a   : > { %1731 = vmatpush1.bf16.msra.mxu0 %v6945_v3  ;;  %v6958_v17 = vld [vmem:[#allocation7 + $0xa4] ss:$16 sps:$4 sm:$0xff]   ;;  %v6975_v18 = vld [vmem:[#allocation7 + $0x68] ss:$16 sps:$4 sm:$0xff]   ;;  %v6960_v19 = vld [vmem:[#allocation7 + $0xa0] ss:$16 sps:$4 sm:$0xff]  }
  0x9b   : > { %1732 = vmatprep.subr.bf16.mxu0 %v6946_v4  ;;  %2404 = vmatpush1.bf16.msra.mxu1 %v6963_v10  ;;  %v6979_v20 = vld [vmem:[#allocation7 + $0x8c] ss:$16 sps:$4 sm:$0xff]   ;;  %v6964_v21 = vld [vmem:[#allocation7 + $0xc4] ss:$16 sps:$4 sm:$0xff]   ;;  %v6981_v22 = vld [vmem:[#allocation7 + $0x88] ss:$16 sps:$4 sm:$0xff]  }
  0x9c   : > { %2405 = vmatprep.subr.bf16.mxu1 %v6967_v13  ;;  %v6966_v23 = vld [vmem:[#allocation7 + $0xc0] ss:$16 sps:$4 sm:$0xff]   ;;  %v6985_v24 = vld [vmem:[#allocation7 + $0xac] ss:$16 sps:$4 sm:$0xff]   ;;  %v6970_v25 = vld [vmem:[#allocation7 + $0xe4] ss:$16 sps:$4 sm:$0xff]  }
  0x9d   : > { %v6987_v26 = vld [vmem:[#allocation7 + $0xa8] ss:$16 sps:$4 sm:$0xff]   ;;  %v6972_v27 = vld [vmem:[#allocation7 + $0xe0] ss:$16 sps:$4 sm:$0xff]   ;;  %v6991_v28 = vld [vmem:[#allocation7 + $0xcc] ss:$16 sps:$4 sm:$0xff]  }
  0x9e   : > { %1733 = vmatpush1.bf16.msra.mxu0 %v6948_v5  ;;  %v6976_v29 = vld [vmem:[#allocation7 + $0x104] ss:$16 sps:$4 sm:$0xff]   ;;  %v6993_v30 = vld [vmem:[#allocation7 + $0xc8] ss:$16 sps:$4 sm:$0xff]   ;;  %v6978_v31 = vld [vmem:[#allocation7 + $0x100] ss:$16 sps:$4 sm:$0xff]  }
  0x9f   : > { %1734 = vmatprep.subr.bf16.mxu0 %v6949_v8  ;;  %2406 = vmatpush1.bf16.msra.mxu1 %v6969_v14  ;;  %v6997_v32 = vld [vmem:[#allocation7 + $0xec] ss:$16 sps:$4 sm:$0xff]   ;;  %v6982_v33 = vld [vmem:[#allocation7 + $0x124] ss:$16 sps:$4 sm:$0xff]   ;;  %v6999_v34 = vld [vmem:[#allocation7 + $0xe8] ss:$16 sps:$4 sm:$0xff]  }
  0xa0   : > { %2407 = vmatprep.subr.bf16.mxu1 %v6973_v16  ;;  %v6984_v35 = vld [vmem:[#allocation7 + $0x120] ss:$16 sps:$4 sm:$0xff]   ;;  %v7003_v36 = vld [vmem:[#allocation7 + $0x10c] ss:$16 sps:$4 sm:$0xff]   ;;  %v6988_v37 = vld [vmem:[#allocation7 + $0x144] ss:$16 sps:$4 sm:$0xff]  }
  0xa1   : > { %v8034_v38 = vld [vmem:[%s8023_s20] sm:$0xff]   ;;  %v7005_v39 = vld [vmem:[#allocation7 + $0x108] ss:$16 sps:$4 sm:$0xff]   ;;  %v7009_v41 = vld [vmem:[#allocation7 + $0x12c] ss:$16 sps:$4 sm:$0xff]   ;;  %s8518_s30 = scalar_lea.vmem [#allocation8], %s8011_s9 }
  0xa2   : > { %1735 = vmatpush1.bf16.msra.mxu0 %v6951_v11  ;;  %v6990_v40 = vld [vmem:[#allocation7 + $0x140] ss:$16 sps:$4 sm:$0xff]   ;;  %v6994_v42 = vld [vmem:[#allocation7 + $0x164] ss:$16 sps:$4 sm:$0xff]   ;;  %1760 = vmatprep.mubr.bf16.mxu0 %v8034_v38  ;;  %v7011_v43 = vld [vmem:[#allocation7 + $0x128] ss:$16 sps:$4 sm:$0xff]  }
  0xa3   : > { %1736 = vmatprep.subr.bf16.mxu0 %v6952_v12  ;;  %2408 = vmatpush1.bf16.msra.mxu1 %v6975_v18  ;;  %v6996_v44 = vld [vmem:[#allocation7 + $0x160] ss:$16 sps:$4 sm:$0xff]   ;;  %v7015_v45 = vld [vmem:[#allocation7 + $0x14c] ss:$16 sps:$4 sm:$0xff]   ;;  %v7000_v46 = vld [vmem:[#allocation7 + $0x184] ss:$16 sps:$4 sm:$0xff]  }
  0xa4   : > { %2409 = vmatprep.subr.bf16.mxu1 %v6979_v20  ;;  %2433 = vmatprep.mubr.bf16.mxu1 %v8034_v38  ;;  %v7002_v47 = vld [vmem:[#allocation7 + $0x180] ss:$16 sps:$4 sm:$0xff]   ;;  %v7017_v48 = vld [vmem:[#allocation7 + $0x148] ss:$16 sps:$4 sm:$0xff]   ;;  %v7021_v49 = vld [vmem:[#allocation7 + $0x16c] ss:$16 sps:$4 sm:$0xff]  }
  0xa5   : > { %v7006_v50 = vld [vmem:[#allocation7 + $0x1a4] ss:$16 sps:$4 sm:$0xff]   ;;  %v7008_v51 = vld [vmem:[#allocation7 + $0x1a0] ss:$16 sps:$4 sm:$0xff]   ;;  %v7024_v52 = vld [vmem:[#allocation7 + $0x168] ss:$16 sps:$4 sm:$0xff]  }
  0xa6   : > { %1737 = vmatpush1.bf16.msra.mxu0 %v6954_v15  ;;  %v7026_v53 = vld [vmem:[#allocation7 + $0x18c] ss:$16 sps:$4 sm:$0xff]   ;;  %v7012_v54 = vld [vmem:[#allocation7 + $0x1c4] ss:$16 sps:$4 sm:$0xff]   ;;  %v7014_v55 = vld [vmem:[#allocation7 + $0x1c0] ss:$16 sps:$4 sm:$0xff]  }
  0xa7   : > { %1738 = vmatprep.subr.bf16.mxu0 %v6958_v17  ;;  %2410 = vmatpush1.bf16.msra.mxu1 %v6981_v22  ;;  %v7028_v56 = vld [vmem:[#allocation7 + $0x188] ss:$16 sps:$4 sm:$0xff]   ;;  %v7029_v57 = vld [vmem:[#allocation7 + $0x1ac] ss:$16 sps:$4 sm:$0xff]   ;;  %v7018_v58 = vld [vmem:[#allocation7 + $0x1e4] ss:$16 sps:$4 sm:$0xff]  }
  0xa8   : > { %2411 = vmatprep.subr.bf16.mxu1 %v6985_v24  ;;  %v7020_v59 = vld [vmem:[#allocation7 + $0x1e0] ss:$16 sps:$4 sm:$0xff]   ;;  %v7032_v60 = vld [vmem:[#allocation7 + $0x1a8] ss:$16 sps:$4 sm:$0xff]   ;;  %v7034_v61 = vld [vmem:[#allocation7 + $0x1cc] ss:$16 sps:$4 sm:$0xff]  }
  0xa9   : > { %v8039_v62 = vld [vmem:[%s8023_s20 + $0x8] sm:$0xff]   ;;  %v7025_v63 = vld [vmem:[%s8015_s5] sm:$0xff]   ;;  %v8044_v3 = vld [vmem:[%s8023_s20 + $0x10] sm:$0xff]   ;;  %s5891_s12 = scalar_lea.sflag [#allocation4], %s8008_s8  ;;  %p12254_p12 = scmp.ne.s32.totalorder %s11605_s27, 0 }
  0xaa   : > { %1739 = vmatpush1.bf16.msra.mxu0 %v6960_v19  ;;  %v7036_v0 = vld [vmem:[#allocation7 + $0x1c8] ss:$16 sps:$4 sm:$0xff]   ;;  %v7037_v1 = vld [vmem:[#allocation7 + $0x1ec] ss:$16 sps:$4 sm:$0xff]   ;;  %v7041_v6 = vld [vmem:[%s8015_s5 + $0x10] sm:$0xff]   ;;  %s6359_s14 = sshll.u32 (%p12254_p12), %s7846_s19, 7 }
  0xab   : > { %1740 = vmatprep.subr.bf16.mxu0 %v6964_v21  ;;  %2412 = vmatpush1.bf16.msra.mxu1 %v6987_v26  ;;  %v7040_v2 = vld [vmem:[#allocation7 + $0x1e8] ss:$16 sps:$4 sm:$0xff]   ;;  %v8056_v7 = vld [vmem:[%s8023_s20 + $0x20] sm:$0xff]   ;;  %v8068_v11 = vld [vmem:[%s8023_s20 + $0x30] sm:$0xff]   ;;  %s5899_s6 = ssub.s32 (%p12254_p12), 250, %s6359_s14 }
  0xac   : > { %2413 = vmatprep.subr.bf16.mxu1 %v6991_v28  ;;  %v7033_v4 = vld [vmem:[%s8015_s5 + $0x8] sm:$0xff]   ;;  %v8050_v5 = vld [vmem:[%s8023_s20 + $0x18] sm:$0xff]   ;;  %v7045_v10 = vld [vmem:[%s8015_s5 + $0x20] sm:$0xff]   ;;  %p5900_p2 = scmp.lt.s32.totalorder (%p12254_p12), %s5899_s6, 128 }
  0xad   : > { %v7043_v8 = vld [vmem:[%s8015_s5 + $0x18] sm:$0xff]   ;;  %v8062_v9 = vld [vmem:[%s8023_s20 + $0x28] sm:$0xff]   ;;  %v7049_v14 = vld [vmem:[%s8015_s5 + $0x30] sm:$0xff]  }
  0xae   : > { %1741 = vmatpush1.bf16.msra.mxu0 %v6966_v23  ;;  %v7047_v12 = vld [vmem:[%s8015_s5 + $0x28] sm:$0xff]   ;;  %v8074_v13 = vld [vmem:[%s8023_s20 + $0x38] sm:$0xff]   ;;  %v8080_v15 = vld [vmem:[%s8023_s20 + $0x40] sm:$0xff]  }
  0xaf   : > { %1742 = vmatprep.subr.bf16.mxu0 %v6970_v25  ;;  %2414 = vmatpush1.bf16.msra.mxu1 %v6993_v30  ;;  %11615 = vst [vmem:[#allocation13_spill] sm:$0xff] %v8080_v15  ;;  %v7051_v16 = vld [vmem:[%s8015_s5 + $0x38] sm:$0xff]   ;;  %v8086_v17 = vld [vmem:[%s8023_s20 + $0x48] sm:$0xff]   ;;  %v7053_v18 = vld [vmem:[%s8015_s5 + $0x40] sm:$0xff]  }
  0xb0   : > { %2415 = vmatprep.subr.bf16.mxu1 %v6997_v32  ;;  %11616 = vst [vmem:[#allocation14_spill] sm:$0xff] %v8086_v17  ;;  %v8092_v19 = vld [vmem:[%s8023_s20 + $0x50] sm:$0xff]   ;;  %v7055_v20 = vld [vmem:[%s8015_s5 + $0x48] sm:$0xff]   ;;  %v8098_v21 = vld [vmem:[%s8023_s20 + $0x58] sm:$0xff]  }
  0xb1   : > { %11617 = vst [vmem:[#allocation15_spill] sm:$0xff] %v8092_v19  ;;  %11618 = vst [vmem:[#allocation16_spill] sm:$0xff] %v8098_v21  ;;  %v7057_v22 = vld [vmem:[%s8015_s5 + $0x50] sm:$0xff]   ;;  %v8104_v23 = vld [vmem:[%s8023_s20 + $0x60] sm:$0xff]  }
  0xb2   : > { %1743 = vmatpush1.bf16.msra.mxu0 %v6972_v27  ;;  %11619 = vst [vmem:[#allocation17_spill] sm:$0xff] %v8104_v23  ;;  %v7059_v24 = vld [vmem:[%s8015_s5 + $0x58] sm:$0xff]   ;;  %v8110_v25 = vld [vmem:[%s8023_s20 + $0x68] sm:$0xff]   ;;  %v7061_v26 = vld [vmem:[%s8015_s5 + $0x60] sm:$0xff]  }
  0xb3   : > { %1744 = vmatprep.subr.bf16.mxu0 %v6976_v29  ;;  %2416 = vmatpush1.bf16.msra.mxu1 %v6999_v34  ;;  %11620 = vst [vmem:[#allocation18_spill] sm:$0xff] %v8110_v25  ;;  %v8116_v27 = vld [vmem:[%s8023_s20 + $0x70] sm:$0xff]   ;;  %v7063_v28 = vld [vmem:[%s8015_s5 + $0x68] sm:$0xff]   ;;  %v8122_v29 = vld [vmem:[%s8023_s20 + $0x78] sm:$0xff]  }
  0xb4   : > { %2417 = vmatprep.subr.bf16.mxu1 %v7003_v36  ;;  %11621 = vst [vmem:[#allocation19_spill] sm:$0xff] %v8116_v27  ;;  %11622 = vst [vmem:[#allocation20_spill] sm:$0xff] %v8122_v29  ;;  %v7065_v30 = vld [vmem:[%s8015_s5 + $0x70] sm:$0xff]   ;;  %v7067_v32 = vld [vmem:[%s8015_s5 + $0x78] sm:$0xff]  }
  0xb5   : > { %v7069_v34 = vld [vmem:[%s8015_s5 + $0x80] sm:$0xff]   ;;  %v7071_v36 = vld [vmem:[%s8015_s5 + $0x88] sm:$0xff]  }
  0xb6   : > { %1745 = vmatpush1.bf16.msra.mxu0 %v6978_v31  ;;  %v8128_v31 = vld [vmem:[%s8023_s20 + $0x80] sm:$0xff]  }
  0xb7   : > { %1746 = vmatprep.subr.bf16.mxu0 %v6982_v33  ;;  %2418 = vmatpush1.bf16.msra.mxu1 %v7005_v39  ;;  %11623 = vst [vmem:[#allocation21_spill] sm:$0xff] %v8128_v31  ;;  %v8134_v33 = vld [vmem:[%s8023_s20 + $0x88] sm:$0xff]   ;;  %v7073_v39 = vld [vmem:[%s8015_s5 + $0x90] sm:$0xff]  }
  0xb8   : > { %2419 = vmatprep.subr.bf16.mxu1 %v7009_v41  ;;  %11624 = vst [vmem:[#allocation22_spill] sm:$0xff] %v8134_v33  ;;  %v7075_v41 = vld [vmem:[%s8015_s5 + $0x98] sm:$0xff]  }
  0xba   : > { %1747 = vmatpush1.bf16.msra.mxu0 %v6984_v35  ;;  %v8140_v35 = vld [vmem:[%s8023_s20 + $0x90] sm:$0xff]  }
  0xbb   : > { %1748 = vmatprep.subr.bf16.mxu0 %v6988_v37  ;;  %2420 = vmatpush1.bf16.msra.mxu1 %v7011_v43  ;;  %11625 = vst [vmem:[#allocation23_spill] sm:$0xff] %v8140_v35  ;;  %v8146_v37 = vld [vmem:[%s8023_s20 + $0x98] sm:$0xff]   ;;  %v7077_v43 = vld [vmem:[%s8015_s5 + $0xa0] sm:$0xff]  }
  0xbc   : > { %2421 = vmatprep.subr.bf16.mxu1 %v7015_v45  ;;  %11626 = vst [vmem:[#allocation24_spill] sm:$0xff] %v8146_v37  ;;  %v7079_v45 = vld [vmem:[%s8015_s5 + $0xa8] sm:$0xff]  }
  0xbe   : > { %1749 = vmatpush1.bf16.msra.mxu0 %v6990_v40  ;;  %v8152_v40 = vld [vmem:[%s8023_s20 + $0xa0] sm:$0xff]  }
  0xbf   : > { %1750 = vmatprep.subr.bf16.mxu0 %v6994_v42  ;;  %2422 = vmatpush1.bf16.msra.mxu1 %v7017_v48  ;;  %11627 = vst [vmem:[#allocation25_spill] sm:$0xff] %v8152_v40  ;;  %v8158_v42 = vld [vmem:[%s8023_s20 + $0xa8] sm:$0xff]   ;;  %v8176_v48 = vld [vmem:[%s8023_s20 + $0xc0] sm:$0xff]  }
  0xc0   : > { %2423 = vmatprep.subr.bf16.mxu1 %v7021_v49  ;;  %11628 = vst [vmem:[#allocation26_spill] sm:$0xff] %v8158_v42  ;;  %11631 = vst [vmem:[#allocation29_spill] sm:$0xff] %v8176_v48  ;;  %v7083_v49 = vld [vmem:[%s8015_s5 + $0xb8] sm:$0xff]  }
  0xc2   : > { %1751 = vmatpush1.bf16.msra.mxu0 %v6996_v44  ;;  %v8164_v44 = vld [vmem:[%s8023_s20 + $0xb0] sm:$0xff]  }
  0xc3   : > { %1752 = vmatprep.subr.bf16.mxu0 %v7000_v46  ;;  %2424 = vmatpush1.bf16.msra.mxu1 %v7024_v52  ;;  %11629 = vst [vmem:[#allocation27_spill] sm:$0xff] %v8164_v44  ;;  %v8170_v46 = vld [vmem:[%s8023_s20 + $0xb8] sm:$0xff]   ;;  %v8188_v52 = vld [vmem:[%s8023_s20 + $0xd0] sm:$0xff]  }
  0xc4   : > { %2425 = vmatprep.subr.bf16.mxu1 %v7026_v53  ;;  %11630 = vst [vmem:[#allocation28_spill] sm:$0xff] %v8170_v46  ;;  %11633 = vst [vmem:[#allocation31_spill] sm:$0xff] %v8188_v52  ;;  %v7087_v53 = vld [vmem:[%s8015_s5 + $0xc8] sm:$0xff]  }
  0xc6   : > { %1753 = vmatpush1.bf16.msra.mxu0 %v7002_v47  ;;  %v7081_v47 = vld [vmem:[%s8015_s5 + $0xb0] sm:$0xff]  }
  0xc7   : > { %1754 = vmatprep.subr.bf16.mxu0 %v7006_v50  ;;  %2426 = vmatpush1.bf16.msra.mxu1 %v7028_v56  ;;  %v8182_v50 = vld [vmem:[%s8023_s20 + $0xc8] sm:$0xff]   ;;  %v8196_v56 = vld [vmem:[%s8023_s20 + $0xd8] sm:$0xff]  }
  0xc8   : > { %2427 = vmatprep.subr.bf16.mxu1 %v7029_v57  ;;  %11632 = vst [vmem:[#allocation30_spill] sm:$0xff] %v8182_v50  ;;  %11634 = vst [vmem:[#allocation32_spill] sm:$0xff] %v8196_v56 }
  0xca   : > { %1755 = vmatpush1.bf16.msra.mxu0 %v7008_v51  ;;  %v7085_v51 = vld [vmem:[%s8015_s5 + $0xc0] sm:$0xff]  }
  0xcb   : > { %1756 = vmatprep.subr.bf16.mxu0 %v7012_v54  ;;  %2428 = vmatpush1.bf16.msra.mxu1 %v7032_v60  ;;  %v1388_v54 = vlaneseq }
  0xcc   : > { %2429 = vmatprep.subr.bf16.mxu1 %v7034_v61  ;;  %v8349_v61 = vld [vmem:[%s8023_s20 + $0x120] sm:$0xff]  }
  0xce   : > { %1757 = vmatpush1.bf16.msra.mxu0 %v7014_v55  ;;  %v8193_v55 = vshrl.u32 %v1388_v54, 7 }
  0xcf   : > { %1758 = vmatprep.subr.bf16.mxu0 %v7018_v58  ;;  %2430 = vmatpush1.bf16.msra.mxu1 %v7036_v0  ;;  %v7089_v58 = vld [vmem:[%s8015_s5 + $0xd0] sm:$0xff]  }
  0xd0   : > { %2431 = vmatprep.subr.bf16.mxu1 %v7037_v1 }
  0xd2   : > { %1759 = vmatpush1.bf16.msra.mxu0 %v7020_v59  ;;  %v8364_v59 = vld [vmem:[%s8023_s20 + $0x130] sm:$0xff]  }
  0xd3   : > { %2432 = vmatpush1.bf16.msra.mxu1 %v7040_v2  ;;  %v1390_v2 = vsub.s32 0, %v8193_v55 }
  0xd5   : > { %1761 = vmatmul.mubr.bf16.vlgmr.msra.gmra.mrb[0].mxu0 %v7025_v63 }
  0xd6   : > { %1770 = vmatprep.mubr.bf16.mxu0 %v8039_v62  ;;  %2434 = vmatmul.mubr.bf16.vlgmr.msra.gmra.mrb[0].mxu1 %v7025_v63 }
  0xd7   : > { %2443 = vmatprep.mubr.bf16.mxu1 %v8039_v62 }
  0xdd   : > { %1771 = vmatmul.mubr.bf16.gmra.mrb[4].mxu0 %v7033_v4 }
  0xde   : > { %1780 = vmatprep.mubr.bf16.mxu0 %v8044_v3  ;;  %2444 = vmatmul.mubr.bf16.gmra.mrb[4].mxu1 %v7033_v4 }
  0xdf   : > { %2453 = vmatprep.mubr.bf16.mxu1 %v8044_v3 }
  0xe5   : > { %1781 = vmatmul.mubr.bf16.gmra.mrb[8].mxu0 %v7041_v6 }
  0xe6   : > { %1790 = vmatprep.mubr.bf16.mxu0 %v8050_v5  ;;  %2454 = vmatmul.mubr.bf16.gmra.mrb[8].mxu1 %v7041_v6 }
  0xe7   : > { %2463 = vmatprep.mubr.bf16.mxu1 %v8050_v5 }
  0xed   : > { %1791 = vmatmul.mubr.bf16.gmra.mrb[12].mxu0 %v7043_v8 }
  0xee   : > { %1800 = vmatprep.mubr.bf16.mxu0 %v8056_v7  ;;  %2464 = vmatmul.mubr.bf16.gmra.mrb[12].mxu1 %v7043_v8 }
  0xef   : > { %2473 = vmatprep.mubr.bf16.mxu1 %v8056_v7 }
  0xf5   : > { %1801 = vmatmul.mubr.bf16.gmra.mrb[16].mxu0 %v7045_v10 }
  0xf6   : > { %1810 = vmatprep.mubr.bf16.mxu0 %v8062_v9  ;;  %2474 = vmatmul.mubr.bf16.gmra.mrb[16].mxu1 %v7045_v10  ;;  %v8213_v10 = vld [vmem:[%s11498_s3] sm:$0xf] }
  0xf7   : > { %2483 = vmatprep.mubr.bf16.mxu1 %v8062_v9 }
  0xfd   : > { %1811 = vmatmul.mubr.bf16.gmra.mrb[20].mxu0 %v7047_v12 }
  0xfe   : > { %1820 = vmatprep.mubr.bf16.mxu0 %v8068_v11  ;;  %2484 = vmatmul.mubr.bf16.gmra.mrb[20].mxu1 %v7047_v12  ;;  %v1394_v12 = vsub.s32 1, %v8193_v55 }
  0xff   : > { %2493 = vmatprep.mubr.bf16.mxu1 %v8068_v11 }
 0x105   : > { %1821 = vmatmul.mubr.bf16.gmra.mrb[24].mxu0 %v7049_v14 }
 0x106   : > { %1830 = vmatprep.mubr.bf16.mxu0 %v8074_v13  ;;  %2494 = vmatmul.mubr.bf16.gmra.mrb[24].mxu1 %v7049_v14 }
 0x107   : > { %2503 = vmatprep.mubr.bf16.mxu1 %v8074_v13 }
 0x10d   : > { %1831 = vmatmul.mubr.bf16.gmra.mrb[28].mxu0 %v7051_v16 }
 0x10e   : > { %1840 = vmatprep.mubr.bf16.mxu0 %v8080_v15  ;;  %2504 = vmatmul.mubr.bf16.gmra.mrb[28].mxu1 %v7051_v16  ;;  %v8295_v16 = vld [vmem:[%s8023_s20 + $0xf0] sm:$0xff]  }
 0x10f   : > { %2513 = vmatprep.mubr.bf16.mxu1 %v8080_v15  ;;  %11637 = vst [vmem:[#allocation35_spill] sm:$0xff] %v8295_v16 }
 0x115   : > { %1841 = vmatmul.mubr.bf16.gmra.mrb[32].mxu0 %v7053_v18 }
 0x116   : > { %1850 = vmatprep.mubr.bf16.mxu0 %v8086_v17  ;;  %2514 = vmatmul.mubr.bf16.gmra.mrb[32].mxu1 %v7053_v18 }
 0x117   : > { %2523 = vmatprep.mubr.bf16.mxu1 %v8086_v17 }
 0x11d   : > { %1851 = vmatmul.mubr.bf16.gmra.mrb[36].mxu0 %v7055_v20 }
 0x11e   : > { %1860 = vmatprep.mubr.bf16.mxu0 %v8092_v19  ;;  %2524 = vmatmul.mubr.bf16.gmra.mrb[36].mxu1 %v7055_v20 }
 0x11f   : > { %2533 = vmatprep.mubr.bf16.mxu1 %v8092_v19 }
 0x125   : > { %1861 = vmatmul.mubr.bf16.gmra.mrb[40].mxu0 %v7057_v22 }
 0x126   : > { %1870 = vmatprep.mubr.bf16.mxu0 %v8098_v21  ;;  %2534 = vmatmul.mubr.bf16.gmra.mrb[40].mxu1 %v7057_v22 }
 0x127   : > { %2543 = vmatprep.mubr.bf16.mxu1 %v8098_v21 }
 0x12d   : > { %1871 = vmatmul.mubr.bf16.gmra.mrb[44].mxu0 %v7059_v24 }
 0x12e   : > { %1880 = vmatprep.mubr.bf16.mxu0 %v8104_v23  ;;  %2544 = vmatmul.mubr.bf16.gmra.mrb[44].mxu1 %v7059_v24  ;;  %v1402_v24 = vsub.s32 3, %v8193_v55 }
 0x12f   : > { %2553 = vmatprep.mubr.bf16.mxu1 %v8104_v23 }
 0x135   : > { %1881 = vmatmul.mubr.bf16.gmra.mrb[48].mxu0 %v7061_v26 }
 0x136   : > { %1890 = vmatprep.mubr.bf16.mxu0 %v8110_v25  ;;  %2554 = vmatmul.mubr.bf16.gmra.mrb[48].mxu1 %v7061_v26  ;;  %v8310_v26 = vrot.slane %v8213_v10, %v1402_v24 }
 0x137   : > { %2563 = vmatprep.mubr.bf16.mxu1 %v8110_v25 }
 0x13d   : > { %1891 = vmatmul.mubr.bf16.gmra.mrb[52].mxu0 %v7063_v28 }
 0x13e   : > { %1900 = vmatprep.mubr.bf16.mxu0 %v8116_v27  ;;  %2564 = vmatmul.mubr.bf16.gmra.mrb[52].mxu1 %v7063_v28 }
 0x13f   : > { %2573 = vmatprep.mubr.bf16.mxu1 %v8116_v27 }
 0x145   : > { %1901 = vmatmul.mubr.bf16.gmra.mrb[56].mxu0 %v7065_v30 }
 0x146   : > { %1910 = vmatprep.mubr.bf16.mxu0 %v8122_v29  ;;  %2574 = vmatmul.mubr.bf16.gmra.mrb[56].mxu1 %v7065_v30 }
 0x147   : > { %2583 = vmatprep.mubr.bf16.mxu1 %v8122_v29 }
 0x14d   : > { %1911 = vmatmul.mubr.bf16.gmra.mrb[60].mxu0 %v7067_v32 }
 0x14e   : > { %1920 = vmatprep.mubr.bf16.mxu0 %v8128_v31  ;;  %2584 = vmatmul.mubr.bf16.gmra.mrb[60].mxu1 %v7067_v32  ;;  %v7091_v32 = vld [vmem:[%s8015_s5 + $0xd8] sm:$0xff]  }
 0x14f   : > { %2593 = vmatprep.mubr.bf16.mxu1 %v8128_v31 }
 0x155   : > { %1921 = vmatmul.mubr.bf16.gmra.mrb[64].mxu0 %v7069_v34 }
 0x156   : > { %1930 = vmatprep.mubr.bf16.mxu0 %v8134_v33  ;;  %2594 = vmatmul.mubr.bf16.gmra.mrb[64].mxu1 %v7069_v34 }
 0x157   : > { %2603 = vmatprep.mubr.bf16.mxu1 %v8134_v33 }
 0x15d   : > { %1931 = vmatmul.mubr.bf16.gmra.mrb[68].mxu0 %v7071_v36 }
 0x15e   : > { %1940 = vmatprep.mubr.bf16.mxu0 %v8140_v35  ;;  %2604 = vmatmul.mubr.bf16.gmra.mrb[68].mxu1 %v7071_v36  ;;  %v8230_v36 = vrot.slane %v8213_v10, %v1390_v2 }
 0x15f   : > { %2613 = vmatprep.mubr.bf16.mxu1 %v8140_v35 }
 0x165   : > { %1941 = vmatmul.mubr.bf16.gmra.mrb[72].mxu0 %v7073_v39 }
 0x166   : > { %1950 = vmatprep.mubr.bf16.mxu0 %v8146_v37  ;;  %2614 = vmatmul.mubr.bf16.gmra.mrb[72].mxu1 %v7073_v39  ;;  %v8233_v39 = vld [vmem:[%s8023_s20 + $0xe0] sm:$0xff]  }
 0x167   : > { %2623 = vmatprep.mubr.bf16.mxu1 %v8146_v37  ;;  %11635 = vst [vmem:[#allocation33_spill] sm:$0xff] %v8233_v39  ;;  %v8393_v37 = vld [vmem:[%s8023_s20 + $0x140] sm:$0xff]  }
 0x16d   : > { %1951 = vmatmul.mubr.bf16.gmra.mrb[76].mxu0 %v7075_v41 }
 0x16e   : > { %1960 = vmatprep.mubr.bf16.mxu0 %v8152_v40  ;;  %2624 = vmatmul.mubr.bf16.gmra.mrb[76].mxu1 %v7075_v41 }
 0x16f   : > { %2633 = vmatprep.mubr.bf16.mxu1 %v8152_v40 }
 0x175   : > { %1961 = vmatmul.mubr.bf16.gmra.mrb[80].mxu0 %v7077_v43 }
 0x176   : > { %1970 = vmatprep.mubr.bf16.mxu0 %v8158_v42  ;;  %2634 = vmatmul.mubr.bf16.gmra.mrb[80].mxu1 %v7077_v43 }
 0x177   : > { %2643 = vmatprep.mubr.bf16.mxu1 %v8158_v42 }
 0x17d   : > { %1971 = vmatmul.mubr.bf16.gmra.mrb[84].mxu0 %v7079_v45 }
 0x17e   : > { %1980 = vmatprep.mubr.bf16.mxu0 %v8164_v44  ;;  %2644 = vmatmul.mubr.bf16.gmra.mrb[84].mxu1 %v7079_v45 }
 0x17f   : > { %2653 = vmatprep.mubr.bf16.mxu1 %v8164_v44 }
 0x185   : > { %1981 = vmatmul.mubr.bf16.gmra.mrb[88].mxu0 %v7081_v47 }
 0x186   : > { %1990 = vmatprep.mubr.bf16.mxu0 %v8170_v46  ;;  %2654 = vmatmul.mubr.bf16.gmra.mrb[88].mxu1 %v7081_v47 }
 0x187   : > { %2663 = vmatprep.mubr.bf16.mxu1 %v8170_v46 }
 0x18d   : > { %1991 = vmatmul.mubr.bf16.gmra.mrb[92].mxu0 %v7083_v49 }
 0x18e   : > { %2000 = vmatprep.mubr.bf16.mxu0 %v8176_v48  ;;  %2664 = vmatmul.mubr.bf16.gmra.mrb[92].mxu1 %v7083_v49  ;;  %v8239_v49 = vrot.slane %v8213_v10, %v1394_v12  ;;  %v8271_v12 = vld [vmem:[%s8023_s20 + $0xe8] sm:$0xff]  }
 0x18f   : > { %2673 = vmatprep.mubr.bf16.mxu1 %v8176_v48  ;;  %11636 = vst [vmem:[#allocation34_spill] sm:$0xff] %v8271_v12 }
 0x195   : > { %2001 = vmatmul.mubr.bf16.gmra.mrb[96].mxu0 %v7085_v51 }
 0x196   : > { %2010 = vmatprep.mubr.bf16.mxu0 %v8182_v50  ;;  %2674 = vmatmul.mubr.bf16.gmra.mrb[96].mxu1 %v7085_v51 }
 0x197   : > { %2683 = vmatprep.mubr.bf16.mxu1 %v8182_v50  ;;  %v8371_v50 = vld [vmem:[%s8023_s20 + $0x138] sm:$0xff]  }
 0x19d   : > { %2011 = vmatmul.mubr.bf16.gmra.mrb[100].mxu0 %v7087_v53 }
 0x19e   : > { %2020 = vmatprep.mubr.bf16.mxu0 %v8188_v52  ;;  %2684 = vmatmul.mubr.bf16.gmra.mrb[100].mxu1 %v7087_v53 }
 0x19f   : > { %2693 = vmatprep.mubr.bf16.mxu1 %v8188_v52 }
 0x1a5   : > { %2021 = vmatmul.mubr.bf16.gmra.mrb[104].mxu0 %v7089_v58 }
 0x1a6   : > { %2030 = vmatprep.mubr.bf16.mxu0 %v8196_v56  ;;  %2694 = vmatmul.mubr.bf16.gmra.mrb[104].mxu1 %v7089_v58 }
 0x1a7   : > { %2703 = vmatprep.mubr.bf16.mxu1 %v8196_v56 }
 0x1a8   : > { %v1762_v47 = vpop.f32.mrb[0].mxu0 }
 0x1a9   : > { %v1764_v34 = vpop.f32.mrb[1].mxu0  ;;  %v1763_v51 = vadd.f32 %v1762_v47, %v8230_v36 }
 0x1aa   : > { %v1766_v30 = vpop.f32.mrb[2].mxu0  ;;  %v1765_v41 = vadd.f32 %v1764_v34, %v8239_v49 }
 0x1ab   : > { %v1767_v53 = vadd.f32 %v1766_v30, %v8230_v36  ;;  %v1768_v54 = vpop.f32.mrb[3].mxu0 }
 0x1ac   : > { %v1769_v43 = vadd.f32 %v1768_v54, %v8239_v49  ;;  %v1398_v54 = vsub.s32 2, %v8193_v55 }
 0x1ad   : > { %v3074_v47 = vpack.c.bf16 %v1767_v53, %v1763_v51  ;;  %2031 = vmatmul.mubr.bf16.gmra.mrb[108].mxu0 %v7091_v32  ;;  %v8268_v53 = vpop.f32.mrb[0].mxu1 }
 0x1ae   : > { %v3075_v2 = vpack.c.bf16 %v1769_v43, %v1765_v41  ;;  %2040 = vmatprep.mubr.bf16.mxu0 %v8233_v39  ;;  %v8276_v45 = vpop.f32.mrb[1].mxu1  ;;  %2704 = vmatmul.mubr.bf16.gmra.mrb[108].mxu1 %v7091_v32 }
 0x1af   : > { %v3202_v51 = vmul.bf16 1056980736, %v3074_v47  ;;  %v8280_v47 = vld [vmem:[%s8015_s5 + $0xe0] sm:$0xff]   ;;  %v8284_v30 = vpop.f32.mrb[2].mxu1  ;;  %2713 = vmatprep.mubr.bf16.mxu1 %v8233_v39 }
 0x1b0   : > { %v3714_v43 = vmul.bf16 1056980736, %v3075_v2  ;;  %v1772_v34 = vpop.f32.mrb[4].mxu0  ;;  %v8288_v22 = vpop.f32.mrb[3].mxu1 }
 0x1b1   : > { %7228 = vtanh.bf16 %v3202_v51  ;;  %v1774_v28 = vpop.f32.mrb[5].mxu0  ;;  %v1773_v20 = vadd.f32 %v1772_v34, %v8230_v36  ;;  %v8302_v51 = vld [vmem:[%s8023_s20 + $0xf8] sm:$0xff]   ;;  %v8324_v24 = vpop.f32.mrb[4].mxu1 }
 0x1b2   : > { %7230 = vtanh.bf16 %v3714_v43  ;;  %v1776_v41 = vpop.f32.mrb[6].mxu0  ;;  %v1775_v2 = vadd.f32 %v1774_v28, %v8239_v49  ;;  %11638 = vst [vmem:[#allocation36_spill] sm:$0xff] %v8302_v51  ;;  %v8314_v28 = vld [vmem:[%s8023_s20 + $0x100] sm:$0xff]   ;;  %v8327_v43 = vld [vmem:[%s8023_s20 + $0x110] sm:$0xff]   ;;  %v8330_v4 = vpop.f32.mrb[5].mxu1 }
 0x1b3   : > { %v1777_v55 = vadd.f32 %v1776_v41, %v8230_v36  ;;  %v1778_v18 = vpop.f32.mrb[7].mxu0  ;;  %v8307_v41 = vrot.slane %v8213_v10, %v1398_v54  ;;  %11639 = vst [vmem:[#allocation37_spill] sm:$0xff] %v8314_v28  ;;  %11641 = vst [vmem:[#allocation39_spill] sm:$0xff] %v8327_v43 }
 0x1b4   : > { %v1779_v14 = vadd.f32 %v1778_v18, %v8239_v49  ;;  %v8317_v18 = vld [vmem:[%s8023_s20 + $0x108] sm:$0xff]  }
 0x1b5   : > { %v3076_v58 = vpack.c.bf16 %v1777_v55, %v1773_v20  ;;  %2041 = vmatmul.mubr.bf16.gmra.mrb[112].mxu0 %v8280_v47  ;;  %11640 = vst [vmem:[#allocation38_spill] sm:$0xff] %v8317_v18  ;;  %v8340_v20 = vpop.f32.mrb[6].mxu1 }
 0x1b6   : > { %v3077_v34 = vpack.c.bf16 %v1779_v14, %v1775_v2  ;;  %2050 = vmatprep.mubr.bf16.mxu0 %v8271_v12  ;;  %v8333_v14 = vld [vmem:[%s8023_s20 + $0x118] sm:$0xff]   ;;  %v8343_v0 = vpop.f32.mrb[7].mxu1  ;;  %2714 = vmatmul.mubr.bf16.gmra.mrb[112].mxu1 %v8280_v47  ;;  %v8380_v47 = vld [vmem:[%s8015_s5 + $0xf0] sm:$0xff]  }
 0x1b7   : > { %v3203_v54 = vmul.bf16 1056980736, %v3076_v58  ;;  %11642 = vst [vmem:[#allocation40_spill] sm:$0xff] %v8333_v14  ;;  %v8336_v58 = vld [vmem:[%s8015_s5 + $0xe8] sm:$0xff]   ;;  %2723 = vmatprep.mubr.bf16.mxu1 %v8271_v12 }
 0x1b8   : > { %v3715_v8 = vmul.bf16 1056980736, %v3077_v34  ;;  %v1782_v6 = vpop.f32.mrb[8].mxu0  ;;  %v8355_v34 = vld [vmem:[%s8023_s20 + $0x128] sm:$0xff]  }
 0x1b9   : > { %7232 = vtanh.bf16 %v3203_v54  ;;  %v1784_v2 = vpop.f32.mrb[9].mxu0  ;;  %v1783_v60 = vadd.f32 %v1782_v6, %v8230_v36 }
 0x1ba   : > { %v1786_v1 = vpop.f32.mrb[10].mxu0  ;;  %7234 = vtanh.bf16 %v3715_v8  ;;  %v1785_v32 = vadd.f32 %v1784_v2, %v8239_v49 }
 0x1bb   : > { %v1787_v10 = vadd.f32 %v1786_v1, %v8230_v36  ;;  %v1788_v55 = vpop.f32.mrb[11].mxu0 }
 0x1bc   : > { %v7229_v57 = vpop.eup %7228  ;;  %v1789_v63 = vadd.f32 %v1788_v55, %v8239_v49 }
 0x1bd   : > { %v7231_v39 = vpop.eup %7230  ;;  %v3078_v6 = vpack.c.bf16 %v1787_v10, %v1783_v60  ;;  %v3330_v1 = vunpack.c.l.bf16 %v7229_v57  ;;  %2051 = vmatmul.mubr.bf16.gmra.mrb[116].mxu0 %v8336_v58  ;;  %v3331_v56 = vunpack.c.h.bf16 %v7229_v57  ;;  %v2455_v60 = vpop.f32.mrb[8].mxu1 }
 0x1be   : > { %v3079_v8 = vpack.c.bf16 %v1789_v63, %v1785_v32  ;;  %2060 = vmatprep.mubr.bf16.mxu0 %v8295_v16  ;;  %v3842_v57 = vunpack.c.l.bf16 %v7231_v39  ;;  %v2438_v63 = vadd.f32 %v8276_v45, %v8310_v26  ;;  %v8375_v48 = vpop.f32.mrb[9].mxu1  ;;  %v3843_v46 = vunpack.c.h.bf16 %v7231_v39  ;;  %2724 = vmatmul.mubr.bf16.gmra.mrb[116].mxu1 %v8336_v58 }
 0x1bf   : > { %v3204_v2 = vmul.bf16 1056980736, %v3078_v6  ;;  %v3458_v54 = vmul.f32 0.5, %v3330_v1  ;;  %v3459_v52 = vmul.f32 0.5, %v3331_v56  ;;  %v2442_v6 = vadd.f32 %v8288_v22, %v8310_v26  ;;  %v8382_v10 = vpop.f32.mrb[10].mxu1  ;;  %2733 = vmatprep.mubr.bf16.mxu1 %v8295_v16 }
 0x1c0   : > { %v3716_v12 = vmul.bf16 1056980736, %v3079_v8  ;;  %v1792_v32 = vpop.f32.mrb[12].mxu0  ;;  %v2436_v8 = vadd.f32 %v8268_v53, %v8307_v41  ;;  %v2440_v45 = vadd.f32 %v8284_v30, %v8307_v41  ;;  %v3970_v39 = vmul.f32 0.5, %v3842_v57 }
 0x1c1   : > { %7236 = vtanh.bf16 %v3204_v2  ;;  %v3586_v55 = vadd.f32 0.5, %v3458_v54  ;;  %v3587_v56 = vadd.f32 0.5, %v3459_v52  ;;  %v1794_v1 = vpop.f32.mrb[13].mxu0  ;;  %v8388_v2 = vpop.f32.mrb[11].mxu1  ;;  %v1793_v22 = vadd.f32 %v1792_v32, %v8230_v36 }
 0x1c2   : > { %v1796_v44 = vpop.f32.mrb[14].mxu0  ;;  %7238 = vtanh.bf16 %v3716_v12  ;;  %v1795_v53 = vadd.f32 %v1794_v1, %v8239_v49  ;;  %v2448_v1 = vadd.f32 %v8330_v4, %v8310_v26 }
 0x1c3   : > { %v4226_v54 = vmul.f32 %v3586_v55, %v2438_v63  ;;  %v4227_v42 = vmul.f32 %v3587_v56, %v2442_v6  ;;  %v1797_v52 = vadd.f32 %v1796_v44, %v8230_v36  ;;  %v1798_v40 = vpop.f32.mrb[15].mxu0  ;;  %v3971_v44 = vmul.f32 0.5, %v3843_v46 }
 0x1c4   : > { %v7233_v35 = vpop.eup %7232  ;;  %v1799_v33 = vadd.f32 %v1798_v40, %v8239_v49  ;;  %v2446_v40 = vadd.f32 %v8324_v24, %v8307_v41  ;;  %v2450_v46 = vadd.f32 %v8340_v20, %v8307_v41  ;;  %v8414_v24 = vadd.f32 %v2455_v60, %v8307_v41 }
 0x1c5   : > { %v4354_v30 = vadd.f32 %v4226_v54, %v2436_v8  ;;  %v4355_v31 = vadd.f32 %v4227_v42, %v2440_v45  ;;  %v3080_v55 = vpack.c.bf16 %v1797_v52, %v1793_v22  ;;  %v3332_v63 = vunpack.c.l.bf16 %v7233_v35  ;;  %2061 = vmatmul.mubr.bf16.gmra.mrb[120].mxu0 %v8380_v47  ;;  %v7235_v12 = vpop.eup %7234  ;;  %v8403_v42 = vpop.f32.mrb[12].mxu1  ;;  %v8417_v22 = vld [vmem:[%s8015_s5 + $0xf8] sm:$0xff]  }
 0x1c6   : > { %v3081_v32 = vpack.c.bf16 %v1799_v33, %v1795_v53  ;;  %v3333_v6 = vunpack.c.h.bf16 %v7233_v35  ;;  %2070 = vmatprep.mubr.bf16.mxu0 %v8302_v51  ;;  %v2452_v33 = vadd.f32 %v8343_v0, %v8310_v26  ;;  %v8411_v45 = vadd.f32 0.5, %v3970_v39  ;;  %v8419_v52 = vpop.f32.mrb[13].mxu1  ;;  %2734 = vmatmul.mubr.bf16.gmra.mrb[120].mxu1 %v8380_v47 }
 0x1c7   : > { %v4482_v57 = vpack.c.bf16 %v4355_v31, %v4354_v30  ;;  %v3205_v56 = vmul.bf16 1056980736, %v3080_v55  ;;  %v3460_v58 = vmul.f32 0.5, %v3332_v63  ;;  %v8421_v4 = vadd.f32 0.5, %v3971_v44  ;;  %v8423_v30 = vpop.f32.mrb[14].mxu1  ;;  %2743 = vmatprep.mubr.bf16.mxu1 %v8302_v51 }
 0x1c8   : > { %v3461_v35 = vmul.f32 0.5, %v3333_v6  ;;  %v1802_v8 = vpop.f32.mrb[16].mxu0  ;;  %v3844_v20 = vunpack.c.l.bf16 %v7235_v12  ;;  %v3717_v39 = vmul.bf16 1056980736, %v3081_v32  ;;  %v3845_v16 = vunpack.c.h.bf16 %v7235_v12 }
 0x1c9   : > { %7240 = vtanh.bf16 %v4482_v57  ;;  %v3588_v31 = vadd.f32 0.5, %v3460_v58  ;;  %v1804_v54 = vpop.f32.mrb[17].mxu0  ;;  %v1803_v63 = vadd.f32 %v1802_v8, %v8230_v36  ;;  %v8427_v57 = vpop.f32.mrb[15].mxu1  ;;  %v2458_v12 = vadd.f32 %v8375_v48, %v8310_v26 }
 0x1ca   : > { %7242 = vtanh.bf16 %v3205_v56  ;;  %v3589_v53 = vadd.f32 0.5, %v3461_v35  ;;  %v1806_v0 = vpop.f32.mrb[18].mxu0  ;;  %v1805_v44 = vadd.f32 %v1804_v54, %v8239_v49  ;;  %v3972_v8 = vmul.f32 0.5, %v3844_v20 }
 0x1cb   : > { %v4228_v55 = vmul.f32 %v3588_v31, %v2448_v1  ;;  %v1807_v6 = vadd.f32 %v1806_v0, %v8230_v36  ;;  %v1808_v60 = vpop.f32.mrb[19].mxu0  ;;  %7244 = vtanh.bf16 %v3717_v39 }
 0x1cc   : > { %v7237_v58 = vpop.eup %7236  ;;  %v4229_v29 = vmul.f32 %v3589_v53, %v2452_v33  ;;  %v1809_v56 = vadd.f32 %v1808_v60, %v8239_v49  ;;  %v8439_v53 = vpop.f32.mrb[16].mxu1 }
 0x1cd   : > { %v4356_v35 = vadd.f32 %v4228_v55, %v2446_v40  ;;  %v3082_v27 = vpack.c.bf16 %v1807_v6, %v1803_v63  ;;  %v3334_v32 = vunpack.c.l.bf16 %v7237_v58  ;;  %2071 = vmatmul.mubr.bf16.gmra.mrb[124].mxu0 %v8417_v22  ;;  %v3335_v1 = vunpack.c.h.bf16 %v7237_v58  ;;  %v8437_v33 = vpop.eup %7238  ;;  %v8445_v20 = vpop.f32.mrb[17].mxu1  ;;  %v8448_v58 = vld [vmem:[%s8015_s5 + $0x100] sm:$0xff]  }
 0x1ce   : > { %v4357_v31 = vadd.f32 %v4229_v29, %v2450_v46  ;;  %v3083_v0 = vpack.c.bf16 %v1809_v56, %v1805_v44  ;;  %2080 = vmatprep.mubr.bf16.mxu0 %v8314_v28  ;;  %v2460_v29 = vadd.f32 %v8382_v10, %v8307_v41  ;;  %v2462_v46 = vadd.f32 %v8388_v2, %v8310_v26  ;;  %v8450_v44 = vpop.f32.mrb[18].mxu1 }
 0x1cf   : > { %v3206_v47 = vmul.bf16 1056980736, %v3082_v27  ;;  %v3462_v40 = vmul.f32 0.5, %v3334_v32  ;;  %v3463_v54 = vmul.f32 0.5, %v3335_v1  ;;  %v3973_v6 = vmul.f32 0.5, %v3845_v16  ;;  %v8459_v32 = vpop.f32.mrb[19].mxu1  ;;  %2744 = vmatmul.mubr.bf16.gmra.mrb[124].mxu1 %v8417_v22 }
 0x1d0   : > { %v4483_v55 = vpack.c.bf16 %v4357_v31, %v4356_v35  ;;  %v3718_v63 = vmul.bf16 1056980736, %v3083_v0  ;;  %v1812_v48 = vpop.f32.mrb[20].mxu0  ;;  %v8452_v56 = vadd.f32 0.5, %v3972_v8  ;;  %v3846_v35 = vunpack.c.l.bf16 %v8437_v33  ;;  %2753 = vmatprep.mubr.bf16.mxu1 %v8314_v28 }
 0x1d1   : > { %7246 = vtanh.bf16 %v3206_v47  ;;  %v3590_v39 = vadd.f32 0.5, %v3462_v40  ;;  %v3591_v60 = vadd.f32 0.5, %v3463_v54  ;;  %v1814_v27 = vpop.f32.mrb[21].mxu0  ;;  %v8457_v2 = vadd.f32 %v8403_v42, %v8307_v41 }
 0x1d2   : > { %7248 = vtanh.bf16 %v4483_v55  ;;  %v1816_v10 = vpop.f32.mrb[22].mxu0  ;;  %v3847_v16 = vunpack.c.h.bf16 %v8437_v33  ;;  %v1813_v8 = vadd.f32 %v1812_v48, %v8230_v36  ;;  %v8465_v54 = vadd.f32 %v1814_v27, %v8239_v49 }
 0x1d3   : > { %v4230_v1 = vmul.f32 %v3590_v39, %v2458_v12  ;;  %v4231_v31 = vmul.f32 %v3591_v60, %v2462_v46  ;;  %v1817_v0 = vadd.f32 %v1816_v10, %v8230_v36  ;;  %v1818_v47 = vpop.f32.mrb[23].mxu0  ;;  %7250 = vtanh.bf16 %v3718_v63 }
 0x1d4   : > { %v7241_v40 = vpop.eup %7240  ;;  %v8468_v55 = vadd.f32 %v1818_v47, %v8239_v49  ;;  %v8477_v22 = vadd.f32 0.5, %v3973_v6  ;;  %v3974_v27 = vmul.f32 0.5, %v3846_v35  ;;  %v11643_v10 = vunpack.c.l.bf16 %v8034_v38 }
 0x1d5   : > { %v7243_v42 = vpop.eup %7242  ;;  %v4610_v51 = vunpack.c.l.bf16 %v7241_v40  ;;  %v4611_v33 = vunpack.c.h.bf16 %v7241_v40  ;;  %v4358_v12 = vadd.f32 %v4230_v1, %v8414_v24  ;;  %v4359_v46 = vadd.f32 %v4231_v31, %v2460_v29  ;;  %2081 = vmatmul.mubr.bf16.gmra.mrb[128].mxu0 %v8448_v58  ;;  %v8483_v31 = vpop.f32.mrb[20].mxu1 }
 0x1d6   : > { %v3084_v63 = vpack.c.bf16 %v1817_v0, %v1813_v8  ;;  %v3085_v48 = vpack.c.bf16 %v8468_v55, %v8465_v54  ;;  %v3336_v39 = vunpack.c.l.bf16 %v7243_v42  ;;  %v3337_v60 = vunpack.c.h.bf16 %v7243_v42  ;;  %2090 = vmatprep.mubr.bf16.mxu0 %v8317_v18 }
 0x1d7   : > { %v4866_v24 = vsub.f32 %v11643_v10, %v4610_v51  ;;  %v11644_v29 = vunpack.c.h.bf16 %v8034_v38  ;;  %v4484_v0 = vpack.c.bf16 %v4359_v46, %v4358_v12  ;;  %v2468_v40 = vadd.f32 %v8419_v52, %v8310_v26  ;;  %v8494_v10 = vld [vmem:[%s8015_s5 + $0x108] sm:$0xff]   ;;  %v8496_v12 = vpop.f32.mrb[21].mxu1  ;;  %v7245_v46 = vpop.eup %7244  ;;  %2754 = vmatmul.mubr.bf16.gmra.mrb[128].mxu1 %v8448_v58 }
 0x1d8   : > { %v3207_v47 = vmul.bf16 1056980736, %v3084_v63  ;;  %v3464_v8 = vmul.f32 0.5, %v3336_v39  ;;  %v1822_v54 = vpop.f32.mrb[24].mxu0  ;;  %v2470_v35 = vadd.f32 %v8423_v30, %v8307_v41  ;;  %v2472_v38 = vadd.f32 %v8427_v57, %v8310_v26  ;;  %2763 = vmatprep.mubr.bf16.mxu1 %v8317_v18 }
 0x1d9   : > { %v4867_v1 = vsub.f32 %v11644_v29, %v4611_v33  ;;  %v4994_v55 = vmul.f32 %v4866_v24, %v8411_v45  ;;  %v1824_v42 = vpop.f32.mrb[25].mxu0  ;;  %v3975_v63 = vmul.f32 0.5, %v3847_v16  ;;  %7252 = vtanh.bf16 %v4484_v0  ;;  %v8498_v45 = vpop.f32.mrb[22].mxu1 }
 0x1da   : > { %v3592_v52 = vadd.f32 0.5, %v3464_v8  ;;  %v3465_v39 = vmul.f32 0.5, %v3337_v60  ;;  %v1826_v29 = vpop.f32.mrb[26].mxu0  ;;  %v8503_v28 = vpop.f32.mrb[23].mxu1  ;;  %7254 = vtanh.bf16 %v3207_v47  ;;  %v1825_v60 = vadd.f32 %v1824_v42, %v8239_v49 }
 0x1db   : > { %v4995_v6 = vmul.f32 %v4867_v1, %v8421_v4  ;;  %v8500_v4 = vadd.f32 0.5, %v3974_v27  ;;  %v5122_v24 = vadd.f32 %v4994_v55, %v4610_v51  ;;  %v1823_v1 = vadd.f32 %v1822_v54, %v8230_v36  ;;  %v1828_v57 = vpop.f32.mrb[27].mxu0 }
 0x1dc   : > { %v8505_v25 = vpop.eup %7246  ;;  %v4232_v23 = vmul.f32 %v3592_v52, %v2468_v40  ;;  %v3593_v16 = vadd.f32 0.5, %v3465_v39  ;;  %v3848_v8 = vunpack.c.l.bf16 %v7245_v46  ;;  %v1827_v51 = vadd.f32 %v1826_v29, %v8230_v36  ;;  %v8521_v29 = vpop.f32.mrb[24].mxu1 }
 0x1dd   : > { %v5123_v30 = vadd.f32 %v4995_v6, %v4611_v33  ;;  %v7249_v0 = vpop.eup %7248  ;;  %v1829_v33 = vadd.f32 %v1828_v57, %v8239_v49  ;;  %2091 = vmatmul.mubr.bf16.gmra.mrb[132].mxu0 %v8494_v10  ;;  %v3849_v58 = vunpack.c.h.bf16 %v7245_v46  ;;  %v3719_v42 = vmul.bf16 1056980736, %v3085_v48 }
 0x1de   : > { %v4612_v54 = vunpack.c.l.bf16 %v7249_v0  ;;  %v4613_v47 = vunpack.c.h.bf16 %v7249_v0  ;;  %v4360_v40 = vadd.f32 %v4232_v23, %v8457_v2  ;;  %v4233_v55 = vmul.f32 %v3593_v16, %v2472_v38  ;;  %2100 = vmatprep.mubr.bf16.mxu0 %v8327_v43  ;;  %v8515_v6 = vpop.eup %7250  ;;  %v8528_v0 = vpop.f32.mrb[25].mxu1 }
 0x1df   : > { %v6501_v27 = vpack.c.bf16 %v5123_v30, %v5122_v24  ;;  %v3086_v52 = vpack.c.bf16 %v1827_v51, %v1823_v1  ;;  %v3087_v39 = vpack.c.bf16 %v1829_v33, %v1825_v60  ;;  %v11645_v24 = vunpack.c.l.bf16 %v8039_v62  ;;  %v8535_v60 = vld [vmem:[%s8015_s5 + $0x110] sm:$0xff]   ;;  %2764 = vmatmul.mubr.bf16.gmra.mrb[132].mxu1 %v8494_v10 }
 0x1e0   : > { %v11646_v23 = vunpack.c.h.bf16 %v8039_v62  ;;  %v4361_v38 = vadd.f32 %v4233_v55, %v2470_v35  ;;  %v3338_v57 = vunpack.c.l.bf16 %v8505_v25  ;;  %v1832_v16 = vpop.f32.mrb[28].mxu0  ;;  %v2476_v48 = vadd.f32 %v8439_v53, %v8307_v41  ;;  %2773 = vmatprep.mubr.bf16.mxu1 %v8327_v43 }
 0x1e1   : > { %6502 = vst [vmem:[%s8518_s30] sm:$0xff] %v6501_v27   ;;  %v4868_v30 = vsub.f32 %v11645_v24, %v4612_v54  ;;  %v4103_v27 = vadd.f32 0.5, %v3975_v63  ;;  %v3720_v46 = vmul.bf16 1056980736, %v3087_v39  ;;  %v2478_v1 = vadd.f32 %v8445_v20, %v8310_v26  ;;  %v1834_v55 = vpop.f32.mrb[29].mxu0  ;;  %v8539_v24 = vpop.f32.mrb[26].mxu1 }
 0x1e2   : > { %v4869_v2 = vsub.f32 %v11646_v23, %v4613_v47  ;;  %v4485_v35 = vpack.c.bf16 %v4361_v38, %v4360_v40  ;;  %v3466_v33 = vmul.f32 0.5, %v3338_v57  ;;  %v3976_v23 = vmul.f32 0.5, %v3848_v8  ;;  %v1836_v53 = vpop.f32.mrb[30].mxu0  ;;  %v8542_v39 = vpop.f32.mrb[27].mxu1 }
 0x1e3   : > { %v4996_v51 = vmul.f32 %v4868_v30, %v8452_v56  ;;  %v3977_v63 = vmul.f32 0.5, %v3849_v58  ;;  %v3850_v18 = vunpack.c.l.bf16 %v8515_v6  ;;  %7256 = vtanh.bf16 %v3719_v42  ;;  %v1838_v56 = vpop.f32.mrb[31].mxu0  ;;  %v8555_v38 = vpop.f32.mrb[28].mxu1 }
 0x1e4   : > { %v4997_v62 = vmul.f32 %v4869_v2, %v8477_v22  ;;  %7258 = vtanh.bf16 %v4485_v35  ;;  %v3594_v19 = vadd.f32 0.5, %v3466_v33  ;;  %v7253_v22 = vpop.eup %7252  ;;  %v3851_v40 = vunpack.c.h.bf16 %v8515_v6  ;;  %v8563_v35 = vpop.f32.mrb[29].mxu1 }
 0x1e5   : > { %v5124_v20 = vadd.f32 %v4996_v51, %v4612_v54  ;;  %v3208_v30 = vmul.bf16 1056980736, %v3086_v52  ;;  %7260 = vtanh.bf16 %v3720_v46  ;;  %v3339_v8 = vunpack.c.h.bf16 %v8505_v25  ;;  %2101 = vmatmul.mubr.bf16.gmra.mrb[136].mxu0 %v8535_v60  ;;  %v8550_v10 = vpop.eup %7254 }
 0x1e6   : > { %v5125_v21 = vadd.f32 %v4997_v62, %v4613_v47  ;;  %v4614_v54 = vunpack.c.l.bf16 %v7253_v22  ;;  %v4615_v47 = vunpack.c.h.bf16 %v7253_v22  ;;  %v4234_v42 = vmul.f32 %v3594_v19, %v2478_v1  ;;  %2110 = vmatprep.mubr.bf16.mxu0 %v8333_v14  ;;  %v8571_v22 = vld [vmem:[%s8015_s5 + $0x118] sm:$0xff]  }
 0x1e7   : > { %v3467_v2 = vmul.f32 0.5, %v3339_v8  ;;  %v1833_v6 = vadd.f32 %v1832_v16, %v8230_v36  ;;  %v1837_v52 = vadd.f32 %v1836_v53, %v8230_v36  ;;  %v1839_v25 = vadd.f32 %v1838_v56, %v8239_v49  ;;  %v8566_v16 = vld [vmem:[%s8023_s20 + $0x148] sm:$0xff]   ;;  %v8573_v8 = vpop.f32.mrb[30].mxu1  ;;  %2774 = vmatmul.mubr.bf16.gmra.mrb[136].mxu1 %v8535_v60 }
 0x1e8   : > { %v6506_v58 = vpack.c.bf16 %v5125_v21, %v5124_v20  ;;  %v11647_v21 = vunpack.c.l.bf16 %v8044_v3  ;;  %v11648_v19 = vunpack.c.h.bf16 %v8044_v3  ;;  %v4362_v1 = vadd.f32 %v4234_v42, %v2476_v48  ;;  %v1842_v62 = vpop.f32.mrb[32].mxu0  ;;  %2783 = vmatprep.mubr.bf16.mxu1 %v8333_v14 }
 0x1e9   : > { %v1835_v51 = vadd.f32 %v1834_v55, %v8239_v49  ;;  %7262 = vtanh.bf16 %v3208_v30  ;;  %v2482_v33 = vadd.f32 %v8459_v32, %v8310_v26  ;;  %v3595_v53 = vadd.f32 0.5, %v3467_v2  ;;  %v1844_v56 = vpop.f32.mrb[33].mxu0 }
 0x1ea   : > { %6818 = vst [vmem:[%s8518_s30 + $0x8] sm:$0xff] %v6506_v58   ;;  %v4870_v57 = vsub.f32 %v11647_v21, %v4614_v54  ;;  %v4871_v46 = vsub.f32 %v11648_v19, %v4615_v47  ;;  %v3088_v20 = vpack.c.bf16 %v1837_v52, %v1833_v6  ;;  %v3340_v58 = vunpack.c.l.bf16 %v8550_v10  ;;  %v1846_v42 = vpop.f32.mrb[34].mxu0  ;;  %v8577_v21 = vpop.f32.mrb[31].mxu1 }
 0x1eb   : > { %v3089_v55 = vpack.c.bf16 %v1839_v25, %v1835_v51  ;;  %v2480_v30 = vadd.f32 %v8450_v44, %v8307_v41  ;;  %v4235_v32 = vmul.f32 %v3595_v53, %v2482_v33  ;;  %v1848_v6 = vpop.f32.mrb[35].mxu0  ;;  %v3978_v25 = vmul.f32 0.5, %v3850_v18 }
 0x1ec   : > { %v4998_v3 = vmul.f32 %v4870_v57, %v8500_v4  ;;  %v4999_v48 = vmul.f32 %v4871_v46, %v4103_v27  ;;  %v3209_v2 = vmul.bf16 1056980736, %v3088_v20  ;;  %v3468_v17 = vmul.f32 0.5, %v3340_v58 }
 0x1ed   : > { %v3721_v43 = vmul.bf16 1056980736, %v3089_v55  ;;  %v4104_v4 = vadd.f32 0.5, %v3976_v23  ;;  %v4105_v27 = vadd.f32 0.5, %v3977_v63  ;;  %v4363_v57 = vadd.f32 %v4235_v32, %v2480_v30  ;;  %2111 = vmatmul.mubr.bf16.gmra.mrb[140].mxu0 %v8571_v22  ;;  %v8590_v63 = vpop.f32.mrb[32].mxu1 }
 0x1ee   : > { %v5126_v52 = vadd.f32 %v4998_v3, %v4614_v54  ;;  %v5127_v19 = vadd.f32 %v4999_v48, %v4615_v47  ;;  %v7257_v46 = vpop.eup %7256  ;;  %v3979_v44 = vmul.f32 0.5, %v3851_v40  ;;  %v2488_v54 = vadd.f32 %v8496_v12, %v8310_v26  ;;  %2120 = vmatprep.mubr.bf16.mxu0 %v8349_v61  ;;  %v8597_v3 = vpop.f32.mrb[33].mxu1 }
 0x1ef   : > { %v3596_v47 = vadd.f32 0.5, %v3468_v17  ;;  %v7259_v33 = vpop.eup %7258  ;;  %v4486_v60 = vpack.c.bf16 %v4363_v57, %v4362_v1  ;;  %7264 = vtanh.bf16 %v3209_v2  ;;  %v2486_v18 = vadd.f32 %v8483_v31, %v8307_v41  ;;  %v8605_v58 = vpop.f32.mrb[34].mxu1  ;;  %2784 = vmatmul.mubr.bf16.gmra.mrb[140].mxu1 %v8571_v22 }
 0x1f0   : > { %v6511_v51 = vpack.c.bf16 %v5127_v19, %v5126_v52  ;;  %v3341_v23 = vunpack.c.h.bf16 %v8550_v10  ;;  %v8592_v53 = vpop.eup %7260  ;;  %v4616_v40 = vunpack.c.l.bf16 %v7259_v33  ;;  %v4617_v20 = vunpack.c.h.bf16 %v7259_v33  ;;  %v8595_v12 = vpop.f32.mrb[36].mxu0  ;;  %v8603_v10 = vld [vmem:[%s8015_s5 + $0x120] sm:$0xff]   ;;  %2793 = vmatprep.mubr.bf16.mxu1 %v8349_v61 }
 0x1f1   : > { %7266 = vtanh.bf16 %v3721_v43  ;;  %v4236_v17 = vmul.f32 %v3596_v47, %v2488_v54  ;;  %v3852_v1 = vunpack.c.l.bf16 %v7257_v46  ;;  %v1843_v31 = vadd.f32 %v1842_v62, %v8230_v36  ;;  %v8600_v55 = vpop.f32.mrb[37].mxu0 }
 0x1f2   : > { %6819 = vst [vmem:[%s8518_s30 + $0x10] sm:$0xff] %v6511_v51   ;;  %7268 = vtanh.bf16 %v4486_v60  ;;  %v3469_v48 = vmul.f32 0.5, %v3341_v23  ;;  %v11649_v30 = vunpack.c.l.bf16 %v8050_v5  ;;  %v11650_v43 = vunpack.c.h.bf16 %v8050_v5  ;;  %v1856_v57 = vpop.f32.mrb[38].mxu0  ;;  %v8612_v51 = vpop.f32.mrb[35].mxu1 }
 0x1f3   : > { %v4364_v52 = vadd.f32 %v4236_v17, %v2486_v18  ;;  %v1847_v19 = vadd.f32 %v1846_v42, %v8230_v36  ;;  %v3853_v54 = vunpack.c.h.bf16 %v7257_v46  ;;  %v2492_v62 = vadd.f32 %v8503_v28, %v8310_v26  ;;  %v1858_v60 = vpop.f32.mrb[39].mxu0 }
 0x1f4   : > { %v4872_v32 = vsub.f32 %v11649_v30, %v4616_v40  ;;  %v4873_v2 = vsub.f32 %v11650_v43, %v4617_v20  ;;  %v3597_v47 = vadd.f32 0.5, %v3469_v48  ;;  %v1845_v33 = vadd.f32 %v1844_v56, %v8239_v49  ;;  %v7263_v23 = vpop.eup %7262 }
 0x1f5   : > { %v3090_v15 = vpack.c.bf16 %v1847_v19, %v1843_v31  ;;  %v1849_v5 = vadd.f32 %v1848_v6, %v8239_v49  ;;  %v8619_v42 = vadd.f32 0.5, %v3978_v25  ;;  %v3854_v18 = vunpack.c.l.bf16 %v8592_v53  ;;  %2121 = vmatmul.mubr.bf16.gmra.mrb[144].mxu0 %v8603_v10 }
 0x1f6   : > { %v5000_v14 = vmul.f32 %v4872_v32, %v4104_v4  ;;  %v5001_v30 = vmul.f32 %v4873_v2, %v4105_v27  ;;  %v2490_v46 = vadd.f32 %v8498_v45, %v8307_v41  ;;  %v4237_v28 = vmul.f32 %v3597_v47, %v2492_v62  ;;  %2130 = vmatprep.mubr.bf16.mxu0 %v8355_v34  ;;  %v8633_v45 = vpop.f32.mrb[36].mxu1 }
 0x1f7   : > { %v8626_v56 = vadd.f32 0.5, %v3979_v44  ;;  %v3091_v17 = vpack.c.bf16 %v1849_v5, %v1845_v33  ;;  %v8629_v22 = vmul.f32 0.5, %v3852_v1  ;;  %v8631_v6 = vmul.f32 0.5, %v3853_v54  ;;  %v8647_v54 = vld [vmem:[%s8015_s5 + $0x128] sm:$0xff]   ;;  %2794 = vmatmul.mubr.bf16.gmra.mrb[144].mxu1 %v8603_v10 }
 0x1f8   : > { %v5128_v4 = vadd.f32 %v5000_v14, %v4616_v40  ;;  %v5129_v27 = vadd.f32 %v5001_v30, %v4617_v20  ;;  %v4365_v25 = vadd.f32 %v4237_v28, %v2490_v46  ;;  %v3342_v48 = vunpack.c.l.bf16 %v7263_v23  ;;  %v8636_v14 = vpop.f32.mrb[40].mxu0  ;;  %v8638_v40 = vpop.f32.mrb[37].mxu1  ;;  %2803 = vmatprep.mubr.bf16.mxu1 %v8355_v34 }
 0x1f9   : > { %v3855_v61 = vunpack.c.h.bf16 %v8592_v53  ;;  %v3722_v44 = vmul.bf16 1056980736, %v3091_v17  ;;  %v3343_v32 = vunpack.c.h.bf16 %v7263_v23  ;;  %v8640_v20 = vmul.f32 0.5, %v3854_v18  ;;  %v8644_v19 = vpop.f32.mrb[41].mxu0  ;;  %v8649_v62 = vpop.f32.mrb[38].mxu1 }
 0x1fa   : > { %v6516_v31 = vpack.c.bf16 %v5129_v27, %v5128_v4  ;;  %v4487_v1 = vpack.c.bf16 %v4365_v25, %v4364_v52  ;;  %v2496_v43 = vadd.f32 %v8521_v29, %v8307_v41  ;;  %v3470_v2 = vmul.f32 0.5, %v3342_v48  ;;  %v8651_v53 = vpop.eup %7264  ;;  %v1866_v30 = vpop.f32.mrb[42].mxu0 }
 0x1fb   : > { %v3210_v47 = vmul.bf16 1056980736, %v3090_v15  ;;  %v2498_v33 = vadd.f32 %v8528_v0, %v8310_v26  ;;  %v2502_v52 = vadd.f32 %v8542_v39, %v8310_v26  ;;  %v3471_v23 = vmul.f32 0.5, %v3343_v32  ;;  %v8658_v29 = vpop.f32.mrb[39].mxu1  ;;  %v1868_v15 = vpop.f32.mrb[43].mxu0 }
 0x1fc   : > { %6820 = vst [vmem:[%s8518_s30 + $0x18] sm:$0xff] %v6516_v31   ;;  %v8660_v5 = vpop.eup %7266  ;;  %7270 = vtanh.bf16 %v4487_v1  ;;  %v3598_v18 = vadd.f32 0.5, %v3470_v2  ;;  %v1853_v46 = vadd.f32 %v8595_v12, %v8230_v36  ;;  %v1857_v28 = vadd.f32 %v1856_v57, %v8230_v36 }
 0x1fd   : > { %v7269_v4 = vpop.eup %7268  ;;  %7272 = vtanh.bf16 %v3722_v44  ;;  %v3599_v0 = vadd.f32 0.5, %v3471_v23  ;;  %v1855_v39 = vadd.f32 %v8600_v55, %v8239_v49  ;;  %v1859_v27 = vadd.f32 %v1858_v60, %v8239_v49  ;;  %2131 = vmatmul.mubr.bf16.gmra.mrb[148].mxu0 %v8647_v54 }
 0x1fe   : > { %v4618_v17 = vunpack.c.l.bf16 %v7269_v4  ;;  %v4619_v25 = vunpack.c.h.bf16 %v7269_v4  ;;  %v4238_v48 = vmul.f32 %v3598_v18, %v2498_v33  ;;  %v3092_v31 = vpack.c.bf16 %v1857_v28, %v1853_v46  ;;  %2140 = vmatprep.mubr.bf16.mxu0 %v8364_v59  ;;  %v8678_v33 = vpop.f32.mrb[40].mxu1  ;;  %v8696_v4 = vld [vmem:[%s8015_s5 + $0x130] sm:$0xff]  }
 0x1ff   : > { %7274 = vtanh.bf16 %v3210_v47  ;;  %v2500_v12 = vadd.f32 %v8539_v24, %v8307_v41  ;;  %v4239_v57 = vmul.f32 %v3599_v0, %v2502_v52  ;;  %v3093_v44 = vpack.c.bf16 %v1859_v27, %v1855_v39  ;;  %v8686_v18 = vpop.f32.mrb[41].mxu1  ;;  %2804 = vmatmul.mubr.bf16.gmra.mrb[148].mxu1 %v8647_v54 }
 0x200   : > { %v11651_v55 = vunpack.c.l.bf16 %v8056_v7  ;;  %v11652_v10 = vunpack.c.h.bf16 %v8056_v7  ;;  %v4366_v1 = vadd.f32 %v4238_v48, %v2496_v43  ;;  %v3211_v2 = vmul.bf16 1056980736, %v3092_v31  ;;  %v8684_v23 = vpop.f32.mrb[44].mxu0  ;;  %v8698_v0 = vpop.f32.mrb[42].mxu1  ;;  %2813 = vmatprep.mubr.bf16.mxu1 %v8364_v59 }
 0x201   : > { %v8680_v34 = vmul.f32 0.5, %v3855_v61  ;;  %v3856_v47 = vunpack.c.l.bf16 %v8660_v5  ;;  %v4367_v24 = vadd.f32 %v4239_v57, %v2500_v12  ;;  %v3344_v52 = vunpack.c.l.bf16 %v8651_v53  ;;  %v8693_v61 = vpop.f32.mrb[45].mxu0 }
 0x202   : > { %v4874_v60 = vsub.f32 %v11651_v55, %v4618_v17  ;;  %v4875_v32 = vsub.f32 %v11652_v10, %v4619_v25  ;;  %v3857_v43 = vunpack.c.h.bf16 %v8660_v5  ;;  %v2506_v28 = vadd.f32 %v8555_v38, %v8307_v41 }
 0x203   : > { %v4488_v39 = vpack.c.bf16 %v4367_v24, %v4366_v1  ;;  %v3723_v27 = vmul.bf16 1056980736, %v3093_v44  ;;  %v2508_v48 = vadd.f32 %v8563_v35, %v8310_v26  ;;  %v3472_v31 = vmul.f32 0.5, %v3344_v52  ;;  %v8733_v24 = vld [vmem:[%s8023_s20 + $0x150] sm:$0xff]  }
 0x204   : > { %v5002_v46 = vmul.f32 %v4874_v60, %v8619_v42  ;;  %v5003_v7 = vmul.f32 %v4875_v32, %v8626_v56  ;;  %v8702_v42 = vpop.f32.mrb[46].mxu0  ;;  %v8704_v56 = vpop.f32.mrb[43].mxu1  ;;  %7276 = vtanh.bf16 %v3211_v2  ;;  %v3345_v38 = vunpack.c.h.bf16 %v8651_v53  ;;  %11653 = vst [vmem:[#allocation41_spill] sm:$0xff] %v8733_v24 }
 0x205   : > { %v8707_v57 = vpop.f32.mrb[47].mxu0  ;;  %7278 = vtanh.bf16 %v4488_v39  ;;  %v3600_v55 = vadd.f32 0.5, %v3472_v31  ;;  %v1863_v44 = vadd.f32 %v8636_v14, %v8230_v36  ;;  %v1867_v35 = vadd.f32 %v1866_v30, %v8230_v36  ;;  %2141 = vmatmul.mubr.bf16.gmra.mrb[152].mxu0 %v8696_v4  ;;  %v8730_v59 = vpop.f32.mrb[44].mxu1 }
 0x206   : > { %v5130_v5 = vadd.f32 %v5002_v46, %v4618_v17  ;;  %v5131_v12 = vadd.f32 %v5003_v7, %v4619_v25  ;;  %v3473_v10 = vmul.f32 0.5, %v3345_v38  ;;  %v8715_v17 = vadd.f32 %v8644_v19, %v8239_v49  ;;  %2150 = vmatprep.mubr.bf16.mxu0 %v8371_v50 }
 0x207   : > { %v8718_v53 = vadd.f32 %v1868_v15, %v8239_v49  ;;  %v7271_v14 = vpop.eup %7270  ;;  %7280 = vtanh.bf16 %v3723_v27  ;;  %v4240_v25 = vmul.f32 %v3600_v55, %v2508_v48  ;;  %v2512_v54 = vadd.f32 %v8577_v21, %v8310_v26  ;;  %v8739_v27 = vpop.f32.mrb[45].mxu1  ;;  %2814 = vmatmul.mubr.bf16.gmra.mrb[152].mxu1 %v8696_v4 }
 0x208   : > { %v6521_v60 = vpack.c.bf16 %v5131_v12, %v5130_v5  ;;  %v3094_v30 = vpack.c.bf16 %v1867_v35, %v1863_v44  ;;  %v8725_v32 = vpop.eup %7272  ;;  %v4620_v19 = vunpack.c.l.bf16 %v7271_v14  ;;  %v4621_v15 = vunpack.c.h.bf16 %v7271_v14  ;;  %v8737_v39 = vpop.f32.mrb[48].mxu0  ;;  %11654 = vst [vmem:[#allocation42_spill] sm:$0xff] %v8739_v27  ;;  %2823 = vmatprep.mubr.bf16.mxu1 %v8371_v50 }
 0x209   : > { %v3601_v1 = vadd.f32 0.5, %v3473_v10  ;;  %v4108_v52 = vadd.f32 0.5, %v8629_v22  ;;  %v4109_v21 = vadd.f32 0.5, %v8631_v6  ;;  %v3984_v46 = vmul.f32 0.5, %v3856_v47  ;;  %v8747_v22 = vpop.f32.mrb[49].mxu0  ;;  %v8750_v6 = vld [vmem:[%s8015_s5 + $0x138] sm:$0xff]  }
 0x20a   : > { %6821 = vst [vmem:[%s8518_s30 + $0x20] sm:$0xff] %v6521_v60   ;;  %v4368_v7 = vadd.f32 %v4240_v25, %v2506_v28  ;;  %v7275_v48 = vpop.eup %7274  ;;  %v11655_v31 = vunpack.c.l.bf16 %v8062_v9  ;;  %v11656_v12 = vunpack.c.h.bf16 %v8062_v9  ;;  %v2510_v55 = vadd.f32 %v8573_v8, %v8307_v41  ;;  %v8752_v47 = vpop.f32.mrb[46].mxu1 }
 0x20b   : > { %v4241_v44 = vmul.f32 %v3601_v1, %v2512_v54  ;;  %11657 = vst [vmem:[#allocation43_spill] sm:$0xff] %v8752_v47  ;;  %v4110_v28 = vadd.f32 0.5, %v8640_v20  ;;  %v4111_v35 = vadd.f32 0.5, %v8680_v34  ;;  %v3858_v60 = vunpack.c.l.bf16 %v8725_v32  ;;  %v8757_v10 = vpop.f32.mrb[50].mxu0  ;;  %v8759_v9 = vpop.f32.mrb[47].mxu1 }
 0x20c   : > { %v4876_v5 = vsub.f32 %v11655_v31, %v4620_v19  ;;  %v4877_v38 = vsub.f32 %v11656_v12, %v4621_v15  ;;  %11658 = vst [vmem:[#allocation44_spill] sm:$0xff] %v8759_v9  ;;  %v8761_v14 = vmul.f32 0.5, %v3857_v43  ;;  %v8763_v1 = vpop.f32.mrb[51].mxu0  ;;  %v8765_v31 = vadd.f32 0.5, %v3984_v46 }
 0x20d   : > { %v4369_v54 = vadd.f32 %v4241_v44, %v2510_v55  ;;  %v3212_v12 = vmul.bf16 1056980736, %v3094_v30  ;;  %v3346_v2 = vunpack.c.l.bf16 %v7275_v48  ;;  %v3347_v20 = vunpack.c.h.bf16 %v7275_v48  ;;  %2151 = vmatmul.mubr.bf16.gmra.mrb[156].mxu0 %v8750_v6 }
 0x20e   : > { %v5004_v8 = vmul.f32 %v4876_v5, %v4108_v52  ;;  %v5005_v25 = vmul.f32 %v4877_v38, %v4109_v21  ;;  %v2516_v9 = vadd.f32 %v8590_v63, %v8307_v41  ;;  %v3859_v52 = vunpack.c.h.bf16 %v8725_v32  ;;  %2160 = vmatprep.mubr.bf16.mxu0 %v8393_v37 }
 0x20f   : > { %v4489_v27 = vpack.c.bf16 %v4369_v54, %v4368_v7  ;;  %v8771_v43 = vpop.eup %7276  ;;  %v3986_v21 = vmul.f32 0.5, %v3858_v60  ;;  %v3474_v46 = vmul.f32 0.5, %v3346_v2  ;;  %v3475_v5 = vmul.f32 0.5, %v3347_v20  ;;  %2824 = vmatmul.mubr.bf16.gmra.mrb[156].mxu1 %v8750_v6 }
 0x210   : > { %v5132_v34 = vadd.f32 %v5004_v8, %v4620_v19  ;;  %v5133_v47 = vadd.f32 %v5005_v25, %v4621_v15  ;;  %v7279_v4 = vpop.eup %7278  ;;  %v1873_v63 = vadd.f32 %v8684_v23, %v8230_v36  ;;  %v1877_v19 = vadd.f32 %v8702_v42, %v8230_v36  ;;  %v8780_v15 = vpop.f32.mrb[48].mxu1  ;;  %2833 = vmatprep.mubr.bf16.mxu1 %v8393_v37 }
 0x211   : > { %7282 = vtanh.bf16 %v4489_v27  ;;  %v4622_v32 = vunpack.c.l.bf16 %v7279_v4  ;;  %v4623_v2 = vunpack.c.h.bf16 %v7279_v4  ;;  %v2518_v7 = vadd.f32 %v8597_v3, %v8310_v26  ;;  %v8784_v48 = vpop.f32.mrb[52].mxu0  ;;  %v8786_v50 = vpop.f32.mrb[49].mxu1 }
 0x212   : > { %v6526_v30 = vpack.c.bf16 %v5133_v47, %v5132_v34  ;;  %7284 = vtanh.bf16 %v3212_v12  ;;  %v8788_v27 = vpop.eup %7280  ;;  %v3602_v23 = vadd.f32 0.5, %v3474_v46  ;;  %v2522_v38 = vadd.f32 %v8612_v51, %v8310_v26  ;;  %v8793_v44 = vpop.f32.mrb[53].mxu0  ;;  %v8796_v47 = vld [vmem:[%s8015_s5 + $0x140] sm:$0xff]  }
 0x213   : > { %v3603_v42 = vadd.f32 0.5, %v3475_v5  ;;  %v3096_v55 = vpack.c.bf16 %v1877_v19, %v1873_v63  ;;  %v8798_v60 = vpop.f32.mrb[50].mxu1  ;;  %v11659_v3 = vunpack.c.l.bf16 %v8068_v11  ;;  %v11660_v25 = vunpack.c.h.bf16 %v8068_v11  ;;  %v8809_v34 = vpop.f32.mrb[54].mxu0 }
 0x214   : > { %6822 = vst [vmem:[%s8518_s30 + $0x28] sm:$0xff] %v6526_v30   ;;  %v11661_v12 = vpack.c.bf16 %v8718_v53, %v8715_v17  ;;  %v2520_v51 = vadd.f32 %v8605_v58, %v8307_v41  ;;  %v8811_v46 = vpop.f32.mrb[51].mxu1  ;;  %v4242_v5 = vmul.f32 %v3602_v23, %v2518_v7  ;;  %v1875_v30 = vadd.f32 %v8693_v61, %v8239_v49  ;;  %v8817_v63 = vpop.f32.mrb[55].mxu0 }
 0x215   : > { %v4878_v8 = vsub.f32 %v11659_v3, %v4622_v32  ;;  %v4879_v54 = vsub.f32 %v11660_v25, %v4623_v2  ;;  %v4243_v4 = vmul.f32 %v3603_v42, %v2522_v38  ;;  %v1879_v11 = vadd.f32 %v8707_v57, %v8239_v49  ;;  %2161 = vmatmul.mubr.bf16.gmra.mrb[160].mxu0 %v8796_v47 }
 0x216   : > { %v3724_v20 = vmul.bf16 1056980736, %v11661_v12  ;;  %v3987_v19 = vmul.f32 0.5, %v3859_v52  ;;  %v3348_v3 = vunpack.c.l.bf16 %v8771_v43  ;;  %v3860_v58 = vunpack.c.l.bf16 %v8788_v27  ;;  %2170 = vmatprep.mubr.bf16.mxu0 %v8566_v16 }
 0x217   : > { %v5006_v17 = vmul.f32 %v4878_v8, %v4110_v28  ;;  %v5007_v53 = vmul.f32 %v4879_v54, %v4111_v35  ;;  %v4370_v25 = vadd.f32 %v4242_v5, %v2516_v9  ;;  %v4371_v7 = vadd.f32 %v4243_v4, %v2520_v51  ;;  %v8828_v9 = vpop.f32.mrb[52].mxu1  ;;  %2834 = vmatmul.mubr.bf16.gmra.mrb[160].mxu1 %v8796_v47 }
 0x218   : > { %v3097_v23 = vpack.c.bf16 %v1879_v11, %v1875_v30  ;;  %v3213_v38 = vmul.bf16 1056980736, %v3096_v55  ;;  %v3476_v42 = vmul.f32 0.5, %v3348_v3  ;;  %v4113_v28 = vadd.f32 0.5, %v8761_v14  ;;  %v8833_v55 = vpop.f32.mrb[56].mxu0  ;;  %v8835_v8 = vpop.f32.mrb[53].mxu1  ;;  %2843 = vmatprep.mubr.bf16.mxu1 %v8566_v16 }
 0x219   : > { %v5134_v61 = vadd.f32 %v5006_v17, %v4622_v32  ;;  %v5135_v57 = vadd.f32 %v5007_v53, %v4623_v2  ;;  %v8826_v35 = vadd.f32 0.5, %v3986_v21  ;;  %7286 = vtanh.bf16 %v3724_v20  ;;  %v8842_v12 = vpop.f32.mrb[57].mxu0  ;;  %v8845_v20 = vld [vmem:[%s8015_s5 + $0x148] sm:$0xff]   ;;  %v8847_v51 = vpop.f32.mrb[54].mxu1 }
 0x21a   : > { %v4490_v6 = vpack.c.bf16 %v4371_v7, %v4370_v25  ;;  %v2528_v37 = vadd.f32 %v8638_v40, %v8310_v26  ;;  %v3604_v32 = vadd.f32 0.5, %v3476_v42  ;;  %v3349_v2 = vunpack.c.h.bf16 %v8771_v43  ;;  %v8852_v30 = vpop.f32.mrb[58].mxu0 }
 0x21b   : > { %v6531_v52 = vpack.c.bf16 %v5135_v57, %v5134_v61  ;;  %v8837_v14 = vadd.f32 0.5, %v3987_v19  ;;  %v3861_v21 = vunpack.c.h.bf16 %v8788_v27  ;;  %v8840_v54 = vmul.f32 0.5, %v3860_v58  ;;  %v8854_v27 = vpop.f32.mrb[55].mxu1  ;;  %v8858_v58 = vpop.f32.mrb[59].mxu0 }
 0x21c   : > { %7288 = vtanh.bf16 %v4490_v6  ;;  %v7283_v40 = vpop.eup %7282  ;;  %v2526_v43 = vadd.f32 %v8633_v45, %v8307_v41  ;;  %v4244_v5 = vmul.f32 %v3604_v32, %v2528_v37  ;;  %v3477_v4 = vmul.f32 0.5, %v3349_v2  ;;  %v8887_v32 = vpop.f32.mrb[56].mxu1 }
 0x21d   : > { %6823 = vst [vmem:[%s8518_s30 + $0x30] sm:$0xff] %v6531_v52   ;;  %7290 = vtanh.bf16 %v3213_v38  ;;  %v7285_v11 = vpop.eup %7284  ;;  %v4624_v19 = vunpack.c.l.bf16 %v7283_v40  ;;  %v4625_v17 = vunpack.c.h.bf16 %v7283_v40  ;;  %v3725_v53 = vmul.bf16 1056980736, %v3097_v23  ;;  %2171 = vmatmul.mubr.bf16.gmra.mrb[164].mxu0 %v8845_v20 }
 0x21e   : > { %v2532_v3 = vadd.f32 %v8658_v29, %v8310_v26  ;;  %v4372_v25 = vadd.f32 %v4244_v5, %v2526_v43  ;;  %v3605_v7 = vadd.f32 0.5, %v3477_v4  ;;  %v1883_v45 = vadd.f32 %v8737_v39, %v8230_v36  ;;  %2180 = vmatprep.mubr.bf16.mxu0 %v8733_v24  ;;  %v8891_v5 = vpop.f32.mrb[57].mxu1 }
 0x21f   : > { %v1887_v61 = vadd.f32 %v8757_v10, %v8230_v36  ;;  %v11662_v57 = vunpack.c.l.bf16 %v8074_v13  ;;  %v11663_v23 = vunpack.c.h.bf16 %v8074_v13  ;;  %v8871_v29 = vadd.f32 %v8747_v22, %v8239_v49  ;;  %2844 = vmatmul.mubr.bf16.gmra.mrb[164].mxu1 %v8845_v20 }
 0x220   : > { %v8875_v6 = vadd.f32 %v8763_v1, %v8239_v49  ;;  %v2530_v39 = vadd.f32 %v8649_v62, %v8307_v41  ;;  %v4245_v10 = vmul.f32 %v3605_v7, %v2532_v3  ;;  %v3350_v52 = vunpack.c.l.bf16 %v7285_v11  ;;  %v8889_v43 = vpop.f32.mrb[60].mxu0  ;;  %v8900_v3 = vld [vmem:[%s8015_s5 + $0x150] sm:$0xff]   ;;  %2853 = vmatprep.mubr.bf16.mxu1 %v8733_v24 }
 0x221   : > { %v4880_v38 = vsub.f32 %v11662_v57, %v4624_v19  ;;  %v4881_v42 = vsub.f32 %v11663_v23, %v4625_v17  ;;  %v3098_v47 = vpack.c.bf16 %v1887_v61, %v1883_v45  ;;  %v8882_v13 = vmul.f32 0.5, %v3861_v21 }
 0x222   : > { %v3099_v1 = vpack.c.bf16 %v8875_v6, %v8871_v29  ;;  %7292 = vtanh.bf16 %v3725_v53  ;;  %v4373_v62 = vadd.f32 %v4245_v10, %v2530_v39  ;;  %v3478_v2 = vmul.f32 0.5, %v3350_v52  ;;  %v8902_v53 = vpop.f32.mrb[58].mxu1 }
 0x223   : > { %v5008_v22 = vmul.f32 %v4880_v38, %v8765_v31  ;;  %v5009_v37 = vmul.f32 %v4881_v42, %v4113_v28  ;;  %v3351_v40 = vunpack.c.h.bf16 %v7285_v11  ;;  %v2536_v4 = vadd.f32 %v8678_v33, %v8307_v41  ;;  %v8897_v28 = vpop.f32.mrb[61].mxu0  ;;  %v8908_v57 = vpop.f32.mrb[59].mxu1 }
 0x224   : > { %v2538_v31 = vadd.f32 %v8686_v18, %v8310_v26  ;;  %v8904_v7 = vpop.eup %7286  ;;  %v4491_v11 = vpack.c.bf16 %v4373_v62, %v4372_v25  ;;  %v3214_v45 = vmul.bf16 1056980736, %v3098_v47  ;;  %v3606_v61 = vadd.f32 0.5, %v3478_v2  ;;  %v11664_v2 = vld [vmem:[#allocation13_spill] sm:$0xff] }
 0x225   : > { %v5136_v16 = vadd.f32 %v5008_v22, %v4624_v19  ;;  %v5137_v21 = vadd.f32 %v5009_v37, %v4625_v17  ;;  %v3479_v19 = vmul.f32 0.5, %v3351_v40  ;;  %v8906_v17 = vpop.f32.mrb[62].mxu0  ;;  %v2542_v18 = vadd.f32 %v8704_v56, %v8310_v26  ;;  %2181 = vmatmul.mubr.bf16.gmra.mrb[168].mxu0 %v8900_v3 }
 0x226   : > { %v1893_v38 = vadd.f32 %v8784_v48, %v8230_v36  ;;  %v1897_v23 = vadd.f32 %v8809_v34, %v8230_v36  ;;  %v8916_v42 = vpop.f32.mrb[63].mxu0  ;;  %7294 = vtanh.bf16 %v4491_v11  ;;  %v4246_v39 = vmul.f32 %v3606_v61, %v2538_v31  ;;  %v8939_v11 = vpop.f32.mrb[60].mxu1 }
 0x227   : > { %v6536_v33 = vpack.c.bf16 %v5137_v21, %v5136_v16  ;;  %v7289_v25 = vpop.eup %7288  ;;  %v3607_v10 = vadd.f32 0.5, %v3479_v19  ;;  %v8920_v47 = vadd.f32 %v8793_v44, %v8239_v49  ;;  %v8926_v34 = vadd.f32 %v8817_v63, %v8239_v49  ;;  %2854 = vmatmul.mubr.bf16.gmra.mrb[168].mxu1 %v8900_v3 }
 0x228   : > { %v7291_v52 = vpop.eup %7290  ;;  %v4626_v56 = vunpack.c.l.bf16 %v7289_v25  ;;  %v4627_v48 = vunpack.c.h.bf16 %v7289_v25  ;;  %v3100_v22 = vpack.c.bf16 %v1897_v23, %v1893_v38  ;;  %7296 = vtanh.bf16 %v3214_v45  ;;  %v8942_v45 = vld [vmem:[%s8023_s20 + $0x118] sm:$0xff]   ;;  %v8952_v38 = vpop.f32.mrb[61].mxu1  ;;  %v8958_v25 = vld [vmem:[%s8023_s20 + $0x128] sm:$0xff]  }
 0x229   : > { %6824 = vst [vmem:[%s8518_s30 + $0x38] sm:$0xff] %v6536_v33   ;;  %v4374_v44 = vadd.f32 %v4246_v39, %v2536_v4  ;;  %v2540_v20 = vadd.f32 %v8698_v0, %v8307_v41  ;;  %v4247_v37 = vmul.f32 %v3607_v10, %v2542_v18  ;;  %v3862_v62 = vunpack.c.l.bf16 %v8904_v7  ;;  %11667 = vst [vmem:[#allocation13_spill] sm:$0xff] %v8942_v45  ;;  %v8946_v0 = vld [vmem:[%s8023_s20 + $0x120] sm:$0xff]   ;;  %v8950_v18 = vpop.f32.mrb[64].mxu0 }
 0x22a   : > { %v11665_v40 = vunpack.c.l.bf16 %v11664_v2  ;;  %v11666_v21 = vunpack.c.h.bf16 %v11664_v2  ;;  %11668 = vst [vmem:[#allocation45_spill] sm:$0xff] %v8946_v0  ;;  %v8955_v23 = vadd.f32 0.5, %v8840_v54  ;;  %11669 = vst [vmem:[#allocation46_spill] sm:$0xff] %v8958_v25  ;;  %v3352_v61 = vunpack.c.l.bf16 %v7291_v52 }
 0x22b   : > { %v4375_v33 = vadd.f32 %v4247_v37, %v2540_v20  ;;  %v4117_v20 = vadd.f32 0.5, %v8882_v13  ;;  %v3863_v37 = vunpack.c.h.bf16 %v8904_v7  ;;  %v3990_v39 = vmul.f32 0.5, %v3862_v62 }
 0x22c   : > { %v4882_v16 = vsub.f32 %v11665_v40, %v4626_v56  ;;  %v4883_v63 = vsub.f32 %v11666_v21, %v4627_v48  ;;  %v8963_v40 = vpop.f32.mrb[65].mxu0  ;;  %v8965_v21 = vpop.f32.mrb[62].mxu1  ;;  %v3726_v13 = vmul.bf16 1056980736, %v3099_v1  ;;  %v3480_v7 = vmul.f32 0.5, %v3352_v61 }
 0x22d   : > { %11670 = vst [vmem:[#allocation47_spill] sm:$0xff] %v8965_v21  ;;  %v4492_v19 = vpack.c.bf16 %v4375_v33, %v4374_v44  ;;  %v8969_v54 = vpop.f32.mrb[66].mxu0  ;;  %v8971_v4 = vpop.f32.mrb[63].mxu1  ;;  %v3353_v44 = vunpack.c.h.bf16 %v7291_v52  ;;  %v2546_v0 = vadd.f32 %v8730_v59, %v8307_v41  ;;  %v8991_v1 = vadd.f32 %v8858_v58, %v8239_v49  ;;  %v11672_v59 = vld [vmem:[#allocation44_spill] sm:$0xff] }
 0x22e   : > { %v5010_v10 = vmul.f32 %v4882_v16, %v8826_v35  ;;  %v5011_v2 = vmul.f32 %v4883_v63, %v8837_v14  ;;  %v8973_v31 = vpop.eup %7292  ;;  %v3215_v14 = vmul.bf16 1056980736, %v3100_v22  ;;  %v8975_v63 = vpop.f32.mrb[67].mxu0  ;;  %v11671_v22 = vld [vmem:[#allocation42_spill] sm:$0xff]  ;;  %v3608_v29 = vadd.f32 0.5, %v3480_v7 }
 0x22f   : > { %7298 = vtanh.bf16 %v4492_v19  ;;  %v2548_v62 = vadd.f32 %v11671_v22, %v8310_v26  ;;  %v3481_v6 = vmul.f32 0.5, %v3353_v44  ;;  %v2552_v52 = vadd.f32 %v11672_v59, %v8310_v26  ;;  %v9000_v61 = vpop.f32.mrb[64].mxu1  ;;  %v11675_v44 = vld [vmem:[#allocation43_spill] sm:$0xff]  ;;  %v11677_v22 = vld [vmem:[#allocation14_spill] sm:$0xff] }
 0x230   : > { %v5138_v35 = vadd.f32 %v5010_v10, %v4626_v56  ;;  %v5139_v16 = vadd.f32 %v5011_v2, %v4627_v48  ;;  %v1903_v56 = vadd.f32 %v8833_v55, %v8230_v36  ;;  %v1907_v48 = vadd.f32 %v8852_v30, %v8230_v36  ;;  %11673 = vst [vmem:[#allocation42_spill] sm:$0xff] %v9000_v61  ;;  %v9004_v58 = vpop.f32.mrb[65].mxu1 }
 0x231   : > { %v7295_v3 = vpop.eup %7294  ;;  %7300 = vtanh.bf16 %v3215_v14  ;;  %v8998_v55 = vadd.f32 %v8842_v12, %v8239_v49  ;;  %v4248_v2 = vmul.f32 %v3608_v29, %v2548_v62  ;;  %11674 = vst [vmem:[#allocation44_spill] sm:$0xff] %v9004_v58  ;;  %v3991_v14 = vmul.f32 0.5, %v3863_v37 }
 0x232   : > { %v6541_v33 = vpack.c.bf16 %v5139_v16, %v5138_v35  ;;  %v3102_v30 = vpack.c.bf16 %v1907_v48, %v1903_v56  ;;  %v4628_v19 = vunpack.c.l.bf16 %v7295_v3  ;;  %v4629_v10 = vunpack.c.h.bf16 %v7295_v3  ;;  %v9002_v16 = vpop.f32.mrb[68].mxu0  ;;  %v9012_v48 = vpop.f32.mrb[66].mxu1 }
 0x233   : > { %v3609_v35 = vadd.f32 0.5, %v3481_v6  ;;  %v7297_v7 = vpop.eup %7296  ;;  %7302 = vtanh.bf16 %v3726_v13  ;;  %v3103_v12 = vpack.c.bf16 %v8991_v1, %v8998_v55  ;;  %v9010_v56 = vpop.f32.mrb[69].mxu0  ;;  %11676 = vst [vmem:[#allocation43_spill] sm:$0xff] %v9012_v48  ;;  %v11678_v62 = vunpack.c.l.bf16 %v11677_v22 }
 0x234   : > { %6825 = vst [vmem:[%s8518_s30 + $0x40] sm:$0xff] %v6541_v33   ;;  %v2550_v33 = vadd.f32 %v11675_v44, %v8307_v41  ;;  %v11679_v6 = vunpack.c.h.bf16 %v11677_v22  ;;  %v4376_v59 = vadd.f32 %v4248_v2, %v2546_v0  ;;  %v9018_v13 = vpop.f32.mrb[70].mxu0  ;;  %v9020_v45 = vpop.f32.mrb[67].mxu1  ;;  %v3864_v1 = vunpack.c.l.bf16 %v8973_v31 }
 0x235   : > { %v4884_v29 = vsub.f32 %v11678_v62, %v4628_v19  ;;  %v4249_v37 = vmul.f32 %v3609_v35, %v2552_v52  ;;  %11680 = vst [vmem:[#allocation14_spill] sm:$0xff] %v9020_v45  ;;  %v3865_v55 = vunpack.c.h.bf16 %v8973_v31  ;;  %v11681_v48 = vpack.c.bf16 %v8926_v34, %v8920_v47  ;;  %v9028_v61 = vpop.f32.mrb[71].mxu0  ;;  %v9032_v45 = vld [vmem:[%s8023_s20 + $0x130] sm:$0xff]  }
 0x236   : > { %v4885_v3 = vsub.f32 %v11679_v6, %v4629_v10  ;;  %v3354_v2 = vunpack.c.l.bf16 %v7297_v7  ;;  %v4118_v35 = vadd.f32 0.5, %v3990_v39  ;;  %v4119_v6 = vadd.f32 0.5, %v3991_v14  ;;  %11682 = vst [vmem:[#allocation48_spill] sm:$0xff] %v9032_v45 }
 0x237   : > { %v3727_v62 = vmul.bf16 1056980736, %v11681_v48  ;;  %v5012_v22 = vmul.f32 %v4884_v29, %v8955_v23  ;;  %v4377_v52 = vadd.f32 %v4249_v37, %v2550_v33  ;;  %v3216_v25 = vmul.bf16 1056980736, %v3102_v30 }
 0x238   : > { %v5013_v0 = vmul.f32 %v4885_v3, %v4117_v20  ;;  %v3482_v21 = vmul.f32 0.5, %v3354_v2  ;;  %v3992_v34 = vmul.f32 0.5, %v3864_v1  ;;  %v9035_v48 = vmul.f32 0.5, %v3865_v55  ;;  %v9037_v20 = vpop.f32.mrb[68].mxu1  ;;  %v9039_v29 = vpop.f32.mrb[72].mxu0 }
 0x239   : > { %v5140_v58 = vadd.f32 %v5012_v22, %v4628_v19  ;;  %v4493_v24 = vpack.c.bf16 %v4377_v52, %v4376_v59  ;;  %7304 = vtanh.bf16 %v3727_v62  ;;  %v3355_v23 = vunpack.c.h.bf16 %v7297_v7  ;;  %v9041_v30 = vpop.f32.mrb[69].mxu1  ;;  %v9047_v37 = vpop.f32.mrb[73].mxu0 }
 0x23a   : > { %v5141_v31 = vadd.f32 %v5013_v0, %v4629_v10  ;;  %v7299_v47 = vpop.eup %7298  ;;  %v2556_v19 = vadd.f32 %v8780_v15, %v8307_v41  ;;  %v2558_v10 = vadd.f32 %v8786_v50, %v8310_v26  ;;  %v3610_v3 = vadd.f32 0.5, %v3482_v21  ;;  %v9049_v7 = vpop.f32.mrb[70].mxu1 }
 0x23b   : > { %v4630_v14 = vunpack.c.l.bf16 %v7299_v47  ;;  %v4631_v33 = vunpack.c.h.bf16 %v7299_v47  ;;  %7306 = vtanh.bf16 %v4493_v24  ;;  %v3483_v59 = vmul.f32 0.5, %v3355_v23  ;;  %v11683_v24 = vld [vmem:[#allocation15_spill] sm:$0xff]  ;;  %v9058_v0 = vpop.f32.mrb[74].mxu0  ;;  %v9060_v50 = vpop.f32.mrb[71].mxu1 }
 0x23c   : > { %v6546_v39 = vpack.c.bf16 %v5141_v31, %v5140_v58  ;;  %v9051_v58 = vpop.eup %7300  ;;  %v11684_v1 = vunpack.c.l.bf16 %v11683_v24  ;;  %v11685_v62 = vunpack.c.h.bf16 %v11683_v24  ;;  %7308 = vtanh.bf16 %v3216_v25  ;;  %v9066_v47 = vpop.f32.mrb[75].mxu0 }
 0x23d   : > { %v3728_v15 = vmul.bf16 1056980736, %v3103_v12  ;;  %v4250_v21 = vmul.f32 %v3610_v3, %v2558_v10  ;;  %v2560_v52 = vadd.f32 %v8798_v60, %v8307_v41  ;;  %v2562_v2 = vadd.f32 %v8811_v46, %v8310_v26 }
 0x23e   : > { %6826 = vst [vmem:[%s8518_s30 + $0x48] sm:$0xff] %v6546_v39   ;;  %v4886_v55 = vsub.f32 %v11684_v1, %v4630_v14  ;;  %v4887_v22 = vsub.f32 %v11685_v62, %v4631_v33  ;;  %v3611_v31 = vadd.f32 0.5, %v3483_v59  ;;  %v7303_v23 = vpop.eup %7302  ;;  %v1913_v25 = vadd.f32 %v8889_v43, %v8230_v36 }
 0x23f   : > { %v1917_v12 = vadd.f32 %v8906_v17, %v8230_v36  ;;  %v4378_v10 = vadd.f32 %v4250_v21, %v2556_v19  ;;  %v9074_v60 = vadd.f32 %v8897_v28, %v8239_v49  ;;  %v9078_v46 = vadd.f32 %v8916_v42, %v8239_v49  ;;  %v9083_v19 = vpop.f32.mrb[72].mxu1 }
 0x240   : > { %v5014_v39 = vmul.f32 %v4886_v55, %v4118_v35  ;;  %v5015_v24 = vmul.f32 %v4887_v22, %v4119_v6  ;;  %v4251_v3 = vmul.f32 %v3611_v31, %v2562_v2  ;;  %v3356_v1 = vunpack.c.l.bf16 %v9051_v58  ;;  %v9087_v22 = vld [vmem:[%s8023_s20 + $0x138] sm:$0xff]   ;;  %v9090_v21 = vpop.f32.mrb[76].mxu0  ;;  %v9092_v2 = vpop.f32.mrb[73].mxu1 }
 0x241   : > { %v3104_v6 = vpack.c.bf16 %v1917_v12, %v1913_v25  ;;  %v3866_v43 = vunpack.c.l.bf16 %v7303_v23  ;;  %v3867_v55 = vunpack.c.h.bf16 %v7303_v23  ;;  %v3105_v17 = vpack.c.bf16 %v9078_v46, %v9074_v60  ;;  %11686 = vst [vmem:[#allocation15_spill] sm:$0xff] %v9087_v22  ;;  %v9097_v25 = vpop.f32.mrb[74].mxu1 }
 0x242   : > { %v5142_v59 = vadd.f32 %v5014_v39, %v4630_v14  ;;  %v5143_v35 = vadd.f32 %v5015_v24, %v4631_v33  ;;  %v4379_v62 = vadd.f32 %v4251_v3, %v2560_v52  ;;  %v3484_v33 = vmul.f32 0.5, %v3356_v1  ;;  %v9095_v24 = vpop.f32.mrb[77].mxu0  ;;  %11687 = vst [vmem:[#allocation49_spill] sm:$0xff] %v9097_v25 }
 0x243   : > { %v4120_v31 = vadd.f32 0.5, %v3992_v34  ;;  %v3217_v39 = vmul.bf16 1056980736, %v3104_v6  ;;  %7310 = vtanh.bf16 %v3728_v15  ;;  %v2568_v3 = vadd.f32 %v8835_v8, %v8310_v26  ;;  %v9107_v34 = vpop.f32.mrb[75].mxu1 }
 0x244   : > { %v6551_v14 = vpack.c.bf16 %v5143_v35, %v5142_v59  ;;  %v4494_v23 = vpack.c.bf16 %v4379_v62, %v4378_v10  ;;  %v9099_v12 = vpop.eup %7304  ;;  %v3612_v60 = vadd.f32 0.5, %v3484_v33  ;;  %v3357_v46 = vunpack.c.h.bf16 %v9051_v58  ;;  %v9105_v59 = vpop.f32.mrb[78].mxu0 }
 0x245   : > { %v4121_v35 = vadd.f32 0.5, %v9035_v48  ;;  %v3994_v6 = vmul.f32 0.5, %v3866_v43  ;;  %v3995_v1 = vmul.f32 0.5, %v3867_v55  ;;  %v9110_v62 = vpop.f32.mrb[79].mxu0  ;;  %v2566_v8 = vadd.f32 %v8828_v9, %v8307_v41  ;;  %v11688_v43 = vld [vmem:[#allocation16_spill] sm:$0xff] }
 0x246   : > { %6827 = vst [vmem:[%s8518_s30 + $0x50] sm:$0xff] %v6551_v14   ;;  %v7307_v10 = vpop.eup %7306  ;;  %7312 = vtanh.bf16 %v4494_v23  ;;  %v4252_v33 = vmul.f32 %v3612_v60, %v2568_v3  ;;  %v2570_v52 = vadd.f32 %v8847_v51, %v8307_v41  ;;  %v3485_v42 = vmul.f32 0.5, %v3357_v46  ;;  %v9125_v3 = vld [vmem:[%s8023_s20 + $0x158] sm:$0xff]   ;;  %v9137_v46 = vpop.f32.mrb[76].mxu1 }
 0x247   : > { %v4632_v15 = vunpack.c.l.bf16 %v7307_v10  ;;  %v4633_v14 = vunpack.c.h.bf16 %v7307_v10  ;;  %v7309_v58 = vpop.eup %7308  ;;  %7314 = vtanh.bf16 %v3217_v39  ;;  %v1923_v48 = vadd.f32 %v8950_v18, %v8230_v36  ;;  %11691 = vst [vmem:[#allocation16_spill] sm:$0xff] %v9125_v3  ;;  %11692 = vst [vmem:[#allocation50_spill] sm:$0xff] %v9137_v46  ;;  %v9142_v22 = vpop.f32.mrb[77].mxu1  ;;  %2190 = vmatprep.mubr.bf16.mxu0 %v9125_v3  ;;  %2863 = vmatprep.mubr.bf16.mxu1 %v9125_v3 }
 0x248   : > { %v11689_v55 = vunpack.c.l.bf16 %v11688_v43  ;;  %v11690_v28 = vunpack.c.h.bf16 %v11688_v43  ;;  %v4380_v44 = vadd.f32 %v4252_v33, %v2566_v8  ;;  %v1927_v9 = vadd.f32 %v8969_v54, %v8230_v36  ;;  %v7123_v43 = vld [vmem:[%s8015_s5 + $0x158] sm:$0xff]  }
 0x249   : > { %v2572_v51 = vadd.f32 %v8854_v27, %v8310_v26  ;;  %v3613_v39 = vadd.f32 0.5, %v3485_v42  ;;  %v9131_v60 = vadd.f32 %v8963_v40, %v8239_v49  ;;  %v9135_v18 = vadd.f32 %v8975_v63, %v8239_v49  ;;  %v9148_v63 = vpop.f32.mrb[78].mxu1  ;;  %2191 = vmatmul.mubr.bf16.gmra.mrb[172].mxu0 %v7123_v43  ;;  %2864 = vmatmul.mubr.bf16.gmra.mrb[172].mxu1 %v7123_v43 }
 0x24a   : > { %v4888_v23 = vsub.f32 %v11689_v55, %v4632_v15  ;;  %v4889_v10 = vsub.f32 %v11690_v28, %v4633_v14  ;;  %v3106_v33 = vpack.c.bf16 %v1927_v9, %v1923_v48  ;;  %v3358_v54 = vunpack.c.l.bf16 %v7309_v58  ;;  %v9140_v55 = vpop.f32.mrb[80].mxu0  ;;  %11693 = vst [vmem:[#allocation51_spill] sm:$0xff] %v9148_v63 }
 0x24b   : > { %v3729_v27 = vmul.bf16 1056980736, %v3105_v17  ;;  %v4253_v42 = vmul.f32 %v3613_v39, %v2572_v51  ;;  %v3107_v40 = vpack.c.bf16 %v9135_v18, %v9131_v60  ;;  %v9146_v45 = vpop.f32.mrb[81].mxu0  ;;  %v4123_v9 = vadd.f32 0.5, %v3995_v1 }
 0x24c   : > { %v5016_v28 = vmul.f32 %v4888_v23, %v4120_v31  ;;  %v5017_v8 = vmul.f32 %v4889_v10, %v4121_v35  ;;  %v3218_v31 = vmul.bf16 1056980736, %v3106_v33  ;;  %v3486_v35 = vmul.f32 0.5, %v3358_v54  ;;  %v9150_v48 = vpop.f32.mrb[82].mxu0  ;;  %v9152_v23 = vpop.f32.mrb[79].mxu1 }
 0x24d   : > { %v4122_v10 = vadd.f32 0.5, %v3994_v6  ;;  %v3868_v17 = vunpack.c.l.bf16 %v9099_v12  ;;  %v4381_v51 = vadd.f32 %v4253_v42, %v2570_v52  ;;  %v9157_v39 = vpop.f32.mrb[83].mxu0  ;;  %v2578_v60 = vadd.f32 %v8891_v5, %v8310_v26  ;;  %v9171_v43 = vpop.f32.mrb[80].mxu1 }
 0x24e   : > { %v5144_v25 = vadd.f32 %v5016_v28, %v4632_v15  ;;  %v5145_v46 = vadd.f32 %v5017_v8, %v4633_v14  ;;  %v3869_v15 = vunpack.c.h.bf16 %v9099_v12  ;;  %v3614_v18 = vadd.f32 0.5, %v3486_v35  ;;  %v9162_v6 = vpop.eup %7310  ;;  %11694 = vst [vmem:[#allocation52_spill] sm:$0xff] %v9171_v43 }
 0x24f   : > { %7316 = vtanh.bf16 %v3729_v27  ;;  %v4495_v52 = vpack.c.bf16 %v4381_v51, %v4380_v44  ;;  %v2576_v1 = vadd.f32 %v8887_v32, %v8307_v41  ;;  %v3359_v28 = vunpack.c.h.bf16 %v7309_v58 }
 0x250   : > { %v6556_v14 = vpack.c.bf16 %v5145_v46, %v5144_v25  ;;  %7318 = vtanh.bf16 %v3218_v31  ;;  %v4254_v33 = vmul.f32 %v3614_v18, %v2578_v60  ;;  %v1933_v25 = vadd.f32 %v9002_v16, %v8230_v36  ;;  %v9181_v42 = vpop.f32.mrb[84].mxu0  ;;  %v11696_v31 = vld [vmem:[#allocation17_spill] sm:$0xff] }
 0x251   : > { %v7313_v8 = vpop.eup %7312  ;;  %v1937_v5 = vadd.f32 %v9018_v13, %v8230_v36  ;;  %7320 = vtanh.bf16 %v4495_v52  ;;  %v3487_v54 = vmul.f32 0.5, %v3359_v28  ;;  %v2582_v58 = vadd.f32 %v8908_v57, %v8310_v26  ;;  %v9183_v13 = vpop.f32.mrb[81].mxu1 }
 0x252   : > { %6828 = vst [vmem:[%s8518_s30 + $0x58] sm:$0xff] %v6556_v14   ;;  %v4634_v12 = vunpack.c.l.bf16 %v7313_v8  ;;  %v4635_v46 = vunpack.c.h.bf16 %v7313_v8  ;;  %v9173_v44 = vpop.eup %7314  ;;  %v4382_v32 = vadd.f32 %v4254_v33, %v2576_v1  ;;  %v9179_v27 = vadd.f32 %v9010_v56, %v8239_v49  ;;  %11695 = vst [vmem:[#allocation53_spill] sm:$0xff] %v9183_v13  ;;  %v9193_v56 = vpop.f32.mrb[85].mxu0 }
 0x253   : > { %v3108_v16 = vpack.c.bf16 %v1937_v5, %v1933_v25  ;;  %v11697_v35 = vunpack.c.l.bf16 %v11696_v31  ;;  %v11698_v14 = vunpack.c.h.bf16 %v11696_v31  ;;  %v3615_v18 = vadd.f32 0.5, %v3487_v54  ;;  %v9195_v52 = vpop.f32.mrb[82].mxu1  ;;  %v9199_v25 = vpop.f32.mrb[86].mxu0 }
 0x254   : > { %v9191_v57 = vadd.f32 %v9028_v61, %v8239_v49  ;;  %11699 = vst [vmem:[#allocation17_spill] sm:$0xff] %v9195_v52  ;;  %v3996_v1 = vmul.f32 0.5, %v3868_v17  ;;  %v3997_v28 = vmul.f32 0.5, %v3869_v15  ;;  %v3730_v8 = vmul.bf16 1056980736, %v3107_v40  ;;  %v9201_v5 = vpop.f32.mrb[83].mxu1 }
 0x255   : > { %v4890_v51 = vsub.f32 %v11697_v35, %v4634_v12  ;;  %v4891_v60 = vsub.f32 %v11698_v14, %v4635_v46  ;;  %v2580_v33 = vadd.f32 %v8902_v53, %v8307_v41  ;;  %11700 = vst [vmem:[#allocation54_spill] sm:$0xff] %v9201_v5  ;;  %v4255_v61 = vmul.f32 %v3615_v18, %v2582_v58  ;;  %v9206_v14 = vld [vmem:[%s8023_s20 + $0x160] sm:$0xff]   ;;  %v9208_v17 = vpop.f32.mrb[87].mxu0  ;;  %v9219_v18 = vld [vmem:[%s8023_s20 + $0x148] sm:$0xff]  }
 0x256   : > { %v3109_v35 = vpack.c.bf16 %v9191_v57, %v9179_v27  ;;  %11701 = vst [vmem:[#allocation55_spill] sm:$0xff] %v9206_v14  ;;  %v9211_v40 = vld [vmem:[%s8023_s20 + $0x140] sm:$0xff]   ;;  %v3219_v52 = vmul.bf16 1056980736, %v3108_v16  ;;  %v3360_v5 = vunpack.c.l.bf16 %v9173_v44  ;;  %v4124_v27 = vadd.f32 0.5, %v3996_v1  ;;  %11703 = vst [vmem:[#allocation57_spill] sm:$0xff] %v9219_v18  ;;  %2200 = vmatprep.mubr.bf16.mxu0 %v9206_v14  ;;  %2873 = vmatprep.mubr.bf16.mxu1 %v9206_v14 }
 0x257   : > { %v5018_v54 = vmul.f32 %v4890_v51, %v4122_v10  ;;  %v5019_v31 = vmul.f32 %v4891_v60, %v4123_v9  ;;  %11702 = vst [vmem:[#allocation56_spill] sm:$0xff] %v9211_v40  ;;  %v3870_v10 = vunpack.c.l.bf16 %v9162_v6  ;;  %v4383_v51 = vadd.f32 %v4255_v61, %v2580_v33  ;;  %v7125_v60 = vld [vmem:[%s8015_s5 + $0x160] sm:$0xff]   ;;  %v9222_v16 = vpop.f32.mrb[84].mxu1 }
 0x258   : > { %v3488_v43 = vmul.f32 0.5, %v3360_v5  ;;  %v4125_v13 = vadd.f32 0.5, %v3997_v28  ;;  %7322 = vtanh.bf16 %v3730_v8  ;;  %11704 = vst [vmem:[#allocation58_spill] sm:$0xff] %v9222_v16  ;;  %v3361_v1 = vunpack.c.h.bf16 %v9173_v44  ;;  %v9231_v28 = vpop.f32.mrb[88].mxu0  ;;  %v9233_v33 = vpop.f32.mrb[85].mxu1  ;;  %2201 = vmatmul.mubr.bf16.gmra.mrb[176].mxu0 %v7125_v60  ;;  %2874 = vmatmul.mubr.bf16.gmra.mrb[176].mxu1 %v7125_v60 }
 0x259   : > { %v5146_v9 = vadd.f32 %v5018_v54, %v4634_v12  ;;  %v5147_v58 = vadd.f32 %v5019_v31, %v4635_v46  ;;  %v4496_v15 = vpack.c.bf16 %v4383_v51, %v4382_v32  ;;  %7324 = vtanh.bf16 %v3219_v52  ;;  %11705 = vst [vmem:[#allocation59_spill] sm:$0xff] %v9233_v33  ;;  %v9243_v44 = vpop.f32.mrb[86].mxu1 }
 0x25a   : > { %v9224_v53 = vpop.eup %7316  ;;  %v2588_v12 = vadd.f32 %v8952_v38, %v8310_v26  ;;  %v3616_v46 = vadd.f32 0.5, %v3488_v43  ;;  %v3871_v8 = vunpack.c.h.bf16 %v9162_v6  ;;  %v3998_v5 = vmul.f32 0.5, %v3870_v10  ;;  %v9241_v43 = vpop.f32.mrb[89].mxu0  ;;  %11706 = vst [vmem:[#allocation60_spill] sm:$0xff] %v9243_v44 }
 0x25b   : > { %v6561_v63 = vpack.c.bf16 %v5147_v58, %v5146_v9  ;;  %v9235_v32 = vpop.eup %7318  ;;  %7326 = vtanh.bf16 %v4496_v15  ;;  %v2586_v38 = vadd.f32 %v8939_v11, %v8307_v41  ;;  %v3489_v31 = vmul.f32 0.5, %v3361_v1  ;;  %v9249_v6 = vpop.f32.mrb[90].mxu0 }
 0x25c   : > { %v7321_v52 = vpop.eup %7320  ;;  %v4256_v54 = vmul.f32 %v3616_v46, %v2588_v12  ;;  %v1943_v61 = vadd.f32 %v9039_v29, %v8230_v36  ;;  %v9251_v15 = vpop.f32.mrb[87].mxu1  ;;  %v2592_v9 = vadd.f32 %v8971_v4, %v8310_v26  ;;  %v9257_v58 = vadd.f32 %v9047_v37, %v8239_v49  ;;  %v9266_v46 = vld [vmem:[%s8023_s20 + $0x168] sm:$0xff]  }
 0x25d   : > { %6829 = vst [vmem:[%s8518_s30 + $0x60] sm:$0xff] %v6561_v63   ;;  %v1947_v63 = vadd.f32 %v9058_v0, %v8230_v36  ;;  %11707 = vst [vmem:[#allocation61_spill] sm:$0xff] %v9251_v15  ;;  %v4636_v11 = vunpack.c.l.bf16 %v7321_v52  ;;  %v4637_v10 = vunpack.c.h.bf16 %v7321_v52  ;;  %v9259_v51 = vpop.f32.mrb[91].mxu0  ;;  %v3617_v60 = vadd.f32 0.5, %v3489_v31  ;;  %v11710_v4 = vld [vmem:[#allocation18_spill] sm:$0xff]  ;;  %v9279_v33 = vpop.f32.mrb[88].mxu1  ;;  %2210 = vmatprep.mubr.bf16.mxu0 %v9266_v46  ;;  %2883 = vmatprep.mubr.bf16.mxu1 %v9266_v46 }
 0x25e   : > { %11708 = vst [vmem:[#allocation62_spill] sm:$0xff] %v9259_v51  ;;  %v4384_v29 = vadd.f32 %v4256_v54, %v2586_v38  ;;  %v9263_v0 = vadd.f32 %v9066_v47, %v8239_v49  ;;  %11709 = vst [vmem:[#allocation63_spill] sm:$0xff] %v9266_v46  ;;  %v3999_v1 = vmul.f32 0.5, %v3871_v8  ;;  %v3872_v52 = vunpack.c.l.bf16 %v9224_v53  ;;  %v11713_v38 = vld [vmem:[#allocation47_spill] sm:$0xff] }
 0x25f   : > { %v3110_v12 = vpack.c.bf16 %v1947_v63, %v1943_v61  ;;  %v11711_v57 = vunpack.c.l.bf16 %v11710_v4  ;;  %v11712_v37 = vunpack.c.h.bf16 %v11710_v4  ;;  %v3731_v15 = vmul.bf16 1056980736, %v3109_v35  ;;  %v7127_v61 = vld [vmem:[%s8015_s5 + $0x168] sm:$0xff]   ;;  %11714 = vst [vmem:[#allocation18_spill] sm:$0xff] %v9279_v33 }
 0x260   : > { %v2590_v54 = vadd.f32 %v11713_v38, %v8307_v41  ;;  %v4257_v31 = vmul.f32 %v3617_v60, %v2592_v9  ;;  %v3362_v8 = vunpack.c.l.bf16 %v9235_v32  ;;  %v3873_v4 = vunpack.c.h.bf16 %v9224_v53  ;;  %v9284_v38 = vpop.f32.mrb[92].mxu0  ;;  %v9286_v9 = vpop.f32.mrb[89].mxu1  ;;  %2211 = vmatmul.mubr.bf16.gmra.mrb[180].mxu0 %v7127_v61  ;;  %2884 = vmatmul.mubr.bf16.gmra.mrb[180].mxu1 %v7127_v61 }
 0x261   : > { %v4892_v40 = vsub.f32 %v11711_v57, %v4636_v11  ;;  %v4893_v44 = vsub.f32 %v11712_v37, %v4637_v10  ;;  %11716 = vst [vmem:[#allocation47_spill] sm:$0xff] %v9286_v9  ;;  %v4126_v35 = vadd.f32 0.5, %v3998_v5  ;;  %7328 = vtanh.bf16 %v3731_v15  ;;  %v7129_v9 = vld [vmem:[%s8015_s5 + $0x170] sm:$0xff]  }
 0x262   : > { %v4385_v51 = vadd.f32 %v4257_v31, %v2590_v54  ;;  %v4127_v54 = vadd.f32 0.5, %v3999_v1  ;;  %v9297_v31 = vld [vmem:[%s8023_s20 + $0x150] sm:$0xff]   ;;  %v4001_v18 = vmul.f32 0.5, %v3873_v4  ;;  %v3363_v61 = vunpack.c.h.bf16 %v9235_v32 }
 0x263   : > { %v5020_v63 = vmul.f32 %v4892_v40, %v4124_v27  ;;  %v5021_v16 = vmul.f32 %v4893_v44, %v4125_v13  ;;  %v3220_v40 = vmul.bf16 1056980736, %v3110_v12  ;;  %v3490_v13 = vmul.f32 0.5, %v3362_v8  ;;  %v9290_v27 = vpop.f32.mrb[93].mxu0  ;;  %v9292_v44 = vpop.f32.mrb[90].mxu1  ;;  %11718 = vst [vmem:[#allocation65_spill] sm:$0xff] %v9297_v31 }
 0x264   : > { %11717 = vst [vmem:[#allocation64_spill] sm:$0xff] %v9292_v44  ;;  %v9294_v53 = vpop.eup %7322  ;;  %v1957_v4 = vadd.f32 %v9105_v59, %v8230_v36  ;;  %v2610_v3 = vadd.f32 %v9049_v7, %v8307_v41 }
 0x265   : > { %v5148_v60 = vadd.f32 %v5020_v63, %v4636_v11  ;;  %v5149_v47 = vadd.f32 %v5021_v16, %v4637_v10  ;;  %v4497_v11 = vpack.c.bf16 %v4385_v51, %v4384_v29  ;;  %v9300_v16 = vpop.f32.mrb[94].mxu0  ;;  %v9302_v10 = vpop.f32.mrb[91].mxu1  ;;  %v4000_v63 = vmul.f32 0.5, %v3872_v52  ;;  %v11721_v51 = vld [vmem:[#allocation44_spill] sm:$0xff]  ;;  %v11722_v52 = vld [vmem:[#allocation42_spill] sm:$0xff] }
 0x266   : > { %11719 = vst [vmem:[#allocation66_spill] sm:$0xff] %v9302_v10  ;;  %v9304_v12 = vpop.eup %7324  ;;  %v3618_v37 = vadd.f32 0.5, %v3490_v13  ;;  %v9306_v5 = vpop.f32.mrb[95].mxu0  ;;  %v2598_v29 = vadd.f32 %v11721_v51, %v8310_v26  ;;  %v1953_v13 = vadd.f32 %v9090_v21, %v8230_v36 }
 0x267   : > { %v6566_v8 = vpack.c.bf16 %v5149_v47, %v5148_v60  ;;  %11720 = vst [vmem:[#allocation67_spill] sm:$0xff] %v9306_v5  ;;  %v7327_v1 = vpop.eup %7326  ;;  %7330 = vtanh.bf16 %v4497_v11  ;;  %v2596_v47 = vadd.f32 %v11722_v52, %v8307_v41  ;;  %v3491_v60 = vmul.f32 0.5, %v3363_v61  ;;  %v11723_v11 = vld [vmem:[#allocation19_spill] sm:$0xff]  ;;  %v9331_v21 = vpop.f32.mrb[92].mxu1 }
 0x268   : > { %v4638_v57 = vunpack.c.l.bf16 %v7327_v1  ;;  %v4639_v31 = vunpack.c.h.bf16 %v7327_v1  ;;  %7332 = vtanh.bf16 %v3220_v40  ;;  %v4258_v15 = vmul.f32 %v3618_v37, %v2598_v29  ;;  %v11726_v40 = vld [vmem:[#allocation14_spill] sm:$0xff]  ;;  %v9329_v29 = vld [vmem:[%s8023_s20 + $0x170] sm:$0xff]   ;;  %11728 = vst [vmem:[#allocation42_spill] sm:$0xff] %v9331_v21 }
 0x269   : > { %6830 = vst [vmem:[%s8518_s30 + $0x68] sm:$0xff] %v6566_v8   ;;  %v11724_v44 = vunpack.c.l.bf16 %v11723_v11  ;;  %v11725_v32 = vunpack.c.h.bf16 %v11723_v11  ;;  %v2602_v1 = vadd.f32 %v11726_v40, %v8310_v26  ;;  %v9326_v37 = vadd.f32 %v9095_v24, %v8239_v49  ;;  %11727 = vst [vmem:[#allocation44_spill] sm:$0xff] %v9329_v29  ;;  %v9337_v11 = vpop.f32.mrb[96].mxu0  ;;  %2220 = vmatprep.mubr.bf16.mxu0 %v9329_v29 }
 0x26a   : > { %v4386_v61 = vadd.f32 %v4258_v15, %v2596_v47  ;;  %v3619_v59 = vadd.f32 0.5, %v3491_v60  ;;  %v3112_v52 = vpack.c.bf16 %v1957_v4, %v1953_v13  ;;  %v3874_v40 = vunpack.c.l.bf16 %v9294_v53  ;;  %v9344_v5 = vpop.f32.mrb[97].mxu0  ;;  %v11732_v15 = vld [vmem:[#allocation43_spill] sm:$0xff]  ;;  %2893 = vmatprep.mubr.bf16.mxu1 %v9329_v29  ;;  %2221 = vmatmul.mubr.bf16.gmra.mrb[184].mxu0 %v7129_v9 }
 0x26b   : > { %v4894_v51 = vsub.f32 %v11724_v44, %v4638_v57  ;;  %v4895_v8 = vsub.f32 %v11725_v32, %v4639_v31  ;;  %v9335_v44 = vadd.f32 %v9110_v62, %v8239_v49  ;;  %v9339_v32 = vpop.f32.mrb[93].mxu1  ;;  %v3364_v33 = vunpack.c.l.bf16 %v9304_v12  ;;  %11730 = vst [vmem:[#allocation14_spill] sm:$0xff] %v9344_v5  ;;  %v9352_v4 = vpop.f32.mrb[98].mxu0  ;;  %2894 = vmatmul.mubr.bf16.gmra.mrb[184].mxu1 %v7129_v9 }
 0x26c   : > { %11729 = vst [vmem:[#allocation19_spill] sm:$0xff] %v9339_v32  ;;  %v9346_v47 = vpop.f32.mrb[94].mxu1  ;;  %v2600_v60 = vadd.f32 %v11732_v15, %v8307_v41  ;;  %v4259_v62 = vmul.f32 %v3619_v59, %v2602_v1  ;;  %v9357_v32 = vpop.f32.mrb[99].mxu0  ;;  %v11733_v1 = vpack.c.bf16 %v9263_v0, %v9257_v58  ;;  %v3221_v0 = vmul.bf16 1056980736, %v3112_v52 }
 0x26d   : > { %v5022_v10 = vmul.f32 %v4894_v51, %v4126_v35  ;;  %v5023_v24 = vmul.f32 %v4895_v8, %v4127_v54  ;;  %11731 = vst [vmem:[#allocation68_spill] sm:$0xff] %v9346_v47  ;;  %v3113_v13 = vpack.c.bf16 %v9335_v44, %v9326_v37  ;;  %v9354_v21 = vpop.f32.mrb[95].mxu1  ;;  %v3875_v35 = vunpack.c.h.bf16 %v9294_v53  ;;  %v7131_v47 = vld [vmem:[%s8015_s5 + $0x178] sm:$0xff]  }
 0x26e   : > { %v3492_v8 = vmul.f32 0.5, %v3364_v33  ;;  %v3732_v59 = vmul.bf16 1056980736, %v11733_v1  ;;  %v4387_v37 = vadd.f32 %v4259_v62, %v2600_v60  ;;  %v4128_v53 = vadd.f32 0.5, %v4000_v63 }
 0x26f   : > { %v5150_v54 = vadd.f32 %v5022_v10, %v4638_v57  ;;  %v5151_v51 = vadd.f32 %v5023_v24, %v4639_v31  ;;  %v2608_v33 = vadd.f32 %v9041_v30, %v8310_v26  ;;  %v9368_v10 = vpop.eup %7328  ;;  %v4129_v44 = vadd.f32 0.5, %v4001_v18 }
 0x270   : > { %v3620_v31 = vadd.f32 0.5, %v3492_v8  ;;  %v4002_v24 = vmul.f32 0.5, %v3874_v40  ;;  %v4498_v58 = vpack.c.bf16 %v4387_v37, %v4386_v61  ;;  %v4003_v60 = vmul.f32 0.5, %v3875_v35  ;;  %v9380_v61 = vpop.f32.mrb[100].mxu0  ;;  %v11736_v37 = vld [vmem:[#allocation20_spill] sm:$0xff] }
 0x271   : > { %v6571_v57 = vpack.c.bf16 %v5151_v51, %v5150_v54  ;;  %v2606_v62 = vadd.f32 %v9037_v20, %v8307_v41  ;;  %v3365_v54 = vunpack.c.h.bf16 %v9304_v12  ;;  %v9374_v51 = vpop.f32.mrb[96].mxu1  ;;  %7334 = vtanh.bf16 %v3732_v59  ;;  %v9386_v35 = vpop.f32.mrb[101].mxu0 }
 0x272   : > { %v7331_v15 = vpop.eup %7330  ;;  %v4260_v63 = vmul.f32 %v3620_v31, %v2608_v33  ;;  %11734 = vst [vmem:[#allocation43_spill] sm:$0xff] %v9374_v51  ;;  %v1963_v18 = vadd.f32 %v9140_v55, %v8230_v36  ;;  %v9382_v52 = vpop.f32.mrb[97].mxu1  ;;  %7336 = vtanh.bf16 %v4498_v58  ;;  %v1967_v12 = vadd.f32 %v9150_v48, %v8230_v36  ;;  %v9397_v58 = vld [vmem:[%s8023_s20 + $0x178] sm:$0xff]  }
 0x273   : > { %6831 = vst [vmem:[%s8518_s30 + $0x70] sm:$0xff] %v6571_v57   ;;  %v9376_v30 = vpop.eup %7332  ;;  %v4640_v9 = vunpack.c.l.bf16 %v7331_v15  ;;  %v4641_v8 = vunpack.c.h.bf16 %v7331_v15  ;;  %v3493_v40 = vmul.f32 0.5, %v3365_v54  ;;  %v9388_v1 = vpop.f32.mrb[98].mxu1  ;;  %v11737_v57 = vunpack.c.l.bf16 %v11736_v37  ;;  %11739 = vst [vmem:[#allocation20_spill] sm:$0xff] %v9397_v58  ;;  %2230 = vmatprep.mubr.bf16.mxu0 %v9397_v58  ;;  %2903 = vmatprep.mubr.bf16.mxu1 %v9397_v58 }
 0x274   : > { %v4388_v20 = vadd.f32 %v4260_v63, %v2606_v62  ;;  %11735 = vst [vmem:[#allocation69_spill] sm:$0xff] %v9388_v1  ;;  %v11738_v33 = vunpack.c.h.bf16 %v11736_v37  ;;  %7338 = vtanh.bf16 %v3221_v0  ;;  %v2612_v31 = vadd.f32 %v9060_v50, %v8310_v26  ;;  %v9399_v15 = vpop.f32.mrb[102].mxu0  ;;  %v9401_v48 = vpop.f32.mrb[99].mxu1  ;;  %2231 = vmatmul.mubr.bf16.gmra.mrb[188].mxu0 %v7131_v47  ;;  %2904 = vmatmul.mubr.bf16.gmra.mrb[188].mxu1 %v7131_v47 }
 0x275   : > { %v4896_v59 = vsub.f32 %v11737_v57, %v4640_v9  ;;  %11740 = vst [vmem:[#allocation70_spill] sm:$0xff] %v9401_v48  ;;  %v3621_v62 = vadd.f32 0.5, %v3493_v40  ;;  %v9405_v63 = vadd.f32 %v9146_v45, %v8239_v49  ;;  %v3114_v54 = vpack.c.bf16 %v1967_v12, %v1963_v18  ;;  %v9409_v57 = vpop.f32.mrb[103].mxu0 }
 0x276   : > { %v4897_v55 = vsub.f32 %v11738_v33, %v4641_v8  ;;  %v1969_v37 = vadd.f32 %v9157_v39, %v8239_v49  ;;  %v3733_v50 = vmul.bf16 1056980736, %v3113_v13  ;;  %v3366_v5 = vunpack.c.l.bf16 %v9376_v30  ;;  %v9420_v13 = vpop.f32.mrb[100].mxu1 }
 0x277   : > { %v5024_v0 = vmul.f32 %v4896_v59, %v4128_v53  ;;  %v4261_v40 = vmul.f32 %v3621_v62, %v2612_v31  ;;  %v3222_v18 = vmul.bf16 1056980736, %v3114_v54  ;;  %v4130_v51 = vadd.f32 0.5, %v4002_v24  ;;  %v9426_v24 = vpop.f32.mrb[101].mxu1  ;;  %v11747_v53 = vld [vmem:[#allocation49_spill] sm:$0xff] }
 0x278   : > { %v5025_v33 = vmul.f32 %v4897_v55, %v4129_v44  ;;  %v3115_v1 = vpack.c.bf16 %v1969_v37, %v9405_v63  ;;  %v3494_v12 = vmul.f32 0.5, %v3366_v5  ;;  %v4131_v7 = vadd.f32 0.5, %v4003_v60  ;;  %v9424_v5 = vpop.f32.mrb[104].mxu0  ;;  %v9432_v60 = vpop.f32.mrb[102].mxu1 }
 0x279   : > { %v5152_v45 = vadd.f32 %v5024_v0, %v4640_v9  ;;  %v4389_v44 = vadd.f32 %v4261_v40, %v2610_v3  ;;  %v2618_v9 = vadd.f32 %v9092_v2, %v8310_v26  ;;  %v3876_v3 = vunpack.c.l.bf16 %v9368_v10  ;;  %v9430_v62 = vpop.f32.mrb[105].mxu0  ;;  %11741 = vst [vmem:[#allocation71_spill] sm:$0xff] %v9432_v60  ;;  %v9440_v54 = vpop.f32.mrb[103].mxu1 }
 0x27a   : > { %v5153_v48 = vadd.f32 %v5025_v33, %v4641_v8  ;;  %v3622_v8 = vadd.f32 0.5, %v3494_v12  ;;  %7340 = vtanh.bf16 %v3733_v50  ;;  %v3367_v31 = vunpack.c.h.bf16 %v9376_v30  ;;  %v9438_v63 = vpop.f32.mrb[106].mxu0  ;;  %11742 = vst [vmem:[#allocation72_spill] sm:$0xff] %v9440_v54 }
 0x27b   : > { %v4499_v55 = vpack.c.bf16 %v4389_v44, %v4388_v20  ;;  %7342 = vtanh.bf16 %v3222_v18  ;;  %v2616_v2 = vadd.f32 %v9083_v19, %v8307_v41  ;;  %v1973_v20 = vadd.f32 %v9181_v42, %v8230_v36  ;;  %v9448_v0 = vpop.f32.mrb[107].mxu0 }
 0x27c   : > { %v6576_v59 = vpack.c.bf16 %v5153_v48, %v5152_v45  ;;  %v3877_v48 = vunpack.c.h.bf16 %v9368_v10  ;;  %v4262_v47 = vmul.f32 %v3622_v8, %v2618_v9  ;;  %v9442_v37 = vpop.eup %7334  ;;  %v3495_v30 = vmul.f32 0.5, %v3367_v31 }
 0x27d   : > { %7344 = vtanh.bf16 %v4499_v55  ;;  %v1977_v10 = vadd.f32 %v9199_v25, %v8230_v36  ;;  %v7337_v33 = vpop.eup %7336  ;;  %v2622_v50 = vadd.f32 %v9107_v34, %v8310_v26  ;;  %v9454_v40 = vadd.f32 %v9193_v56, %v8239_v49  ;;  %v11744_v56 = vld [vmem:[#allocation21_spill] sm:$0xff] }
 0x27e   : > { %6832 = vst [vmem:[%s8518_s30 + $0x78] sm:$0xff] %v6576_v59   ;;  %v4390_v19 = vadd.f32 %v4262_v47, %v2616_v2  ;;  %v9458_v45 = vadd.f32 %v9208_v17, %v8239_v49  ;;  %v4642_v18 = vunpack.c.l.bf16 %v7337_v33  ;;  %v4643_v12 = vunpack.c.h.bf16 %v7337_v33  ;;  %v9461_v59 = vld [vmem:[%s8023_s20 + $0x180] sm:$0xff]  }
 0x27f   : > { %v7339_v42 = vpop.eup %7338  ;;  %v3623_v25 = vadd.f32 0.5, %v3495_v30  ;;  %v3116_v44 = vpack.c.bf16 %v1977_v10, %v1973_v20  ;;  %11743 = vst [vmem:[#allocation73_spill] sm:$0xff] %v9461_v59  ;;  %v4004_v9 = vmul.f32 0.5, %v3876_v3  ;;  %v4005_v8 = vmul.f32 0.5, %v3877_v48  ;;  %v7133_v30 = vld [vmem:[%s8015_s5 + $0x180] sm:$0xff]   ;;  %v9472_v20 = vpop.f32.mrb[104].mxu1  ;;  %2240 = vmatprep.mubr.bf16.mxu0 %v9461_v59  ;;  %2913 = vmatprep.mubr.bf16.mxu1 %v9461_v59 }
 0x280   : > { %v3734_v55 = vmul.bf16 1056980736, %v3115_v1  ;;  %v11745_v31 = vunpack.c.l.bf16 %v11744_v56  ;;  %v11746_v47 = vunpack.c.h.bf16 %v11744_v56  ;;  %v2620_v39 = vadd.f32 %v11747_v53, %v8307_v41  ;;  %11748 = vst [vmem:[#allocation21_spill] sm:$0xff] %v9472_v20  ;;  %v9475_v10 = vpop.f32.mrb[108].mxu0  ;;  %v9477_v34 = vpop.f32.mrb[105].mxu1  ;;  %2241 = vmatmul.mubr.bf16.gmra.mrb[192].mxu0 %v7133_v30  ;;  %2914 = vmatmul.mubr.bf16.gmra.mrb[192].mxu1 %v7133_v30  ;;  %v11815_v59 = vld [vmem:[#allocation64_spill] sm:$0xff] }
 0x281   : > { %v4263_v33 = vmul.f32 %v3623_v25, %v2622_v50  ;;  %v3223_v48 = vmul.bf16 1056980736, %v3116_v44  ;;  %v3368_v1 = vunpack.c.l.bf16 %v7339_v42  ;;  %11749 = vst [vmem:[#allocation49_spill] sm:$0xff] %v9477_v34  ;;  %v9480_v60 = vpop.f32.mrb[109].mxu0  ;;  %v9482_v53 = vpop.f32.mrb[106].mxu1  ;;  %v4132_v50 = vadd.f32 0.5, %v4004_v9 }
 0x282   : > { %v4898_v2 = vsub.f32 %v11745_v31, %v4642_v18  ;;  %v4899_v17 = vsub.f32 %v11746_v47, %v4643_v12  ;;  %v3878_v31 = vunpack.c.l.bf16 %v9442_v37  ;;  %11750 = vst [vmem:[#allocation74_spill] sm:$0xff] %v9482_v53  ;;  %v4133_v25 = vadd.f32 0.5, %v4005_v8  ;;  %v9486_v44 = vpop.f32.mrb[110].mxu0  ;;  %v9488_v3 = vpop.f32.mrb[107].mxu1  ;;  %v7135_v34 = vld [vmem:[%s8015_s5 + $0x188] sm:$0xff]  }
 0x283   : > { %v4391_v47 = vadd.f32 %v4263_v33, %v2620_v39  ;;  %7346 = vtanh.bf16 %v3734_v55  ;;  %v3496_v20 = vmul.f32 0.5, %v3368_v1  ;;  %11751 = vst [vmem:[#allocation75_spill] sm:$0xff] %v9488_v3  ;;  %v2628_v8 = vadd.f32 %v9142_v22, %v8310_v26 }
 0x284   : > { %v5026_v14 = vmul.f32 %v4898_v2, %v4130_v51  ;;  %v5027_v56 = vmul.f32 %v4899_v17, %v4131_v7  ;;  %v3879_v51 = vunpack.c.h.bf16 %v9442_v37  ;;  %v9491_v17 = vpop.f32.mrb[111].mxu0  ;;  %7348 = vtanh.bf16 %v3223_v48 }
 0x285   : > { %v4500_v2 = vpack.c.bf16 %v4391_v47, %v4390_v19  ;;  %v9493_v9 = vpop.eup %7340  ;;  %v3624_v55 = vadd.f32 0.5, %v3496_v20  ;;  %v3369_v33 = vunpack.c.h.bf16 %v7339_v42  ;;  %v4006_v53 = vmul.f32 0.5, %v3878_v31  ;;  %v9512_v47 = vpop.f32.mrb[108].mxu1 }
 0x286   : > { %v5154_v7 = vadd.f32 %v5026_v14, %v4642_v18  ;;  %v5155_v39 = vadd.f32 %v5027_v56, %v4643_v12  ;;  %v9497_v1 = vpop.eup %7342  ;;  %v11752_v14 = vld [vmem:[#allocation50_spill] sm:$0xff]  ;;  %v1983_v48 = vadd.f32 %v9231_v28, %v8230_v36  ;;  %v1987_v22 = vadd.f32 %v9249_v6, %v8230_v36 }
 0x287   : > { %7350 = vtanh.bf16 %v4500_v2  ;;  %v2626_v19 = vadd.f32 %v11752_v14, %v8307_v41  ;;  %v4264_v12 = vmul.f32 %v3624_v55, %v2628_v8  ;;  %v3497_v56 = vmul.f32 0.5, %v3369_v33  ;;  %11753 = vst [vmem:[#allocation50_spill] sm:$0xff] %v9512_v47  ;;  %v11754_v28 = vld [vmem:[#allocation62_spill] sm:$0xff]  ;;  %v9523_v33 = vpop.f32.mrb[109].mxu1  ;;  %v11764_v47 = vld [vmem:[#allocation51_spill] sm:$0xff] }
 0x288   : > { %v6581_v37 = vpack.c.bf16 %v5155_v39, %v5154_v7  ;;  %v7345_v18 = vpop.eup %7344  ;;  %v2632_v20 = vadd.f32 %v9152_v23, %v8310_v26  ;;  %v9510_v31 = vadd.f32 %v9241_v43, %v8239_v49  ;;  %v3118_v2 = vpack.c.bf16 %v1987_v22, %v1983_v48  ;;  %v9519_v6 = vld [vmem:[%s8023_s20 + $0x188] sm:$0xff]   ;;  %v9521_v55 = vpop.f32.mrb[112].mxu0  ;;  %11757 = vst [vmem:[#allocation77_spill] sm:$0xff] %v9523_v33 }
 0x289   : > { %v4644_v42 = vunpack.c.l.bf16 %v7345_v18  ;;  %v4645_v30 = vunpack.c.h.bf16 %v7345_v18  ;;  %v4392_v7 = vadd.f32 %v4264_v12, %v2626_v19  ;;  %v3625_v39 = vadd.f32 0.5, %v3497_v56  ;;  %11755 = vst [vmem:[#allocation62_spill] sm:$0xff] %v9519_v6  ;;  %11756 = vst [vmem:[#allocation76_spill] sm:$0xff] %v9521_v55  ;;  %v9530_v56 = vpop.f32.mrb[113].mxu0  ;;  %v9532_v48 = vpop.f32.mrb[110].mxu1  ;;  %2250 = vmatprep.mubr.bf16.mxu0 %v9519_v6  ;;  %2923 = vmatprep.mubr.bf16.mxu1 %v9519_v6 }
 0x28a   : > { %6833 = vst [vmem:[%s8518_s30 + $0x80] sm:$0xff] %v6581_v37   ;;  %v9516_v8 = vadd.f32 %v11754_v28, %v8239_v49  ;;  %v4007_v23 = vmul.f32 0.5, %v3879_v51  ;;  %v3880_v43 = vunpack.c.l.bf16 %v9493_v9  ;;  %v11758_v37 = vld [vmem:[#allocation22_spill] sm:$0xff]  ;;  %11762 = vst [vmem:[#allocation78_spill] sm:$0xff] %v9532_v48  ;;  %v11763_v22 = vpack.c.bf16 %v9458_v45, %v9454_v40  ;;  %2251 = vmatmul.mubr.bf16.gmra.mrb[196].mxu0 %v7135_v34 }
 0x28b   : > { %v11759_v14 = vunpack.c.l.bf16 %v11758_v37  ;;  %v11760_v19 = vunpack.c.h.bf16 %v11758_v37  ;;  %11761 = vst [vmem:[#allocation22_spill] sm:$0xff] %v9530_v56  ;;  %v2630_v33 = vadd.f32 %v11764_v47, %v8307_v41  ;;  %v4265_v51 = vmul.f32 %v3625_v39, %v2632_v20  ;;  %v9544_v37 = vpop.f32.mrb[111].mxu1  ;;  %2924 = vmatmul.mubr.bf16.gmra.mrb[196].mxu1 %v7135_v34 }
 0x28c   : > { %v3735_v28 = vmul.bf16 1056980736, %v11763_v22  ;;  %11766 = vst [vmem:[#allocation79_spill] sm:$0xff] %v9544_v37  ;;  %v3370_v48 = vunpack.c.l.bf16 %v9497_v1  ;;  %v3881_v45 = vunpack.c.h.bf16 %v9493_v9  ;;  %v4134_v22 = vadd.f32 0.5, %v4006_v53  ;;  %v11767_v53 = vld [vmem:[#allocation53_spill] sm:$0xff] }
 0x28d   : > { %v4900_v18 = vsub.f32 %v11759_v14, %v4644_v42  ;;  %v4901_v12 = vsub.f32 %v11760_v19, %v4645_v30  ;;  %v9542_v14 = vpop.f32.mrb[114].mxu0  ;;  %v4393_v47 = vadd.f32 %v4265_v51, %v2630_v33  ;;  %v4008_v33 = vmul.f32 0.5, %v3880_v43 }
 0x28e   : > { %11765 = vst [vmem:[#allocation51_spill] sm:$0xff] %v9542_v14  ;;  %v9547_v54 = vpop.f32.mrb[115].mxu0  ;;  %v9552_v39 = vpop.eup %7346  ;;  %v3498_v55 = vmul.f32 0.5, %v3370_v48  ;;  %7352 = vtanh.bf16 %v3735_v28  ;;  %v4009_v51 = vmul.f32 0.5, %v3881_v45  ;;  %v11770_v28 = vld [vmem:[#allocation52_spill] sm:$0xff] }
 0x28f   : > { %v5028_v19 = vmul.f32 %v4900_v18, %v4132_v50  ;;  %v5029_v56 = vmul.f32 %v4901_v12, %v4133_v25  ;;  %v4135_v50 = vadd.f32 0.5, %v4007_v23  ;;  %v4501_v25 = vpack.c.bf16 %v4393_v47, %v4392_v7  ;;  %v9556_v9 = vpop.eup %7348 }
 0x290   : > { %v3224_v18 = vmul.bf16 1056980736, %v3118_v2  ;;  %v3882_v23 = vunpack.c.l.bf16 %v9552_v39  ;;  %v3371_v7 = vunpack.c.h.bf16 %v9497_v1  ;;  %v9564_v2 = vpop.f32.mrb[116].mxu0  ;;  %v3883_v47 = vunpack.c.h.bf16 %v9552_v39 }
 0x291   : > { %v5156_v3 = vadd.f32 %v5028_v19, %v4644_v42  ;;  %v5157_v14 = vadd.f32 %v5029_v56, %v4645_v30  ;;  %v2638_v42 = vadd.f32 %v11767_v53, %v8310_v26  ;;  %v3626_v30 = vadd.f32 0.5, %v3498_v55  ;;  %v9560_v56 = vpop.f32.mrb[112].mxu1  ;;  %v9571_v19 = vpop.f32.mrb[117].mxu0 }
 0x292   : > { %11768 = vst [vmem:[#allocation53_spill] sm:$0xff] %v9560_v56  ;;  %v7351_v48 = vpop.eup %7350  ;;  %7354 = vtanh.bf16 %v4501_v25  ;;  %v9566_v34 = vpop.f32.mrb[113].mxu1  ;;  %v2636_v55 = vadd.f32 %v11770_v28, %v8307_v41  ;;  %11771 = vst [vmem:[#allocation52_spill] sm:$0xff] %v9571_v19  ;;  %v3499_v1 = vmul.f32 0.5, %v3371_v7  ;;  %v1993_v25 = vadd.f32 %v9284_v38, %v8230_v36  ;;  %v11780_v38 = vld [vmem:[#allocation54_spill] sm:$0xff]  ;;  %v7137_v56 = vld [vmem:[%s8015_s5 + $0x190] sm:$0xff]  }
 0x293   : > { %v6586_v12 = vpack.c.bf16 %v5157_v14, %v5156_v3  ;;  %11769 = vst [vmem:[#allocation80_spill] sm:$0xff] %v9566_v34  ;;  %v4646_v43 = vunpack.c.l.bf16 %v7351_v48  ;;  %v4647_v3 = vunpack.c.h.bf16 %v7351_v48  ;;  %v4266_v14 = vmul.f32 %v3626_v30, %v2638_v42  ;;  %v9573_v45 = vpop.f32.mrb[114].mxu1  ;;  %v9578_v53 = vpop.f32.mrb[118].mxu0  ;;  %v11775_v48 = vld [vmem:[#allocation23_spill] sm:$0xff]  ;;  %v11782_v34 = vld [vmem:[#allocation17_spill] sm:$0xff] }
 0x294   : > { %11772 = vst [vmem:[#allocation81_spill] sm:$0xff] %v9573_v45  ;;  %7356 = vtanh.bf16 %v3224_v18  ;;  %11773 = vst [vmem:[#allocation82_spill] sm:$0xff] %v9578_v53  ;;  %v11776_v20 = vunpack.c.l.bf16 %v11775_v48  ;;  %v11777_v42 = vunpack.c.h.bf16 %v11775_v48  ;;  %v1997_v39 = vadd.f32 %v9300_v16, %v8230_v36  ;;  %v9589_v18 = vld [vmem:[%s8023_s20 + $0x190] sm:$0xff]   ;;  %v9591_v7 = vpop.f32.mrb[119].mxu0 }
 0x295   : > { %6834 = vst [vmem:[%s8518_s30 + $0x88] sm:$0xff] %v6586_v12   ;;  %v9580_v12 = vpop.f32.mrb[115].mxu1  ;;  %v4394_v40 = vadd.f32 %v4266_v14, %v2636_v55  ;;  %11778 = vst [vmem:[#allocation23_spill] sm:$0xff] %v9589_v18  ;;  %v2642_v46 = vadd.f32 %v11780_v38, %v8310_v26  ;;  %v3627_v45 = vadd.f32 0.5, %v3499_v1  ;;  %v3372_v16 = vunpack.c.l.bf16 %v9556_v9  ;;  %2260 = vmatprep.mubr.bf16.mxu0 %v9589_v18 }
 0x296   : > { %11774 = vst [vmem:[#allocation83_spill] sm:$0xff] %v9580_v12  ;;  %v4902_v28 = vsub.f32 %v11776_v20, %v4646_v43  ;;  %v4903_v30 = vsub.f32 %v11777_v42, %v4647_v3  ;;  %11779 = vst [vmem:[#allocation84_spill] sm:$0xff] %v9591_v7  ;;  %v9597_v12 = vadd.f32 %v9290_v27, %v8239_v49  ;;  %v11781_v20 = vld [vmem:[#allocation67_spill] sm:$0xff]  ;;  %2933 = vmatprep.mubr.bf16.mxu1 %v9589_v18 }
 0x297   : > { %v9601_v48 = vadd.f32 %v11781_v20, %v8239_v49  ;;  %v3120_v42 = vpack.c.bf16 %v1997_v39, %v1993_v25  ;;  %v2640_v37 = vadd.f32 %v11782_v34, %v8307_v41  ;;  %v4267_v7 = vmul.f32 %v3627_v45, %v2642_v46  ;;  %v9610_v20 = vpop.f32.mrb[116].mxu1  ;;  %2261 = vmatmul.mubr.bf16.gmra.mrb[200].mxu0 %v7137_v56  ;;  %v11831_v18 = vld [vmem:[#allocation43_spill] sm:$0xff] }
 0x298   : > { %v5030_v55 = vmul.f32 %v4902_v28, %v4134_v22  ;;  %v5031_v14 = vmul.f32 %v4903_v30, %v4135_v50  ;;  %v3500_v53 = vmul.f32 0.5, %v3372_v16  ;;  %11783 = vst [vmem:[#allocation54_spill] sm:$0xff] %v9610_v20  ;;  %v4136_v22 = vadd.f32 0.5, %v4008_v33  ;;  %v9616_v46 = vpop.f32.mrb[120].mxu0  ;;  %v9618_v34 = vpop.f32.mrb[117].mxu1  ;;  %v11785_v33 = vld [vmem:[#allocation59_spill] sm:$0xff]  ;;  %2934 = vmatmul.mubr.bf16.gmra.mrb[200].mxu1 %v7137_v56 }
 0x299   : > { %v4395_v28 = vadd.f32 %v4267_v7, %v2640_v37  ;;  %11784 = vst [vmem:[#allocation67_spill] sm:$0xff] %v9618_v34  ;;  %v9620_v45 = vpop.eup %7352  ;;  %v2648_v30 = vadd.f32 %v11785_v33, %v8310_v26  ;;  %v9624_v37 = vpop.f32.mrb[121].mxu0  ;;  %v3225_v25 = vmul.bf16 1056980736, %v3120_v42  ;;  %v11789_v56 = vld [vmem:[#allocation58_spill] sm:$0xff] }
 0x29a   : > { %v5158_v38 = vadd.f32 %v5030_v55, %v4646_v43  ;;  %v5159_v19 = vadd.f32 %v5031_v14, %v4647_v3  ;;  %v4137_v43 = vadd.f32 0.5, %v4009_v51  ;;  %v3628_v39 = vadd.f32 0.5, %v3500_v53  ;;  %v9626_v7 = vpop.f32.mrb[118].mxu1  ;;  %v9628_v50 = vpop.f32.mrb[122].mxu0 }
 0x29b   : > { %11786 = vst [vmem:[#allocation17_spill] sm:$0xff] %v9626_v7  ;;  %v4010_v55 = vmul.f32 0.5, %v3882_v23  ;;  %v4011_v14 = vmul.f32 0.5, %v3883_v47  ;;  %v4502_v16 = vpack.c.bf16 %v4395_v28, %v4394_v40  ;;  %v9630_v27 = vpop.f32.mrb[119].mxu1  ;;  %v3373_v23 = vunpack.c.h.bf16 %v9556_v9  ;;  %v9639_v47 = vpop.f32.mrb[123].mxu0  ;;  %v9653_v7 = vld [vmem:[%s8023_s20 + $0x198] sm:$0xff]  }
 0x29c   : > { %v6591_v3 = vpack.c.bf16 %v5159_v19, %v5158_v38  ;;  %11787 = vst [vmem:[#allocation59_spill] sm:$0xff] %v9630_v27  ;;  %v11788_v19 = vpack.c.bf16 %v9516_v8, %v9510_v31  ;;  %v2646_v38 = vadd.f32 %v11789_v56, %v8307_v41  ;;  %v4268_v33 = vmul.f32 %v3628_v39, %v2648_v30  ;;  %v11790_v39 = vld [vmem:[#allocation24_spill] sm:$0xff] }
 0x29d   : > { %v7355_v51 = vpop.eup %7354  ;;  %v3884_v40 = vunpack.c.l.bf16 %v9620_v45  ;;  %7358 = vtanh.bf16 %v4502_v16  ;;  %v3501_v8 = vmul.f32 0.5, %v3373_v23  ;;  %v2007_v30 = vadd.f32 %v9352_v4, %v8230_v36  ;;  %11794 = vst [vmem:[#allocation58_spill] sm:$0xff] %v9653_v7  ;;  %v11795_v16 = vld [vmem:[#allocation14_spill] sm:$0xff]  ;;  %v9663_v23 = vpop.f32.mrb[120].mxu1  ;;  %2270 = vmatprep.mubr.bf16.mxu0 %v9653_v7  ;;  %2943 = vmatprep.mubr.bf16.mxu1 %v9653_v7 }
 0x29e   : > { %6835 = vst [vmem:[%s8518_s30 + $0x90] sm:$0xff] %v6591_v3   ;;  %v3736_v53 = vmul.bf16 1056980736, %v11788_v19  ;;  %v4648_v42 = vunpack.c.l.bf16 %v7355_v51  ;;  %v4649_v28 = vunpack.c.h.bf16 %v7355_v51  ;;  %v2003_v3 = vadd.f32 %v9337_v11, %v8230_v36  ;;  %v11793_v51 = vld [vmem:[#allocation61_spill] sm:$0xff]  ;;  %11796 = vst [vmem:[#allocation24_spill] sm:$0xff] %v9663_v23  ;;  %v9668_v27 = vpop.f32.mrb[121].mxu1 }
 0x29f   : > { %v7357_v1 = vpop.eup %7356  ;;  %v4396_v31 = vadd.f32 %v4268_v33, %v2646_v38  ;;  %v11791_v19 = vunpack.c.l.bf16 %v11790_v39  ;;  %v11792_v56 = vunpack.c.h.bf16 %v11790_v39  ;;  %7360 = vtanh.bf16 %v3225_v25  ;;  %11797 = vst [vmem:[#allocation61_spill] sm:$0xff] %v9668_v27 }
 0x2a0   : > { %v2652_v29 = vadd.f32 %v11793_v51, %v8310_v26  ;;  %v3629_v11 = vadd.f32 0.5, %v3501_v8  ;;  %v9657_v38 = vadd.f32 %v11795_v16, %v8239_v49  ;;  %v3122_v33 = vpack.c.bf16 %v2007_v30, %v2003_v3  ;;  %v9666_v51 = vpop.f32.mrb[124].mxu0  ;;  %v11798_v8 = vld [vmem:[#allocation60_spill] sm:$0xff]  ;;  %v9676_v30 = vpop.f32.mrb[122].mxu1 }
 0x2a1   : > { %v4904_v9 = vsub.f32 %v11791_v19, %v4648_v42  ;;  %v4905_v58 = vsub.f32 %v11792_v56, %v4649_v28  ;;  %v9661_v4 = vadd.f32 %v9357_v32, %v8239_v49  ;;  %7362 = vtanh.bf16 %v3736_v53  ;;  %v7139_v56 = vld [vmem:[%s8015_s5 + $0x198] sm:$0xff]   ;;  %v9674_v32 = vpop.f32.mrb[125].mxu0  ;;  %11799 = vst [vmem:[#allocation14_spill] sm:$0xff] %v9676_v30  ;;  %v9680_v23 = vpop.f32.mrb[123].mxu1 }
 0x2a2   : > { %v3374_v25 = vunpack.c.l.bf16 %v7357_v1  ;;  %v2650_v16 = vadd.f32 %v11798_v8, %v8307_v41  ;;  %v4269_v20 = vmul.f32 %v3629_v11, %v2652_v29  ;;  %11800 = vst [vmem:[#allocation60_spill] sm:$0xff] %v9680_v23  ;;  %v4138_v27 = vadd.f32 0.5, %v4010_v55  ;;  %2271 = vmatmul.mubr.bf16.gmra.mrb[204].mxu0 %v7139_v56  ;;  %2944 = vmatmul.mubr.bf16.gmra.mrb[204].mxu1 %v7139_v56 }
 0x2a3   : > { %v5032_v39 = vmul.f32 %v4904_v9, %v4136_v22  ;;  %v5033_v19 = vmul.f32 %v4905_v58, %v4137_v43  ;;  %v3123_v3 = vpack.c.bf16 %v9661_v4, %v9657_v38  ;;  %v3226_v43 = vmul.bf16 1056980736, %v3122_v33  ;;  %v9678_v9 = vpop.f32.mrb[126].mxu0  ;;  %v11801_v33 = vld [vmem:[#allocation47_spill] sm:$0xff] }
 0x2a4   : > { %v3502_v53 = vmul.f32 0.5, %v3374_v25  ;;  %v4397_v11 = vadd.f32 %v4269_v20, %v2650_v16  ;;  %v9686_v38 = vpop.f32.mrb[127].mxu0  ;;  %v2658_v4 = vadd.f32 %v11801_v33, %v8310_v26  ;;  %v3885_v55 = vunpack.c.h.bf16 %v9620_v45 }
 0x2a5   : > { %v5160_v22 = vadd.f32 %v5032_v39, %v4648_v42  ;;  %v5161_v58 = vadd.f32 %v5033_v19, %v4649_v28  ;;  %v4139_v42 = vadd.f32 0.5, %v4011_v14  ;;  %v4012_v19 = vmul.f32 0.5, %v3884_v40  ;;  %v11803_v14 = vld [vmem:[#allocation18_spill] sm:$0xff] }
 0x2a6   : > { %v3630_v39 = vadd.f32 0.5, %v3502_v53  ;;  %v4503_v25 = vpack.c.bf16 %v4397_v11, %v4396_v31  ;;  %v3375_v8 = vunpack.c.h.bf16 %v7357_v1  ;;  %v11802_v20 = vpack.c.bf16 %v9601_v48, %v9597_v12  ;;  %v9701_v1 = vpop.f32.mrb[124].mxu1  ;;  %v11805_v12 = vld [vmem:[#allocation66_spill] sm:$0xff] }
 0x2a7   : > { %v6596_v28 = vpack.c.bf16 %v5161_v58, %v5160_v22  ;;  %7364 = vtanh.bf16 %v3226_v43  ;;  %v2656_v22 = vadd.f32 %v11803_v14, %v8307_v41  ;;  %v2013_v56 = vadd.f32 %v9380_v61, %v8230_v36  ;;  %11804 = vst [vmem:[#allocation47_spill] sm:$0xff] %v9701_v1  ;;  %v9715_v61 = vpop.f32.mrb[125].mxu1 }
 0x2a8   : > { %v3737_v16 = vmul.bf16 1056980736, %v11802_v20  ;;  %v4270_v58 = vmul.f32 %v3630_v39, %v2658_v4  ;;  %7366 = vtanh.bf16 %v4503_v25  ;;  %v3503_v33 = vmul.f32 0.5, %v3375_v8  ;;  %v7359_v40 = vpop.eup %7358  ;;  %v9713_v11 = vpop.f32.mrb[128].mxu0  ;;  %11806 = vst [vmem:[#allocation18_spill] sm:$0xff] %v9715_v61  ;;  %v9718_v8 = vld [vmem:[%s8023_s20 + $0x1a0] sm:$0xff]  }
 0x2a9   : > { %6836 = vst [vmem:[%s8518_s30 + $0x98] sm:$0xff] %v6596_v28   ;;  %v2017_v45 = vadd.f32 %v9399_v15, %v8230_v36  ;;  %v2662_v48 = vadd.f32 %v11805_v12, %v8310_v26  ;;  %v9707_v43 = vadd.f32 %v9386_v35, %v8239_v49  ;;  %v9711_v53 = vadd.f32 %v9409_v57, %v8239_v49  ;;  %v9720_v20 = vpop.f32.mrb[129].mxu0  ;;  %v9722_v35 = vpop.f32.mrb[126].mxu1 }
 0x2aa   : > { %v4398_v31 = vadd.f32 %v4270_v58, %v2656_v22  ;;  %v7361_v15 = vpop.eup %7360  ;;  %v4650_v28 = vunpack.c.l.bf16 %v7359_v40  ;;  %v4651_v4 = vunpack.c.h.bf16 %v7359_v40  ;;  %v3631_v39 = vadd.f32 0.5, %v3503_v33  ;;  %11807 = vst [vmem:[#allocation66_spill] sm:$0xff] %v9718_v8  ;;  %11808 = vst [vmem:[#allocation85_spill] sm:$0xff] %v9720_v20  ;;  %v9726_v58 = vpop.f32.mrb[130].mxu0  ;;  %v11812_v33 = vld [vmem:[#allocation25_spill] sm:$0xff]  ;;  %2280 = vmatprep.mubr.bf16.mxu0 %v9718_v8  ;;  %2953 = vmatprep.mubr.bf16.mxu1 %v9718_v8 }
 0x2ab   : > { %v3124_v25 = vpack.c.bf16 %v2017_v45, %v2013_v56  ;;  %11809 = vst [vmem:[#allocation86_spill] sm:$0xff] %v9722_v35  ;;  %v4013_v14 = vmul.f32 0.5, %v3885_v55  ;;  %7368 = vtanh.bf16 %v3737_v16  ;;  %v3738_v57 = vmul.bf16 1056980736, %v3123_v3  ;;  %11810 = vst [vmem:[#allocation87_spill] sm:$0xff] %v9726_v58  ;;  %v9728_v12 = vpop.f32.mrb[127].mxu1 }
 0x2ac   : > { %11811 = vst [vmem:[#allocation88_spill] sm:$0xff] %v9728_v12  ;;  %v7363_v40 = vpop.eup %7362  ;;  %v11813_v29 = vunpack.c.l.bf16 %v11812_v33  ;;  %v11814_v45 = vunpack.c.h.bf16 %v11812_v33  ;;  %v2660_v35 = vadd.f32 %v11815_v59, %v8307_v41  ;;  %v4271_v55 = vmul.f32 %v3631_v39, %v2662_v48  ;;  %v7141_v16 = vld [vmem:[%s8015_s5 + $0x1a0] sm:$0xff]   ;;  %v9737_v3 = vpop.f32.mrb[131].mxu0 }
 0x2ad   : > { %v3227_v1 = vmul.bf16 1056980736, %v3124_v25  ;;  %v3376_v61 = vunpack.c.l.bf16 %v7361_v15  ;;  %v4141_v58 = vadd.f32 0.5, %v4013_v14  ;;  %v3886_v33 = vunpack.c.l.bf16 %v7363_v40  ;;  %2281 = vmatmul.mubr.bf16.gmra.mrb[208].mxu0 %v7141_v16  ;;  %v9743_v25 = vpop.f32.mrb[128].mxu1  ;;  %2954 = vmatmul.mubr.bf16.gmra.mrb[208].mxu1 %v7141_v16 }
 0x2ae   : > { %v4906_v56 = vsub.f32 %v11813_v29, %v4650_v28  ;;  %v4907_v34 = vsub.f32 %v11814_v45, %v4651_v4  ;;  %v4399_v20 = vadd.f32 %v4271_v55, %v2660_v35  ;;  %v4140_v29 = vadd.f32 0.5, %v4012_v19  ;;  %11816 = vst [vmem:[#allocation25_spill] sm:$0xff] %v9743_v25 }
 0x2af   : > { %v3504_v45 = vmul.f32 0.5, %v3376_v61  ;;  %7370 = vtanh.bf16 %v3738_v57  ;;  %v3377_v19 = vunpack.c.h.bf16 %v7361_v15  ;;  %v9749_v61 = vpop.f32.mrb[129].mxu1  ;;  %v2027_v55 = vadd.f32 %v9438_v63, %v8230_v36 }
 0x2b0   : > { %v5034_v30 = vmul.f32 %v4906_v56, %v4138_v27  ;;  %v5035_v23 = vmul.f32 %v4907_v34, %v4139_v42  ;;  %v4504_v39 = vpack.c.bf16 %v4399_v20, %v4398_v31  ;;  %7372 = vtanh.bf16 %v3227_v1  ;;  %v11817_v27 = vld [vmem:[#allocation19_spill] sm:$0xff]  ;;  %v9747_v35 = vpop.f32.mrb[132].mxu0  ;;  %v11818_v31 = vld [vmem:[#allocation42_spill] sm:$0xff] }
 0x2b1   : > { %v2668_v34 = vadd.f32 %v11817_v27, %v8310_v26  ;;  %v3632_v42 = vadd.f32 0.5, %v3504_v45  ;;  %v9755_v1 = vpop.f32.mrb[133].mxu0  ;;  %v3505_v57 = vmul.f32 0.5, %v3377_v19  ;;  %v2023_v56 = vadd.f32 %v9424_v5, %v8230_v36  ;;  %v9781_v19 = vld [vmem:[%s8023_s20 + $0x1a8] sm:$0xff]  }
 0x2b2   : > { %v5162_v59 = vadd.f32 %v5034_v30, %v4650_v28  ;;  %v5163_v48 = vadd.f32 %v5035_v23, %v4651_v4  ;;  %v9751_v14 = vpop.eup %7364  ;;  %v3887_v23 = vunpack.c.h.bf16 %v7363_v40  ;;  %7374 = vtanh.bf16 %v4504_v39  ;;  %v9757_v4 = vpop.f32.mrb[130].mxu1  ;;  %11821 = vst [vmem:[#allocation42_spill] sm:$0xff] %v9781_v19  ;;  %2290 = vmatprep.mubr.bf16.mxu0 %v9781_v19  ;;  %2963 = vmatprep.mubr.bf16.mxu1 %v9781_v19 }
 0x2b3   : > { %v2666_v28 = vadd.f32 %v11818_v31, %v8307_v41  ;;  %11819 = vst [vmem:[#allocation64_spill] sm:$0xff] %v9757_v4  ;;  %v7367_v20 = vpop.eup %7366  ;;  %v4272_v15 = vmul.f32 %v3632_v42, %v2668_v34  ;;  %v9763_v40 = vpop.f32.mrb[134].mxu0  ;;  %v9772_v39 = vadd.f32 %v9430_v62, %v8239_v49  ;;  %v3633_v34 = vadd.f32 0.5, %v3505_v57  ;;  %v11826_v57 = vld [vmem:[#allocation68_spill] sm:$0xff]  ;;  %v7143_v4 = vld [vmem:[%s8015_s5 + $0x1a8] sm:$0xff]  }
 0x2b4   : > { %v6601_v30 = vpack.c.bf16 %v5163_v48, %v5162_v59  ;;  %v9765_v16 = vpop.f32.mrb[131].mxu1  ;;  %v4652_v45 = vunpack.c.l.bf16 %v7367_v20  ;;  %v4653_v59 = vunpack.c.h.bf16 %v7367_v20  ;;  %v2672_v48 = vadd.f32 %v9354_v21, %v8310_v26  ;;  %v9774_v27 = vpop.f32.mrb[135].mxu0  ;;  %v11822_v21 = vld [vmem:[#allocation26_spill] sm:$0xff] }
 0x2b5   : > { %11820 = vst [vmem:[#allocation19_spill] sm:$0xff] %v9765_v16  ;;  %v4400_v5 = vadd.f32 %v4272_v15, %v2666_v28  ;;  %v3126_v63 = vpack.c.bf16 %v2027_v55, %v2023_v56  ;;  %v9778_v42 = vadd.f32 %v9448_v0, %v8239_v49  ;;  %v4014_v31 = vmul.f32 0.5, %v3886_v33  ;;  %2291 = vmatmul.mubr.bf16.gmra.mrb[212].mxu0 %v7143_v4 }
 0x2b6   : > { %6837 = vst [vmem:[%s8518_s30 + $0xa0] sm:$0xff] %v6601_v30   ;;  %v7369_v30 = vpop.eup %7368  ;;  %v4015_v20 = vmul.f32 0.5, %v3887_v23  ;;  %v11823_v12 = vunpack.c.l.bf16 %v11822_v21  ;;  %v11824_v62 = vunpack.c.h.bf16 %v11822_v21  ;;  %v11825_v28 = vpack.c.bf16 %v9711_v53, %v9707_v43  ;;  %2964 = vmatmul.mubr.bf16.gmra.mrb[212].mxu1 %v7143_v4 }
 0x2b7   : > { %v2670_v56 = vadd.f32 %v11826_v57, %v8307_v41  ;;  %v4273_v0 = vmul.f32 %v3633_v34, %v2672_v48  ;;  %v3378_v16 = vunpack.c.l.bf16 %v9751_v14  ;;  %v3888_v21 = vunpack.c.l.bf16 %v7369_v30 }
 0x2b8   : > { %v4908_v22 = vsub.f32 %v11823_v12, %v4652_v45  ;;  %v4909_v6 = vsub.f32 %v11824_v62, %v4653_v59  ;;  %v3739_v15 = vmul.bf16 1056980736, %v11825_v28  ;;  %v9796_v12 = vpop.f32.mrb[132].mxu1  ;;  %v3889_v62 = vunpack.c.h.bf16 %v7369_v30  ;;  %v9799_v53 = vpop.f32.mrb[136].mxu0 }
 0x2b9   : > { %11827 = vst [vmem:[#allocation26_spill] sm:$0xff] %v9796_v12  ;;  %v4401_v43 = vadd.f32 %v4273_v0, %v2670_v56  ;;  %v9801_v28 = vpop.f32.mrb[133].mxu1  ;;  %v3506_v55 = vmul.f32 0.5, %v3378_v16  ;;  %v4143_v30 = vadd.f32 0.5, %v4015_v20  ;;  %v3228_v0 = vmul.bf16 1056980736, %v3126_v63 }
 0x2ba   : > { %v5036_v33 = vmul.f32 %v4908_v22, %v4140_v29  ;;  %v5037_v23 = vmul.f32 %v4909_v6, %v4141_v58  ;;  %11828 = vst [vmem:[#allocation68_spill] sm:$0xff] %v9801_v28  ;;  %v9806_v6 = vpop.f32.mrb[137].mxu0  ;;  %v9808_v22 = vpop.f32.mrb[134].mxu1  ;;  %v4142_v29 = vadd.f32 0.5, %v4014_v31  ;;  %7376 = vtanh.bf16 %v3739_v15 }
 0x2bb   : > { %11829 = vst [vmem:[#allocation89_spill] sm:$0xff] %v9808_v22  ;;  %v9810_v58 = vpop.eup %7370  ;;  %v4505_v56 = vpack.c.bf16 %v4401_v43, %v4400_v5  ;;  %v9814_v16 = vpop.f32.mrb[135].mxu1  ;;  %v3634_v48 = vadd.f32 0.5, %v3506_v55  ;;  %v4016_v5 = vmul.f32 0.5, %v3888_v21  ;;  %v4017_v63 = vmul.f32 0.5, %v3889_v62  ;;  %v11832_v21 = vld [vmem:[#allocation27_spill] sm:$0xff] }
 0x2bc   : > { %v5164_v34 = vadd.f32 %v5036_v33, %v4652_v45  ;;  %v5165_v57 = vadd.f32 %v5037_v23, %v4653_v59  ;;  %v9812_v45 = vpop.f32.mrb[138].mxu0  ;;  %11830 = vst [vmem:[#allocation90_spill] sm:$0xff] %v9814_v16  ;;  %v9816_v59 = vpop.eup %7372  ;;  %v2678_v23 = vadd.f32 %v9382_v52, %v8310_v26  ;;  %v3379_v4 = vunpack.c.h.bf16 %v9751_v14  ;;  %v7145_v16 = vld [vmem:[%s8015_s5 + $0x1b0] sm:$0xff]  }
 0x2bd   : > { %v9820_v25 = vpop.f32.mrb[139].mxu0  ;;  %v7375_v31 = vpop.eup %7374  ;;  %7378 = vtanh.bf16 %v4505_v56  ;;  %v2033_v55 = vadd.f32 %v9475_v10, %v8230_v36  ;;  %v11833_v62 = vunpack.c.l.bf16 %v11832_v21  ;;  %v11834_v56 = vunpack.c.h.bf16 %v11832_v21 }
 0x2be   : > { %v6606_v33 = vpack.c.bf16 %v5165_v57, %v5164_v34  ;;  %v4654_v20 = vunpack.c.l.bf16 %v7375_v31  ;;  %v4655_v43 = vunpack.c.h.bf16 %v7375_v31  ;;  %v2676_v34 = vadd.f32 %v11831_v18, %v8307_v41  ;;  %v9836_v18 = vld [vmem:[%s8023_s20 + $0x1b0] sm:$0xff]  }
 0x2bf   : > { %v4274_v15 = vmul.f32 %v3634_v48, %v2678_v23  ;;  %v3890_v57 = vunpack.c.l.bf16 %v9810_v58  ;;  %7380 = vtanh.bf16 %v3228_v0  ;;  %v3507_v52 = vmul.f32 0.5, %v3379_v4  ;;  %11835 = vst [vmem:[#allocation43_spill] sm:$0xff] %v9836_v18  ;;  %v9838_v48 = vpop.f32.mrb[136].mxu1  ;;  %v11837_v0 = vld [vmem:[#allocation70_spill] sm:$0xff]  ;;  %2300 = vmatprep.mubr.bf16.mxu0 %v9836_v18  ;;  %2973 = vmatprep.mubr.bf16.mxu1 %v9836_v18  ;;  %v544_v18 = vld [vmem:[%s8023_s20 + $0x1d8] sm:$0xff]  }
 0x2c0   : > { %6838 = vst [vmem:[%s8518_s30 + $0xa8] sm:$0xff] %v6606_v33   ;;  %v4910_v22 = vsub.f32 %v11833_v62, %v4654_v20  ;;  %v4911_v14 = vsub.f32 %v11834_v56, %v4655_v43  ;;  %v2037_v31 = vadd.f32 %v9486_v44, %v8230_v36  ;;  %11836 = vst [vmem:[#allocation27_spill] sm:$0xff] %v9838_v48  ;;  %v3380_v48 = vunpack.c.l.bf16 %v9816_v59 }
 0x2c1   : > { %v4402_v33 = vadd.f32 %v4274_v15, %v2676_v34  ;;  %v2682_v23 = vadd.f32 %v11837_v0, %v8310_v26  ;;  %v3635_v4 = vadd.f32 0.5, %v3507_v52  ;;  %v9844_v10 = vadd.f32 %v9480_v60, %v8239_v49  ;;  %v9850_v34 = vpop.f32.mrb[140].mxu0  ;;  %v9852_v15 = vpop.f32.mrb[137].mxu1  ;;  %v11841_v60 = vld [vmem:[#allocation69_spill] sm:$0xff]  ;;  %2301 = vmatmul.mubr.bf16.gmra.mrb[216].mxu0 %v7145_v16  ;;  %2974 = vmatmul.mubr.bf16.gmra.mrb[216].mxu1 %v7145_v16  ;;  %v11845_v16 = vld [vmem:[#allocation76_spill] sm:$0xff] }
 0x2c2   : > { %v9848_v21 = vadd.f32 %v9491_v17, %v8239_v49  ;;  %11838 = vst [vmem:[#allocation70_spill] sm:$0xff] %v9850_v34  ;;  %11839 = vst [vmem:[#allocation91_spill] sm:$0xff] %v9852_v15  ;;  %v5038_v44 = vmul.f32 %v4910_v22, %v4142_v29  ;;  %v5039_v62 = vmul.f32 %v4911_v14, %v4143_v30  ;;  %v9856_v0 = vpop.f32.mrb[141].mxu0  ;;  %v9858_v52 = vpop.f32.mrb[138].mxu1  ;;  %v3891_v22 = vunpack.c.h.bf16 %v9810_v58 }
 0x2c3   : > { %v3128_v56 = vpack.c.bf16 %v2037_v31, %v2033_v55  ;;  %11840 = vst [vmem:[#allocation92_spill] sm:$0xff] %v9858_v52  ;;  %v2680_v12 = vadd.f32 %v11841_v60, %v8307_v41  ;;  %v4275_v28 = vmul.f32 %v3635_v4, %v2682_v23  ;;  %v9864_v34 = vpop.f32.mrb[142].mxu0  ;;  %v9866_v15 = vpop.f32.mrb[139].mxu1  ;;  %v3508_v55 = vmul.f32 0.5, %v3380_v48  ;;  %v11854_v52 = vld [vmem:[#allocation72_spill] sm:$0xff]  ;;  %v11858_v31 = vld [vmem:[#allocation22_spill] sm:$0xff] }
 0x2c4   : > { %v3129_v17 = vpack.c.bf16 %v9848_v21, %v9844_v10  ;;  %11842 = vst [vmem:[#allocation69_spill] sm:$0xff] %v9866_v15  ;;  %v5166_v29 = vadd.f32 %v5038_v44, %v4654_v20  ;;  %v5167_v30 = vadd.f32 %v5039_v62, %v4655_v43  ;;  %v9869_v14 = vpop.f32.mrb[143].mxu0  ;;  %v11843_v23 = vpack.c.bf16 %v9778_v42, %v9772_v39  ;;  %v11860_v15 = vld [vmem:[#allocation71_spill] sm:$0xff] }
 0x2c5   : > { %v4403_v10 = vadd.f32 %v4275_v28, %v2680_v12  ;;  %v4144_v58 = vadd.f32 0.5, %v4016_v5  ;;  %v2688_v43 = vadd.f32 %v9426_v24, %v8310_v26  ;;  %v3636_v48 = vadd.f32 0.5, %v3508_v55  ;;  %v9880_v21 = vpop.eup %7376 }
 0x2c6   : > { %v3740_v4 = vmul.bf16 1056980736, %v11843_v23  ;;  %v6611_v20 = vpack.c.bf16 %v5167_v30, %v5166_v29  ;;  %v4145_v44 = vadd.f32 0.5, %v4017_v63  ;;  %v4018_v62 = vmul.f32 0.5, %v3890_v57  ;;  %v9886_v30 = vpop.f32.mrb[140].mxu1  ;;  %v11848_v23 = vld [vmem:[#allocation51_spill] sm:$0xff] }
 0x2c7   : > { %v4506_v39 = vpack.c.bf16 %v4403_v10, %v4402_v33  ;;  %v3229_v42 = vmul.bf16 1056980736, %v3128_v56  ;;  %v4019_v28 = vmul.f32 0.5, %v3891_v22  ;;  %v2686_v60 = vadd.f32 %v9420_v13, %v8307_v41  ;;  %11844 = vst [vmem:[#allocation93_spill] sm:$0xff] %v9886_v30  ;;  %v9892_v33 = vpop.f32.mrb[141].mxu1  ;;  %v7147_v30 = vld [vmem:[%s8015_s5 + $0x1b8] sm:$0xff]  }
 0x2c8   : > { %v7379_v12 = vpop.eup %7378  ;;  %6839 = vst [vmem:[%s8518_s30 + $0xb0] sm:$0xff] %v6611_v20   ;;  %v4276_v5 = vmul.f32 %v3636_v48, %v2688_v43  ;;  %v3381_v29 = vunpack.c.h.bf16 %v9816_v59  ;;  %7382 = vtanh.bf16 %v3740_v4  ;;  %v2043_v63 = vadd.f32 %v11845_v16, %v8230_v36  ;;  %v9890_v57 = vpop.f32.mrb[144].mxu0  ;;  %11847 = vst [vmem:[#allocation94_spill] sm:$0xff] %v9892_v33  ;;  %v11851_v43 = vld [vmem:[#allocation28_spill] sm:$0xff] }
 0x2c9   : > { %v4656_v24 = vunpack.c.l.bf16 %v7379_v12  ;;  %v4657_v55 = vunpack.c.h.bf16 %v7379_v12  ;;  %11846 = vst [vmem:[#allocation76_spill] sm:$0xff] %v9890_v57  ;;  %7384 = vtanh.bf16 %v4506_v39  ;;  %v2047_v59 = vadd.f32 %v11848_v23, %v8230_v36  ;;  %v9896_v10 = vpop.f32.mrb[145].mxu0  ;;  %v9898_v20 = vpop.f32.mrb[142].mxu1 }
 0x2ca   : > { %v7381_v56 = vpop.eup %7380  ;;  %v4404_v22 = vadd.f32 %v4276_v5, %v2686_v60  ;;  %v3509_v13 = vmul.f32 0.5, %v3381_v29  ;;  %11849 = vst [vmem:[#allocation51_spill] sm:$0xff] %v9896_v10  ;;  %11850 = vst [vmem:[#allocation95_spill] sm:$0xff] %v9898_v20  ;;  %v11852_v4 = vunpack.c.l.bf16 %v11851_v43  ;;  %v11853_v12 = vunpack.c.h.bf16 %v11851_v43  ;;  %v9907_v60 = vld [vmem:[%s8023_s20 + $0x1b8] sm:$0xff]   ;;  %v9909_v5 = vpop.f32.mrb[146].mxu0 }
 0x2cb   : > { %7386 = vtanh.bf16 %v3229_v42  ;;  %v2692_v39 = vadd.f32 %v11854_v52, %v8310_v26  ;;  %11855 = vst [vmem:[#allocation28_spill] sm:$0xff] %v9907_v60  ;;  %11856 = vst [vmem:[#allocation72_spill] sm:$0xff] %v9909_v5  ;;  %v9911_v29 = vpop.f32.mrb[143].mxu1  ;;  %v9915_v7 = vadd.f32 %v11858_v31, %v8239_v49  ;;  %v2049_v43 = vadd.f32 %v9547_v54, %v8239_v49 }
 0x2cc   : > { %v4912_v48 = vsub.f32 %v11852_v4, %v4656_v24  ;;  %v4913_v16 = vsub.f32 %v11853_v12, %v4657_v55  ;;  %11857 = vst [vmem:[#allocation96_spill] sm:$0xff] %v9911_v29  ;;  %v3637_v23 = vadd.f32 0.5, %v3509_v13  ;;  %v3130_v4 = vpack.c.bf16 %v2047_v59, %v2043_v63  ;;  %v9919_v12 = vpop.f32.mrb[147].mxu0  ;;  %2310 = vmatprep.mubr.bf16.mxu0 %v9907_v60 }
 0x2cd   : > { %11859 = vst [vmem:[#allocation22_spill] sm:$0xff] %v9919_v12  ;;  %v3741_v52 = vmul.bf16 1056980736, %v3129_v17  ;;  %v3382_v33 = vunpack.c.l.bf16 %v7381_v56  ;;  %v2690_v10 = vadd.f32 %v11860_v15, %v8307_v41  ;;  %v3131_v13 = vpack.c.bf16 %v2049_v43, %v9915_v7  ;;  %2983 = vmatprep.mubr.bf16.mxu1 %v9907_v60  ;;  %v9929_v17 = vpop.f32.mrb[144].mxu1  ;;  %v11862_v7 = vld [vmem:[#allocation49_spill] sm:$0xff]  ;;  %2311 = vmatmul.mubr.bf16.gmra.mrb[220].mxu0 %v7147_v30  ;;  %v11939_v60 = vld [vmem:[#allocation14_spill] sm:$0xff] }
 0x2ce   : > { %v5040_v42 = vmul.f32 %v4912_v48, %v4144_v58  ;;  %v5041_v20 = vmul.f32 %v4913_v16, %v4145_v44  ;;  %v4277_v29 = vmul.f32 %v3637_v23, %v2692_v39  ;;  %v3230_v57 = vmul.bf16 1056980736, %v3130_v4  ;;  %11861 = vst [vmem:[#allocation71_spill] sm:$0xff] %v9929_v17  ;;  %2984 = vmatmul.mubr.bf16.gmra.mrb[220].mxu1 %v7147_v30  ;;  %v9969_v12 = vld [vmem:[%s8023_s20 + $0x1c0] sm:$0xff]  }
 0x2cf   : > { %v3510_v63 = vmul.f32 0.5, %v3382_v33  ;;  %v4146_v59 = vadd.f32 0.5, %v4018_v62  ;;  %v4147_v15 = vadd.f32 0.5, %v4019_v28  ;;  %v9935_v33 = vpop.f32.mrb[145].mxu1  ;;  %7388 = vtanh.bf16 %v3741_v52  ;;  %2320 = vmatprep.mubr.bf16.mxu0 %v9969_v12  ;;  %2993 = vmatprep.mubr.bf16.mxu1 %v9969_v12 }
 0x2d0   : > { %v5168_v5 = vadd.f32 %v5040_v42, %v4656_v24  ;;  %v5169_v31 = vadd.f32 %v5041_v20, %v4657_v55  ;;  %v4405_v58 = vadd.f32 %v4277_v29, %v2690_v10  ;;  %v2698_v24 = vadd.f32 %v11862_v7, %v8310_v26  ;;  %v9933_v62 = vpop.f32.mrb[148].mxu0  ;;  %11863 = vst [vmem:[#allocation49_spill] sm:$0xff] %v9935_v33  ;;  %v9940_v39 = vpop.f32.mrb[146].mxu1  ;;  %v11877_v33 = vld [vmem:[#allocation74_spill] sm:$0xff] }
 0x2d1   : > { %v3638_v55 = vadd.f32 0.5, %v3510_v63  ;;  %v3892_v10 = vunpack.c.l.bf16 %v9880_v21  ;;  %v3383_v48 = vunpack.c.h.bf16 %v7381_v56  ;;  %v9938_v16 = vpop.f32.mrb[149].mxu0  ;;  %11865 = vst [vmem:[#allocation98_spill] sm:$0xff] %v9940_v39  ;;  %v3893_v28 = vunpack.c.h.bf16 %v9880_v21  ;;  %v9948_v4 = vpop.f32.mrb[147].mxu1  ;;  %v11868_v21 = vld [vmem:[#allocation82_spill] sm:$0xff]  ;;  %v11870_v63 = vld [vmem:[#allocation75_spill] sm:$0xff] }
 0x2d2   : > { %v6616_v44 = vpack.c.bf16 %v5169_v31, %v5168_v5  ;;  %v4507_v20 = vpack.c.bf16 %v4405_v58, %v4404_v22  ;;  %11864 = vst [vmem:[#allocation97_spill] sm:$0xff] %v9938_v16  ;;  %7390 = vtanh.bf16 %v3230_v57  ;;  %v11866_v5 = vld [vmem:[#allocation21_spill] sm:$0xff]  ;;  %v9946_v23 = vpop.f32.mrb[150].mxu0  ;;  %v2053_v22 = vadd.f32 %v9564_v2, %v8230_v36  ;;  %11873 = vst [vmem:[#allocation75_spill] sm:$0xff] %v9969_v12 }
 0x2d3   : > { %v2696_v30 = vadd.f32 %v11866_v5, %v8307_v41  ;;  %v4278_v29 = vmul.f32 %v3638_v55, %v2698_v24  ;;  %11867 = vst [vmem:[#allocation21_spill] sm:$0xff] %v9948_v4  ;;  %v9950_v43 = vpop.eup %7382  ;;  %v3511_v56 = vmul.f32 0.5, %v3383_v48  ;;  %v2057_v42 = vadd.f32 %v11868_v21, %v8230_v36  ;;  %v9956_v57 = vpop.f32.mrb[151].mxu0  ;;  %v11872_v24 = vld [vmem:[#allocation84_spill] sm:$0xff] }
 0x2d4   : > { %6840 = vst [vmem:[%s8518_s30 + $0xb8] sm:$0xff] %v6616_v44   ;;  %7392 = vtanh.bf16 %v4507_v20  ;;  %11869 = vst [vmem:[#allocation82_spill] sm:$0xff] %v9956_v57  ;;  %v7385_v52 = vpop.eup %7384  ;;  %v2702_v58 = vadd.f32 %v11870_v63, %v8310_v26  ;;  %v11871_v44 = vld [vmem:[#allocation52_spill] sm:$0xff]  ;;  %v9966_v55 = vadd.f32 %v11872_v24, %v8239_v49  ;;  %v3742_v54 = vmul.bf16 1056980736, %v3131_v13 }
 0x2d5   : > { %v4406_v31 = vadd.f32 %v4278_v29, %v2696_v30  ;;  %v9962_v7 = vadd.f32 %v11871_v44, %v8239_v49  ;;  %v4658_v20 = vunpack.c.l.bf16 %v7385_v52  ;;  %v4659_v48 = vunpack.c.h.bf16 %v7385_v52  ;;  %v11874_v44 = vld [vmem:[#allocation29_spill] sm:$0xff] }
 0x2d6   : > { %v7387_v2 = vpop.eup %7386  ;;  %v3639_v5 = vadd.f32 0.5, %v3511_v56  ;;  %v3132_v21 = vpack.c.bf16 %v2057_v42, %v2053_v22  ;;  %v4020_v30 = vmul.f32 0.5, %v3892_v10  ;;  %v4021_v29 = vmul.f32 0.5, %v3893_v28  ;;  %v7149_v56 = vld [vmem:[%s8015_s5 + $0x1c0] sm:$0xff]   ;;  %v9980_v22 = vpop.f32.mrb[148].mxu1 }
 0x2d7   : > { %v11875_v8 = vunpack.c.l.bf16 %v11874_v44  ;;  %v11876_v4 = vunpack.c.h.bf16 %v11874_v44  ;;  %v2700_v17 = vadd.f32 %v11877_v33, %v8307_v41  ;;  %11878 = vst [vmem:[#allocation52_spill] sm:$0xff] %v9980_v22  ;;  %v3384_v13 = vunpack.c.l.bf16 %v7387_v2  ;;  %v9985_v63 = vpop.f32.mrb[149].mxu1  ;;  %2321 = vmatmul.mubr.bf16.gmra.mrb[224].mxu0 %v7149_v56  ;;  %2994 = vmatmul.mubr.bf16.gmra.mrb[224].mxu1 %v7149_v56 }
 0x2d8   : > { %v4279_v52 = vmul.f32 %v3639_v5, %v2702_v58  ;;  %v3231_v28 = vmul.bf16 1056980736, %v3132_v21  ;;  %v9983_v42 = vpop.f32.mrb[152].mxu0  ;;  %11879 = vst [vmem:[#allocation84_spill] sm:$0xff] %v9985_v63  ;;  %v9990_v33 = vpop.f32.mrb[150].mxu1  ;;  %v4148_v58 = vadd.f32 0.5, %v4020_v30  ;;  %7394 = vtanh.bf16 %v3742_v54 }
 0x2d9   : > { %v4914_v39 = vsub.f32 %v11875_v8, %v4658_v20  ;;  %v4915_v24 = vsub.f32 %v11876_v4, %v4659_v48  ;;  %v3894_v8 = vunpack.c.l.bf16 %v9950_v43  ;;  %v9988_v16 = vpop.f32.mrb[153].mxu0  ;;  %11880 = vst [vmem:[#allocation29_spill] sm:$0xff] %v9990_v33  ;;  %v4149_v5 = vadd.f32 0.5, %v4021_v29  ;;  %v9996_v10 = vpop.f32.mrb[151].mxu1  ;;  %v11883_v54 = vld [vmem:[#allocation77_spill] sm:$0xff]  ;;  %v7151_v63 = vld [vmem:[%s8015_s5 + $0x1c8] sm:$0xff]  }
 0x2da   : > { %v4407_v4 = vadd.f32 %v4279_v52, %v2700_v17  ;;  %v3512_v22 = vmul.f32 0.5, %v3384_v13  ;;  %v9994_v21 = vpop.f32.mrb[154].mxu0  ;;  %11881 = vst [vmem:[#allocation74_spill] sm:$0xff] %v9996_v10  ;;  %v10001_v30 = vpop.eup %7388  ;;  %7396 = vtanh.bf16 %v3231_v28  ;;  %v2708_v29 = vadd.f32 %v11883_v54, %v8310_v26 }
 0x2db   : > { %v5042_v57 = vmul.f32 %v4914_v39, %v4146_v59  ;;  %v5043_v44 = vmul.f32 %v4915_v24, %v4147_v15  ;;  %v3895_v59 = vunpack.c.h.bf16 %v9950_v43  ;;  %v9999_v24 = vpop.f32.mrb[155].mxu0  ;;  %v3385_v13 = vunpack.c.h.bf16 %v7387_v2 }
 0x2dc   : > { %v4508_v39 = vpack.c.bf16 %v4407_v4, %v4406_v31  ;;  %11882 = vst [vmem:[#allocation99_spill] sm:$0xff] %v9999_v24  ;;  %v3640_v52 = vadd.f32 0.5, %v3512_v22  ;;  %v4022_v10 = vmul.f32 0.5, %v3894_v8  ;;  %v2063_v28 = vadd.f32 %v9616_v46, %v8230_v36  ;;  %v11885_v8 = vld [vmem:[#allocation79_spill] sm:$0xff] }
 0x2dd   : > { %v5170_v15 = vadd.f32 %v5042_v57, %v4658_v20  ;;  %v5171_v17 = vadd.f32 %v5043_v44, %v4659_v48  ;;  %v10005_v33 = vpop.eup %7390  ;;  %v11884_v57 = vld [vmem:[#allocation50_spill] sm:$0xff]  ;;  %v3513_v44 = vmul.f32 0.5, %v3385_v13  ;;  %v2067_v22 = vadd.f32 %v9628_v50, %v8230_v36 }
 0x2de   : > { %7398 = vtanh.bf16 %v4508_v39  ;;  %v2706_v31 = vadd.f32 %v11884_v57, %v8307_v41  ;;  %v4280_v48 = vmul.f32 %v3640_v52, %v2708_v29  ;;  %v2712_v4 = vadd.f32 %v11885_v8, %v8310_v26  ;;  %v540_v50 = vld [vmem:[%s8023_s20 + $0x1c8] sm:$0xff]  }
 0x2df   : > { %v6621_v43 = vpack.c.bf16 %v5171_v17, %v5170_v15  ;;  %v7393_v20 = vpop.eup %7392  ;;  %v10018_v15 = vadd.f32 %v9624_v37, %v8239_v49  ;;  %v10020_v17 = vpop.f32.mrb[152].mxu1  ;;  %v3641_v54 = vadd.f32 0.5, %v3513_v44  ;;  %v3134_v29 = vpack.c.bf16 %v2067_v22, %v2063_v28  ;;  %v11889_v57 = vld [vmem:[#allocation30_spill] sm:$0xff]  ;;  %2330 = vmatprep.mubr.bf16.mxu0 %v540_v50  ;;  %3003 = vmatprep.mubr.bf16.mxu1 %v540_v50 }
 0x2e0   : > { %v4660_v2 = vunpack.c.l.bf16 %v7393_v20  ;;  %v4661_v56 = vunpack.c.h.bf16 %v7393_v20  ;;  %11886 = vst [vmem:[#allocation77_spill] sm:$0xff] %v10020_v17  ;;  %v4408_v39 = vadd.f32 %v4280_v48, %v2706_v31  ;;  %v10024_v46 = vadd.f32 %v9639_v47, %v8239_v49  ;;  %v10027_v52 = vpop.f32.mrb[156].mxu0  ;;  %v10029_v13 = vpop.f32.mrb[153].mxu1  ;;  %v11895_v22 = vld [vmem:[#allocation78_spill] sm:$0xff]  ;;  %2331 = vmatmul.mubr.bf16.gmra.mrb[228].mxu0 %v7151_v63  ;;  %3004 = vmatmul.mubr.bf16.gmra.mrb[228].mxu1 %v7151_v63 }
 0x2e1   : > { %6841 = vst [vmem:[%s8518_s30 + $0xc0] sm:$0xff] %v6621_v43   ;;  %11887 = vst [vmem:[#allocation50_spill] sm:$0xff] %v10027_v52  ;;  %v4023_v43 = vmul.f32 0.5, %v3895_v59  ;;  %v11890_v20 = vunpack.c.l.bf16 %v11889_v57  ;;  %v11891_v8 = vunpack.c.h.bf16 %v11889_v57  ;;  %v11892_v31 = vpack.c.bf16 %v9966_v55, %v9962_v7  ;;  %v10038_v44 = vpop.f32.mrb[157].mxu0  ;;  %v10040_v47 = vpop.f32.mrb[154].mxu1 }
 0x2e2   : > { %11888 = vst [vmem:[#allocation79_spill] sm:$0xff] %v10029_v13  ;;  %11893 = vst [vmem:[#allocation30_spill] sm:$0xff] %v10038_v44  ;;  %v3896_v28 = vunpack.c.l.bf16 %v10001_v30  ;;  %v2710_v13 = vadd.f32 %v11895_v22, %v8307_v41  ;;  %v4281_v59 = vmul.f32 %v3641_v54, %v2712_v4  ;;  %v10048_v57 = vpop.f32.mrb[158].mxu0  ;;  %v3897_v52 = vunpack.c.h.bf16 %v10001_v30 }
 0x2e3   : > { %v4916_v37 = vsub.f32 %v11890_v20, %v4660_v2  ;;  %v4917_v17 = vsub.f32 %v11891_v8, %v4661_v56  ;;  %v3743_v48 = vmul.bf16 1056980736, %v11892_v31  ;;  %11894 = vst [vmem:[#allocation100_spill] sm:$0xff] %v10040_v47  ;;  %11896 = vst [vmem:[#allocation78_spill] sm:$0xff] %v10048_v57  ;;  %v10050_v8 = vpop.f32.mrb[155].mxu1  ;;  %v3386_v31 = vunpack.c.l.bf16 %v10005_v33  ;;  %v10053_v44 = vpop.f32.mrb[159].mxu0 }
 0x2e4   : > { %11897 = vst [vmem:[#allocation101_spill] sm:$0xff] %v10050_v8  ;;  %v4409_v54 = vadd.f32 %v4281_v59, %v2710_v13  ;;  %v10058_v22 = vpop.eup %7394  ;;  %v4024_v30 = vmul.f32 0.5, %v3896_v28  ;;  %v11898_v13 = vld [vmem:[#allocation80_spill] sm:$0xff] }
 0x2e5   : > { %v5044_v7 = vmul.f32 %v4916_v37, %v4148_v58  ;;  %v5045_v55 = vmul.f32 %v4917_v17, %v4149_v5  ;;  %7400 = vtanh.bf16 %v3743_v48  ;;  %v3514_v57 = vmul.f32 0.5, %v3386_v31  ;;  %v10060_v47 = vpop.eup %7396 }
 0x2e6   : > { %v4150_v58 = vadd.f32 0.5, %v4022_v10  ;;  %v4151_v5 = vadd.f32 0.5, %v4023_v43  ;;  %v4509_v17 = vpack.c.bf16 %v4409_v54, %v4408_v39  ;;  %v3232_v37 = vmul.bf16 1056980736, %v3134_v29  ;;  %v11901_v43 = vld [vmem:[#allocation53_spill] sm:$0xff] }
 0x2e7   : > { %v5172_v20 = vadd.f32 %v5044_v7, %v4660_v2  ;;  %v5173_v24 = vadd.f32 %v5045_v55, %v4661_v56  ;;  %v2718_v59 = vadd.f32 %v11898_v13, %v8310_v26  ;;  %v3642_v2 = vadd.f32 0.5, %v3514_v57  ;;  %v10064_v56 = vpop.f32.mrb[156].mxu1 }
 0x2e8   : > { %11899 = vst [vmem:[#allocation80_spill] sm:$0xff] %v10064_v56  ;;  %v4025_v7 = vmul.f32 0.5, %v3897_v52  ;;  %v3898_v10 = vunpack.c.l.bf16 %v10058_v22  ;;  %7402 = vtanh.bf16 %v4509_v17  ;;  %v3387_v39 = vunpack.c.h.bf16 %v10005_v33  ;;  %v10068_v29 = vpop.f32.mrb[160].mxu0  ;;  %v10070_v63 = vpop.f32.mrb[157].mxu1  ;;  %v11905_v17 = vld [vmem:[#allocation31_spill] sm:$0xff] }
 0x2e9   : > { %v6626_v4 = vpack.c.bf16 %v5173_v24, %v5172_v20  ;;  %v7399_v48 = vpop.eup %7398  ;;  %11900 = vst [vmem:[#allocation102_spill] sm:$0xff] %v10070_v63  ;;  %v2716_v28 = vadd.f32 %v11901_v43, %v8307_v41  ;;  %v4282_v20 = vmul.f32 %v3642_v2, %v2718_v59  ;;  %v10075_v57 = vpop.f32.mrb[161].mxu0  ;;  %v3899_v55 = vunpack.c.h.bf16 %v10058_v22 }
 0x2ea   : > { %v4662_v50 = vunpack.c.l.bf16 %v7399_v48  ;;  %v4663_v24 = vunpack.c.h.bf16 %v7399_v48  ;;  %11902 = vst [vmem:[#allocation53_spill] sm:$0xff] %v10075_v57  ;;  %v10077_v52 = vpop.f32.mrb[158].mxu1  ;;  %7404 = vtanh.bf16 %v3232_v37  ;;  %v3515_v33 = vmul.f32 0.5, %v3387_v39  ;;  %v10082_v54 = vpop.f32.mrb[162].mxu0  ;;  %v542_v37 = vld [vmem:[%s8023_s20 + $0x1d0] sm:$0xff]  }
 0x2eb   : > { %6842 = vst [vmem:[%s8518_s30 + $0xc8] sm:$0xff] %v6626_v4   ;;  %11903 = vst [vmem:[#allocation103_spill] sm:$0xff] %v10077_v52  ;;  %v2073_v31 = vadd.f32 %v9666_v51, %v8230_v36  ;;  %v10084_v4 = vpop.f32.mrb[159].mxu1  ;;  %v11906_v13 = vunpack.c.l.bf16 %v11905_v17  ;;  %v11907_v59 = vunpack.c.h.bf16 %v11905_v17  ;;  %v4410_v43 = vadd.f32 %v4282_v20, %v2716_v28  ;;  %v10093_v39 = vpop.f32.mrb[163].mxu0  ;;  %v11909_v51 = vld [vmem:[#allocation83_spill] sm:$0xff]  ;;  %2340 = vmatprep.mubr.bf16.mxu0 %v542_v37 }
 0x2ec   : > { %11904 = vst [vmem:[#allocation104_spill] sm:$0xff] %v10084_v4  ;;  %v2077_v22 = vadd.f32 %v9678_v9, %v8230_v36  ;;  %11908 = vst [vmem:[#allocation31_spill] sm:$0xff] %v10093_v39  ;;  %v2722_v19 = vadd.f32 %v11909_v51, %v8310_v26  ;;  %v3643_v52 = vadd.f32 0.5, %v3515_v33  ;;  %v10099_v56 = vadd.f32 %v9674_v32, %v8239_v49  ;;  %v11910_v4 = vld [vmem:[#allocation81_spill] sm:$0xff] }
 0x2ed   : > { %v4918_v48 = vsub.f32 %v11906_v13, %v4662_v50  ;;  %v4919_v2 = vsub.f32 %v11907_v59, %v4663_v24  ;;  %v10103_v13 = vadd.f32 %v9686_v38, %v8239_v49  ;;  %v3388_v9 = vunpack.c.l.bf16 %v10060_v47  ;;  %v7153_v59 = vld [vmem:[%s8015_s5 + $0x1d0] sm:$0xff]   ;;  %v10112_v38 = vpop.f32.mrb[160].mxu1  ;;  %3013 = vmatprep.mubr.bf16.mxu1 %v542_v37 }
 0x2ee   : > { %v3136_v20 = vpack.c.bf16 %v2077_v22, %v2073_v31  ;;  %v2720_v63 = vadd.f32 %v11910_v4, %v8307_v41  ;;  %v4283_v8 = vmul.f32 %v3643_v52, %v2722_v19  ;;  %11911 = vst [vmem:[#allocation83_spill] sm:$0xff] %v10112_v38  ;;  %v10122_v52 = vpop.f32.mrb[161].mxu1  ;;  %2341 = vmatmul.mubr.bf16.gmra.mrb[232].mxu0 %v7153_v59 }
 0x2ef   : > { %v5046_v17 = vmul.f32 %v4918_v48, %v4150_v58  ;;  %v5047_v28 = vmul.f32 %v4919_v2, %v4151_v5  ;;  %v3137_v33 = vpack.c.bf16 %v10103_v13, %v10099_v56  ;;  %v3516_v57 = vmul.f32 0.5, %v3388_v9  ;;  %11913 = vst [vmem:[#allocation81_spill] sm:$0xff] %v10122_v52  ;;  %v11914_v2 = vld [vmem:[#allocation67_spill] sm:$0xff]  ;;  %3014 = vmatmul.mubr.bf16.gmra.mrb[232].mxu1 %v7153_v59 }
 0x2f0   : > { %v10114_v58 = vpop.eup %7400  ;;  %v4152_v5 = vadd.f32 0.5, %v4024_v30  ;;  %v11912_v48 = vpack.c.bf16 %v10024_v46, %v10018_v15  ;;  %v4411_v19 = vadd.f32 %v4283_v8, %v2720_v63  ;;  %v10120_v56 = vpop.f32.mrb[164].mxu0  ;;  %v2728_v22 = vadd.f32 %v11914_v2, %v8310_v26  ;;  %v11918_v2 = vld [vmem:[#allocation87_spill] sm:$0xff]  ;;  %2350 = vmatprep.mubr.bf16.mxu0 %v544_v18  ;;  %3023 = vmatprep.mubr.bf16.mxu1 %v544_v18 }
 0x2f1   : > { %v5174_v51 = vadd.f32 %v5046_v17, %v4662_v50  ;;  %v5175_v39 = vadd.f32 %v5047_v28, %v4663_v24  ;;  %v4153_v50 = vadd.f32 0.5, %v4025_v7  ;;  %v3644_v30 = vadd.f32 0.5, %v3516_v57  ;;  %v10126_v13 = vpop.f32.mrb[165].mxu0  ;;  %v10128_v15 = vpop.f32.mrb[162].mxu1  ;;  %v11917_v57 = vld [vmem:[#allocation54_spill] sm:$0xff] }
 0x2f2   : > { %v3744_v4 = vmul.bf16 1056980736, %v11912_v48  ;;  %11915 = vst [vmem:[#allocation67_spill] sm:$0xff] %v10128_v15  ;;  %v4026_v46 = vmul.f32 0.5, %v3898_v10  ;;  %v4027_v8 = vmul.f32 0.5, %v3899_v55  ;;  %v4510_v63 = vpack.c.bf16 %v4411_v19, %v4410_v43  ;;  %v10130_v17 = vpop.f32.mrb[166].mxu0 }
 0x2f3   : > { %v6631_v24 = vpack.c.bf16 %v5175_v39, %v5174_v51  ;;  %v3233_v37 = vmul.bf16 1056980736, %v3136_v20  ;;  %v10132_v28 = vpop.f32.mrb[163].mxu1  ;;  %v7403_v7 = vpop.eup %7402  ;;  %v3900_v39 = vunpack.c.l.bf16 %v10114_v58  ;;  %v2726_v9 = vadd.f32 %v11917_v57, %v8307_v41 }
 0x2f4   : > { %11916 = vst [vmem:[#allocation105_spill] sm:$0xff] %v10132_v28  ;;  %v4284_v59 = vmul.f32 %v3644_v30, %v2728_v22  ;;  %v3389_v51 = vunpack.c.h.bf16 %v10060_v47  ;;  %v10139_v48 = vpop.f32.mrb[167].mxu0  ;;  %v4664_v10 = vunpack.c.l.bf16 %v7403_v7  ;;  %v4665_v55 = vunpack.c.h.bf16 %v7403_v7  ;;  %v11919_v22 = vld [vmem:[#allocation32_spill] sm:$0xff] }
 0x2f5   : > { %6843 = vst [vmem:[%s8518_s30 + $0xd0] sm:$0xff] %v6631_v24   ;;  %7406 = vtanh.bf16 %v3744_v4  ;;  %v2083_v43 = vadd.f32 %v9713_v11, %v8230_v36  ;;  %v7405_v20 = vpop.eup %7404  ;;  %v2087_v57 = vadd.f32 %v11918_v2, %v8230_v36  ;;  %v11920_v30 = vunpack.c.l.bf16 %v11919_v22  ;;  %v11922_v4 = vld [vmem:[#allocation59_spill] sm:$0xff]  ;;  %v10156_v2 = vpop.f32.mrb[164].mxu1 }
 0x2f6   : > { %7408 = vtanh.bf16 %v4510_v63  ;;  %v4412_v19 = vadd.f32 %v4284_v59, %v2726_v9  ;;  %v3517_v24 = vmul.f32 0.5, %v3389_v51  ;;  %v11921_v47 = vunpack.c.h.bf16 %v11919_v22  ;;  %v11923_v63 = vld [vmem:[#allocation85_spill] sm:$0xff]  ;;  %11924 = vst [vmem:[#allocation54_spill] sm:$0xff] %v10156_v2  ;;  %v10161_v52 = vpop.f32.mrb[165].mxu1 }
 0x2f7   : > { %v4920_v31 = vsub.f32 %v11920_v30, %v4664_v10  ;;  %7410 = vtanh.bf16 %v3233_v37  ;;  %v2732_v7 = vadd.f32 %v11922_v4, %v8310_v26  ;;  %v2085_v9 = vadd.f32 %v11923_v63, %v8239_v49  ;;  %11926 = vst [vmem:[#allocation32_spill] sm:$0xff] %v10161_v52 }
 0x2f8   : > { %v4921_v32 = vsub.f32 %v11921_v47, %v4665_v55  ;;  %v3645_v11 = vadd.f32 0.5, %v3517_v24  ;;  %v3138_v59 = vpack.c.bf16 %v2087_v57, %v2083_v43  ;;  %v2089_v51 = vadd.f32 %v9737_v3, %v8239_v49  ;;  %v7155_v47 = vld [vmem:[%s8015_s5 + $0x1d8] sm:$0xff]   ;;  %v10159_v37 = vpop.f32.mrb[168].mxu0  ;;  %v11927_v24 = vld [vmem:[#allocation17_spill] sm:$0xff]  ;;  %v10167_v57 = vpop.f32.mrb[166].mxu1 }
 0x2f9   : > { %v5048_v15 = vmul.f32 %v4920_v31, %v4152_v5  ;;  %v3745_v28 = vmul.bf16 1056980736, %v3137_v33  ;;  %v3390_v22 = vunpack.c.l.bf16 %v7405_v20  ;;  %11925 = vst [vmem:[#allocation87_spill] sm:$0xff] %v10159_v37  ;;  %v2730_v4 = vadd.f32 %v11927_v24, %v8307_v41  ;;  %v10165_v43 = vpop.f32.mrb[169].mxu0  ;;  %v10171_v31 = vpop.f32.mrb[167].mxu1  ;;  %2351 = vmatmul.mubr.bf16.gmra.mrb[236].mxu0 %v7155_v47  ;;  %3024 = vmatmul.mubr.bf16.gmra.mrb[236].mxu1 %v7155_v47  ;;  %v11932_v47 = vld [vmem:[#allocation60_spill] sm:$0xff] }
 0x2fa   : > { %v5049_v30 = vmul.f32 %v4921_v32, %v4153_v50  ;;  %v4285_v38 = vmul.f32 %v3645_v11, %v2732_v7  ;;  %v3139_v63 = vpack.c.bf16 %v2089_v51, %v2085_v9  ;;  %v3234_v5 = vmul.bf16 1056980736, %v3138_v59  ;;  %v10169_v33 = vpop.f32.mrb[170].mxu0  ;;  %11928 = vst [vmem:[#allocation59_spill] sm:$0xff] %v10171_v31 }
 0x2fb   : > { %v5176_v3 = vadd.f32 %v5048_v15, %v4664_v10  ;;  %v3518_v32 = vmul.f32 0.5, %v3390_v22  ;;  %v4154_v50 = vadd.f32 0.5, %v4026_v46  ;;  %v4155_v37 = vadd.f32 0.5, %v4027_v8  ;;  %v10174_v7 = vpop.f32.mrb[171].mxu0  ;;  %v11929_v10 = vld [vmem:[#allocation61_spill] sm:$0xff] }
 0x2fc   : > { %v5177_v2 = vadd.f32 %v5049_v30, %v4665_v55  ;;  %v4413_v24 = vadd.f32 %v4285_v38, %v2730_v4  ;;  %v3901_v11 = vunpack.c.h.bf16 %v10114_v58  ;;  %v2738_v55 = vadd.f32 %v11929_v10, %v8310_v26  ;;  %v11930_v38 = vld [vmem:[#allocation24_spill] sm:$0xff]  ;;  %v546_v10 = vld [vmem:[%s8023_s20 + $0x1e0] sm:$0xff]  }
 0x2fd   : > { %v3646_v9 = vadd.f32 0.5, %v3518_v32  ;;  %v4028_v59 = vmul.f32 0.5, %v3900_v39  ;;  %7412 = vtanh.bf16 %v3745_v28  ;;  %v3391_v8 = vunpack.c.h.bf16 %v7405_v20  ;;  %v10186_v28 = vpop.f32.mrb[168].mxu1  ;;  %2360 = vmatprep.mubr.bf16.mxu0 %v546_v10  ;;  %3033 = vmatprep.mubr.bf16.mxu1 %v546_v10 }
 0x2fe   : > { %v6636_v15 = vpack.c.bf16 %v5177_v2, %v5176_v3  ;;  %v4511_v46 = vpack.c.bf16 %v4413_v24, %v4412_v19  ;;  %7414 = vtanh.bf16 %v3234_v5  ;;  %v2736_v18 = vadd.f32 %v11930_v38, %v8307_v41  ;;  %11931 = vst [vmem:[#allocation85_spill] sm:$0xff] %v10186_v28  ;;  %v10194_v5 = vpop.f32.mrb[169].mxu1 }
 0x2ff   : > { %v3746_v51 = vmul.bf16 1056980736, %v3139_v63  ;;  %v4286_v30 = vmul.f32 %v3646_v9, %v2738_v55  ;;  %v3519_v58 = vmul.f32 0.5, %v3391_v8  ;;  %v2093_v2 = vadd.f32 %v9747_v35, %v8230_v36  ;;  %11933 = vst [vmem:[#allocation17_spill] sm:$0xff] %v10194_v5  ;;  %v10197_v55 = vpop.f32.mrb[170].mxu1 }
 0x300   : > { %6844 = vst [vmem:[%s8518_s30 + $0xd8] sm:$0xff] %v6636_v15   ;;  %v7407_v22 = vpop.eup %7406  ;;  %7416 = vtanh.bf16 %v4511_v46  ;;  %v2097_v39 = vadd.f32 %v9763_v40, %v8230_v36  ;;  %v2742_v4 = vadd.f32 %v11932_v47, %v8310_v26  ;;  %v2095_v63 = vadd.f32 %v9755_v1, %v8239_v49  ;;  %11934 = vst [vmem:[#allocation61_spill] sm:$0xff] %v10197_v55  ;;  %v11936_v1 = vld [vmem:[#allocation33_spill] sm:$0xff] }
 0x301   : > { %v7409_v20 = vpop.eup %7408  ;;  %v4414_v19 = vadd.f32 %v4286_v30, %v2736_v18  ;;  %v2099_v3 = vadd.f32 %v9774_v27, %v8239_v49  ;;  %v3647_v40 = vadd.f32 0.5, %v3519_v58  ;;  %v4029_v9 = vmul.f32 0.5, %v3901_v11  ;;  %v10199_v18 = vpop.f32.mrb[171].mxu1 }
 0x302   : > { %v7411_v32 = vpop.eup %7410  ;;  %v4666_v35 = vunpack.c.l.bf16 %v7409_v20  ;;  %v4667_v24 = vunpack.c.h.bf16 %v7409_v20  ;;  %v3140_v15 = vpack.c.bf16 %v2097_v39, %v2093_v2  ;;  %v3902_v46 = vunpack.c.l.bf16 %v7407_v22  ;;  %11935 = vst [vmem:[#allocation24_spill] sm:$0xff] %v10199_v18  ;;  %v7157_v2 = vld [vmem:[%s8015_s5 + $0x1e0] sm:$0xff]  }
 0x303   : > { %v3903_v8 = vunpack.c.h.bf16 %v7407_v22  ;;  %v3141_v38 = vpack.c.bf16 %v2099_v3, %v2095_v63  ;;  %v11937_v30 = vunpack.c.l.bf16 %v11936_v1  ;;  %v11938_v47 = vunpack.c.h.bf16 %v11936_v1  ;;  %2361 = vmatmul.mubr.bf16.gmra.mrb[240].mxu0 %v7157_v2  ;;  %3034 = vmatmul.mubr.bf16.gmra.mrb[240].mxu1 %v7157_v2 }
 0x304   : > { %v2740_v20 = vadd.f32 %v11939_v60, %v8307_v41  ;;  %v4287_v58 = vmul.f32 %v3647_v40, %v2742_v4  ;;  %7418 = vtanh.bf16 %v3746_v51  ;;  %v3235_v39 = vmul.bf16 1056980736, %v3140_v15  ;;  %v11940_v51 = vld [vmem:[#allocation18_spill] sm:$0xff]  ;;  %v11941_v15 = vld [vmem:[#allocation47_spill] sm:$0xff] }
 0x305   : > { %v4922_v27 = vsub.f32 %v11937_v30, %v4666_v35  ;;  %v4923_v52 = vsub.f32 %v11938_v47, %v4667_v24  ;;  %v3392_v55 = vunpack.c.l.bf16 %v7411_v32  ;;  %v4156_v18 = vadd.f32 0.5, %v4028_v59 }
 0x306   : > { %v4415_v3 = vadd.f32 %v4287_v58, %v2740_v20  ;;  %v4157_v5 = vadd.f32 0.5, %v4029_v9  ;;  %v4030_v28 = vmul.f32 0.5, %v3902_v46  ;;  %v4031_v1 = vmul.f32 0.5, %v3903_v8 }
 0x307   : > { %v5050_v22 = vmul.f32 %v4922_v27, %v4154_v50  ;;  %v5051_v63 = vmul.f32 %v4923_v52, %v4155_v37  ;;  %v3520_v30 = vmul.f32 0.5, %v3392_v55  ;;  %7420 = vtanh.bf16 %v3235_v39 }
 0x308   : > { %v4512_v60 = vpack.c.bf16 %v4415_v3, %v4414_v19  ;;  %v7413_v4 = vpop.eup %7412  ;;  %v2748_v40 = vadd.f32 %v11940_v51, %v8310_v26  ;;  %v3393_v52 = vunpack.c.h.bf16 %v7411_v32  ;;  %v2746_v10 = vadd.f32 %v11941_v15, %v8307_v41  ;;  %v11946_v51 = vld [vmem:[#allocation86_spill] sm:$0xff] }
 0x309   : > { %v5178_v47 = vadd.f32 %v5050_v22, %v4666_v35  ;;  %v5179_v31 = vadd.f32 %v5051_v63, %v4667_v24  ;;  %v3648_v50 = vadd.f32 0.5, %v3520_v30  ;;  %v10211_v37 = vpop.eup %7414  ;;  %v3747_v35 = vmul.bf16 1056980736, %v3141_v38 }
 0x30a   : > { %7422 = vtanh.bf16 %v4512_v60  ;;  %v3521_v55 = vmul.f32 0.5, %v3393_v52  ;;  %v2103_v9 = vadd.f32 %v9799_v53, %v8230_v36  ;;  %v2107_v46 = vadd.f32 %v9812_v45, %v8230_v36  ;;  %v548_v53 = vld [vmem:[%s8023_s20 + $0x1e8] sm:$0xff]  }
 0x30b   : > { %v6641_v59 = vpack.c.bf16 %v5179_v31, %v5178_v47  ;;  %v7417_v19 = vpop.eup %7416  ;;  %v4288_v24 = vmul.f32 %v3648_v50, %v2748_v40  ;;  %v11942_v31 = vld [vmem:[#allocation88_spill] sm:$0xff]  ;;  %v2105_v20 = vadd.f32 %v9806_v6, %v8239_v49  ;;  %v2109_v39 = vadd.f32 %v9820_v25, %v8239_v49  ;;  %v11943_v45 = vld [vmem:[#allocation34_spill] sm:$0xff]  ;;  %2370 = vmatprep.mubr.bf16.mxu0 %v548_v53 }
 0x30c   : > { %v4668_v32 = vunpack.c.l.bf16 %v7417_v19  ;;  %v4669_v8 = vunpack.c.h.bf16 %v7417_v19  ;;  %v2752_v27 = vadd.f32 %v11942_v31, %v8310_v26  ;;  %v3649_v58 = vadd.f32 0.5, %v3521_v55  ;;  %v7159_v52 = vld [vmem:[%s8015_s5 + $0x1e8] sm:$0xff]   ;;  %3043 = vmatprep.mubr.bf16.mxu1 %v548_v53  ;;  %v11947_v53 = vld [vmem:[#allocation25_spill] sm:$0xff] }
 0x30d   : > { %6845 = vst [vmem:[%s8518_s30 + $0xe0] sm:$0xff] %v6641_v59   ;;  %v4416_v38 = vadd.f32 %v4288_v24, %v2746_v10  ;;  %v3142_v2 = vpack.c.bf16 %v2107_v46, %v2103_v9  ;;  %v3904_v22 = vunpack.c.l.bf16 %v7413_v4  ;;  %v3905_v63 = vunpack.c.h.bf16 %v7413_v4  ;;  %2371 = vmatmul.mubr.bf16.gmra.mrb[244].mxu0 %v7159_v52  ;;  %3044 = vmatmul.mubr.bf16.gmra.mrb[244].mxu1 %v7159_v52 }
 0x30e   : > { %v11944_v3 = vunpack.c.l.bf16 %v11943_v45  ;;  %v11945_v47 = vunpack.c.h.bf16 %v11943_v45  ;;  %7424 = vtanh.bf16 %v3747_v35  ;;  %v2750_v40 = vadd.f32 %v11946_v51, %v8307_v41  ;;  %v11949_v51 = vld [vmem:[#allocation35_spill] sm:$0xff] }
 0x30f   : > { %v4289_v6 = vmul.f32 %v3649_v58, %v2752_v27  ;;  %v3143_v50 = vpack.c.bf16 %v2109_v39, %v2105_v20  ;;  %v10234_v59 = vpop.eup %7418  ;;  %v3394_v10 = vunpack.c.l.bf16 %v10211_v37  ;;  %v4158_v19 = vadd.f32 0.5, %v4030_v28 }
 0x310   : > { %v4924_v30 = vsub.f32 %v11944_v3, %v4668_v32  ;;  %v4925_v60 = vsub.f32 %v11945_v47, %v4669_v8  ;;  %v4159_v24 = vadd.f32 0.5, %v4031_v1  ;;  %v3236_v35 = vmul.bf16 1056980736, %v3142_v2 }
 0x311   : > { %v4417_v55 = vadd.f32 %v4289_v6, %v2750_v40  ;;  %v3522_v31 = vmul.f32 0.5, %v3394_v10  ;;  %v4032_v27 = vmul.f32 0.5, %v3904_v22  ;;  %v3906_v20 = vunpack.c.l.bf16 %v10234_v59 }
 0x312   : > { %v5052_v15 = vmul.f32 %v4924_v30, %v4156_v18  ;;  %v5053_v25 = vmul.f32 %v4925_v60, %v4157_v5  ;;  %v3748_v18 = vmul.bf16 1056980736, %v3143_v50  ;;  %v10239_v5 = vpop.eup %7420  ;;  %v4033_v39 = vmul.f32 0.5, %v3905_v63 }
 0x313   : > { %v4513_v58 = vpack.c.bf16 %v4417_v55, %v4416_v38  ;;  %v2758_v1 = vadd.f32 %v9749_v61, %v8310_v26  ;;  %v3907_v2 = vunpack.c.h.bf16 %v10234_v59  ;;  %v2756_v22 = vadd.f32 %v11947_v53, %v8307_v41  ;;  %v11948_v61 = vld [vmem:[#allocation70_spill] sm:$0xff] }
 0x314   : > { %v5180_v9 = vadd.f32 %v5052_v15, %v4668_v32  ;;  %v5181_v46 = vadd.f32 %v5053_v25, %v4669_v8  ;;  %v3650_v32 = vadd.f32 0.5, %v3522_v31  ;;  %v3395_v38 = vunpack.c.h.bf16 %v10211_v37  ;;  %v550_v15 = vld [vmem:[%s8023_s20 + $0x1f0] sm:$0xff]  }
 0x315   : > { %v7423_v8 = vpop.eup %7422  ;;  %7426 = vtanh.bf16 %v4513_v58  ;;  %v4034_v30 = vmul.f32 0.5, %v3906_v20  ;;  %v2113_v60 = vadd.f32 %v11948_v61, %v8230_v36  ;;  %v11950_v40 = vunpack.c.l.bf16 %v11949_v51  ;;  %v11952_v25 = vld [vmem:[#allocation19_spill] sm:$0xff]  ;;  %2380 = vmatprep.mubr.bf16.mxu0 %v550_v15  ;;  %3053 = vmatprep.mubr.bf16.mxu1 %v550_v15 }
 0x316   : > { %v6646_v28 = vpack.c.bf16 %v5181_v46, %v5180_v9  ;;  %v4670_v45 = vunpack.c.l.bf16 %v7423_v8  ;;  %v4671_v3 = vunpack.c.h.bf16 %v7423_v8  ;;  %7428 = vtanh.bf16 %v3236_v35 }
 0x317   : > { %v4290_v63 = vmul.f32 %v3650_v32, %v2758_v1  ;;  %7430 = vtanh.bf16 %v3748_v18  ;;  %v3523_v47 = vmul.f32 0.5, %v3395_v38  ;;  %v11951_v50 = vunpack.c.h.bf16 %v11949_v51 }
 0x318   : > { %6846 = vst [vmem:[%s8518_s30 + $0xe8] sm:$0xff] %v6646_v28   ;;  %v4926_v6 = vsub.f32 %v11950_v40, %v4670_v45  ;;  %v2117_v37 = vadd.f32 %v9864_v34, %v8230_v36  ;;  %v2762_v10 = vadd.f32 %v11952_v25, %v8310_v26  ;;  %v2115_v9 = vadd.f32 %v9856_v0, %v8239_v49  ;;  %v7161_v28 = vld [vmem:[%s8015_s5 + $0x1f0] sm:$0xff]   ;;  %v11953_v34 = vld [vmem:[#allocation64_spill] sm:$0xff] }
 0x319   : > { %v4927_v52 = vsub.f32 %v11951_v50, %v4671_v3  ;;  %v4418_v59 = vadd.f32 %v4290_v63, %v2756_v22  ;;  %v3651_v55 = vadd.f32 0.5, %v3523_v47  ;;  %v2119_v46 = vadd.f32 %v9869_v14, %v8239_v49  ;;  %v10263_v35 = vpop.eup %7424  ;;  %2381 = vmatmul.mubr.bf16.gmra.mrb[248].mxu0 %v7161_v28  ;;  %3054 = vmatmul.mubr.bf16.gmra.mrb[248].mxu1 %v7161_v28  ;;  %v11955_v50 = vld [vmem:[#allocation26_spill] sm:$0xff] }
 0x31a   : > { %v5054_v31 = vmul.f32 %v4926_v6, %v4158_v19  ;;  %v3144_v58 = vpack.c.bf16 %v2117_v37, %v2113_v60  ;;  %v3396_v18 = vunpack.c.l.bf16 %v10239_v5  ;;  %v2760_v1 = vadd.f32 %v11953_v34, %v8307_v41  ;;  %v11954_v60 = vld [vmem:[#allocation68_spill] sm:$0xff] }
 0x31b   : > { %v5055_v20 = vmul.f32 %v4927_v52, %v4159_v24  ;;  %v4291_v32 = vmul.f32 %v3651_v55, %v2762_v10  ;;  %v3145_v8 = vpack.c.bf16 %v2119_v46, %v2115_v9  ;;  %v4160_v53 = vadd.f32 0.5, %v4032_v27  ;;  %v11956_v9 = vld [vmem:[#allocation76_spill] sm:$0xff] }
 0x31c   : > { %v5182_v22 = vadd.f32 %v5054_v31, %v4670_v45  ;;  %v3524_v0 = vmul.f32 0.5, %v3396_v18  ;;  %v4161_v63 = vadd.f32 0.5, %v4033_v39  ;;  %v3908_v14 = vunpack.c.l.bf16 %v10263_v35  ;;  %v10279_v15 = vpop.f32.mrb[172].mxu0  ;;  %v10281_v25 = vpop.f32.mrb[172].mxu1  ;;  %v11957_v18 = vld [vmem:[#allocation72_spill] sm:$0xff] }
 0x31d   : > { %v5183_v38 = vadd.f32 %v5055_v20, %v4671_v3  ;;  %v4419_v47 = vadd.f32 %v4291_v32, %v2760_v1  ;;  %v3749_v19 = vmul.bf16 1056980736, %v3145_v8  ;;  %v4035_v24 = vmul.f32 0.5, %v3907_v2  ;;  %v10285_v31 = vpop.f32.mrb[173].mxu0  ;;  %v11959_v32 = vld [vmem:[#allocation36_spill] sm:$0xff] }
 0x31e   : > { %v2768_v51 = vadd.f32 %v11954_v60, %v8310_v26  ;;  %v3652_v40 = vadd.f32 0.5, %v3524_v0  ;;  %v10272_v27 = vadd.f32 0.5, %v4034_v30  ;;  %v3237_v3 = vmul.bf16 1056980736, %v3144_v58  ;;  %v10293_v34 = vpop.f32.mrb[174].mxu0 }
 0x31f   : > { %v6651_v61 = vpack.c.bf16 %v5183_v38, %v5182_v22  ;;  %v4514_v45 = vpack.c.bf16 %v4419_v47, %v4418_v59  ;;  %7432 = vtanh.bf16 %v3749_v19  ;;  %v3909_v6 = vunpack.c.h.bf16 %v10263_v35  ;;  %v10287_v35 = vpop.f32.mrb[173].mxu1  ;;  %v552_v19 = vld [vmem:[%s8023_s20 + $0x1f8] sm:$0xff]  }
 0x320   : > { %v7427_v39 = vpop.eup %7426  ;;  %v2766_v52 = vadd.f32 %v11955_v50, %v8307_v41  ;;  %v4292_v2 = vmul.f32 %v3652_v40, %v2768_v51  ;;  %v3397_v37 = vunpack.c.h.bf16 %v10239_v5  ;;  %v4036_v30 = vmul.f32 0.5, %v3908_v14  ;;  %v10295_v1 = vpop.f32.mrb[174].mxu1  ;;  %v11962_v14 = vld [vmem:[#allocation90_spill] sm:$0xff]  ;;  %v11964_v40 = vld [vmem:[#allocation51_spill] sm:$0xff]  ;;  %2390 = vmatprep.mubr.bf16.mxu0 %v552_v19  ;;  %3063 = vmatprep.mubr.bf16.mxu1 %v552_v19 }
 0x321   : > { %6847 = vst [vmem:[%s8518_s30 + $0xf0] sm:$0xff] %v6651_v61   ;;  %v7429_v10 = vpop.eup %7428  ;;  %v4672_v55 = vunpack.c.l.bf16 %v7427_v39  ;;  %v4673_v59 = vunpack.c.h.bf16 %v7427_v39  ;;  %v2123_v46 = vadd.f32 %v11956_v9, %v8230_v36  ;;  %7434 = vtanh.bf16 %v4514_v45  ;;  %11958 = vst [vmem:[#allocation60_spill] sm:$0xff] %v10295_v1  ;;  %v10304_v61 = vpop.f32.mrb[175].mxu0  ;;  %v11965_v50 = vld [vmem:[#allocation22_spill] sm:$0xff] }
 0x322   : > { %v10289_v20 = vpop.eup %7430  ;;  %v4420_v5 = vadd.f32 %v4292_v2, %v2766_v52  ;;  %v3525_v58 = vmul.f32 0.5, %v3397_v37  ;;  %v2127_v28 = vadd.f32 %v11957_v18, %v8230_v36  ;;  %v11960_v8 = vunpack.c.l.bf16 %v11959_v32  ;;  %v10306_v60 = vpop.f32.mrb[175].mxu1 }
 0x323   : > { %v11961_v38 = vunpack.c.h.bf16 %v11959_v32  ;;  %7436 = vtanh.bf16 %v3237_v3  ;;  %v2772_v47 = vadd.f32 %v11962_v14, %v8310_v26  ;;  %11963 = vst [vmem:[#allocation33_spill] sm:$0xff] %v10306_v60  ;;  %v2125_v45 = vadd.f32 %v11964_v40, %v8239_v49  ;;  %v11966_v3 = vld [vmem:[#allocation89_spill] sm:$0xff]  ;;  %v7163_v32 = vld [vmem:[%s8015_s5 + $0x1f8] sm:$0xff]  }
 0x324   : > { %v4928_v22 = vsub.f32 %v11960_v8, %v4672_v55  ;;  %v3653_v51 = vadd.f32 0.5, %v3525_v58  ;;  %v3146_v39 = vpack.c.bf16 %v2127_v28, %v2123_v46  ;;  %v2129_v52 = vadd.f32 %v11965_v50, %v8239_v49  ;;  %2391 = vmatmul.mubr.bf16.gmra.mrb[252].mxu0 %v7163_v32  ;;  %3064 = vmatmul.mubr.bf16.gmra.mrb[252].mxu1 %v7163_v32  ;;  %v11969_v40 = vld [vmem:[#allocation69_spill] sm:$0xff] }
 0x325   : > { %v4929_v0 = vsub.f32 %v11961_v38, %v4673_v59  ;;  %v2770_v9 = vadd.f32 %v11966_v3, %v8307_v41  ;;  %v3398_v18 = vunpack.c.l.bf16 %v7429_v10  ;;  %v4163_v4 = vadd.f32 0.5, %v4035_v24 }
 0x326   : > { %v5056_v2 = vmul.f32 %v4928_v22, %v4160_v53  ;;  %v4293_v8 = vmul.f32 %v3653_v51, %v2772_v47  ;;  %v3238_v38 = vmul.bf16 1056980736, %v3146_v39  ;;  %v3147_v14 = vpack.c.bf16 %v2129_v52, %v2125_v45  ;;  %v11970_v52 = vld [vmem:[#allocation97_spill] sm:$0xff] }
 0x327   : > { %v5057_v37 = vmul.f32 %v4929_v0, %v4161_v63  ;;  %v3526_v12 = vmul.f32 0.5, %v3398_v18  ;;  %v10315_v1 = vmul.f32 0.5, %v3909_v6  ;;  %v10317_v46 = vadd.f32 0.5, %v4036_v30  ;;  %v11967_v0 = vld [vmem:[#allocation91_spill] sm:$0xff] }
 0x328   : > { %v5184_v11 = vadd.f32 %v5056_v2, %v4672_v55  ;;  %v4421_v28 = vadd.f32 %v4293_v8, %v2770_v9  ;;  %v3750_v53 = vmul.bf16 1056980736, %v3147_v14  ;;  %v3910_v22 = vunpack.c.l.bf16 %v10289_v20 }
 0x329   : > { %v5185_v58 = vadd.f32 %v5057_v37, %v4673_v59  ;;  %v2778_v47 = vadd.f32 %v11967_v0, %v8310_v26  ;;  %v3654_v51 = vadd.f32 0.5, %v3526_v12  ;;  %v3911_v6 = vunpack.c.h.bf16 %v10289_v20  ;;  %v11968_v59 = vld [vmem:[#allocation27_spill] sm:$0xff]  ;;  %v11971_v37 = vld [vmem:[#allocation82_spill] sm:$0xff] }
 0x32a   : > { %v10322_v24 = vpop.eup %7432  ;;  %v4515_v30 = vpack.c.bf16 %v4421_v28, %v4420_v5  ;;  %7438 = vtanh.bf16 %v3238_v38  ;;  %v3399_v55 = vunpack.c.h.bf16 %v7429_v10  ;;  %v2776_v19 = vadd.f32 %v11968_v59, %v8307_v41 }
 0x32b   : > { %v6656_v63 = vpack.c.bf16 %v5185_v58, %v5184_v11  ;;  %7440 = vtanh.bf16 %v3750_v53  ;;  %v4294_v11 = vmul.f32 %v3654_v51, %v2778_v47  ;;  %v2782_v45 = vadd.f32 %v11969_v40, %v8310_v26  ;;  %v10339_v9 = vpop.f32.mrb[176].mxu0  ;;  %v10341_v18 = vpop.f32.mrb[176].mxu1 }
 0x32c   : > { %7442 = vtanh.bf16 %v4515_v30  ;;  %v3527_v12 = vmul.f32 0.5, %v3399_v55  ;;  %v2133_v39 = vadd.f32 %v9933_v62, %v8230_v36  ;;  %v2137_v20 = vadd.f32 %v9946_v23, %v8230_v36  ;;  %v7435_v5 = vpop.eup %7434  ;;  %11972 = vst [vmem:[#allocation14_spill] sm:$0xff] %v10341_v18  ;;  %v10343_v23 = vpop.f32.mrb[177].mxu0  ;;  %v11976_v55 = vld [vmem:[#allocation37_spill] sm:$0xff] }
 0x32d   : > { %6848 = vst [vmem:[%s8518_s30 + $0xf8] sm:$0xff] %v6656_v63   ;;  %v3912_v10 = vunpack.c.l.bf16 %v10322_v24  ;;  %v4422_v50 = vadd.f32 %v4294_v11, %v2776_v19  ;;  %v2135_v2 = vadd.f32 %v11970_v52, %v8239_v49  ;;  %v2139_v3 = vadd.f32 %v11971_v37, %v8239_v49  ;;  %v10345_v58 = vpop.f32.mrb[177].mxu1  ;;  %v11974_v63 = vld [vmem:[#allocation92_spill] sm:$0xff]  ;;  %v10349_v51 = vpop.f32.mrb[178].mxu0 }
 0x32e   : > { %v7437_v32 = vpop.eup %7436  ;;  %v4674_v8 = vunpack.c.l.bf16 %v7435_v5  ;;  %v4675_v62 = vunpack.c.h.bf16 %v7435_v5  ;;  %v3655_v38 = vadd.f32 0.5, %v3527_v12  ;;  %v3148_v14 = vpack.c.bf16 %v2137_v20, %v2133_v39  ;;  %11973 = vst [vmem:[#allocation18_spill] sm:$0xff] %v10345_v58  ;;  %v10351_v30 = vpop.f32.mrb[178].mxu1  ;;  %v11980_v5 = vld [vmem:[#allocation93_spill] sm:$0xff] }
 0x32f   : > { %v4038_v28 = vmul.f32 0.5, %v3910_v22  ;;  %v4039_v53 = vmul.f32 0.5, %v3911_v6  ;;  %v2780_v0 = vadd.f32 %v11974_v63, %v8307_v41  ;;  %v3149_v47 = vpack.c.bf16 %v2139_v3, %v2135_v2  ;;  %11975 = vst [vmem:[#allocation47_spill] sm:$0xff] %v10351_v30  ;;  %v10357_v20 = vpop.f32.mrb[179].mxu0  ;;  %v10359_v22 = vpop.f32.mrb[179].mxu1 }
 0x330   : > { %v11977_v59 = vunpack.c.l.bf16 %v11976_v55  ;;  %v11978_v11 = vunpack.c.h.bf16 %v11976_v55  ;;  %v4295_v12 = vmul.f32 %v3655_v38, %v2782_v45  ;;  %v3239_v39 = vmul.bf16 1056980736, %v3148_v14  ;;  %11979 = vst [vmem:[#allocation88_spill] sm:$0xff] %v10359_v22  ;;  %v11981_v45 = vld [vmem:[#allocation94_spill] sm:$0xff] }
 0x331   : > { %v3913_v6 = vunpack.c.h.bf16 %v10322_v24  ;;  %v2786_v52 = vadd.f32 %v11980_v5, %v8307_v41  ;;  %v3751_v2 = vmul.bf16 1056980736, %v3149_v47  ;;  %v3400_v37 = vunpack.c.l.bf16 %v7437_v32 }
 0x332   : > { %v4930_v19 = vsub.f32 %v11977_v59, %v4674_v8  ;;  %v4931_v40 = vsub.f32 %v11978_v11, %v4675_v62  ;;  %v4040_v59 = vmul.f32 0.5, %v3912_v10  ;;  %v4423_v30 = vadd.f32 %v4295_v12, %v2780_v0  ;;  %v11982_v0 = vld [vmem:[#allocation96_spill] sm:$0xff] }
 0x333   : > { %7444 = vtanh.bf16 %v3239_v39  ;;  %v2788_v38 = vadd.f32 %v11981_v45, %v8310_v26  ;;  %v3528_v14 = vmul.f32 0.5, %v3400_v37  ;;  %v3401_v55 = vunpack.c.h.bf16 %v7437_v32  ;;  %v11987_v45 = vld [vmem:[#allocation95_spill] sm:$0xff] }
 0x334   : > { %v5058_v3 = vmul.f32 %v4930_v19, %v10272_v27  ;;  %v5059_v63 = vmul.f32 %v4931_v40, %v4163_v4  ;;  %v4516_v58 = vpack.c.bf16 %v4423_v30, %v4422_v50  ;;  %7446 = vtanh.bf16 %v3751_v2 }
 0x335   : > { %v7439_v24 = vpop.eup %7438  ;;  %v3656_v18 = vadd.f32 0.5, %v3528_v14  ;;  %v3529_v5 = vmul.f32 0.5, %v3401_v55  ;;  %v2143_v47 = vadd.f32 %v9983_v42, %v8230_v36  ;;  %v2147_v4 = vadd.f32 %v9994_v21, %v8230_v36  ;;  %v11984_v21 = vld [vmem:[#allocation99_spill] sm:$0xff] }
 0x336   : > { %v5186_v11 = vadd.f32 %v5058_v3, %v4674_v8  ;;  %v5187_v22 = vadd.f32 %v5059_v63, %v4675_v62  ;;  %v7441_v27 = vpop.eup %7440  ;;  %7448 = vtanh.bf16 %v4516_v58  ;;  %v2792_v32 = vadd.f32 %v11982_v0, %v8310_v26  ;;  %v10375_v8 = vpop.f32.mrb[180].mxu0 }
 0x337   : > { %v2145_v50 = vadd.f32 %v9988_v16, %v8239_v49  ;;  %v10377_v62 = vpop.f32.mrb[180].mxu1  ;;  %v7443_v30 = vpop.eup %7442  ;;  %v4296_v19 = vmul.f32 %v3656_v18, %v2788_v38  ;;  %v3657_v42 = vadd.f32 0.5, %v3529_v5  ;;  %v3150_v40 = vpack.c.bf16 %v2147_v4, %v2143_v47 }
 0x338   : > { %v6661_v10 = vpack.c.bf16 %v5187_v22, %v5186_v11  ;;  %11983 = vst [vmem:[#allocation34_spill] sm:$0xff] %v10377_v62  ;;  %v2149_v12 = vadd.f32 %v11984_v21, %v8239_v49  ;;  %v10381_v39 = vpop.f32.mrb[181].mxu0  ;;  %v10383_v58 = vpop.f32.mrb[181].mxu1  ;;  %v4165_v22 = vadd.f32 0.5, %v10315_v1  ;;  %v10386_v2 = vadd.f32 0.5, %v4038_v28  ;;  %v11989_v28 = vld [vmem:[#allocation38_spill] sm:$0xff] }
 0x339   : > { %11985 = vst [vmem:[#allocation86_spill] sm:$0xff] %v10383_v58  ;;  %v4676_v16 = vunpack.c.l.bf16 %v7443_v30  ;;  %v4677_v37 = vunpack.c.h.bf16 %v7443_v30  ;;  %v10389_v3 = vpop.f32.mrb[182].mxu0  ;;  %v10391_v63 = vpop.f32.mrb[182].mxu1  ;;  %v4424_v18 = vadd.f32 %v4296_v19, %v2786_v52  ;;  %v2790_v38 = vadd.f32 %v11987_v45, %v8307_v41 }
 0x33a   : > { %6849 = vst [vmem:[%s8518_s30 + $0x100] sm:$0xff] %v6661_v10   ;;  %11986 = vst [vmem:[#allocation25_spill] sm:$0xff] %v10391_v63  ;;  %v4297_v14 = vmul.f32 %v3657_v42, %v2792_v32  ;;  %v3151_v55 = vpack.c.bf16 %v2149_v12, %v2145_v50  ;;  %v10395_v11 = vpop.f32.mrb[183].mxu0  ;;  %v10397_v5 = vpop.f32.mrb[183].mxu1  ;;  %v4167_v1 = vadd.f32 0.5, %v4039_v53  ;;  %v11990_v47 = vunpack.c.l.bf16 %v11989_v28  ;;  %v11992_v42 = vld [vmem:[#allocation71_spill] sm:$0xff] }
 0x33b   : > { %11988 = vst [vmem:[#allocation70_spill] sm:$0xff] %v10397_v5  ;;  %v11991_v10 = vunpack.c.h.bf16 %v11989_v28  ;;  %v3240_v30 = vmul.bf16 1056980736, %v3150_v40  ;;  %v4041_v21 = vmul.f32 0.5, %v3913_v6  ;;  %v10403_v63 = vadd.f32 0.5, %v4040_v59 }
 0x33c   : > { %v4932_v4 = vsub.f32 %v11990_v47, %v4676_v16  ;;  %v3914_v52 = vunpack.c.l.bf16 %v7441_v27  ;;  %v4425_v19 = vadd.f32 %v4297_v14, %v2790_v38  ;;  %v2796_v12 = vadd.f32 %v11992_v42, %v8307_v41 }
 0x33d   : > { %v4933_v0 = vsub.f32 %v11991_v10, %v4677_v37  ;;  %v3402_v45 = vunpack.c.l.bf16 %v7439_v24  ;;  %v3915_v53 = vunpack.c.h.bf16 %v7441_v27  ;;  %v3752_v58 = vmul.bf16 1056980736, %v3151_v55  ;;  %v11995_v55 = vld [vmem:[#allocation78_spill] sm:$0xff] }
 0x33e   : > { %v5060_v32 = vmul.f32 %v4932_v4, %v10317_v46  ;;  %v4517_v5 = vpack.c.bf16 %v4425_v19, %v4424_v18  ;;  %v3403_v47 = vunpack.c.h.bf16 %v7439_v24  ;;  %v10408_v62 = vpop.eup %7444  ;;  %7450 = vtanh.bf16 %v3240_v30  ;;  %v11993_v46 = vld [vmem:[#allocation49_spill] sm:$0xff]  ;;  %v11994_v18 = vld [vmem:[#allocation50_spill] sm:$0xff]  ;;  %v10422_v19 = vpop.f32.mrb[184].mxu1 }
 0x33f   : > { %v5061_v50 = vmul.f32 %v4933_v0, %v4165_v22  ;;  %v3530_v6 = vmul.f32 0.5, %v3402_v45  ;;  %v10410_v59 = vpop.eup %7446  ;;  %v4042_v38 = vmul.f32 0.5, %v3914_v52  ;;  %v2798_v22 = vadd.f32 %v11993_v46, %v8310_v26  ;;  %v11996_v0 = vld [vmem:[#allocation21_spill] sm:$0xff]  ;;  %11997 = vst [vmem:[#allocation35_spill] sm:$0xff] %v10422_v19 }
 0x340   : > { %v5188_v28 = vadd.f32 %v5060_v32, %v4676_v16  ;;  %7452 = vtanh.bf16 %v4517_v5  ;;  %v3531_v14 = vmul.f32 0.5, %v3403_v47  ;;  %v2153_v24 = vadd.f32 %v11994_v18, %v8230_v36  ;;  %v10420_v5 = vpop.f32.mrb[184].mxu0 }
 0x341   : > { %v5189_v40 = vadd.f32 %v5061_v50, %v4677_v37  ;;  %v3658_v27 = vadd.f32 0.5, %v3530_v6  ;;  %v2157_v16 = vadd.f32 %v11995_v55, %v8230_v36  ;;  %v7449_v37 = vpop.eup %7448  ;;  %v4043_v10 = vmul.f32 0.5, %v3915_v53  ;;  %v10425_v47 = vpop.f32.mrb[185].mxu0  ;;  %v12000_v53 = vld [vmem:[#allocation98_spill] sm:$0xff] }
 0x342   : > { %7454 = vtanh.bf16 %v3752_v58  ;;  %v2802_v30 = vadd.f32 %v11996_v0, %v8310_v26  ;;  %v3659_v52 = vadd.f32 0.5, %v3531_v14  ;;  %v4678_v32 = vunpack.c.l.bf16 %v7449_v37  ;;  %11998 = vst [vmem:[#allocation19_spill] sm:$0xff] %v10425_v47  ;;  %v12001_v6 = vld [vmem:[#allocation30_spill] sm:$0xff]  ;;  %v10435_v18 = vpop.f32.mrb[186].mxu0 }
 0x343   : > { %v6666_v4 = vpack.c.bf16 %v5189_v40, %v5188_v28  ;;  %v4679_v50 = vunpack.c.h.bf16 %v7449_v37  ;;  %v4298_v42 = vmul.f32 %v3658_v27, %v2798_v22  ;;  %v3152_v45 = vpack.c.bf16 %v2157_v16, %v2153_v24  ;;  %v10427_v28 = vpop.f32.mrb[185].mxu1  ;;  %v12003_v22 = vld [vmem:[#allocation39_spill] sm:$0xff] }
 0x344   : > { %11999 = vst [vmem:[#allocation64_spill] sm:$0xff] %v10427_v28  ;;  %v2800_v58 = vadd.f32 %v12000_v53, %v8307_v41  ;;  %v4299_v40 = vmul.f32 %v3659_v52, %v2802_v30  ;;  %v2155_v46 = vadd.f32 %v12001_v6, %v8239_v49  ;;  %v2159_v14 = vadd.f32 %v10053_v44, %v8239_v49  ;;  %v10444_v30 = vpop.f32.mrb[187].mxu0 }
 0x345   : > { %6850 = vst [vmem:[%s8518_s30 + $0x108] sm:$0xff] %v6666_v4   ;;  %v10437_v4 = vpop.f32.mrb[186].mxu1  ;;  %v12004_v27 = vunpack.c.l.bf16 %v12003_v22  ;;  %v12005_v55 = vunpack.c.h.bf16 %v12003_v22  ;;  %v3916_v37 = vunpack.c.l.bf16 %v10410_v59  ;;  %v4426_v0 = vadd.f32 %v4298_v42, %v2796_v12  ;;  %12006 = vst [vmem:[#allocation26_spill] sm:$0xff] %v10444_v30 }
 0x346   : > { %12002 = vst [vmem:[#allocation68_spill] sm:$0xff] %v10437_v4  ;;  %v10446_v52 = vpop.f32.mrb[187].mxu1  ;;  %v4169_v53 = vadd.f32 0.5, %v4041_v21  ;;  %v4427_v6 = vadd.f32 %v4299_v40, %v2800_v58  ;;  %v3153_v44 = vpack.c.bf16 %v2159_v14, %v2155_v46  ;;  %v3404_v28 = vunpack.c.l.bf16 %v10408_v62  ;;  %v12010_v14 = vld [vmem:[#allocation29_spill] sm:$0xff] }
 0x347   : > { %v4934_v24 = vsub.f32 %v12004_v27, %v4678_v32  ;;  %v4935_v16 = vsub.f32 %v12005_v55, %v4679_v50  ;;  %12007 = vst [vmem:[#allocation76_spill] sm:$0xff] %v10446_v52  ;;  %v10449_v19 = vadd.f32 0.5, %v4042_v38  ;;  %v3241_v60 = vmul.bf16 1056980736, %v3152_v45  ;;  %v12008_v38 = vld [vmem:[#allocation52_spill] sm:$0xff] }
 0x348   : > { %v10452_v22 = vadd.f32 0.5, %v4043_v10  ;;  %v3917_v55 = vunpack.c.h.bf16 %v10410_v59  ;;  %v4518_v12 = vpack.c.bf16 %v4427_v6, %v4426_v0  ;;  %v3532_v42 = vmul.f32 0.5, %v3404_v28  ;;  %v12009_v59 = vld [vmem:[#allocation84_spill] sm:$0xff]  ;;  %v10475_v6 = vpop.f32.mrb[188].mxu1 }
 0x349   : > { %v5062_v4 = vmul.f32 %v4934_v24, %v10386_v2  ;;  %v5063_v27 = vmul.f32 %v4935_v16, %v4167_v1  ;;  %v10455_v52 = vmul.f32 0.5, %v3916_v37  ;;  %v3405_v21 = vunpack.c.h.bf16 %v10408_v62  ;;  %v7451_v58 = vpop.eup %7450  ;;  %12012 = vst [vmem:[#allocation72_spill] sm:$0xff] %v10475_v6 }
 0x34a   : > { %7456 = vtanh.bf16 %v4518_v12  ;;  %v2806_v2 = vadd.f32 %v12008_v38, %v8307_v41  ;;  %v3753_v1 = vmul.bf16 1056980736, %v3153_v44  ;;  %v3660_v45 = vadd.f32 0.5, %v3532_v42  ;;  %v12013_v44 = vld [vmem:[#allocation40_spill] sm:$0xff]  ;;  %v12015_v42 = vld [vmem:[#allocation13_spill] sm:$0xff] }
 0x34b   : > { %v5190_v30 = vadd.f32 %v5062_v4, %v4678_v32  ;;  %v5191_v47 = vadd.f32 %v5063_v27, %v4679_v50  ;;  %v7453_v10 = vpop.eup %7452  ;;  %7458 = vtanh.bf16 %v3241_v60  ;;  %v2808_v28 = vadd.f32 %v12009_v59, %v8310_v26  ;;  %v12011_v4 = vld [vmem:[#allocation74_spill] sm:$0xff] }
 0x34c   : > { %v3533_v32 = vmul.f32 0.5, %v3405_v21  ;;  %v4680_v50 = vunpack.c.l.bf16 %v7453_v10  ;;  %v4681_v46 = vunpack.c.h.bf16 %v7453_v10  ;;  %v2810_v62 = vadd.f32 %v12010_v14, %v8307_v41 }
 0x34d   : > { %v6671_v40 = vpack.c.bf16 %v5191_v47, %v5190_v30  ;;  %v2812_v24 = vadd.f32 %v12011_v4, %v8310_v26  ;;  %v10466_v16 = vpop.eup %7454  ;;  %v4300_v37 = vmul.f32 %v3660_v45, %v2808_v28  ;;  %v2163_v60 = vadd.f32 %v10068_v29, %v8230_v36  ;;  %v10473_v30 = vpop.f32.mrb[188].mxu0  ;;  %v12017_v45 = vld [vmem:[#allocation53_spill] sm:$0xff] }
 0x34e   : > { %v3661_v0 = vadd.f32 0.5, %v3533_v32  ;;  %v2167_v47 = vadd.f32 %v10082_v54, %v8230_v36  ;;  %v12014_v27 = vunpack.c.l.bf16 %v12013_v44  ;;  %v12016_v21 = vunpack.c.h.bf16 %v12015_v42  ;;  %v10485_v29 = vpop.f32.mrb[189].mxu1  ;;  %v12020_v32 = vld [vmem:[#allocation31_spill] sm:$0xff] }
 0x34f   : > { %6851 = vst [vmem:[%s8518_s30 + $0x110] sm:$0xff] %v6671_v40   ;;  %7460 = vtanh.bf16 %v3753_v1  ;;  %v2165_v10 = vadd.f32 %v12017_v45, %v8239_v49  ;;  %v10483_v40 = vpop.f32.mrb[189].mxu0  ;;  %12019 = vst [vmem:[#allocation90_spill] sm:$0xff] %v10485_v29  ;;  %v4428_v59 = vadd.f32 %v4300_v37, %v2806_v2  ;;  %v2169_v14 = vadd.f32 %v12020_v32, %v8239_v49  ;;  %v10491_v44 = vpop.f32.mrb[190].mxu1 }
 0x350   : > { %v4936_v12 = vsub.f32 %v12014_v27, %v4680_v50  ;;  %v4937_v38 = vsub.f32 %v12016_v21, %v4681_v46  ;;  %12018 = vst [vmem:[#allocation36_spill] sm:$0xff] %v10483_v40  ;;  %v4301_v54 = vmul.f32 %v3661_v0, %v2812_v24  ;;  %v3154_v28 = vpack.c.bf16 %v2167_v47, %v2163_v60  ;;  %v10489_v4 = vpop.f32.mrb[190].mxu0  ;;  %v10496_v6 = vpop.f32.mrb[191].mxu1 }
 0x351   : > { %12021 = vst [vmem:[#allocation51_spill] sm:$0xff] %v10491_v44  ;;  %v4045_v27 = vmul.f32 0.5, %v3917_v55  ;;  %v3406_v21 = vunpack.c.l.bf16 %v7451_v58  ;;  %v10494_v45 = vpop.f32.mrb[191].mxu0  ;;  %12023 = vst [vmem:[#allocation89_spill] sm:$0xff] %v10496_v6  ;;  %v3918_v2 = vunpack.c.l.bf16 %v10466_v16  ;;  %v3919_v24 = vunpack.c.h.bf16 %v10466_v16  ;;  %v12025_v6 = vld [vmem:[#allocation79_spill] sm:$0xff]  ;;  %v12026_v16 = vld [vmem:[#allocation101_spill] sm:$0xff] }
 0x352   : > { %v5064_v1 = vmul.f32 %v4936_v12, %v10403_v63  ;;  %v5065_v42 = vmul.f32 %v4937_v38, %v4169_v53  ;;  %12022 = vst [vmem:[#allocation22_spill] sm:$0xff] %v10494_v45  ;;  %v4429_v37 = vadd.f32 %v4301_v54, %v2810_v62  ;;  %v3155_v0 = vpack.c.bf16 %v2169_v14, %v2165_v10  ;;  %v12024_v63 = vld [vmem:[#allocation77_spill] sm:$0xff] }
 0x353   : > { %v3242_v32 = vmul.bf16 1056980736, %v3154_v28  ;;  %v3534_v44 = vmul.f32 0.5, %v3406_v21  ;;  %v2816_v53 = vadd.f32 %v12024_v63, %v8307_v41  ;;  %v3407_v38 = vunpack.c.h.bf16 %v7451_v58 }
 0x354   : > { %v5192_v60 = vadd.f32 %v5064_v1, %v4680_v50  ;;  %v5193_v47 = vadd.f32 %v5065_v42, %v4681_v46  ;;  %v4519_v55 = vpack.c.bf16 %v4429_v37, %v4428_v59  ;;  %v3754_v12 = vmul.bf16 1056980736, %v3155_v0  ;;  %v12027_v42 = vld [vmem:[#allocation45_spill] sm:$0xff] }
 0x355   : > { %v2818_v45 = vadd.f32 %v12025_v6, %v8310_v26  ;;  %v3662_v40 = vadd.f32 0.5, %v3534_v44  ;;  %v2822_v62 = vadd.f32 %v12026_v16, %v8310_v26  ;;  %v7457_v10 = vpop.eup %7456  ;;  %v3535_v50 = vmul.f32 0.5, %v3407_v38 }
 0x356   : > { %v6676_v29 = vpack.c.bf16 %v5193_v47, %v5192_v60  ;;  %7462 = vtanh.bf16 %v4519_v55  ;;  %v2173_v46 = vadd.f32 %v10120_v56, %v8230_v36  ;;  %v2177_v59 = vadd.f32 %v10130_v17, %v8230_v36  ;;  %v7459_v54 = vpop.eup %7458  ;;  %v10519_v60 = vpop.f32.mrb[192].mxu0 }
 0x357   : > { %v4682_v58 = vunpack.c.l.bf16 %v7457_v10  ;;  %v4683_v28 = vunpack.c.h.bf16 %v7457_v10  ;;  %7464 = vtanh.bf16 %v3242_v32  ;;  %v4302_v6 = vmul.f32 %v3662_v40, %v2818_v45  ;;  %v10524_v40 = vld [vmem:[%s8023_s20 + $0x1c8] sm:$0xff]   ;;  %v12031_v32 = vld [vmem:[#allocation100_spill] sm:$0xff] }
 0x358   : > { %6852 = vst [vmem:[%s8518_s30 + $0x118] sm:$0xff] %v6676_v29   ;;  %7466 = vtanh.bf16 %v3754_v12  ;;  %v3663_v14 = vadd.f32 0.5, %v3535_v50  ;;  %v2175_v44 = vadd.f32 %v10126_v13, %v8239_v49  ;;  %v3156_v1 = vpack.c.bf16 %v2177_v59, %v2173_v46  ;;  %12030 = vst [vmem:[#allocation91_spill] sm:$0xff] %v10524_v40  ;;  %v10532_v12 = vpop.f32.mrb[193].mxu0 }
 0x359   : > { %v12028_v21 = vunpack.c.l.bf16 %v12027_v42  ;;  %v12029_v56 = vunpack.c.h.bf16 %v12027_v42  ;;  %v4430_v17 = vadd.f32 %v4302_v6, %v2816_v53  ;;  %v2179_v29 = vadd.f32 %v10139_v48, %v8239_v49  ;;  %v10534_v53 = vpop.f32.mrb[192].mxu1  ;;  %v10538_v50 = vpop.f32.mrb[194].mxu0 }
 0x35a   : > { %v10521_v47 = vpop.eup %7460  ;;  %v10528_v13 = vadd.f32 0.5, %v10455_v52  ;;  %v2820_v55 = vadd.f32 %v12031_v32, %v8307_v41  ;;  %v4303_v63 = vmul.f32 %v3663_v14, %v2822_v62  ;;  %v3243_v16 = vmul.bf16 1056980736, %v3156_v1  ;;  %v10540_v46 = vpop.f32.mrb[193].mxu1 }
 0x35b   : > { %v4938_v37 = vsub.f32 %v12028_v21, %v4682_v58  ;;  %v4939_v0 = vsub.f32 %v12029_v56, %v4683_v28  ;;  %v3157_v10 = vpack.c.bf16 %v2179_v29, %v2175_v44  ;;  %v4173_v52 = vadd.f32 0.5, %v4045_v27  ;;  %v10542_v21 = vpop.f32.mrb[195].mxu0  ;;  %v10544_v62 = vpop.f32.mrb[194].mxu1  ;;  %v12033_v27 = vld [vmem:[#allocation102_spill] sm:$0xff] }
 0x35c   : > { %v4046_v59 = vmul.f32 0.5, %v3918_v2  ;;  %v4047_v6 = vmul.f32 0.5, %v3919_v24  ;;  %v4431_v42 = vadd.f32 %v4303_v63, %v2820_v55  ;;  %12032 = vst [vmem:[#allocation27_spill] sm:$0xff] %v10544_v62  ;;  %v10547_v1 = vpop.f32.mrb[195].mxu1  ;;  %v3921_v44 = vunpack.c.h.bf16 %v10521_v47 }
 0x35d   : > { %v5066_v48 = vmul.f32 %v4938_v37, %v10449_v19  ;;  %v5067_v38 = vmul.f32 %v4939_v0, %v10452_v22  ;;  %v3920_v19 = vunpack.c.l.bf16 %v10521_v47  ;;  %v3408_v22 = vunpack.c.l.bf16 %v7459_v54 }
 0x35e   : > { %v4520_v37 = vpack.c.bf16 %v4431_v42, %v4430_v17  ;;  %v2828_v2 = vadd.f32 %v12033_v27, %v8310_v26  ;;  %v3409_v24 = vunpack.c.h.bf16 %v7459_v54  ;;  %7468 = vtanh.bf16 %v3243_v16  ;;  %v12035_v17 = vld [vmem:[#allocation104_spill] sm:$0xff] }
 0x35f   : > { %v5194_v14 = vadd.f32 %v5066_v48, %v4682_v58  ;;  %v5195_v56 = vadd.f32 %v5067_v38, %v4683_v28  ;;  %v3755_v29 = vmul.bf16 1056980736, %v3157_v10  ;;  %v3536_v32 = vmul.f32 0.5, %v3408_v22  ;;  %v12034_v28 = vld [vmem:[#allocation87_spill] sm:$0xff] }
 0x360   : > { %7470 = vtanh.bf16 %v4520_v37  ;;  %v3537_v58 = vmul.f32 0.5, %v3409_v24  ;;  %v2183_v55 = vadd.f32 %v12034_v28, %v8230_v36  ;;  %v2187_v63 = vadd.f32 %v10169_v33, %v8230_v36  ;;  %v12036_v33 = vld [vmem:[#allocation80_spill] sm:$0xff] }
 0x361   : > { %v6681_v0 = vpack.c.bf16 %v5195_v56, %v5194_v14  ;;  %v7463_v48 = vpop.eup %7462  ;;  %v3664_v47 = vadd.f32 0.5, %v3536_v32  ;;  %v2832_v38 = vadd.f32 %v12035_v17, %v8310_v26  ;;  %v2185_v54 = vadd.f32 %v10165_v43, %v8239_v49  ;;  %v12037_v32 = vld [vmem:[#allocation46_spill] sm:$0xff] }
 0x362   : > { %v2189_v16 = vadd.f32 %v10174_v7, %v8239_v49  ;;  %v7465_v10 = vpop.eup %7464  ;;  %v4684_v42 = vunpack.c.l.bf16 %v7463_v48  ;;  %v4685_v14 = vunpack.c.h.bf16 %v7463_v48  ;;  %v3665_v56 = vadd.f32 0.5, %v3537_v58  ;;  %v12040_v7 = vld [vmem:[#allocation103_spill] sm:$0xff]  ;;  %v10571_v48 = vpop.f32.mrb[196].mxu0 }
 0x363   : > { %6853 = vst [vmem:[%s8518_s30 + $0x120] sm:$0xff] %v6681_v0   ;;  %v3158_v22 = vpack.c.bf16 %v2187_v63, %v2183_v55  ;;  %v7467_v37 = vpop.eup %7466  ;;  %v2826_v27 = vadd.f32 %v12036_v33, %v8307_v41  ;;  %7472 = vtanh.bf16 %v3755_v29  ;;  %v4304_v24 = vmul.f32 %v3664_v47, %v2828_v2  ;;  %v10573_v58 = vpop.f32.mrb[196].mxu1 }
 0x364   : > { %v3159_v0 = vpack.c.bf16 %v2189_v16, %v2185_v54  ;;  %v12038_v28 = vunpack.c.l.bf16 %v12037_v32  ;;  %v12039_v43 = vunpack.c.h.bf16 %v12037_v32  ;;  %v2830_v40 = vadd.f32 %v12040_v7, %v8307_v41  ;;  %12041 = vst [vmem:[#allocation69_spill] sm:$0xff] %v10573_v58  ;;  %v10575_v2 = vpop.f32.mrb[197].mxu0  ;;  %v10577_v47 = vpop.f32.mrb[197].mxu1 }
 0x365   : > { %v4305_v62 = vmul.f32 %v3665_v56, %v2832_v38  ;;  %v4174_v55 = vadd.f32 0.5, %v4046_v59  ;;  %v4175_v63 = vadd.f32 0.5, %v4047_v6  ;;  %v4048_v33 = vmul.f32 0.5, %v3920_v19  ;;  %12042 = vst [vmem:[#allocation97_spill] sm:$0xff] %v10577_v47  ;;  %v10582_v38 = vpop.f32.mrb[198].mxu1  ;;  %v12044_v59 = vld [vmem:[#allocation83_spill] sm:$0xff] }
 0x366   : > { %v4940_v17 = vsub.f32 %v12038_v28, %v4684_v42  ;;  %v4941_v45 = vsub.f32 %v12039_v43, %v4685_v14  ;;  %v4432_v29 = vadd.f32 %v4304_v24, %v2826_v27  ;;  %v4049_v54 = vmul.f32 0.5, %v3921_v44  ;;  %v10580_v43 = vpop.f32.mrb[198].mxu0  ;;  %12043 = vst [vmem:[#allocation82_spill] sm:$0xff] %v10582_v38  ;;  %v10588_v24 = vpop.f32.mrb[199].mxu1 }
 0x367   : > { %v4433_v28 = vadd.f32 %v4305_v62, %v2830_v40  ;;  %v3922_v56 = vunpack.c.l.bf16 %v7467_v37  ;;  %v3923_v7 = vunpack.c.h.bf16 %v7467_v37  ;;  %v2836_v6 = vadd.f32 %v12044_v59, %v8307_v41  ;;  %v10586_v27 = vpop.f32.mrb[199].mxu0  ;;  %12045 = vst [vmem:[#allocation92_spill] sm:$0xff] %v10588_v24 }
 0x368   : > { %v5068_v16 = vmul.f32 %v4940_v17, %v10528_v13  ;;  %v5069_v32 = vmul.f32 %v4941_v45, %v4173_v52  ;;  %v3410_v19 = vunpack.c.l.bf16 %v7465_v10  ;;  %v3244_v45 = vmul.bf16 1056980736, %v3158_v22  ;;  %v12046_v13 = vld [vmem:[#allocation81_spill] sm:$0xff] }
 0x369   : > { %v4521_v58 = vpack.c.bf16 %v4433_v28, %v4432_v29  ;;  %v3756_v40 = vmul.bf16 1056980736, %v3159_v0  ;;  %v2838_v52 = vadd.f32 %v12046_v13, %v8310_v26  ;;  %v3411_v17 = vunpack.c.h.bf16 %v7465_v10  ;;  %v10592_v37 = vpop.eup %7468  ;;  %v12048_v13 = vld [vmem:[#allocation48_spill] sm:$0xff] }
 0x36a   : > { %v5196_v47 = vadd.f32 %v5068_v16, %v4684_v42  ;;  %v5197_v44 = vadd.f32 %v5069_v32, %v4685_v14  ;;  %v3538_v62 = vmul.f32 0.5, %v3410_v19  ;;  %v2193_v59 = vadd.f32 %v10279_v15, %v8230_v36 }
 0x36b   : > { %7474 = vtanh.bf16 %v4521_v58  ;;  %v2197_v42 = vadd.f32 %v10293_v34, %v8230_v36  ;;  %v7471_v14 = vpop.eup %7470  ;;  %v4050_v29 = vmul.f32 0.5, %v3922_v56  ;;  %v4051_v16 = vmul.f32 0.5, %v3923_v7  ;;  %v12047_v58 = vld [vmem:[#allocation105_spill] sm:$0xff] }
 0x36c   : > { %v6686_v38 = vpack.c.bf16 %v5197_v44, %v5196_v47  ;;  %v3666_v22 = vadd.f32 0.5, %v3538_v62  ;;  %v3539_v0 = vmul.f32 0.5, %v3411_v17  ;;  %v4686_v32 = vunpack.c.l.bf16 %v7471_v14  ;;  %v12051_v62 = vld [vmem:[#allocation67_spill] sm:$0xff] }
 0x36d   : > { %v4687_v28 = vunpack.c.h.bf16 %v7471_v14  ;;  %7476 = vtanh.bf16 %v3244_v45  ;;  %v3160_v10 = vpack.c.bf16 %v2197_v42, %v2193_v59  ;;  %v2842_v47 = vadd.f32 %v12047_v58, %v8310_v26  ;;  %v10613_v42 = vpop.f32.mrb[200].mxu0  ;;  %v10615_v14 = vpop.f32.mrb[200].mxu1 }
 0x36e   : > { %6854 = vst [vmem:[%s8518_s30 + $0x128] sm:$0xff] %v6686_v38   ;;  %7478 = vtanh.bf16 %v3756_v40  ;;  %v4306_v19 = vmul.f32 %v3666_v22, %v2838_v52  ;;  %v3667_v44 = vadd.f32 0.5, %v3539_v0  ;;  %v10601_v15 = vpop.eup %7472  ;;  %v12049_v34 = vunpack.c.l.bf16 %v12048_v13  ;;  %12052 = vst [vmem:[#allocation37_spill] sm:$0xff] %v10615_v14 }
 0x36f   : > { %v12050_v56 = vunpack.c.h.bf16 %v12048_v13  ;;  %v2195_v38 = vadd.f32 %v10285_v31, %v8239_v49  ;;  %v2199_v45 = vadd.f32 %v10304_v61, %v8239_v49  ;;  %v4176_v40 = vadd.f32 0.5, %v4048_v33  ;;  %v10619_v31 = vpop.f32.mrb[201].mxu1 }
 0x370   : > { %v4942_v24 = vsub.f32 %v12049_v34, %v4686_v32  ;;  %v4434_v52 = vadd.f32 %v4306_v19, %v2836_v6  ;;  %v2840_v17 = vadd.f32 %v12051_v62, %v8307_v41  ;;  %v4307_v59 = vmul.f32 %v3667_v44, %v2842_v47  ;;  %v10617_v34 = vpop.f32.mrb[201].mxu0  ;;  %12053 = vst [vmem:[#allocation93_spill] sm:$0xff] %v10619_v31  ;;  %v10625_v47 = vpop.f32.mrb[202].mxu1 }
 0x371   : > { %v4943_v7 = vsub.f32 %v12050_v56, %v4687_v28  ;;  %v3245_v58 = vmul.bf16 1056980736, %v3160_v10  ;;  %v3161_v13 = vpack.c.bf16 %v2199_v45, %v2195_v38  ;;  %v4177_v56 = vadd.f32 0.5, %v4049_v54  ;;  %v10623_v19 = vpop.f32.mrb[202].mxu0  ;;  %12054 = vst [vmem:[#allocation94_spill] sm:$0xff] %v10625_v47  ;;  %v12056_v45 = vld [vmem:[#allocation54_spill] sm:$0xff] }
 0x372   : > { %v5070_v22 = vmul.f32 %v4942_v24, %v4174_v55  ;;  %v3924_v61 = vunpack.c.l.bf16 %v10601_v15  ;;  %v4435_v33 = vadd.f32 %v4307_v59, %v2840_v17  ;;  %v3412_v6 = vunpack.c.l.bf16 %v10592_v37  ;;  %v10631_v10 = vpop.f32.mrb[203].mxu0 }
 0x373   : > { %v5071_v0 = vmul.f32 %v4943_v7, %v4175_v63  ;;  %v10627_v44 = vadd.f32 0.5, %v4050_v29  ;;  %v10629_v55 = vadd.f32 0.5, %v4051_v16  ;;  %v10633_v7 = vpop.f32.mrb[203].mxu1  ;;  %v3925_v54 = vunpack.c.h.bf16 %v10601_v15 }
 0x374   : > { %v5198_v63 = vadd.f32 %v5070_v22, %v4686_v32  ;;  %12055 = vst [vmem:[#allocation96_spill] sm:$0xff] %v10633_v7  ;;  %v4522_v38 = vpack.c.bf16 %v4435_v33, %v4434_v52  ;;  %v2846_v62 = vadd.f32 %v12056_v45, %v8307_v41  ;;  %v3540_v17 = vmul.f32 0.5, %v3412_v6 }
 0x375   : > { %v5199_v24 = vadd.f32 %v5071_v0, %v4687_v28  ;;  %7480 = vtanh.bf16 %v3245_v58  ;;  %v3757_v29 = vmul.bf16 1056980736, %v3161_v13  ;;  %v3413_v16 = vunpack.c.h.bf16 %v10592_v37  ;;  %v12057_v28 = vld [vmem:[#allocation32_spill] sm:$0xff]  ;;  %v12058_v58 = vld [vmem:[#allocation59_spill] sm:$0xff]  ;;  %v10660_v14 = vpop.f32.mrb[204].mxu0 }
 0x376   : > { %v7475_v47 = vpop.eup %7474  ;;  %v4052_v32 = vmul.f32 0.5, %v3924_v61  ;;  %7482 = vtanh.bf16 %v4522_v38  ;;  %v2848_v22 = vadd.f32 %v12057_v28, %v8310_v26  ;;  %v3668_v0 = vadd.f32 0.5, %v3540_v17  ;;  %v12059_v38 = vld [vmem:[#allocation15_spill] sm:$0xff] }
 0x377   : > { %v6691_v59 = vpack.c.bf16 %v5199_v24, %v5198_v63  ;;  %v4688_v7 = vunpack.c.l.bf16 %v7475_v47  ;;  %v4689_v15 = vunpack.c.h.bf16 %v7475_v47  ;;  %v2850_v52 = vadd.f32 %v10167_v57, %v8307_v41 }
 0x378   : > { %v3541_v33 = vmul.f32 0.5, %v3413_v16  ;;  %v7477_v6 = vpop.eup %7476  ;;  %v4308_v63 = vmul.f32 %v3668_v0, %v2848_v22  ;;  %v2852_v13 = vadd.f32 %v12058_v58, %v8310_v26  ;;  %v2203_v37 = vadd.f32 %v10339_v9, %v8230_v36 }
 0x379   : > { %6855 = vst [vmem:[%s8518_s30 + $0x130] sm:$0xff] %v6691_v59   ;;  %v2207_v61 = vadd.f32 %v10349_v51, %v8230_v36  ;;  %v10650_v24 = vpop.eup %7478  ;;  %v12060_v45 = vunpack.c.l.bf16 %v12059_v38  ;;  %v12061_v17 = vunpack.c.h.bf16 %v12059_v38  ;;  %7484 = vtanh.bf16 %v3757_v29 }
 0x37a   : > { %v3669_v59 = vadd.f32 0.5, %v3541_v33  ;;  %v4436_v16 = vadd.f32 %v4308_v63, %v2846_v62  ;;  %v2205_v28 = vadd.f32 %v10343_v23, %v8239_v49  ;;  %v2209_v9 = vadd.f32 %v10357_v20, %v8239_v49  ;;  %v10667_v33 = vpop.f32.mrb[205].mxu0 }
 0x37b   : > { %v4944_v47 = vsub.f32 %v12060_v45, %v4688_v7  ;;  %v4945_v57 = vsub.f32 %v12061_v17, %v4689_v15  ;;  %v3162_v22 = vpack.c.bf16 %v2207_v61, %v2203_v37  ;;  %v3414_v31 = vunpack.c.l.bf16 %v7477_v6  ;;  %v10662_v45 = vpop.f32.mrb[204].mxu1 }
 0x37c   : > { %v4309_v58 = vmul.f32 %v3669_v59, %v2852_v13  ;;  %12062 = vst [vmem:[#allocation99_spill] sm:$0xff] %v10662_v45  ;;  %v4053_v38 = vmul.f32 0.5, %v3925_v54  ;;  %v10664_v17 = vadd.f32 0.5, %v4052_v32  ;;  %v3926_v62 = vunpack.c.l.bf16 %v10650_v24  ;;  %v10669_v23 = vpop.f32.mrb[205].mxu1  ;;  %v10671_v13 = vpop.f32.mrb[206].mxu0  ;;  %v12065_v54 = vld [vmem:[#allocation85_spill] sm:$0xff] }
 0x37d   : > { %v5072_v0 = vmul.f32 %v4944_v47, %v4176_v40  ;;  %v5073_v51 = vmul.f32 %v4945_v57, %v4177_v56  ;;  %v3163_v29 = vpack.c.bf16 %v2209_v9, %v2205_v28  ;;  %12063 = vst [vmem:[#allocation95_spill] sm:$0xff] %v10669_v23  ;;  %v3542_v56 = vmul.f32 0.5, %v3414_v31  ;;  %v10673_v37 = vpop.f32.mrb[206].mxu1  ;;  %v12066_v47 = vld [vmem:[#allocation17_spill] sm:$0xff]  ;;  %v10680_v28 = vpop.f32.mrb[207].mxu0 }
 0x37e   : > { %v4437_v40 = vadd.f32 %v4309_v58, %v2850_v52  ;;  %12064 = vst [vmem:[#allocation38_spill] sm:$0xff] %v10673_v37  ;;  %v3927_v61 = vunpack.c.h.bf16 %v10650_v24  ;;  %v2856_v32 = vadd.f32 %v12065_v54, %v8307_v41  ;;  %v2858_v57 = vadd.f32 %v12066_v47, %v8310_v26  ;;  %v12068_v47 = vld [vmem:[#allocation61_spill] sm:$0xff] }
 0x37f   : > { %v5200_v63 = vadd.f32 %v5072_v0, %v4688_v7  ;;  %v5201_v20 = vadd.f32 %v5073_v51, %v4689_v15  ;;  %v3415_v59 = vunpack.c.h.bf16 %v7477_v6  ;;  %v10682_v7 = vpop.f32.mrb[207].mxu1  ;;  %v3246_v52 = vmul.bf16 1056980736, %v3162_v22 }
 0x380   : > { %12067 = vst [vmem:[#allocation71_spill] sm:$0xff] %v10682_v7  ;;  %v4523_v31 = vpack.c.bf16 %v4437_v40, %v4436_v16  ;;  %v3670_v9 = vadd.f32 0.5, %v3542_v56  ;;  %v7481_v0 = vpop.eup %7480  ;;  %v3758_v51 = vmul.bf16 1056980736, %v3163_v29  ;;  %v2213_v24 = vadd.f32 %v10375_v8, %v8230_v36  ;;  %v12069_v16 = vld [vmem:[#allocation24_spill] sm:$0xff] }
 0x381   : > { %v6696_v15 = vpack.c.bf16 %v5201_v20, %v5200_v63  ;;  %v3543_v58 = vmul.f32 0.5, %v3415_v59  ;;  %v2217_v54 = vadd.f32 %v10389_v3, %v8230_v36  ;;  %v7483_v37 = vpop.eup %7482  ;;  %v2860_v7 = vadd.f32 %v12068_v47, %v8307_v41 }
 0x382   : > { %7486 = vtanh.bf16 %v4523_v31  ;;  %v4310_v6 = vmul.f32 %v3670_v9, %v2858_v57  ;;  %v2862_v22 = vadd.f32 %v12069_v16, %v8310_v26  ;;  %v4690_v63 = vunpack.c.l.bf16 %v7483_v37  ;;  %v12070_v57 = vld [vmem:[#allocation56_spill] sm:$0xff] }
 0x383   : > { %6856 = vst [vmem:[%s8518_s30 + $0x138] sm:$0xff] %v6696_v15   ;;  %v4691_v20 = vunpack.c.h.bf16 %v7483_v37  ;;  %v3671_v29 = vadd.f32 0.5, %v3543_v58  ;;  %v3164_v40 = vpack.c.bf16 %v2217_v54, %v2213_v24  ;;  %7488 = vtanh.bf16 %v3246_v52 }
 0x384   : > { %v4438_v56 = vadd.f32 %v4310_v6, %v2856_v32  ;;  %v2215_v8 = vadd.f32 %v10381_v39, %v8239_v49  ;;  %v2219_v3 = vadd.f32 %v10395_v11, %v8239_v49  ;;  %v7485_v59 = vpop.eup %7484  ;;  %v12071_v15 = vunpack.c.l.bf16 %v12070_v57  ;;  %v10705_v6 = vpop.f32.mrb[208].mxu0 }
 0x385   : > { %v12072_v9 = vunpack.c.h.bf16 %v12070_v57  ;;  %7490 = vtanh.bf16 %v3758_v51  ;;  %v4311_v16 = vmul.f32 %v3671_v29, %v2862_v22  ;;  %v4181_v37 = vadd.f32 0.5, %v4053_v38  ;;  %v10707_v51 = vpop.f32.mrb[209].mxu0  ;;  %v10709_v38 = vpop.f32.mrb[208].mxu1 }
 0x386   : > { %v4946_v31 = vsub.f32 %v12071_v15, %v4690_v63  ;;  %v4054_v58 = vmul.f32 0.5, %v3926_v62  ;;  %v4055_v24 = vmul.f32 0.5, %v3927_v61  ;;  %v3165_v52 = vpack.c.bf16 %v2219_v3, %v2215_v8  ;;  %12073 = vst [vmem:[#allocation49_spill] sm:$0xff] %v10709_v38  ;;  %v10711_v29 = vpop.f32.mrb[210].mxu0 }
 0x387   : > { %v4947_v47 = vsub.f32 %v12072_v9, %v4691_v20  ;;  %v4439_v54 = vadd.f32 %v4311_v16, %v2860_v7  ;;  %v2866_v11 = vadd.f32 %v10281_v25, %v8307_v41  ;;  %v3928_v15 = vunpack.c.l.bf16 %v7485_v59  ;;  %v10719_v3 = vpop.f32.mrb[211].mxu0  ;;  %v12078_v16 = vld [vmem:[#allocation26_spill] sm:$0xff] }
 0x388   : > { %v5074_v32 = vmul.f32 %v4946_v31, %v10627_v44  ;;  %v3247_v23 = vmul.bf16 1056980736, %v3164_v40  ;;  %v3759_v57 = vmul.bf16 1056980736, %v3165_v52  ;;  %v3416_v9 = vunpack.c.l.bf16 %v7481_v0 }
 0x389   : > { %v5075_v39 = vmul.f32 %v4947_v47, %v10629_v55  ;;  %v4524_v22 = vpack.c.bf16 %v4439_v54, %v4438_v56  ;;  %v3417_v44 = vunpack.c.h.bf16 %v7481_v0  ;;  %v10713_v55 = vpop.f32.mrb[209].mxu1  ;;  %v3929_v7 = vunpack.c.h.bf16 %v7485_v59 }
 0x38a   : > { %v5202_v62 = vadd.f32 %v5074_v32, %v4690_v63  ;;  %12074 = vst [vmem:[#allocation50_spill] sm:$0xff] %v10713_v55  ;;  %v2868_v25 = vadd.f32 %v10287_v35, %v8310_v26  ;;  %v3544_v40 = vmul.f32 0.5, %v3416_v9  ;;  %v2223_v8 = vadd.f32 %v10420_v5, %v8230_v36  ;;  %v10721_v31 = vpop.f32.mrb[210].mxu1  ;;  %v12077_v35 = vld [vmem:[#allocation19_spill] sm:$0xff]  ;;  %v12079_v32 = vld [vmem:[#allocation33_spill] sm:$0xff] }
 0x38b   : > { %v5203_v61 = vadd.f32 %v5075_v39, %v4691_v20  ;;  %12075 = vst [vmem:[#allocation78_spill] sm:$0xff] %v10721_v31  ;;  %7492 = vtanh.bf16 %v4524_v22  ;;  %v3545_v0 = vmul.f32 0.5, %v3417_v44  ;;  %v2227_v20 = vadd.f32 %v10435_v18, %v8230_v36  ;;  %v10725_v56 = vpop.f32.mrb[211].mxu1 }
 0x38c   : > { %12076 = vst [vmem:[#allocation21_spill] sm:$0xff] %v10725_v56  ;;  %7494 = vtanh.bf16 %v3759_v57  ;;  %v3672_v59 = vadd.f32 0.5, %v3544_v40  ;;  %v2225_v47 = vadd.f32 %v12077_v35, %v8239_v49  ;;  %v2229_v5 = vadd.f32 %v12078_v16, %v8239_v49  ;;  %v12080_v35 = vld [vmem:[#allocation60_spill] sm:$0xff] }
 0x38d   : > { %v6701_v63 = vpack.c.bf16 %v5203_v61, %v5202_v62  ;;  %v7487_v52 = vpop.eup %7486  ;;  %7496 = vtanh.bf16 %v3247_v23  ;;  %v2872_v39 = vadd.f32 %v12079_v32, %v8310_v26  ;;  %v3673_v54 = vadd.f32 0.5, %v3545_v0 }
 0x38e   : > { %v3166_v9 = vpack.c.bf16 %v2227_v20, %v2223_v8  ;;  %v4692_v62 = vunpack.c.l.bf16 %v7487_v52  ;;  %v4693_v18 = vunpack.c.h.bf16 %v7487_v52  ;;  %v4312_v61 = vmul.f32 %v3672_v59, %v2868_v25  ;;  %v7489_v57 = vpop.eup %7488  ;;  %v12084_v25 = vld [vmem:[#allocation14_spill] sm:$0xff] }
 0x38f   : > { %6857 = vst [vmem:[%s8518_s30 + $0x140] sm:$0xff] %v6701_v63   ;;  %v3167_v22 = vpack.c.bf16 %v2229_v5, %v2225_v47  ;;  %v4182_v44 = vadd.f32 0.5, %v4054_v58  ;;  %v4183_v40 = vadd.f32 0.5, %v4055_v24  ;;  %v2870_v31 = vadd.f32 %v12080_v35, %v8307_v41  ;;  %v12081_v63 = vld [vmem:[#allocation57_spill] sm:$0xff]  ;;  %v12085_v58 = vld [vmem:[#allocation18_spill] sm:$0xff]  ;;  %v10747_v35 = vpop.f32.mrb[212].mxu1 }
 0x390   : > { %v4313_v56 = vmul.f32 %v3673_v54, %v2872_v39  ;;  %v7491_v16 = vpop.eup %7490  ;;  %v4056_v55 = vmul.f32 0.5, %v3928_v15  ;;  %v12082_v23 = vunpack.c.l.bf16 %v12081_v63  ;;  %v12083_v32 = vunpack.c.h.bf16 %v12081_v63  ;;  %v10745_v54 = vpop.f32.mrb[212].mxu0  ;;  %12086 = vst [vmem:[#allocation98_spill] sm:$0xff] %v10747_v35 }
 0x391   : > { %v4440_v8 = vadd.f32 %v4312_v61, %v2866_v11  ;;  %v4057_v20 = vmul.f32 0.5, %v3929_v7  ;;  %v2876_v59 = vadd.f32 %v12084_v25, %v8307_v41  ;;  %v2878_v24 = vadd.f32 %v12085_v58, %v8310_v26 }
 0x392   : > { %v4948_v38 = vsub.f32 %v12082_v23, %v4692_v62  ;;  %v4949_v0 = vsub.f32 %v12083_v32, %v4693_v18  ;;  %v4441_v52 = vadd.f32 %v4313_v56, %v2870_v31  ;;  %v3248_v39 = vmul.bf16 1056980736, %v3166_v9  ;;  %v10749_v31 = vpop.f32.mrb[213].mxu0  ;;  %v10751_v56 = vpop.f32.mrb[213].mxu1 }
 0x393   : > { %v3418_v15 = vunpack.c.l.bf16 %v7489_v57  ;;  %v3930_v63 = vunpack.c.l.bf16 %v7491_v16  ;;  %v3931_v23 = vunpack.c.h.bf16 %v7491_v16  ;;  %v3419_v7 = vunpack.c.h.bf16 %v7489_v57  ;;  %12087 = vst [vmem:[#allocation30_spill] sm:$0xff] %v10749_v31  ;;  %12088 = vst [vmem:[#allocation39_spill] sm:$0xff] %v10751_v56 }
 0x394   : > { %v5076_v47 = vmul.f32 %v4948_v38, %v10664_v17  ;;  %v5077_v5 = vmul.f32 %v4949_v0, %v4181_v37  ;;  %v4525_v11 = vpack.c.bf16 %v4441_v52, %v4440_v8  ;;  %v3760_v25 = vmul.bf16 1056980736, %v3167_v22  ;;  %v10753_v17 = vpop.f32.mrb[214].mxu0  ;;  %v10755_v37 = vpop.f32.mrb[214].mxu1  ;;  %v12092_v8 = vld [vmem:[#allocation88_spill] sm:$0xff] }
 0x395   : > { %v3546_v58 = vmul.f32 0.5, %v3418_v15  ;;  %12089 = vst [vmem:[#allocation52_spill] sm:$0xff] %v10755_v37  ;;  %v3547_v38 = vmul.f32 0.5, %v3419_v7  ;;  %v2233_v9 = vadd.f32 %v10473_v30, %v8230_v36  ;;  %v2237_v57 = vadd.f32 %v10489_v4, %v8230_v36  ;;  %v10761_v16 = vpop.f32.mrb[215].mxu0  ;;  %v10763_v0 = vpop.f32.mrb[215].mxu1 }
 0x396   : > { %v5204_v61 = vadd.f32 %v5076_v47, %v4692_v62  ;;  %v5205_v32 = vadd.f32 %v5077_v5, %v4693_v18  ;;  %7498 = vtanh.bf16 %v4525_v11  ;;  %12090 = vst [vmem:[#allocation84_spill] sm:$0xff] %v10761_v16  ;;  %12091 = vst [vmem:[#allocation29_spill] sm:$0xff] %v10763_v0  ;;  %v7493_v62 = vpop.eup %7492  ;;  %v2882_v52 = vadd.f32 %v12092_v8, %v8310_v26  ;;  %v12093_v0 = vld [vmem:[#allocation41_spill] sm:$0xff]  ;;  %v12097_v8 = vld [vmem:[#allocation47_spill] sm:$0xff] }
 0x397   : > { %7500 = vtanh.bf16 %v3248_v39  ;;  %v3674_v22 = vadd.f32 0.5, %v3546_v58  ;;  %v10767_v47 = vpop.eup %7494  ;;  %v4694_v5 = vunpack.c.l.bf16 %v7493_v62  ;;  %v4695_v15 = vunpack.c.h.bf16 %v7493_v62  ;;  %v12095_v39 = vld [vmem:[#allocation65_spill] sm:$0xff] }
 0x398   : > { %v6706_v18 = vpack.c.bf16 %v5205_v32, %v5204_v61  ;;  %v3675_v11 = vadd.f32 0.5, %v3547_v38  ;;  %v3168_v30 = vpack.c.bf16 %v2237_v57, %v2233_v9  ;;  %v7497_v7 = vpop.eup %7496  ;;  %v4058_v4 = vmul.f32 0.5, %v3930_v63  ;;  %v12098_v9 = vld [vmem:[#allocation36_spill] sm:$0xff]  ;;  %v12099_v63 = vld [vmem:[#allocation22_spill] sm:$0xff] }
 0x399   : > { %v4059_v37 = vmul.f32 0.5, %v3931_v23  ;;  %7502 = vtanh.bf16 %v3760_v25  ;;  %v4314_v56 = vmul.f32 %v3674_v22, %v2878_v24  ;;  %v12094_v35 = vunpack.c.l.bf16 %v12093_v0 }
 0x39a   : > { %6858 = vst [vmem:[%s8518_s30 + $0x148] sm:$0xff] %v6706_v18   ;;  %v12096_v32 = vunpack.c.h.bf16 %v12095_v39  ;;  %v2880_v45 = vadd.f32 %v12097_v8, %v8307_v41  ;;  %v4315_v16 = vmul.f32 %v3675_v11, %v2882_v52  ;;  %v3932_v62 = vunpack.c.l.bf16 %v10767_v47 }
 0x39b   : > { %v4950_v61 = vsub.f32 %v12094_v35, %v4694_v5  ;;  %v4442_v38 = vadd.f32 %v4314_v56, %v2876_v59  ;;  %v2235_v57 = vadd.f32 %v12098_v9, %v8239_v49  ;;  %v2239_v23 = vadd.f32 %v12099_v63, %v8239_v49  ;;  %v10783_v59 = vpop.f32.mrb[216].mxu0  ;;  %v10785_v56 = vpop.f32.mrb[216].mxu1 }
 0x39c   : > { %v4951_v58 = vsub.f32 %v12096_v32, %v4695_v15  ;;  %v4184_v24 = vadd.f32 0.5, %v4056_v55  ;;  %v4443_v35 = vadd.f32 %v4315_v16, %v2880_v45  ;;  %v4185_v18 = vadd.f32 0.5, %v4057_v20  ;;  %12100 = vst [vmem:[#allocation74_spill] sm:$0xff] %v10785_v56  ;;  %v10794_v20 = vpop.f32.mrb[217].mxu1 }
 0x39d   : > { %v5078_v25 = vmul.f32 %v4950_v61, %v4182_v44  ;;  %v3249_v22 = vmul.bf16 1056980736, %v3168_v30  ;;  %v3169_v39 = vpack.c.bf16 %v2239_v23, %v2235_v57  ;;  %v3420_v32 = vunpack.c.l.bf16 %v7497_v7  ;;  %12101 = vst [vmem:[#allocation40_spill] sm:$0xff] %v10794_v20 }
 0x39e   : > { %v5079_v0 = vmul.f32 %v4951_v58, %v4183_v40  ;;  %v10781_v31 = vadd.f32 0.5, %v4058_v4  ;;  %v4526_v8 = vpack.c.bf16 %v4443_v35, %v4442_v38  ;;  %v10787_v9 = vadd.f32 0.5, %v4059_v37  ;;  %v10792_v40 = vpop.f32.mrb[217].mxu0  ;;  %v10798_v4 = vpop.f32.mrb[218].mxu1  ;;  %v12104_v58 = vld [vmem:[#allocation86_spill] sm:$0xff] }
 0x39f   : > { %v5206_v52 = vadd.f32 %v5078_v25, %v4694_v5  ;;  %v3933_v55 = vunpack.c.h.bf16 %v10767_v47  ;;  %v10790_v44 = vmul.f32 0.5, %v3932_v62  ;;  %v3548_v45 = vmul.f32 0.5, %v3420_v32  ;;  %v10796_v30 = vpop.f32.mrb[218].mxu0  ;;  %12102 = vst [vmem:[#allocation13_spill] sm:$0xff] %v10798_v4  ;;  %v12103_v47 = vld [vmem:[#allocation34_spill] sm:$0xff]  ;;  %v10806_v63 = vpop.f32.mrb[219].mxu1 }
 0x3a0   : > { %v5207_v11 = vadd.f32 %v5079_v0, %v4695_v15  ;;  %7504 = vtanh.bf16 %v4526_v8  ;;  %v3761_v5 = vmul.bf16 1056980736, %v3169_v39  ;;  %v3421_v15 = vunpack.c.h.bf16 %v7497_v7  ;;  %v10804_v57 = vpop.f32.mrb[219].mxu0  ;;  %12106 = vst [vmem:[#allocation31_spill] sm:$0xff] %v10806_v63  ;;  %v12107_v0 = vld [vmem:[#allocation25_spill] sm:$0xff]  ;;  %v12108_v32 = vld [vmem:[#allocation70_spill] sm:$0xff] }
 0x3a1   : > { %v7499_v37 = vpop.eup %7498  ;;  %7506 = vtanh.bf16 %v3249_v22  ;;  %v2886_v61 = vadd.f32 %v12103_v47, %v8307_v41  ;;  %v2888_v62 = vadd.f32 %v12104_v58, %v8310_v26  ;;  %v3676_v38 = vadd.f32 0.5, %v3548_v45  ;;  %12105 = vst [vmem:[#allocation53_spill] sm:$0xff] %v10804_v57  ;;  %v12109_v47 = vld [vmem:[#allocation16_spill] sm:$0xff] }
 0x3a2   : > { %v6711_v16 = vpack.c.bf16 %v5207_v11, %v5206_v52  ;;  %v7501_v23 = vpop.eup %7500  ;;  %v4696_v7 = vunpack.c.l.bf16 %v7499_v37  ;;  %v4697_v25 = vunpack.c.h.bf16 %v7499_v37  ;;  %v2890_v35 = vadd.f32 %v12107_v0, %v8307_v41 }
 0x3a3   : > { %v3549_v39 = vmul.f32 0.5, %v3421_v15  ;;  %v4316_v22 = vmul.f32 %v3676_v38, %v2888_v62  ;;  %v2892_v52 = vadd.f32 %v12108_v32, %v8310_v26  ;;  %v2243_v11 = vadd.f32 %v10519_v60, %v8230_v36 }
 0x3a4   : > { %6859 = vst [vmem:[%s8518_s30 + $0x150] sm:$0xff] %v6711_v16   ;;  %v2247_v8 = vadd.f32 %v10538_v50, %v8230_v36  ;;  %v10817_v45 = vpop.eup %7502  ;;  %v12110_v16 = vunpack.c.l.bf16 %v12109_v47  ;;  %v12111_v37 = vunpack.c.h.bf16 %v12109_v47  ;;  %7508 = vtanh.bf16 %v3761_v5 }
 0x3a5   : > { %v3677_v15 = vadd.f32 0.5, %v3549_v39  ;;  %v4444_v62 = vadd.f32 %v4316_v22, %v2886_v61  ;;  %v2245_v38 = vadd.f32 %v10532_v12, %v8239_v49  ;;  %v2249_v60 = vadd.f32 %v10542_v21, %v8239_v49  ;;  %v12112_v12 = vld [vmem:[#allocation35_spill] sm:$0xff]  ;;  %v12113_v21 = vld [vmem:[#allocation64_spill] sm:$0xff] }
 0x3a6   : > { %v4952_v58 = vsub.f32 %v12110_v16, %v4696_v7  ;;  %v4953_v4 = vsub.f32 %v12111_v37, %v4697_v25  ;;  %v3170_v0 = vpack.c.bf16 %v2247_v8, %v2243_v11  ;;  %v3422_v20 = vunpack.c.l.bf16 %v7501_v23 }
 0x3a7   : > { %v4317_v63 = vmul.f32 %v3677_v15, %v2892_v52  ;;  %v4061_v56 = vmul.f32 0.5, %v3933_v55  ;;  %v3934_v16 = vunpack.c.l.bf16 %v10817_v45  ;;  %v3935_v47 = vunpack.c.h.bf16 %v10817_v45  ;;  %v10835_v55 = vpop.f32.mrb[220].mxu1 }
 0x3a8   : > { %v5080_v32 = vmul.f32 %v4952_v58, %v4184_v24  ;;  %v5081_v50 = vmul.f32 %v4953_v4, %v4185_v18  ;;  %v3171_v37 = vpack.c.bf16 %v2249_v60, %v2245_v38  ;;  %v3550_v22 = vmul.f32 0.5, %v3422_v20  ;;  %v10833_v4 = vpop.f32.mrb[220].mxu0 }
 0x3a9   : > { %v4445_v61 = vadd.f32 %v4317_v63, %v2890_v35  ;;  %v3250_v57 = vmul.bf16 1056980736, %v3170_v0  ;;  %v2896_v11 = vadd.f32 %v12112_v12, %v8307_v41  ;;  %v2898_v24 = vadd.f32 %v12113_v21, %v8310_v26  ;;  %v10839_v20 = vpop.f32.mrb[221].mxu0 }
 0x3aa   : > { %v5208_v5 = vadd.f32 %v5080_v32, %v4696_v7  ;;  %v5209_v39 = vadd.f32 %v5081_v50, %v4697_v25  ;;  %v3423_v18 = vunpack.c.h.bf16 %v7501_v23  ;;  %v3678_v45 = vadd.f32 0.5, %v3550_v22  ;;  %v12114_v7 = vld [vmem:[#allocation76_spill] sm:$0xff]  ;;  %v10841_v25 = vpop.f32.mrb[221].mxu1  ;;  %v10847_v0 = vpop.f32.mrb[222].mxu0  ;;  %v12118_v22 = vld [vmem:[#allocation55_spill] sm:$0xff] }
 0x3ab   : > { %v4527_v8 = vpack.c.bf16 %v4445_v61, %v4444_v62  ;;  %v2902_v63 = vadd.f32 %v12114_v7, %v8310_v26  ;;  %12115 = vst [vmem:[#allocation77_spill] sm:$0xff] %v10841_v25  ;;  %v7505_v35 = vpop.eup %7504  ;;  %v3762_v58 = vmul.bf16 1056980736, %v3171_v37  ;;  %v2253_v23 = vadd.f32 %v10571_v48, %v8230_v36  ;;  %v10849_v62 = vpop.f32.mrb[222].mxu1 }
 0x3ac   : > { %v6716_v52 = vpack.c.bf16 %v5209_v39, %v5208_v5  ;;  %v3551_v15 = vmul.f32 0.5, %v3423_v18  ;;  %v2257_v38 = vadd.f32 %v10580_v43, %v8230_v36  ;;  %12116 = vst [vmem:[#allocation79_spill] sm:$0xff] %v10849_v62  ;;  %v7507_v60 = vpop.eup %7506  ;;  %v4698_v32 = vunpack.c.l.bf16 %v7505_v35  ;;  %v10852_v39 = vpop.f32.mrb[223].mxu0 }
 0x3ad   : > { %v4699_v50 = vunpack.c.h.bf16 %v7505_v35  ;;  %7510 = vtanh.bf16 %v4527_v8  ;;  %v4318_v5 = vmul.f32 %v3678_v45, %v2898_v24  ;;  %v10854_v37 = vpop.f32.mrb[223].mxu1  ;;  %v2255_v48 = vadd.f32 %v10575_v2, %v8239_v49 }
 0x3ae   : > { %6860 = vst [vmem:[%s8518_s30 + $0x158] sm:$0xff] %v6716_v52   ;;  %12117 = vst [vmem:[#allocation101_spill] sm:$0xff] %v10854_v37  ;;  %7512 = vtanh.bf16 %v3250_v57  ;;  %v3679_v61 = vadd.f32 0.5, %v3551_v15  ;;  %v3172_v43 = vpack.c.bf16 %v2257_v38, %v2253_v23  ;;  %v12119_v12 = vunpack.c.l.bf16 %v12118_v22  ;;  %v12121_v57 = vld [vmem:[#allocation68_spill] sm:$0xff] }
 0x3af   : > { %v12120_v18 = vunpack.c.h.bf16 %v12118_v22  ;;  %v4446_v7 = vadd.f32 %v4318_v5, %v2896_v11  ;;  %v2259_v24 = vadd.f32 %v10586_v27, %v8239_v49  ;;  %v7509_v8 = vpop.eup %7508  ;;  %v10865_v45 = vadd.f32 0.5, %v10790_v44  ;;  %v12122_v27 = vld [vmem:[#allocation72_spill] sm:$0xff] }
 0x3b0   : > { %v4954_v21 = vsub.f32 %v12119_v12, %v4698_v32  ;;  %7514 = vtanh.bf16 %v3762_v58  ;;  %v2900_v35 = vadd.f32 %v12121_v57, %v8307_v41  ;;  %v4319_v2 = vmul.f32 %v3679_v61, %v2902_v63 }
 0x3b1   : > { %v4955_v52 = vsub.f32 %v12120_v18, %v4699_v50  ;;  %v4189_v15 = vadd.f32 0.5, %v4061_v56  ;;  %v3173_v22 = vpack.c.bf16 %v2259_v24, %v2255_v48  ;;  %v4062_v12 = vmul.f32 0.5, %v3934_v16 }
 0x3b2   : > { %v5082_v23 = vmul.f32 %v4954_v21, %v10781_v31  ;;  %v4063_v11 = vmul.f32 0.5, %v3935_v47  ;;  %v4447_v5 = vadd.f32 %v4319_v2, %v2900_v35  ;;  %v2906_v18 = vadd.f32 %v12122_v27, %v8307_v41  ;;  %v10875_v47 = vpop.f32.mrb[224].mxu0 }
 0x3b3   : > { %v5083_v38 = vmul.f32 %v4955_v52, %v10787_v9  ;;  %v3763_v37 = vmul.bf16 1056980736, %v3173_v22  ;;  %v3424_v58 = vunpack.c.l.bf16 %v7507_v60  ;;  %v3936_v25 = vunpack.c.l.bf16 %v7509_v8  ;;  %v12123_v9 = vld [vmem:[#allocation90_spill] sm:$0xff]  ;;  %v10881_v52 = vpop.f32.mrb[225].mxu0 }
 0x3b4   : > { %v5210_v62 = vadd.f32 %v5082_v23, %v4698_v32  ;;  %v4528_v57 = vpack.c.bf16 %v4447_v5, %v4446_v7  ;;  %v3251_v63 = vmul.bf16 1056980736, %v3172_v43  ;;  %v3425_v56 = vunpack.c.h.bf16 %v7507_v60  ;;  %v10883_v43 = vpop.f32.mrb[224].mxu1  ;;  %v10890_v24 = vpop.f32.mrb[226].mxu0 }
 0x3b5   : > { %v5211_v44 = vadd.f32 %v5083_v38, %v4699_v50  ;;  %v3937_v31 = vunpack.c.h.bf16 %v7509_v8  ;;  %v2908_v48 = vadd.f32 %v12123_v9, %v8310_v26  ;;  %v3552_v16 = vmul.f32 0.5, %v3424_v58  ;;  %12124 = vst [vmem:[#allocation45_spill] sm:$0xff] %v10883_v43  ;;  %v10892_v8 = vpop.f32.mrb[225].mxu1  ;;  %v10896_v38 = vpop.f32.mrb[227].mxu0 }
 0x3b6   : > { %7516 = vtanh.bf16 %v4528_v57  ;;  %v3553_v21 = vmul.f32 0.5, %v3425_v56  ;;  %v2263_v32 = vadd.f32 %v10613_v42, %v8230_v36  ;;  %v2267_v50 = vadd.f32 %v10623_v19, %v8230_v36  ;;  %v12125_v19 = vld [vmem:[#allocation89_spill] sm:$0xff] }
 0x3b7   : > { %v6721_v61 = vpack.c.bf16 %v5211_v44, %v5210_v62  ;;  %7518 = vtanh.bf16 %v3763_v37  ;;  %v3680_v62 = vadd.f32 0.5, %v3552_v16  ;;  %v2265_v60 = vadd.f32 %v10617_v34, %v8239_v49  ;;  %v10898_v37 = vpop.f32.mrb[226].mxu1 }
 0x3b8   : > { %v2269_v7 = vadd.f32 %v10631_v10, %v8239_v49  ;;  %v7511_v42 = vpop.eup %7510  ;;  %7520 = vtanh.bf16 %v3251_v63  ;;  %v2912_v35 = vadd.f32 %v12125_v19, %v8310_v26  ;;  %v3681_v2 = vadd.f32 0.5, %v3553_v21  ;;  %12126 = vst [vmem:[#allocation100_spill] sm:$0xff] %v10898_v37  ;;  %v10900_v44 = vpop.f32.mrb[227].mxu1  ;;  %v12127_v63 = vld [vmem:[#allocation51_spill] sm:$0xff] }
 0x3b9   : > { %6861 = vst [vmem:[%s8518_s30 + $0x160] sm:$0xff] %v6721_v61   ;;  %v3174_v23 = vpack.c.bf16 %v2267_v50, %v2263_v32  ;;  %v7513_v22 = vpop.eup %7512  ;;  %v4700_v34 = vunpack.c.l.bf16 %v7511_v42  ;;  %v4701_v5 = vunpack.c.h.bf16 %v7511_v42  ;;  %v4320_v27 = vmul.f32 %v3680_v62, %v2908_v48  ;;  %v12128_v21 = vld [vmem:[#allocation63_spill] sm:$0xff] }
 0x3ba   : > { %v3175_v10 = vpack.c.bf16 %v2269_v7, %v2265_v60  ;;  %v4190_v58 = vadd.f32 0.5, %v4062_v12  ;;  %v4191_v57 = vadd.f32 0.5, %v4063_v11  ;;  %v2910_v56 = vadd.f32 %v12127_v63, %v8307_v41 }
 0x3bb   : > { %v4321_v61 = vmul.f32 %v3681_v2, %v2912_v35  ;;  %v7515_v9 = vpop.eup %7514  ;;  %v4064_v16 = vmul.f32 0.5, %v3936_v25  ;;  %v12129_v32 = vunpack.c.l.bf16 %v12128_v21  ;;  %v12130_v19 = vunpack.c.h.bf16 %v12128_v21 }
 0x3bc   : > { %v4448_v43 = vadd.f32 %v4320_v27, %v2906_v18  ;;  %v4065_v42 = vmul.f32 0.5, %v3937_v31  ;;  %v2916_v62 = vadd.f32 %v10534_v53, %v8307_v41  ;;  %v2918_v12 = vadd.f32 %v10540_v46, %v8310_v26 }
 0x3bd   : > { %v4956_v50 = vsub.f32 %v12129_v32, %v4700_v34  ;;  %v4957_v37 = vsub.f32 %v12130_v19, %v4701_v5  ;;  %v4449_v48 = vadd.f32 %v4321_v61, %v2910_v56  ;;  %v3252_v7 = vmul.bf16 1056980736, %v3174_v23 }
 0x3be   : > { %v3426_v25 = vunpack.c.l.bf16 %v7513_v22  ;;  %v3938_v35 = vunpack.c.l.bf16 %v7515_v9  ;;  %v3939_v2 = vunpack.c.h.bf16 %v7515_v9  ;;  %v3427_v32 = vunpack.c.h.bf16 %v7513_v22 }
 0x3bf   : > { %v5084_v11 = vmul.f32 %v4956_v50, %v10865_v45  ;;  %v5085_v60 = vmul.f32 %v4957_v37, %v4189_v15  ;;  %v4529_v63 = vpack.c.bf16 %v4449_v48, %v4448_v43  ;;  %v3764_v18 = vmul.bf16 1056980736, %v3175_v10  ;;  %v10917_v45 = vpop.f32.mrb[228].mxu0  ;;  %v10919_v15 = vpop.f32.mrb[228].mxu1 }
 0x3c0   : > { %v3554_v31 = vmul.f32 0.5, %v3426_v25  ;;  %v3555_v27 = vmul.f32 0.5, %v3427_v32  ;;  %v2273_v53 = vadd.f32 %v10660_v14, %v8230_v36  ;;  %v2277_v46 = vadd.f32 %v10671_v13, %v8230_v36  ;;  %12131 = vst [vmem:[#allocation102_spill] sm:$0xff] %v10919_v15 }
 0x3c1   : > { %v5212_v21 = vadd.f32 %v5084_v11, %v4700_v34  ;;  %v5213_v19 = vadd.f32 %v5085_v60, %v4701_v5  ;;  %7522 = vtanh.bf16 %v4529_v63  ;;  %v7517_v23 = vpop.eup %7516  ;;  %v2922_v22 = vadd.f32 %v10547_v1, %v8310_v26  ;;  %v10923_v34 = vpop.f32.mrb[229].mxu0  ;;  %v12135_v63 = vld [vmem:[#allocation44_spill] sm:$0xff] }
 0x3c2   : > { %7524 = vtanh.bf16 %v3252_v7  ;;  %v3682_v37 = vadd.f32 0.5, %v3554_v31  ;;  %v10925_v5 = vpop.f32.mrb[229].mxu1  ;;  %v10927_v14 = vpop.eup %7518  ;;  %v4702_v10 = vunpack.c.l.bf16 %v7517_v23  ;;  %v4703_v13 = vunpack.c.h.bf16 %v7517_v23 }
 0x3c3   : > { %v6726_v43 = vpack.c.bf16 %v5213_v19, %v5212_v21  ;;  %12132 = vst [vmem:[#allocation87_spill] sm:$0xff] %v10925_v5  ;;  %v3683_v56 = vadd.f32 0.5, %v3555_v27  ;;  %v3176_v61 = vpack.c.bf16 %v2277_v46, %v2273_v53  ;;  %v10929_v9 = vpop.f32.mrb[230].mxu0  ;;  %v10931_v50 = vpop.f32.mrb[230].mxu1  ;;  %v4066_v11 = vmul.f32 0.5, %v3938_v35  ;;  %v12138_v27 = vld [vmem:[#allocation27_spill] sm:$0xff] }
 0x3c4   : > { %12133 = vst [vmem:[#allocation104_spill] sm:$0xff] %v10931_v50  ;;  %v7521_v48 = vpop.eup %7520  ;;  %v4067_v60 = vmul.f32 0.5, %v3939_v2  ;;  %7526 = vtanh.bf16 %v3764_v18  ;;  %v4322_v1 = vmul.f32 %v3682_v37, %v2918_v12  ;;  %v10934_v7 = vpop.f32.mrb[231].mxu0  ;;  %v12136_v32 = vunpack.c.l.bf16 %v12135_v63 }
 0x3c5   : > { %6862 = vst [vmem:[%s8518_s30 + $0x168] sm:$0xff] %v6726_v43   ;;  %v10936_v25 = vpop.f32.mrb[231].mxu1  ;;  %v12137_v19 = vunpack.c.h.bf16 %v12135_v63  ;;  %v2920_v53 = vadd.f32 %v12138_v27, %v8307_v41  ;;  %v4323_v46 = vmul.f32 %v3683_v56, %v2922_v22  ;;  %v3940_v23 = vunpack.c.l.bf16 %v10927_v14 }
 0x3c6   : > { %12134 = vst [vmem:[#allocation80_spill] sm:$0xff] %v10936_v25  ;;  %v4958_v21 = vsub.f32 %v12136_v32, %v4702_v10  ;;  %v4450_v35 = vadd.f32 %v4322_v1, %v2916_v62  ;;  %v2275_v12 = vadd.f32 %v10667_v33, %v8239_v49  ;;  %v2279_v2 = vadd.f32 %v10680_v28, %v8239_v49 }
 0x3c7   : > { %v4959_v31 = vsub.f32 %v12137_v19, %v4703_v13  ;;  %v4192_v18 = vadd.f32 0.5, %v4064_v16  ;;  %v4451_v32 = vadd.f32 %v4323_v46, %v2920_v53  ;;  %v4193_v25 = vadd.f32 0.5, %v4065_v42  ;;  %v12142_v46 = vld [vmem:[#allocation82_spill] sm:$0xff] }
 0x3c8   : > { %v5086_v43 = vmul.f32 %v4958_v21, %v4190_v58  ;;  %v3253_v63 = vmul.bf16 1056980736, %v3176_v61  ;;  %v3177_v19 = vpack.c.bf16 %v2279_v2, %v2275_v12  ;;  %v3428_v50 = vunpack.c.l.bf16 %v7521_v48  ;;  %v12139_v61 = vld [vmem:[#allocation69_spill] sm:$0xff]  ;;  %v10960_v21 = vpop.f32.mrb[232].mxu0 }
 0x3c9   : > { %v5087_v37 = vmul.f32 %v4959_v31, %v4191_v57  ;;  %v10949_v5 = vadd.f32 0.5, %v4066_v11  ;;  %v4530_v27 = vpack.c.bf16 %v4451_v32, %v4450_v35  ;;  %v10951_v62 = vadd.f32 0.5, %v4067_v60  ;;  %v10962_v31 = vpop.f32.mrb[232].mxu1  ;;  %v10967_v35 = vpop.f32.mrb[233].mxu0 }
 0x3ca   : > { %v5214_v22 = vadd.f32 %v5086_v43, %v4702_v10  ;;  %v3941_v33 = vunpack.c.h.bf16 %v10927_v14  ;;  %v10954_v1 = vmul.f32 0.5, %v3940_v23  ;;  %v3556_v28 = vmul.f32 0.5, %v3428_v50  ;;  %v12140_v10 = vld [vmem:[#allocation97_spill] sm:$0xff]  ;;  %12141 = vst [vmem:[#allocation46_spill] sm:$0xff] %v10962_v31  ;;  %v10969_v12 = vpop.f32.mrb[233].mxu1  ;;  %v12144_v43 = vld [vmem:[#allocation92_spill] sm:$0xff] }
 0x3cb   : > { %v5215_v56 = vadd.f32 %v5087_v37, %v4703_v13  ;;  %7528 = vtanh.bf16 %v4530_v27  ;;  %v3765_v57 = vmul.bf16 1056980736, %v3177_v19  ;;  %v3429_v16 = vunpack.c.h.bf16 %v7521_v48  ;;  %12143 = vst [vmem:[#allocation103_spill] sm:$0xff] %v10969_v12  ;;  %v10977_v19 = vpop.f32.mrb[234].mxu0  ;;  %v12146_v27 = vld [vmem:[#allocation20_spill] sm:$0xff] }
 0x3cc   : > { %v7523_v42 = vpop.eup %7522  ;;  %7530 = vtanh.bf16 %v3253_v63  ;;  %v2926_v11 = vadd.f32 %v12139_v61, %v8307_v41  ;;  %v2928_v13 = vadd.f32 %v12140_v10, %v8310_v26  ;;  %v3684_v60 = vadd.f32 0.5, %v3556_v28  ;;  %v10987_v10 = vpop.f32.mrb[235].mxu0 }
 0x3cd   : > { %v6731_v58 = vpack.c.bf16 %v5215_v56, %v5214_v22  ;;  %v7525_v14 = vpop.eup %7524  ;;  %v4704_v50 = vunpack.c.l.bf16 %v7523_v42  ;;  %v4705_v53 = vunpack.c.h.bf16 %v7523_v42  ;;  %v2930_v48 = vadd.f32 %v12142_v46, %v8307_v41  ;;  %v10979_v22 = vpop.f32.mrb[234].mxu1 }
 0x3ce   : > { %v3557_v23 = vmul.f32 0.5, %v3429_v16  ;;  %v4324_v2 = vmul.f32 %v3684_v60, %v2928_v13  ;;  %v2932_v37 = vadd.f32 %v12144_v43, %v8310_v26  ;;  %v2283_v32 = vadd.f32 %v10705_v6, %v8230_v36  ;;  %12145 = vst [vmem:[#allocation83_spill] sm:$0xff] %v10979_v22  ;;  %v10989_v6 = vpop.f32.mrb[235].mxu1 }
 0x3cf   : > { %6863 = vst [vmem:[%s8518_s30 + $0x170] sm:$0xff] %v6731_v58   ;;  %v2287_v63 = vadd.f32 %v10711_v29, %v8230_v36  ;;  %v10981_v56 = vpop.eup %7526  ;;  %v12147_v28 = vunpack.c.l.bf16 %v12146_v27  ;;  %v12148_v16 = vunpack.c.h.bf16 %v12146_v27  ;;  %7532 = vtanh.bf16 %v3765_v57  ;;  %12149 = vst [vmem:[#allocation81_spill] sm:$0xff] %v10989_v6 }
 0x3d0   : > { %v3685_v61 = vadd.f32 0.5, %v3557_v23  ;;  %v4452_v13 = vadd.f32 %v4324_v2, %v2926_v11  ;;  %v2285_v29 = vadd.f32 %v10707_v51, %v8239_v49  ;;  %v2289_v46 = vadd.f32 %v10719_v3, %v8239_v49  ;;  %v12151_v3 = vld [vmem:[#allocation93_spill] sm:$0xff] }
 0x3d1   : > { %v4960_v58 = vsub.f32 %v12147_v28, %v4704_v50  ;;  %v4961_v42 = vsub.f32 %v12148_v16, %v4705_v53  ;;  %v3178_v60 = vpack.c.bf16 %v2287_v63, %v2283_v32  ;;  %v3430_v12 = vunpack.c.l.bf16 %v7525_v14  ;;  %v12150_v32 = vld [vmem:[#allocation37_spill] sm:$0xff] }
 0x3d2   : > { %v4325_v28 = vmul.f32 %v3685_v61, %v2932_v37  ;;  %v4069_v27 = vmul.f32 0.5, %v3941_v33  ;;  %v3942_v57 = vunpack.c.l.bf16 %v10981_v56  ;;  %v3943_v23 = vunpack.c.h.bf16 %v10981_v56 }
 0x3d3   : > { %v5088_v43 = vmul.f32 %v4960_v58, %v4192_v18  ;;  %v5089_v22 = vmul.f32 %v4961_v42, %v4193_v25  ;;  %v3179_v16 = vpack.c.bf16 %v2289_v46, %v2285_v29  ;;  %v3558_v2 = vmul.f32 0.5, %v3430_v12  ;;  %v12152_v42 = vld [vmem:[#allocation96_spill] sm:$0xff]  ;;  %v12154_v46 = vld [vmem:[#allocation30_spill] sm:$0xff] }
 0x3d4   : > { %v4453_v11 = vadd.f32 %v4325_v28, %v2930_v48  ;;  %v3254_v51 = vmul.bf16 1056980736, %v3178_v60  ;;  %v2936_v63 = vadd.f32 %v12150_v32, %v8307_v41  ;;  %v2938_v25 = vadd.f32 %v12151_v3, %v8310_v26 }
 0x3d5   : > { %v5216_v31 = vadd.f32 %v5088_v43, %v4704_v50  ;;  %v5217_v6 = vadd.f32 %v5089_v22, %v4705_v53  ;;  %v3431_v18 = vunpack.c.h.bf16 %v7525_v14  ;;  %v3686_v58 = vadd.f32 0.5, %v3558_v2  ;;  %v11008_v14 = vpop.f32.mrb[236].mxu0 }
 0x3d6   : > { %v4531_v33 = vpack.c.bf16 %v4453_v11, %v4452_v13  ;;  %v2942_v56 = vadd.f32 %v12152_v42, %v8310_v26  ;;  %v7529_v61 = vpop.eup %7528  ;;  %v3766_v50 = vmul.bf16 1056980736, %v3179_v16  ;;  %v2293_v48 = vadd.f32 %v10745_v54, %v8230_v36  ;;  %v11014_v54 = vpop.f32.mrb[237].mxu0 }
 0x3d7   : > { %v6736_v37 = vpack.c.bf16 %v5217_v6, %v5216_v31  ;;  %v3559_v53 = vmul.f32 0.5, %v3431_v18  ;;  %v2297_v12 = vadd.f32 %v10753_v17, %v8230_v36  ;;  %v7531_v22 = vpop.eup %7530  ;;  %v4706_v29 = vunpack.c.l.bf16 %v7529_v61  ;;  %v11010_v6 = vpop.f32.mrb[236].mxu1  ;;  %v12156_v17 = vld [vmem:[#allocation73_spill] sm:$0xff]  ;;  %v12159_v18 = vld [vmem:[#allocation84_spill] sm:$0xff] }
 0x3d8   : > { %v4707_v60 = vunpack.c.h.bf16 %v7529_v61  ;;  %7534 = vtanh.bf16 %v4531_v33  ;;  %v4326_v31 = vmul.f32 %v3686_v58, %v2938_v25  ;;  %12153 = vst [vmem:[#allocation105_spill] sm:$0xff] %v11010_v6  ;;  %v2295_v43 = vadd.f32 %v12154_v46, %v8239_v49  ;;  %v11016_v16 = vpop.f32.mrb[237].mxu1  ;;  %v12161_v61 = vld [vmem:[#allocation94_spill] sm:$0xff] }
 0x3d9   : > { %6864 = vst [vmem:[%s8518_s30 + $0x178] sm:$0xff] %v6736_v37   ;;  %7536 = vtanh.bf16 %v3254_v51  ;;  %v3687_v13 = vadd.f32 0.5, %v3559_v53  ;;  %v3180_v28 = vpack.c.bf16 %v2297_v12, %v2293_v48  ;;  %12155 = vst [vmem:[#allocation48_spill] sm:$0xff] %v11016_v16  ;;  %v12157_v11 = vunpack.c.l.bf16 %v12156_v17  ;;  %v11024_v51 = vpop.f32.mrb[238].mxu0  ;;  %v11026_v33 = vpop.f32.mrb[238].mxu1 }
 0x3da   : > { %v12158_v32 = vunpack.c.h.bf16 %v12156_v17  ;;  %v4454_v25 = vadd.f32 %v4326_v31, %v2936_v63  ;;  %v2299_v37 = vadd.f32 %v12159_v18, %v8239_v49  ;;  %12160 = vst [vmem:[#allocation67_spill] sm:$0xff] %v11026_v33  ;;  %v7533_v58 = vpop.eup %7532  ;;  %v11029_v42 = vadd.f32 0.5, %v10954_v1  ;;  %v11033_v12 = vpop.f32.mrb[239].mxu0  ;;  %v12164_v1 = vld [vmem:[#allocation99_spill] sm:$0xff] }
 0x3db   : > { %v4962_v2 = vsub.f32 %v12157_v11, %v4706_v29  ;;  %7538 = vtanh.bf16 %v3766_v50  ;;  %v2940_v53 = vadd.f32 %v12161_v61, %v8307_v41  ;;  %v4327_v48 = vmul.f32 %v3687_v13, %v2942_v56  ;;  %12162 = vst [vmem:[#allocation54_spill] sm:$0xff] %v11033_v12  ;;  %v11035_v46 = vpop.f32.mrb[239].mxu1 }
 0x3dc   : > { %v4963_v3 = vsub.f32 %v12158_v32, %v4707_v60  ;;  %12163 = vst [vmem:[#allocation32_spill] sm:$0xff] %v11035_v46  ;;  %v4197_v63 = vadd.f32 0.5, %v4069_v27  ;;  %v3181_v11 = vpack.c.bf16 %v2299_v37, %v2295_v43  ;;  %v4070_v32 = vmul.f32 0.5, %v3942_v57 }
 0x3dd   : > { %v5090_v31 = vmul.f32 %v4962_v2, %v10949_v5  ;;  %v4071_v18 = vmul.f32 0.5, %v3943_v23  ;;  %v4455_v33 = vadd.f32 %v4327_v48, %v2940_v53  ;;  %v2946_v50 = vadd.f32 %v12164_v1, %v8307_v41 }
 0x3de   : > { %v5091_v17 = vmul.f32 %v4963_v3, %v10951_v62  ;;  %v3767_v56 = vmul.bf16 1056980736, %v3181_v11  ;;  %v3432_v13 = vunpack.c.l.bf16 %v7531_v22  ;;  %v3944_v6 = vunpack.c.l.bf16 %v7533_v58  ;;  %v12165_v62 = vld [vmem:[#allocation95_spill] sm:$0xff] }
 0x3df   : > { %v5218_v16 = vadd.f32 %v5090_v31, %v4706_v29  ;;  %v4532_v15 = vpack.c.bf16 %v4455_v33, %v4454_v25  ;;  %v3255_v46 = vmul.bf16 1056980736, %v3180_v28  ;;  %v3433_v27 = vunpack.c.h.bf16 %v7531_v22  ;;  %v12166_v28 = vld [vmem:[#allocation53_spill] sm:$0xff] }
 0x3e0   : > { %v5219_v61 = vadd.f32 %v5091_v17, %v4707_v60  ;;  %v3945_v5 = vunpack.c.h.bf16 %v7533_v58  ;;  %v2948_v43 = vadd.f32 %v12165_v62, %v8310_v26  ;;  %v3560_v57 = vmul.f32 0.5, %v3432_v13 }
 0x3e1   : > { %7540 = vtanh.bf16 %v4532_v15  ;;  %v3561_v23 = vmul.f32 0.5, %v3433_v27  ;;  %v2303_v2 = vadd.f32 %v10783_v59, %v8230_v36  ;;  %v2307_v29 = vadd.f32 %v10796_v30, %v8230_v36  ;;  %v12167_v15 = vld [vmem:[#allocation71_spill] sm:$0xff]  ;;  %v11054_v59 = vpop.f32.mrb[240].mxu0 }
 0x3e2   : > { %v6741_v12 = vpack.c.bf16 %v5219_v61, %v5218_v16  ;;  %7542 = vtanh.bf16 %v3767_v56  ;;  %v3688_v60 = vadd.f32 0.5, %v3560_v57  ;;  %v2305_v22 = vadd.f32 %v10792_v40, %v8239_v49  ;;  %v11056_v31 = vpop.f32.mrb[241].mxu0  ;;  %v11058_v40 = vpop.f32.mrb[240].mxu1 }
 0x3e3   : > { %v2309_v16 = vadd.f32 %v12166_v28, %v8239_v49  ;;  %v7535_v3 = vpop.eup %7534  ;;  %7544 = vtanh.bf16 %v3255_v46  ;;  %v2952_v25 = vadd.f32 %v12167_v15, %v8310_v26  ;;  %v3689_v37 = vadd.f32 0.5, %v3561_v23  ;;  %12168 = vst [vmem:[#allocation59_spill] sm:$0xff] %v11058_v40  ;;  %v12169_v46 = vld [vmem:[#allocation38_spill] sm:$0xff]  ;;  %v11066_v56 = vpop.f32.mrb[242].mxu0 }
 0x3e4   : > { %6865 = vst [vmem:[%s8518_s30 + $0x180] sm:$0xff] %v6741_v12   ;;  %v3182_v33 = vpack.c.bf16 %v2307_v29, %v2303_v2  ;;  %v7537_v58 = vpop.eup %7536  ;;  %v4708_v30 = vunpack.c.l.bf16 %v7535_v3  ;;  %v4709_v53 = vunpack.c.h.bf16 %v7535_v3  ;;  %v4328_v48 = vmul.f32 %v3688_v60, %v2948_v43  ;;  %v11068_v13 = vpop.f32.mrb[241].mxu1  ;;  %v12170_v43 = vld [vmem:[#allocation62_spill] sm:$0xff] }
 0x3e5   : > { %v3183_v12 = vpack.c.bf16 %v2309_v16, %v2305_v22  ;;  %v11060_v17 = vadd.f32 0.5, %v4070_v32  ;;  %v11062_v11 = vadd.f32 0.5, %v4071_v18  ;;  %v2950_v1 = vadd.f32 %v12169_v46, %v8307_v41  ;;  %v11074_v60 = vpop.f32.mrb[243].mxu0  ;;  %v11076_v18 = vpop.f32.mrb[242].mxu1  ;;  %v12174_v16 = vld [vmem:[#allocation49_spill] sm:$0xff]  ;;  %v12175_v15 = vld [vmem:[#allocation50_spill] sm:$0xff] }
 0x3e6   : > { %v4329_v61 = vmul.f32 %v3689_v37, %v2952_v25  ;;  %v7539_v27 = vpop.eup %7538  ;;  %v4072_v62 = vmul.f32 0.5, %v3944_v6  ;;  %v12171_v57 = vunpack.c.l.bf16 %v12170_v43  ;;  %v12172_v2 = vunpack.c.h.bf16 %v12170_v43  ;;  %12173 = vst [vmem:[#allocation15_spill] sm:$0xff] %v11076_v18  ;;  %v11082_v6 = vpop.f32.mrb[243].mxu1 }
 0x3e7   : > { %v4456_v32 = vadd.f32 %v4328_v48, %v2946_v50  ;;  %v4073_v22 = vmul.f32 0.5, %v3945_v5  ;;  %v2956_v3 = vadd.f32 %v12174_v16, %v8307_v41  ;;  %v2958_v25 = vadd.f32 %v12175_v15, %v8310_v26  ;;  %12176 = vst [vmem:[#allocation85_spill] sm:$0xff] %v11082_v6 }
 0x3e8   : > { %v4964_v23 = vsub.f32 %v12171_v57, %v4708_v30  ;;  %v4965_v29 = vsub.f32 %v12172_v2, %v4709_v53  ;;  %v4457_v28 = vadd.f32 %v4329_v61, %v2950_v1  ;;  %v3256_v43 = vmul.bf16 1056980736, %v3182_v33 }
 0x3e9   : > { %v3434_v57 = vunpack.c.l.bf16 %v7537_v58  ;;  %v3946_v50 = vunpack.c.l.bf16 %v7539_v27  ;;  %v3947_v48 = vunpack.c.h.bf16 %v7539_v27  ;;  %v3435_v40 = vunpack.c.h.bf16 %v7537_v58  ;;  %v12177_v27 = vld [vmem:[#allocation21_spill] sm:$0xff] }
 0x3ea   : > { %v5092_v37 = vmul.f32 %v4964_v23, %v11029_v42  ;;  %v5093_v46 = vmul.f32 %v4965_v29, %v4197_v63  ;;  %v4533_v2 = vpack.c.bf16 %v4457_v28, %v4456_v32  ;;  %v3768_v1 = vmul.bf16 1056980736, %v3183_v12 }
 0x3eb   : > { %v3562_v61 = vmul.f32 0.5, %v3434_v57  ;;  %v3563_v16 = vmul.f32 0.5, %v3435_v40  ;;  %v2313_v15 = vadd.f32 %v10833_v4, %v8230_v36  ;;  %v2317_v42 = vadd.f32 %v10847_v0, %v8230_v36  ;;  %v11094_v0 = vpop.f32.mrb[244].mxu0 }
 0x3ec   : > { %v5220_v18 = vadd.f32 %v5092_v37, %v4708_v30  ;;  %v5221_v5 = vadd.f32 %v5093_v46, %v4709_v53  ;;  %7546 = vtanh.bf16 %v4533_v2  ;;  %v7541_v63 = vpop.eup %7540  ;;  %v2962_v58 = vadd.f32 %v12177_v27, %v8310_v26  ;;  %v12179_v46 = vld [vmem:[#allocation23_spill] sm:$0xff] }
 0x3ed   : > { %7548 = vtanh.bf16 %v3256_v43  ;;  %v3690_v23 = vadd.f32 0.5, %v3562_v61  ;;  %v11091_v30 = vpop.eup %7542  ;;  %v4710_v53 = vunpack.c.l.bf16 %v7541_v63  ;;  %v4711_v12 = vunpack.c.h.bf16 %v7541_v63  ;;  %v12182_v61 = vld [vmem:[#allocation78_spill] sm:$0xff] }
 0x3ee   : > { %v6746_v33 = vpack.c.bf16 %v5221_v5, %v5220_v18  ;;  %v3691_v29 = vadd.f32 0.5, %v3563_v16  ;;  %v3184_v32 = vpack.c.bf16 %v2317_v42, %v2313_v15  ;;  %v7545_v40 = vpop.eup %7544  ;;  %v4074_v28 = vmul.f32 0.5, %v3946_v50  ;;  %v11096_v18 = vpop.f32.mrb[244].mxu1 }
 0x3ef   : > { %v4075_v4 = vmul.f32 0.5, %v3947_v48  ;;  %7550 = vtanh.bf16 %v3768_v1  ;;  %v4330_v37 = vmul.f32 %v3690_v23, %v2958_v25  ;;  %12178 = vst [vmem:[#allocation17_spill] sm:$0xff] %v11096_v18  ;;  %v12180_v43 = vunpack.c.l.bf16 %v12179_v46  ;;  %v11104_v42 = vpop.f32.mrb[245].mxu0  ;;  %v11106_v50 = vpop.f32.mrb[245].mxu1 }
 0x3f0   : > { %6866 = vst [vmem:[%s8518_s30 + $0x188] sm:$0xff] %v6746_v33   ;;  %v12181_v2 = vunpack.c.h.bf16 %v12179_v46  ;;  %v2960_v16 = vadd.f32 %v12182_v61, %v8307_v41  ;;  %v4331_v15 = vmul.f32 %v3691_v29, %v2962_v58  ;;  %12183 = vst [vmem:[#allocation61_spill] sm:$0xff] %v11106_v50  ;;  %v3948_v25 = vunpack.c.l.bf16 %v11091_v30  ;;  %v11113_v33 = vpop.f32.mrb[246].mxu0  ;;  %v11115_v23 = vpop.f32.mrb[246].mxu1 }
 0x3f1   : > { %v4966_v57 = vsub.f32 %v12180_v43, %v4710_v53  ;;  %v4458_v48 = vadd.f32 %v4330_v37, %v2956_v3  ;;  %v2315_v1 = vadd.f32 %v10839_v20, %v8239_v49  ;;  %v2319_v63 = vadd.f32 %v10852_v39, %v8239_v49  ;;  %12184 = vst [vmem:[#allocation24_spill] sm:$0xff] %v11115_v23  ;;  %v11119_v43 = vpop.f32.mrb[247].mxu0 }
 0x3f2   : > { %v4967_v5 = vsub.f32 %v12181_v2, %v4711_v12  ;;  %v4200_v27 = vadd.f32 0.5, %v4072_v62  ;;  %v4459_v46 = vadd.f32 %v4331_v15, %v2960_v16  ;;  %v11121_v2 = vpop.f32.mrb[247].mxu1  ;;  %v4201_v3 = vadd.f32 0.5, %v4073_v22 }
 0x3f3   : > { %v5094_v58 = vmul.f32 %v4966_v57, %v11060_v17  ;;  %12185 = vst [vmem:[#allocation56_spill] sm:$0xff] %v11121_v2  ;;  %v3257_v37 = vmul.bf16 1056980736, %v3184_v32  ;;  %v3185_v20 = vpack.c.bf16 %v2319_v63, %v2315_v1  ;;  %v3436_v61 = vunpack.c.l.bf16 %v7545_v40 }
 0x3f4   : > { %v5095_v29 = vmul.f32 %v4967_v5, %v11062_v11  ;;  %v11123_v18 = vadd.f32 0.5, %v4074_v28  ;;  %v4534_v23 = vpack.c.bf16 %v4459_v46, %v4458_v48  ;;  %v11125_v62 = vadd.f32 0.5, %v4075_v4  ;;  %v12186_v28 = vld [vmem:[#allocation98_spill] sm:$0xff] }
 0x3f5   : > { %v5222_v39 = vadd.f32 %v5094_v58, %v4710_v53  ;;  %v3949_v17 = vunpack.c.h.bf16 %v11091_v30  ;;  %v11128_v11 = vmul.f32 0.5, %v3948_v25  ;;  %v3564_v57 = vmul.f32 0.5, %v3436_v61  ;;  %v12187_v53 = vld [vmem:[#allocation39_spill] sm:$0xff]  ;;  %v12188_v25 = vld [vmem:[#allocation52_spill] sm:$0xff] }
 0x3f6   : > { %v5223_v50 = vadd.f32 %v5095_v29, %v4711_v12  ;;  %7552 = vtanh.bf16 %v4534_v23  ;;  %v3769_v16 = vmul.bf16 1056980736, %v3185_v20  ;;  %v3437_v22 = vunpack.c.h.bf16 %v7545_v40  ;;  %v12189_v40 = vld [vmem:[#allocation29_spill] sm:$0xff]  ;;  %v12190_v20 = vld [vmem:[#allocation58_spill] sm:$0xff] }
 0x3f7   : > { %v7547_v32 = vpop.eup %7546  ;;  %7554 = vtanh.bf16 %v3257_v37  ;;  %v2966_v15 = vadd.f32 %v12186_v28, %v8307_v41  ;;  %v2968_v12 = vadd.f32 %v12187_v53, %v8310_v26  ;;  %v3692_v48 = vadd.f32 0.5, %v3564_v57  ;;  %v11151_v28 = vpop.f32.mrb[248].mxu1 }
 0x3f8   : > { %v6751_v5 = vpack.c.bf16 %v5223_v50, %v5222_v39  ;;  %v7549_v4 = vpop.eup %7548  ;;  %v4712_v1 = vunpack.c.l.bf16 %v7547_v32  ;;  %v4713_v30 = vunpack.c.h.bf16 %v7547_v32  ;;  %v2970_v63 = vadd.f32 %v12188_v25, %v8307_v41  ;;  %v11149_v32 = vpop.f32.mrb[248].mxu0  ;;  %12193 = vst [vmem:[#allocation19_spill] sm:$0xff] %v11151_v28 }
 0x3f9   : > { %v3565_v50 = vmul.f32 0.5, %v3437_v22  ;;  %v4332_v23 = vmul.f32 %v3692_v48, %v2968_v12  ;;  %v2972_v58 = vadd.f32 %v12189_v40, %v8310_v26  ;;  %v2323_v29 = vadd.f32 %v10875_v47, %v8230_v36  ;;  %v11157_v48 = vpop.f32.mrb[249].mxu0  ;;  %v11159_v25 = vpop.f32.mrb[249].mxu1 }
 0x3fa   : > { %6867 = vst [vmem:[%s8518_s30 + $0x190] sm:$0xff] %v6751_v5   ;;  %v2327_v46 = vadd.f32 %v10890_v24, %v8230_v36  ;;  %v11143_v37 = vpop.eup %7550  ;;  %v12191_v61 = vunpack.c.l.bf16 %v12190_v20  ;;  %v12192_v57 = vunpack.c.h.bf16 %v12190_v20  ;;  %7556 = vtanh.bf16 %v3769_v16  ;;  %12194 = vst [vmem:[#allocation26_spill] sm:$0xff] %v11159_v25 }
 0x3fb   : > { %v3693_v22 = vadd.f32 0.5, %v3565_v50  ;;  %v4460_v53 = vadd.f32 %v4332_v23, %v2966_v15  ;;  %v2325_v47 = vadd.f32 %v10881_v52, %v8239_v49  ;;  %v2329_v24 = vadd.f32 %v10896_v38, %v8239_v49 }
 0x3fc   : > { %v4968_v39 = vsub.f32 %v12191_v61, %v4712_v1  ;;  %v4969_v5 = vsub.f32 %v12192_v57, %v4713_v30  ;;  %v3186_v12 = vpack.c.bf16 %v2327_v46, %v2323_v29  ;;  %v3438_v50 = vunpack.c.l.bf16 %v7549_v4  ;;  %v11161_v61 = vpop.f32.mrb[250].mxu0  ;;  %v11163_v57 = vpop.f32.mrb[250].mxu1 }
 0x3fd   : > { %v4333_v16 = vmul.f32 %v3693_v22, %v2972_v58  ;;  %12195 = vst [vmem:[#allocation33_spill] sm:$0xff] %v11163_v57  ;;  %v4077_v15 = vmul.f32 0.5, %v3949_v17  ;;  %v3950_v23 = vunpack.c.l.bf16 %v11143_v37  ;;  %v3951_v52 = vunpack.c.h.bf16 %v11143_v37  ;;  %v11167_v46 = vpop.f32.mrb[251].mxu0  ;;  %v11169_v38 = vpop.f32.mrb[251].mxu1  ;;  %v12198_v17 = vld [vmem:[#allocation40_spill] sm:$0xff] }
 0x3fe   : > { %v5096_v40 = vmul.f32 %v4968_v39, %v4200_v27  ;;  %v5097_v20 = vmul.f32 %v4969_v5, %v4201_v3  ;;  %v3187_v29 = vpack.c.bf16 %v2329_v24, %v2325_v47  ;;  %12196 = vst [vmem:[#allocation60_spill] sm:$0xff] %v11169_v38  ;;  %v3566_v3 = vmul.f32 0.5, %v3438_v50  ;;  %v12197_v39 = vld [vmem:[#allocation74_spill] sm:$0xff]  ;;  %v12199_v24 = vld [vmem:[#allocation31_spill] sm:$0xff] }
 0x3ff   : > { %v4461_v27 = vadd.f32 %v4333_v16, %v2970_v63  ;;  %v3258_v58 = vmul.bf16 1056980736, %v3186_v12  ;;  %v2976_v5 = vadd.f32 %v12197_v39, %v8307_v41  ;;  %v2978_v22 = vadd.f32 %v12198_v17, %v8310_v26  ;;  %v12200_v50 = vld [vmem:[#allocation66_spill] sm:$0xff] }
 0x400   : > { %v5224_v28 = vadd.f32 %v5096_v40, %v4712_v1  ;;  %v5225_v25 = vadd.f32 %v5097_v20, %v4713_v30  ;;  %v3439_v57 = vunpack.c.h.bf16 %v7549_v4  ;;  %v3694_v47 = vadd.f32 0.5, %v3566_v3 }
 0x401   : > { %v4535_v37 = vpack.c.bf16 %v4461_v27, %v4460_v53  ;;  %v2982_v6 = vadd.f32 %v12199_v24, %v8310_v26  ;;  %v7553_v38 = vpop.eup %7552  ;;  %v3770_v1 = vmul.bf16 1056980736, %v3187_v29  ;;  %v2333_v63 = vadd.f32 %v10917_v45, %v8230_v36 }
 0x402   : > { %v6756_v2 = vpack.c.bf16 %v5225_v25, %v5224_v28  ;;  %v3567_v30 = vmul.f32 0.5, %v3439_v57  ;;  %v2337_v12 = vadd.f32 %v10929_v9, %v8230_v36  ;;  %v7555_v40 = vpop.eup %7554  ;;  %v4714_v20 = vunpack.c.l.bf16 %v7553_v38 }
 0x403   : > { %v4715_v4 = vunpack.c.h.bf16 %v7553_v38  ;;  %7558 = vtanh.bf16 %v4535_v37  ;;  %v4334_v28 = vmul.f32 %v3694_v47, %v2978_v22  ;;  %v2335_v25 = vadd.f32 %v10923_v34, %v8239_v49  ;;  %v11193_v38 = vld [vmem:[%s8023_s20 + $0x1c8] sm:$0xff]   ;;  %v12203_v34 = vld [vmem:[#allocation13_spill] sm:$0xff]  ;;  %v11198_v22 = vpop.f32.mrb[252].mxu0  ;;  %v11200_v37 = vpop.f32.mrb[252].mxu1 }
 0x404   : > { %6868 = vst [vmem:[%s8518_s30 + $0x198] sm:$0xff] %v6756_v2   ;;  %7560 = vtanh.bf16 %v3258_v58  ;;  %v3695_v53 = vadd.f32 0.5, %v3567_v30  ;;  %v3188_v16 = vpack.c.bf16 %v2337_v12, %v2333_v63  ;;  %v12201_v57 = vunpack.c.l.bf16 %v12200_v50  ;;  %12204 = vst [vmem:[#allocation57_spill] sm:$0xff] %v11200_v37  ;;  %v11205_v30 = vpop.f32.mrb[253].mxu0  ;;  %v11207_v63 = vpop.f32.mrb[253].mxu1 }
 0x405   : > { %v12202_v45 = vunpack.c.h.bf16 %v12200_v50  ;;  %v4462_v9 = vadd.f32 %v4334_v28, %v2976_v5  ;;  %v2339_v2 = vadd.f32 %v10934_v7, %v8239_v49  ;;  %v11190_v3 = vpop.eup %7556  ;;  %7562 = vtanh.bf16 %v3770_v1 }
 0x406   : > { %v4970_v29 = vsub.f32 %v12201_v57, %v4714_v20  ;;  %v2980_v39 = vadd.f32 %v12203_v34, %v8307_v41  ;;  %v4335_v17 = vmul.f32 %v3695_v53, %v2982_v6  ;;  %v4204_v5 = vadd.f32 0.5, %v11128_v11  ;;  %v11209_v6 = vpop.f32.mrb[254].mxu0  ;;  %v11211_v53 = vpop.f32.mrb[254].mxu1 }
 0x407   : > { %v4971_v27 = vsub.f32 %v12202_v45, %v4715_v4  ;;  %v3189_v24 = vpack.c.bf16 %v2339_v2, %v2335_v25  ;;  %v4205_v1 = vadd.f32 0.5, %v4077_v15  ;;  %v4078_v12 = vmul.f32 0.5, %v3950_v23  ;;  %12205 = vst [vmem:[#allocation14_spill] sm:$0xff] %v11211_v53  ;;  %v11215_v11 = vpop.f32.mrb[255].mxu0  ;;  %v11217_v25 = vpop.f32.mrb[255].mxu1 }
 0x408   : > { %v5098_v47 = vmul.f32 %v4970_v29, %v11123_v18  ;;  %v4079_v28 = vmul.f32 0.5, %v3951_v52  ;;  %v4463_v50 = vadd.f32 %v4335_v17, %v2980_v39  ;;  %v2986_v18 = vadd.f32 %v10835_v55, %v8307_v41  ;;  %12206 = vst [vmem:[#allocation18_spill] sm:$0xff] %v11217_v25 }
 0x409   : > { %v5099_v7 = vmul.f32 %v4971_v27, %v11125_v62  ;;  %v3440_v62 = vunpack.c.l.bf16 %v7555_v40  ;;  %v3952_v15 = vunpack.c.l.bf16 %v11190_v3  ;;  %v3259_v52 = vmul.bf16 1056980736, %v3188_v16 }
 0x40a   : > { %v5226_v57 = vadd.f32 %v5098_v47, %v4714_v20  ;;  %v4536_v23 = vpack.c.bf16 %v4463_v50, %v4462_v9  ;;  %v3441_v29 = vunpack.c.h.bf16 %v7555_v40  ;;  %v3953_v2 = vunpack.c.h.bf16 %v11190_v3  ;;  %v12207_v20 = vld [vmem:[#allocation77_spill] sm:$0xff] }
 0x40b   : > { %v5227_v45 = vadd.f32 %v5099_v7, %v4715_v4  ;;  %v2988_v4 = vadd.f32 %v12207_v20, %v8310_v26  ;;  %v3568_v34 = vmul.f32 0.5, %v3440_v62  ;;  %v2343_v39 = vadd.f32 %v10960_v21, %v8230_v36  ;;  %v12208_v7 = vld [vmem:[#allocation101_spill] sm:$0xff]  ;;  %v12209_v20 = vld [vmem:[#allocation79_spill] sm:$0xff] }
 0x40c   : > { %7564 = vtanh.bf16 %v4536_v23  ;;  %v3569_v55 = vmul.f32 0.5, %v3441_v29  ;;  %v2347_v17 = vadd.f32 %v10977_v19, %v8230_v36  ;;  %v3771_v47 = vmul.bf16 1056980736, %v3189_v24 }
 0x40d   : > { %v6761_v27 = vpack.c.bf16 %v5227_v45, %v5226_v57  ;;  %v3696_v9 = vadd.f32 0.5, %v3568_v34  ;;  %v2345_v40 = vadd.f32 %v10967_v35, %v8239_v49  ;;  %v2349_v16 = vadd.f32 %v10987_v10, %v8239_v49  ;;  %v12210_v10 = vld [vmem:[#allocation42_spill] sm:$0xff] }
 0x40e   : > { %v7559_v3 = vpop.eup %7558  ;;  %7566 = vtanh.bf16 %v3259_v52  ;;  %v2992_v50 = vadd.f32 %v12208_v7, %v8310_v26  ;;  %v3697_v57 = vadd.f32 0.5, %v3569_v55  ;;  %v3190_v45 = vpack.c.bf16 %v2347_v17, %v2343_v39 }
 0x40f   : > { %6869 = vst [vmem:[%s8518_s30 + $0x1a0] sm:$0xff] %v6761_v27   ;;  %v7561_v21 = vpop.eup %7560  ;;  %v4716_v62 = vunpack.c.l.bf16 %v7559_v3  ;;  %v4717_v23 = vunpack.c.h.bf16 %v7559_v3  ;;  %v4336_v19 = vmul.f32 %v3696_v9, %v2988_v4  ;;  %v3191_v29 = vpack.c.bf16 %v2349_v16, %v2345_v40 }
 0x410   : > { %v4206_v24 = vadd.f32 0.5, %v4078_v12  ;;  %v4207_v27 = vadd.f32 0.5, %v4079_v28  ;;  %v2990_v35 = vadd.f32 %v12209_v20, %v8307_v41  ;;  %v4337_v34 = vmul.f32 %v3697_v57, %v2992_v50  ;;  %v7563_v58 = vpop.eup %7562 }
 0x411   : > { %v12211_v53 = vunpack.c.l.bf16 %v12210_v10  ;;  %v12212_v37 = vunpack.c.h.bf16 %v12210_v10  ;;  %7568 = vtanh.bf16 %v3771_v47  ;;  %v4464_v55 = vadd.f32 %v4336_v19, %v2986_v18 }
 0x412   : > { %v4080_v39 = vmul.f32 0.5, %v3952_v15  ;;  %v4081_v17 = vmul.f32 0.5, %v3953_v2  ;;  %v4465_v3 = vadd.f32 %v4337_v34, %v2990_v35  ;;  %v2998_v12 = vadd.f32 %v10892_v8, %v8310_v26  ;;  %v12214_v35 = vld [vmem:[#allocation43_spill] sm:$0xff] }
 0x413   : > { %v4972_v52 = vsub.f32 %v12211_v53, %v4716_v62  ;;  %v4973_v7 = vsub.f32 %v12212_v37, %v4717_v23  ;;  %v3260_v9 = vmul.bf16 1056980736, %v3190_v45  ;;  %v3442_v40 = vunpack.c.l.bf16 %v7561_v21 }
 0x414   : > { %v3954_v16 = vunpack.c.l.bf16 %v7563_v58  ;;  %v3955_v50 = vunpack.c.h.bf16 %v7563_v58  ;;  %v4537_v57 = vpack.c.bf16 %v4465_v3, %v4464_v55  ;;  %v3443_v20 = vunpack.c.h.bf16 %v7561_v21 }
 0x415   : > { %v5100_v28 = vmul.f32 %v4972_v52, %v4204_v5  ;;  %v5101_v4 = vmul.f32 %v4973_v7, %v4205_v1  ;;  %v3772_v10 = vmul.bf16 1056980736, %v3191_v29  ;;  %v3570_v37 = vmul.f32 0.5, %v3442_v40  ;;  %v12218_v40 = vld [vmem:[#allocation54_spill] sm:$0xff] }
 0x416   : > { %7570 = vtanh.bf16 %v4537_v57  ;;  %v3571_v18 = vmul.f32 0.5, %v3443_v20  ;;  %v2353_v15 = vadd.f32 %v11008_v14, %v8230_v36  ;;  %v2357_v8 = vadd.f32 %v11024_v51, %v8230_v36  ;;  %v12213_v14 = vld [vmem:[#allocation45_spill] sm:$0xff] }
 0x417   : > { %v5228_v53 = vadd.f32 %v5100_v28, %v4716_v62  ;;  %v5229_v25 = vadd.f32 %v5101_v4, %v4717_v23  ;;  %v7565_v5 = vpop.eup %7564  ;;  %7572 = vtanh.bf16 %v3260_v9  ;;  %v3698_v2 = vadd.f32 0.5, %v3570_v37 }
 0x418   : > { %v3002_v58 = vadd.f32 %v10900_v44, %v8310_v26  ;;  %v4718_v47 = vunpack.c.l.bf16 %v7565_v5  ;;  %v4719_v45 = vunpack.c.h.bf16 %v7565_v5  ;;  %v3699_v21 = vadd.f32 0.5, %v3571_v18  ;;  %v12217_v44 = vld [vmem:[#allocation100_spill] sm:$0xff] }
 0x419   : > { %v6766_v1 = vpack.c.bf16 %v5229_v25, %v5228_v53  ;;  %v3192_v62 = vpack.c.bf16 %v2357_v8, %v2353_v15  ;;  %v7567_v23 = vpop.eup %7566  ;;  %v4082_v19 = vmul.f32 0.5, %v3954_v16  ;;  %v2996_v29 = vadd.f32 %v12213_v14, %v8307_v41 }
 0x41a   : > { %7574 = vtanh.bf16 %v3772_v10  ;;  %v4338_v51 = vmul.f32 %v3698_v2, %v2998_v12  ;;  %v12215_v25 = vunpack.c.l.bf16 %v12214_v35  ;;  %v12216_v52 = vunpack.c.h.bf16 %v12214_v35  ;;  %v11262_v12 = vld [vmem:[%s8023_s20 + $0x1d0] sm:$0xff]  }
 0x41b   : > { %6870 = vst [vmem:[%s8518_s30 + $0x1a8] sm:$0xff] %v6766_v1   ;;  %v3000_v55 = vadd.f32 %v12217_v44, %v8307_v41  ;;  %v4339_v3 = vmul.f32 %v3699_v21, %v3002_v58  ;;  %v4083_v28 = vmul.f32 0.5, %v3955_v50  ;;  %v2355_v9 = vadd.f32 %v11014_v54, %v8239_v49 }
 0x41c   : > { %v4974_v34 = vsub.f32 %v12215_v25, %v4718_v47  ;;  %v4975_v7 = vsub.f32 %v12216_v52, %v4719_v45  ;;  %v4466_v4 = vadd.f32 %v4338_v51, %v2996_v29  ;;  %v2359_v16 = vadd.f32 %v12218_v40, %v8239_v49  ;;  %v7569_v57 = vpop.eup %7568  ;;  %v12221_v52 = vld [vmem:[#allocation104_spill] sm:$0xff] }
 0x41d   : > { %v4854_v20 = vunpack.c.l.bf16 %v11262_v12  ;;  %v4467_v37 = vadd.f32 %v4339_v3, %v3000_v55  ;;  %v4208_v18 = vadd.f32 0.5, %v4080_v39  ;;  %v3261_v15 = vmul.bf16 1056980736, %v3192_v62  ;;  %v12219_v39 = vld [vmem:[#allocation102_spill] sm:$0xff]  ;;  %v12223_v40 = vld [vmem:[#allocation28_spill] sm:$0xff] }
 0x41e   : > { %v5102_v53 = vmul.f32 %v4974_v34, %v4206_v24  ;;  %v5103_v10 = vmul.f32 %v4975_v7, %v4207_v27  ;;  %v3193_v8 = vpack.c.bf16 %v2359_v16, %v2355_v9  ;;  %v3444_v5 = vunpack.c.l.bf16 %v7567_v23 }
 0x41f   : > { %v4209_v50 = vadd.f32 0.5, %v4081_v17  ;;  %v4538_v54 = vpack.c.bf16 %v4467_v37, %v4466_v4  ;;  %v11265_v58 = vadd.f32 0.5, %v4082_v19  ;;  %v11267_v21 = vadd.f32 0.5, %v4083_v28  ;;  %v12220_v17 = vld [vmem:[#allocation87_spill] sm:$0xff] }
 0x420   : > { %v5230_v1 = vadd.f32 %v5102_v53, %v4718_v47  ;;  %v5231_v2 = vadd.f32 %v5103_v10, %v4719_v45  ;;  %v3956_v14 = vunpack.c.l.bf16 %v7569_v57  ;;  %v3572_v29 = vmul.f32 0.5, %v3444_v5 }
 0x421   : > { %v3957_v35 = vunpack.c.h.bf16 %v7569_v57  ;;  %7576 = vtanh.bf16 %v4538_v54  ;;  %v3445_v24 = vunpack.c.h.bf16 %v7567_v23  ;;  %v7571_v27 = vpop.eup %7570  ;;  %v3006_v62 = vadd.f32 %v12219_v39, %v8307_v41  ;;  %v12222_v23 = vld [vmem:[#allocation80_spill] sm:$0xff] }
 0x422   : > { %v6771_v51 = vpack.c.bf16 %v5231_v2, %v5230_v1  ;;  %7578 = vtanh.bf16 %v3261_v15  ;;  %v3008_v47 = vadd.f32 %v12220_v17, %v8310_v26  ;;  %v3700_v45 = vadd.f32 0.5, %v3572_v29  ;;  %v7573_v25 = vpop.eup %7572 }
 0x423   : > { %v4720_v19 = vunpack.c.l.bf16 %v7571_v27  ;;  %v4721_v34 = vunpack.c.h.bf16 %v7571_v27  ;;  %v3010_v7 = vadd.f32 %v12221_v52, %v8307_v41  ;;  %v3573_v44 = vmul.f32 0.5, %v3445_v24  ;;  %v12226_v52 = vld [vmem:[#allocation46_spill] sm:$0xff] }
 0x424   : > { %6871 = vst [vmem:[%s8518_s30 + $0x1b0] sm:$0xff] %v6771_v51   ;;  %v4340_v55 = vmul.f32 %v3700_v45, %v3008_v47  ;;  %v3012_v3 = vadd.f32 %v12222_v23, %v8310_v26  ;;  %v2363_v28 = vadd.f32 %v11054_v59, %v8230_v36  ;;  %v2367_v4 = vadd.f32 %v11066_v56, %v8230_v36 }
 0x425   : > { %v11282_v9 = vpop.eup %7574  ;;  %v12224_v16 = vunpack.c.l.bf16 %v12223_v40  ;;  %v12225_v53 = vunpack.c.h.bf16 %v12223_v40  ;;  %v3773_v37 = vmul.bf16 1056980736, %v3193_v8  ;;  %v3701_v15 = vadd.f32 0.5, %v3573_v44 }
 0x426   : > { %v4468_v5 = vadd.f32 %v4340_v55, %v3006_v62  ;;  %v2365_v1 = vadd.f32 %v11056_v31, %v8239_v49  ;;  %v3194_v2 = vpack.c.bf16 %v2367_v4, %v2363_v28  ;;  %v2369_v59 = vadd.f32 %v11074_v60, %v8239_v49  ;;  %v12227_v55 = vld [vmem:[#allocation103_spill] sm:$0xff] }
 0x427   : > { %v4976_v57 = vsub.f32 %v12224_v16, %v4720_v19  ;;  %v4977_v10 = vsub.f32 %v12225_v53, %v4721_v34  ;;  %v4341_v29 = vmul.f32 %v3701_v15, %v3012_v3  ;;  %v3446_v51 = vunpack.c.l.bf16 %v7573_v25  ;;  %v12228_v3 = vld [vmem:[#allocation81_spill] sm:$0xff] }
 0x428   : > { %v4084_v24 = vmul.f32 0.5, %v3956_v14  ;;  %v4085_v27 = vmul.f32 0.5, %v3957_v35  ;;  %v3958_v39 = vunpack.c.l.bf16 %v11282_v9  ;;  %v3195_v17 = vpack.c.bf16 %v2369_v59, %v2365_v1 }
 0x429   : > { %v5104_v54 = vmul.f32 %v4976_v57, %v4208_v18  ;;  %v5105_v56 = vmul.f32 %v4977_v10, %v4209_v50  ;;  %v4469_v45 = vadd.f32 %v4341_v29, %v3010_v7  ;;  %v3574_v62 = vmul.f32 0.5, %v3446_v51 }
 0x42a   : > { %7580 = vtanh.bf16 %v3773_v37  ;;  %v3262_v31 = vmul.bf16 1056980736, %v3194_v2  ;;  %v3016_v44 = vadd.f32 %v12226_v52, %v8307_v41  ;;  %v3447_v60 = vunpack.c.h.bf16 %v7573_v25  ;;  %v12229_v37 = vld [vmem:[#allocation75_spill] sm:$0xff] }
 0x42b   : > { %v5232_v47 = vadd.f32 %v5104_v54, %v4720_v19  ;;  %v5233_v8 = vadd.f32 %v5105_v56, %v4721_v34  ;;  %v4539_v50 = vpack.c.bf16 %v4469_v45, %v4468_v5  ;;  %v3018_v14 = vadd.f32 %v12227_v55, %v8310_v26  ;;  %v12232_v56 = vld [vmem:[#allocation83_spill] sm:$0xff] }
 0x42c   : > { %v3702_v35 = vadd.f32 0.5, %v3574_v62  ;;  %v7577_v23 = vpop.eup %7576  ;;  %v3022_v19 = vadd.f32 %v12228_v3, %v8310_v26  ;;  %v3575_v34 = vmul.f32 0.5, %v3447_v60  ;;  %v2373_v7 = vadd.f32 %v11094_v0, %v8230_v36  ;;  %v11325_v62 = vld [vmem:[%s8023_s20 + $0x1d8] sm:$0xff]  }
 0x42d   : > { %v6776_v18 = vpack.c.bf16 %v5233_v8, %v5232_v47  ;;  %v2377_v28 = vadd.f32 %v11113_v33, %v8230_v36  ;;  %v7579_v4 = vpop.eup %7578  ;;  %v4722_v25 = vunpack.c.l.bf16 %v7577_v23  ;;  %v4723_v40 = vunpack.c.h.bf16 %v7577_v23  ;;  %v12233_v23 = vld [vmem:[#allocation105_spill] sm:$0xff] }
 0x42e   : > { %7582 = vtanh.bf16 %v4539_v50  ;;  %v4342_v16 = vmul.f32 %v3702_v35, %v3018_v14  ;;  %v3703_v57 = vadd.f32 0.5, %v3575_v34  ;;  %v11306_v53 = vadd.f32 %v11104_v42, %v8239_v49  ;;  %v12234_v34 = vld [vmem:[#allocation48_spill] sm:$0xff] }
 0x42f   : > { %6872 = vst [vmem:[%s8518_s30 + $0x1b8] sm:$0xff] %v6776_v18   ;;  %7584 = vtanh.bf16 %v3262_v31  ;;  %v3196_v10 = vpack.c.bf16 %v2377_v28, %v2373_v7  ;;  %v12230_v15 = vunpack.c.l.bf16 %v12229_v37  ;;  %v12231_v5 = vunpack.c.h.bf16 %v12229_v37 }
 0x430   : > { %v4470_v1 = vadd.f32 %v4342_v16, %v3016_v44  ;;  %v11314_v2 = vadd.f32 %v11119_v43, %v8239_v49  ;;  %v4855_v59 = vunpack.c.h.bf16 %v11262_v12  ;;  %v3959_v54 = vunpack.c.h.bf16 %v11282_v9 }
 0x431   : > { %v4978_v0 = vsub.f32 %v12230_v15, %v4722_v25  ;;  %v4979_v33 = vsub.f32 %v12231_v5, %v4723_v40  ;;  %v3020_v42 = vadd.f32 %v12232_v56, %v8307_v41  ;;  %v4343_v29 = vmul.f32 %v3703_v57, %v3022_v19  ;;  %v12237_v56 = vld [vmem:[#allocation91_spill] sm:$0xff] }
 0x432   : > { %v3774_v8 = vmul.bf16 1056980736, %v3195_v17  ;;  %v3197_v45 = vpack.c.bf16 %v11314_v2, %v11306_v53  ;;  %v4856_v43 = vunpack.c.l.bf16 %v11325_v62  ;;  %v4212_v31 = vadd.f32 0.5, %v4084_v24 }
 0x433   : > { %v5106_v51 = vmul.f32 %v4978_v0, %v11265_v58  ;;  %v5107_v47 = vmul.f32 %v4979_v33, %v11267_v21  ;;  %v4213_v52 = vadd.f32 0.5, %v4085_v27  ;;  %v4471_v44 = vadd.f32 %v4343_v29, %v3020_v42 }
 0x434   : > { %v4086_v9 = vmul.f32 0.5, %v3958_v39  ;;  %v3448_v50 = vunpack.c.l.bf16 %v7579_v4  ;;  %v4087_v55 = vmul.f32 0.5, %v3959_v54  ;;  %v3263_v14 = vmul.bf16 1056980736, %v3196_v10 }
 0x435   : > { %v5234_v60 = vadd.f32 %v5106_v51, %v4722_v25  ;;  %v5235_v18 = vadd.f32 %v5107_v47, %v4723_v40  ;;  %v4540_v58 = vpack.c.bf16 %v4471_v44, %v4470_v1  ;;  %v3449_v21 = vunpack.c.h.bf16 %v7579_v4  ;;  %v7581_v17 = vpop.eup %7580 }
 0x436   : > { %7586 = vtanh.bf16 %v3774_v8  ;;  %v3026_v3 = vadd.f32 %v12233_v23, %v8307_v41  ;;  %v3576_v19 = vmul.f32 0.5, %v3448_v50  ;;  %v2383_v27 = vadd.f32 %v11149_v32, %v8230_v36  ;;  %v12235_v32 = vld [vmem:[#allocation32_spill] sm:$0xff] }
 0x437   : > { %v6781_v35 = vpack.c.bf16 %v5235_v18, %v5234_v60  ;;  %7588 = vtanh.bf16 %v4540_v58  ;;  %v3577_v24 = vmul.f32 0.5, %v3449_v21  ;;  %v2387_v39 = vadd.f32 %v11161_v61, %v8230_v36  ;;  %v11357_v18 = vld [vmem:[%s8023_s20 + $0x1e0] sm:$0xff]  }
 0x438   : > { %v3028_v7 = vadd.f32 %v12234_v34, %v8310_v26  ;;  %v3704_v28 = vadd.f32 0.5, %v3576_v19  ;;  %v11339_v4 = vadd.f32 %v11157_v48, %v8239_v49  ;;  %v11343_v25 = vadd.f32 %v11167_v46, %v8239_v49  ;;  %v12236_v46 = vld [vmem:[#allocation67_spill] sm:$0xff] }
 0x439   : > { %6873 = vst [vmem:[%s8518_s30 + $0x1c0] sm:$0xff] %v6781_v35   ;;  %v7583_v40 = vpop.eup %7582  ;;  %7590 = vtanh.bf16 %v3263_v14  ;;  %v3032_v16 = vadd.f32 %v12235_v32, %v8310_v26  ;;  %v3705_v57 = vadd.f32 0.5, %v3577_v24  ;;  %v3198_v61 = vpack.c.bf16 %v2387_v39, %v2383_v27 }
 0x43a   : > { %v7585_v10 = vpop.eup %7584  ;;  %v4724_v37 = vunpack.c.l.bf16 %v7583_v40  ;;  %v4725_v15 = vunpack.c.h.bf16 %v7583_v40  ;;  %v4344_v0 = vmul.f32 %v3704_v28, %v3028_v7  ;;  %v3199_v48 = vpack.c.bf16 %v11343_v25, %v11339_v4 }
 0x43b   : > { %v3960_v5 = vunpack.c.l.bf16 %v7581_v17  ;;  %v3961_v33 = vunpack.c.h.bf16 %v7581_v17  ;;  %v3030_v1 = vadd.f32 %v12236_v46, %v8307_v41  ;;  %v4345_v54 = vmul.f32 %v3705_v57, %v3032_v16  ;;  %v12240_v16 = vld [vmem:[#allocation85_spill] sm:$0xff] }
 0x43c   : > { %v12238_v42 = vunpack.c.l.bf16 %v12237_v56  ;;  %v12239_v51 = vunpack.c.h.bf16 %v11193_v38  ;;  %v4472_v8 = vadd.f32 %v4344_v0, %v3026_v3  ;;  %v3264_v44 = vmul.bf16 1056980736, %v3198_v61 }
 0x43d   : > { %v4857_v60 = vunpack.c.h.bf16 %v11325_v62  ;;  %v4858_v50 = vunpack.c.l.bf16 %v11357_v18  ;;  %v4214_v58 = vadd.f32 0.5, %v4086_v9  ;;  %v4473_v14 = vadd.f32 %v4345_v54, %v3030_v1  ;;  %v12248_v62 = vld [vmem:[#allocation26_spill] sm:$0xff] }
 0x43e   : > { %v4980_v29 = vsub.f32 %v12238_v42, %v4724_v37  ;;  %v4981_v47 = vsub.f32 %v12239_v51, %v4725_v15  ;;  %v4215_v21 = vadd.f32 0.5, %v4087_v55  ;;  %v3450_v23 = vunpack.c.l.bf16 %v7585_v10 }
 0x43f   : > { %v4088_v19 = vmul.f32 0.5, %v3960_v5  ;;  %v4089_v24 = vmul.f32 0.5, %v3961_v33  ;;  %v4541_v27 = vpack.c.bf16 %v4473_v14, %v4472_v8  ;;  %v3451_v39 = vunpack.c.h.bf16 %v7585_v10 }
 0x440   : > { %v5108_v17 = vmul.f32 %v4980_v29, %v4212_v31  ;;  %v5109_v35 = vmul.f32 %v4981_v47, %v4213_v52  ;;  %7592 = vtanh.bf16 %v3264_v44  ;;  %v3578_v3 = vmul.f32 0.5, %v3450_v23 }
 0x441   : > { %v7587_v7 = vpop.eup %7586  ;;  %7594 = vtanh.bf16 %v4541_v27  ;;  %v3579_v28 = vmul.f32 0.5, %v3451_v39  ;;  %v2393_v9 = vadd.f32 %v11198_v22, %v8230_v36  ;;  %v2397_v31 = vadd.f32 %v11209_v6, %v8230_v36  ;;  %v12241_v22 = vld [vmem:[#allocation59_spill] sm:$0xff] }
 0x442   : > { %v5236_v38 = vadd.f32 %v5108_v17, %v4724_v37  ;;  %v5237_v34 = vadd.f32 %v5109_v35, %v4725_v15  ;;  %v7589_v52 = vpop.eup %7588  ;;  %v3038_v40 = vadd.f32 %v11068_v13, %v8310_v26  ;;  %v3706_v32 = vadd.f32 0.5, %v3578_v3  ;;  %v12242_v6 = vld [vmem:[#allocation15_spill] sm:$0xff]  ;;  %v12243_v3 = vld [vmem:[#allocation61_spill] sm:$0xff] }
 0x443   : > { %v3042_v57 = vadd.f32 %v12240_v16, %v8310_v26  ;;  %v4726_v61 = vunpack.c.l.bf16 %v7589_v52  ;;  %v4727_v10 = vunpack.c.h.bf16 %v7589_v52  ;;  %v3707_v37 = vadd.f32 0.5, %v3579_v28  ;;  %v12244_v28 = vld [vmem:[#allocation17_spill] sm:$0xff] }
 0x444   : > { %v6786_v55 = vpack.c.bf16 %v5237_v34, %v5236_v38  ;;  %v3200_v15 = vpack.c.bf16 %v2397_v31, %v2393_v9  ;;  %v7591_v0 = vpop.eup %7590  ;;  %v3962_v5 = vunpack.c.l.bf16 %v7587_v7  ;;  %v3036_v33 = vadd.f32 %v12241_v22, %v8307_v41 }
 0x445   : > { %v4346_v36 = vmul.f32 %v3706_v32, %v3038_v40  ;;  %v3040_v46 = vadd.f32 %v12242_v6, %v8307_v41  ;;  %v4982_v13 = vsub.f32 %v4854_v20, %v4726_v61  ;;  %v4983_v1 = vsub.f32 %v4855_v59, %v4727_v10  ;;  %v12245_v32 = vld [vmem:[#allocation56_spill] sm:$0xff] }
 0x446   : > { %6874 = vst [vmem:[%s8518_s30 + $0x1c8] sm:$0xff] %v6786_v55   ;;  %v4347_v54 = vmul.f32 %v3707_v37, %v3042_v57  ;;  %v3265_v56 = vmul.bf16 1056980736, %v3200_v15  ;;  %v3775_v42 = vmul.bf16 1056980736, %v3197_v45  ;;  %v2395_v51 = vadd.f32 %v11205_v30, %v8239_v49 }
 0x447   : > { %v4474_v29 = vadd.f32 %v4346_v36, %v3036_v33  ;;  %v2399_v47 = vadd.f32 %v11215_v11, %v8239_v49  ;;  %v5110_v8 = vmul.f32 %v4982_v13, %v4214_v58  ;;  %v5111_v44 = vmul.f32 %v4983_v1, %v4215_v21  ;;  %v12247_v36 = vld [vmem:[#allocation19_spill] sm:$0xff] }
 0x448   : > { %v4475_v14 = vadd.f32 %v4347_v54, %v3040_v46  ;;  %7596 = vtanh.bf16 %v3265_v56  ;;  %v3963_v20 = vunpack.c.h.bf16 %v7587_v7  ;;  %v4090_v12 = vmul.f32 0.5, %v3962_v5 }
 0x449   : > { %v3201_v59 = vpack.c.bf16 %v2399_v47, %v2395_v51  ;;  %v3452_v17 = vunpack.c.l.bf16 %v7591_v0  ;;  %v5238_v35 = vadd.f32 %v5110_v8, %v4726_v61  ;;  %v5239_v23 = vadd.f32 %v5111_v44, %v4727_v10  ;;  %v12246_v10 = vld [vmem:[#allocation24_spill] sm:$0xff] }
 0x44a   : > { %v3776_v53 = vmul.bf16 1056980736, %v3199_v48  ;;  %v4542_v2 = vpack.c.bf16 %v4475_v14, %v4474_v29  ;;  %v4859_v30 = vunpack.c.h.bf16 %v11357_v18  ;;  %v4216_v45 = vadd.f32 0.5, %v4088_v19  ;;  %v12249_v51 = vld [vmem:[#allocation60_spill] sm:$0xff] }
 0x44b   : > { %7598 = vtanh.bf16 %v3775_v42  ;;  %v3580_v49 = vmul.f32 0.5, %v3452_v17  ;;  %v7593_v11 = vpop.eup %7592  ;;  %v4217_v58 = vadd.f32 0.5, %v4089_v24  ;;  %v6791_v21 = vpack.c.bf16 %v5239_v23, %v5238_v35 }
 0x44c   : > { %7600 = vtanh.bf16 %v4542_v2  ;;  %v3453_v27 = vunpack.c.h.bf16 %v7591_v0  ;;  %v7595_v39 = vpop.eup %7594  ;;  %v4091_v38 = vmul.f32 0.5, %v3963_v20  ;;  %v11388_v34 = vadd.f32 0.5, %v4090_v12 }
 0x44d   : > { %v3048_v4 = vadd.f32 %v12243_v3, %v8310_v26  ;;  %v3708_v25 = vadd.f32 0.5, %v3580_v49  ;;  %6875 = vst [vmem:[%s8518_s30 + $0x1d0] sm:$0xff] %v6791_v21   ;;  %v4728_v48 = vunpack.c.l.bf16 %v7595_v39  ;;  %v4729_v7 = vunpack.c.h.bf16 %v7595_v39 }
 0x44e   : > { %7602 = vtanh.bf16 %v3776_v53  ;;  %v3581_v19 = vmul.f32 0.5, %v3453_v27  ;;  %v3046_v9 = vadd.f32 %v12244_v28, %v8307_v41  ;;  %v3777_v24 = vmul.bf16 1056980736, %v3201_v59  ;;  %v12250_v59 = vld [vmem:[#allocation33_spill] sm:$0xff] }
 0x44f   : > { %v4348_v31 = vmul.f32 %v3708_v25, %v3048_v4  ;;  %v3454_v52 = vunpack.c.l.bf16 %v7593_v11  ;;  %v4984_v55 = vsub.f32 %v4856_v43, %v4728_v48  ;;  %v4985_v40 = vsub.f32 %v4857_v60, %v4729_v7  ;;  %v12251_v4 = vld [vmem:[#allocation18_spill] sm:$0xff] }
 0x450   : > { %v3052_v16 = vadd.f32 %v12245_v32, %v8310_v26  ;;  %v3709_v57 = vadd.f32 0.5, %v3581_v19  ;;  %v3050_v37 = vadd.f32 %v12246_v10, %v8307_v41  ;;  %v3455_v0 = vunpack.c.h.bf16 %v7593_v11 }
 0x451   : > { %v4476_v61 = vadd.f32 %v4348_v31, %v3046_v9  ;;  %v3582_v15 = vmul.f32 0.5, %v3454_v52  ;;  %v5112_v5 = vmul.f32 %v4984_v55, %v4216_v45  ;;  %v5113_v22 = vmul.f32 %v4985_v40, %v4217_v58  ;;  %v12253_v31 = vld [vmem:[#allocation14_spill] sm:$0xff] }
 0x452   : > { %v4349_v33 = vmul.f32 %v3709_v57, %v3052_v16  ;;  %v3056_v6 = vadd.f32 %v12247_v36, %v8307_v41  ;;  %7604 = vtanh.bf16 %v3777_v24  ;;  %v3058_v60 = vadd.f32 %v12248_v62, %v8310_v26 }
 0x453   : > { %v7597_v43 = vpop.eup %7596  ;;  %v3710_v46 = vadd.f32 0.5, %v3582_v15  ;;  %v3583_v13 = vmul.f32 0.5, %v3455_v0  ;;  %v5240_v1 = vadd.f32 %v5112_v5, %v4728_v48  ;;  %v5241_v54 = vadd.f32 %v5113_v22, %v4729_v7 }
 0x454   : > { %v4477_v56 = vadd.f32 %v4349_v33, %v3050_v37  ;;  %v3456_v42 = vunpack.c.l.bf16 %v7597_v43  ;;  %v3062_v47 = vadd.f32 %v12249_v51, %v8310_v26  ;;  %v3457_v44 = vunpack.c.h.bf16 %v7597_v43 }
 0x455   : > { %v4350_v29 = vmul.f32 %v3710_v46, %v3058_v60  ;;  %v3711_v8 = vadd.f32 0.5, %v3583_v13  ;;  %v6796_v20 = vpack.c.bf16 %v5241_v54, %v5240_v1  ;;  %v3060_v17 = vadd.f32 %v12250_v59, %v8307_v41  ;;  %v7626_v54 = vld [vmem:[%s8023_s20 + $0x1f0] sm:$0xff]  }
 0x456   : > { %v7599_v14 = vpop.eup %7598  ;;  %v4543_v12 = vpack.c.bf16 %v4477_v56, %v4476_v61  ;;  %v3584_v35 = vmul.f32 0.5, %v3456_v42  ;;  %v3068_v45 = vadd.f32 %v11207_v63, %v8310_v26  ;;  %v3585_v49 = vmul.f32 0.5, %v3457_v44  ;;  %v12252_v63 = vld [vmem:[#allocation57_spill] sm:$0xff] }
 0x457   : > { %v7601_v23 = vpop.eup %7600  ;;  %v4478_v53 = vadd.f32 %v4350_v29, %v3056_v6  ;;  %v4351_v2 = vmul.f32 %v3711_v8, %v3062_v47  ;;  %6876 = vst [vmem:[%s8518_s30 + $0x1d8] sm:$0xff] %v6796_v20   ;;  %v4219_v39 = vadd.f32 0.5, %v4091_v38  ;;  %v3072_v25 = vadd.f32 %v12251_v4, %v8310_v26 }
 0x458   : > { %v4730_v11 = vunpack.c.l.bf16 %v7601_v23  ;;  %v4731_v58 = vunpack.c.h.bf16 %v7601_v23  ;;  %7606 = vtanh.bf16 %v4543_v12  ;;  %v3712_v21 = vadd.f32 0.5, %v3584_v35 }
 0x459   : > { %v7603_v27 = vpop.eup %7602  ;;  %v4479_v3 = vadd.f32 %v4351_v2, %v3060_v17  ;;  %v3713_v48 = vadd.f32 0.5, %v3585_v49  ;;  %v3066_v28 = vadd.f32 %v12252_v63, %v8307_v41  ;;  %v3070_v52 = vadd.f32 %v12253_v31, %v8307_v41  ;;  %v7625_v41 = vld [vmem:[%s8023_s20 + $0x1e8] sm:$0xff]  }
 0x45a   : > { %v4986_v7 = vsub.f32 %v4858_v50, %v4730_v11  ;;  %v4987_v19 = vsub.f32 %v4859_v30, %v4731_v58  ;;  %v4352_v9 = vmul.f32 %v3712_v21, %v3068_v45  ;;  %v3964_v32 = vunpack.c.l.bf16 %v7599_v14 }
 0x45b   : > { %v4544_v24 = vpack.c.bf16 %v4479_v3, %v4478_v53  ;;  %v4353_v38 = vmul.f32 %v3713_v48, %v3072_v25  ;;  %v3965_v50 = vunpack.c.h.bf16 %v7599_v14  ;;  %v4860_v0 = vunpack.c.l.bf16 %v7625_v41  ;;  %v7627_v14 = vld [vmem:[%s8023_s20 + $0x1f8] sm:$0xff]  }
 0x45c   : > { %v5114_v55 = vmul.f32 %v4986_v7, %v11388_v34  ;;  %v5115_v26 = vmul.f32 %v4987_v19, %v4219_v39  ;;  %v4480_v40 = vadd.f32 %v4352_v9, %v3066_v28  ;;  %v4092_v37 = vmul.f32 0.5, %v3964_v32 }
 0x45d   : > { %7608 = vtanh.bf16 %v4544_v24  ;;  %v4481_v18 = vadd.f32 %v4353_v38, %v3070_v52  ;;  %v7605_v30 = vpop.eup %7604  ;;  %v4093_v15 = vmul.f32 0.5, %v3965_v50  ;;  %v4861_v5 = vunpack.c.h.bf16 %v7625_v41 }
 0x45e   : > { %v5242_v16 = vadd.f32 %v5114_v55, %v4730_v11  ;;  %v5243_v57 = vadd.f32 %v5115_v26, %v4731_v58  ;;  %v3966_v22 = vunpack.c.l.bf16 %v7603_v27  ;;  %v3967_v33 = vunpack.c.h.bf16 %v7603_v27 }
 0x45f   : > { %v4545_v61 = vpack.c.bf16 %v4481_v18, %v4480_v40  ;;  %v4220_v43 = vadd.f32 0.5, %v4092_v37  ;;  %v4221_v62 = vadd.f32 0.5, %v4093_v15  ;;  %v3968_v60 = vunpack.c.l.bf16 %v7605_v30 }
 0x460   : > { %v6801_v10 = vpack.c.bf16 %v5243_v57, %v5242_v16  ;;  %v3969_v46 = vunpack.c.h.bf16 %v7605_v30  ;;  %v4862_v56 = vunpack.c.l.bf16 %v7626_v54  ;;  %v4863_v42 = vunpack.c.h.bf16 %v7626_v54 }
 0x461   : > { %7610 = vtanh.bf16 %v4545_v61  ;;  %v4094_v29 = vmul.f32 0.5, %v3966_v22  ;;  %v4095_v51 = vmul.f32 0.5, %v3967_v33  ;;  %v4864_v20 = vunpack.c.l.bf16 %v7627_v14 }
 0x462   : > { %6877 = vst [vmem:[%s8518_s30 + $0x1e0] sm:$0xff] %v6801_v10   ;;  %v4865_v12 = vunpack.c.h.bf16 %v7627_v14  ;;  %v4096_v35 = vmul.f32 0.5, %v3968_v60  ;;  %v4097_v23 = vmul.f32 0.5, %v3969_v46 }
 0x463   : > { %v7607_v34 = vpop.eup %7606  ;;  %v4222_v45 = vadd.f32 0.5, %v4094_v29  ;;  %v4223_v49 = vadd.f32 0.5, %v4095_v51 }
 0x464   : > { %v4732_v36 = vunpack.c.l.bf16 %v7607_v34  ;;  %v4733_v6 = vunpack.c.h.bf16 %v7607_v34  ;;  %v4224_v48 = vadd.f32 0.5, %v4096_v35  ;;  %v4225_v7 = vadd.f32 0.5, %v4097_v23 }
 0x466   : > { %v4988_v13 = vsub.f32 %v4860_v0, %v4732_v36  ;;  %v4989_v1 = vsub.f32 %v4861_v5, %v4733_v6 }
 0x468   : > { %v7609_v47 = vpop.eup %7608  ;;  %v5116_v8 = vmul.f32 %v4988_v13, %v4220_v43  ;;  %v5117_v44 = vmul.f32 %v4989_v1, %v4221_v62 }
 0x469   : > { %v4734_v59 = vunpack.c.l.bf16 %v7609_v47  ;;  %v4735_v17 = vunpack.c.h.bf16 %v7609_v47 }
 0x46a   : > { %v5244_v53 = vadd.f32 %v5116_v8, %v4732_v36  ;;  %v5245_v2 = vadd.f32 %v5117_v44, %v4733_v6 }
 0x46b   : > { %v4990_v11 = vsub.f32 %v4862_v56, %v4734_v59  ;;  %v4991_v58 = vsub.f32 %v4863_v42, %v4735_v17 }
 0x46c   : > { %v7611_v21 = vpop.eup %7610  ;;  %v6806_v27 = vpack.c.bf16 %v5245_v2, %v5244_v53 }
 0x46d   : > { %v5118_v39 = vmul.f32 %v4990_v11, %v4222_v45  ;;  %v5119_v3 = vmul.f32 %v4991_v58, %v4223_v49  ;;  %v4736_v4 = vunpack.c.l.bf16 %v7611_v21  ;;  %v4737_v25 = vunpack.c.h.bf16 %v7611_v21 }
 0x46e   : > { %6878 = vst [vmem:[%s8518_s30 + $0x1e8] sm:$0xff] %v6806_v27  }
 0x46f   : > { %v5246_v19 = vadd.f32 %v5118_v39, %v4734_v59  ;;  %v5247_v63 = vadd.f32 %v5119_v3, %v4735_v17  ;;  %v4992_v28 = vsub.f32 %v4864_v20, %v4736_v4  ;;  %v4993_v9 = vsub.f32 %v4865_v12, %v4737_v25 }
 0x471   : > { %v6811_v24 = vpack.c.bf16 %v5247_v63, %v5246_v19  ;;  %v5120_v31 = vmul.f32 %v4992_v28, %v4224_v48  ;;  %v5121_v52 = vmul.f32 %v4993_v9, %v4225_v7  ;;  %5897 = sbr.rel (!%p12254_p12) target bundleno = 1172 (0x494), region = 52 }
 0x473   : > { %6879 = vst [vmem:[%s8518_s30 + $0x1f0] sm:$0xff] %v6811_v24   ;;  %v5248_v38 = vadd.f32 %v5120_v31, %v4736_v4  ;;  %v5249_v55 = vadd.f32 %v5121_v52, %v4737_v25 }
 0x475   : > { %v6816_v26 = vpack.c.bf16 %v5249_v55, %v5248_v38 }
 0x477   : > { %6880 = vst [vmem:[%s8518_s30 + $0x1f8] sm:$0xff] %v6816_v26  }
 0x478   : > { %s12265_s6 = smov (!%p5900_p2, %s5899_s6), 128 }
 0x479   : > { %s11436_s25 = sshll.u32 %s12265_s6, 6 }
 0x47a   : > { %s5904_s11 = ssub.s32 8192, %s11436_s25 }
 0x47b   : > { %5905 = vsyncadd %s5891_s12, %s5904_s11  ;;  %p6361_p3 = scmp.ne.s32.totalorder %s11436_s25, 0  ;;  %s6497_s27 = sshll.u32 %s7846_s19, 13 }
 0x47c   : > { %s11446_s9 = scalar_lea.hbm %s11499_s4, %s6497_s27  ;;  %s5910_s10 = sshll.u32 %s8518_s30, 4  ;;  %s11449_s10 = int_to_ptr.vmem [resolvable:$true] %s5910_s10 }
 0x47d   : > { %s7712_s5 = scalar_lea.vmem %s11449_s10, %s11436_s25  ;;  %s7797_s29 = smov [#allocation8]  }
 0x47e   : > { %p7713_p13 = scmp.ne.s32.totalorder %s11449_s10, %s7712_s5  ;;  %s7716_s13 = sshll.u32 %s7797_s29, 4  ;;  %s7717_s13 = int_to_ptr.vmem [resolvable:$false] %s7716_s13 }
 0x47f   : > { %s7718_s19 = scalar_lea.vmem %s7717_s13, 16384  ;;  %p7719_p9 = scmp.lt.s32.totalorder %s11449_s10, %s7717_s13 }
 0x480   : > { %p7714_p7 = pnand %p7713_p13, %p6361_p3  ;;  %p7720_p1 = scmp.lt.s32.totalorder %s7718_s19, %s7712_s5 }
 0x482   : > { %p7715_p8 = pneg %p7714_p7  ;;  %p7721_p4 = por %p7720_p1, %p7719_p9 }
 0x484   : > { %p7722_p10 = pnand %p7721_p4, %p7715_p8 }
 0x486   : > { %7725 = shalt.err (!%p7722_p10)
}
 0x487   : > { %s7726_s20 = scalar_lea.hbm %s11446_s9, %s11436_s25  ;;  %s7730_s30 = scalar_lea.hbm %s11499_s4, 16000 }
 0x488   : > { %p7727_p5 = scmp.ne.s32.totalorder %s11446_s9, %s7726_s20  ;;  %p7731_p12 = scmp.lt.u32.totalorder %s11446_s9, %s11499_s4 }
 0x489   : > { %p7732_p2 = scmp.lt.u32.totalorder %s7730_s30, %s7726_s20  ;;  %p7734_p7 = scmp.lt.u32.totalorder %s7726_s20, %s11446_s9 }
 0x48a   : > { %p7728_p6 = pnand %p7727_p5, %p6361_p3 }
 0x48b   : > { %p7733_p13 = por %p7732_p2, %p7731_p12 }
 0x48c   : > { %p7729_p11 = pneg %p7728_p6 }
 0x48d   : > { %p7735_p8 = por %p7734_p7, %p7733_p13 }
 0x48f   : > { %p7736_p9 = pnand %p7735_p8, %p7729_p11 }
 0x491   : > { %7739 = shalt.err (!%p7736_p9)
}
 0x492   : > { %s7798_s11 = smov 64   ;;  %s7799_s27 = smov 4  }
 0x493   : > { %5916 = dma.vmem_to_hbm [thread:$0]  (%p6361_p3), %s11449_s10, %s11436_s25, %s11446_s9, %s5891_s12, %s7798_s11, %s7798_s11, %s7799_s27  }
 0x494 PF: > { %s5925_s22 = sand.u32 1, %s7774_s15   ;;  %p12255_p1 = scmp.ne.s32.totalorder %s11606_s28, 0 }
 0x495   : > { %s5926_s7 = scalar_lea.sflag [#allocation4], %s5925_s22 }
 0x496   : > { %p6893_p4 = pnand %p6018_p0, %p12255_p1 }
 0x498   : > { %7769 = dma.done.wait (!%p6893_p4), %s5926_s7, 8192  }
 0x499   : > { %7771 = vsyncadd (!%p6893_p4), %s5926_s7, 4294959104  ;;  %p20_p10 = scmp.ge.s32.totalorder %s7850_s21, 4   ;;  %s12256_s15 = smov %s7778_s16 }
 0x49a   : > { %s12257_s16 = smov %s7782_s17  ;;  %s12258_s17 = smov %s7862_s24 }
 0x49b   : > { %s12259_s18 = smov %s7850_s21  ;;  %22 = sbr.rel (!%p20_p10) target bundleno = 7 (0x7), region = 98 }
 0x4a2   :  { %5931 = vsyncpa [#allocation3], 1 }
 0x4a3   :  { %5933 = vsyncpa [#allocation3 + $0x1], 1 }
 0x4a4   :  { %5934 = vsyncpa [#allocation6], 1 }
 0x4a5   :  { %5936 = vsyncpa [#allocation6 + $0x1], 1 }
 0x4a6   :  { %5937 = vsyncpa [#allocation4], 1 }
 0x4a7   :  { %5939 = vsyncpa [#allocation4 + $0x1], 1 }

</bundles_post_ra>
